<compile_context>
chip_gen: v5e
topology: v5e:2x2
jax: 0.10.0
libtpu: 0.0.40
codegen_flags: <defaults>
</compile_context>

<pallas_src>
import jax
import jax.numpy as jnp
from jax import lax
from jax.experimental import pallas as pl
from jax.experimental.pallas import tpu as pltpu


def _sigmoid(x):
    # sigmoid(x) == 0.5 * (tanh(0.5 x) + 1): one EUP op + two VPU ops, no divide.
    return 0.5 * jnp.tanh(0.5 * x) + 0.5


def _lstm_decoder_kernel(x_ref, h0_ref, c0_ref,
                         wih0_ref, whh0_ref, b0_ref,
                         wl1_ref, b1_ref,
                         wox_ref, woh_ref, bo_ref,
                         logits_ref, hout_ref, cout_ref,
                         gx_ref, hseq_ref):
    TB = x_ref.shape[0]            # T * Bp, time-major flattened
    B = h0_ref.shape[1]            # batch padded to a sublane-tile multiple (16)
    Hp = h0_ref.shape[-1]          # hidden padded to a lane multiple (128)
    T = TB // B

    f32 = jnp.float32
    bf16 = jnp.bfloat16

    # ---- weights resident (bf16 for the MXU) --------------------------------
    whh0 = whh0_ref[...]           # (Hp, 4Hp)
    wl1 = wl1_ref[...]             # (2Hp, 4Hp) = [w_ih_l1 ; w_hh_l1] stacked
    woh = woh_ref[...]             # (Hp, Np)

    # ---- hoisted, parallel precompute (one big GEMM each) -------------------
    xb = x_ref[...].astype(bf16)   # (T*Bp, D)
    # layer-0 input projection with fused bias (b_ih + b_hh)
    gx_ref[...] = jnp.dot(xb, wih0_ref[...], preferred_element_type=f32) + b0_ref[...]
    # x-part of to_out (cat([x, out]) @ W_out == x @ Wx + out @ Wh), bias folded
    logits_ref[...] = (jnp.dot(xb, wox_ref[...], preferred_element_type=f32)
                       + bo_ref[...]).astype(logits_ref.dtype)

    # hoisted bias broadcast for layer 1 (not re-emitted per iteration)
    b1b = jnp.broadcast_to(b1_ref[...], (B, 4 * Hp))

    def gates(g, c_prev):
        # PyTorch gate order i, f, g, o; each slice is a whole 128-lane block.
        i = _sigmoid(g[:, 0 * Hp:1 * Hp])
        f = _sigmoid(g[:, 1 * Hp:2 * Hp])
        gg = jnp.tanh(g[:, 2 * Hp:3 * Hp])
        o = _sigmoid(g[:, 3 * Hp:4 * Hp])
        c_new = f * c_prev + i * gg
        h_new = o * jnp.tanh(c_new)
        return h_new, c_new

    def step(t, carry):
        h1, c1, h2, c2 = carry
        r = pl.ds(pl.multiple_of(t * B, B), B)       # whole-tile aligned rows
        # layer 0: only the serial h @ W_hh dot remains on the critical path
        g0 = gx_ref[r, :] + jnp.dot(h1.astype(bf16), whh0,
                                    preferred_element_type=f32)
        h1n, c1n = gates(g0, c1)
        # layer 1: single fused 2Hp-deep MXU push (x-part + h-part in one dot)
        hcat = jnp.concatenate([h1n.astype(bf16), h2.astype(bf16)], axis=-1)
        g1 = jnp.dot(hcat, wl1, preferred_element_type=f32) + b1b
        h2n, c2n = gates(g1, c2)
        hseq_ref[r, :] = h2n.astype(bf16)            # bf16 store, whole-tile
        return (h1n, c1n, h2n, c2n)

    init = (h0_ref[0], c0_ref[0], h0_ref[1], c0_ref[1])
    unroll = True if T <= 8 else 4   # unroll=4 keeps vreg pressure below spill
    h1, c1, h2, c2 = lax.fori_loop(0, T, step, init, unroll=unroll)

    hout_ref[0] = h1
    hout_ref[1] = h2
    cout_ref[0] = c1
    cout_ref[1] = c2

    # ---- output projection: one lane-dense GEMM + single slab store ---------
    logits_ref[...] = (logits_ref[...]
                       + jnp.dot(hseq_ref[...], woh, preferred_element_type=f32)
                       ).astype(logits_ref.dtype)


def init_params(key, input_size=23, d_hidden=64, n_out=23):
    """Deterministic synthetic parameters (shapes follow nn.LSTM / nn.Linear)."""
    H = d_hidden
    ks = jax.random.split(key, 10)
    s = 1.0 / float(jnp.sqrt(H))

    def u(k, shape):
        return jax.random.uniform(k, shape, jnp.float32, -s, s)

    return dict(
        w_ih_l0=u(ks[0], (4 * H, input_size)),
        w_hh_l0=u(ks[1], (4 * H, H)),
        b_ih_l0=u(ks[2], (4 * H,)),
        b_hh_l0=u(ks[3], (4 * H,)),
        w_ih_l1=u(ks[4], (4 * H, H)),
        w_hh_l1=u(ks[5], (4 * H, H)),
        b_ih_l1=u(ks[6], (4 * H,)),
        b_hh_l1=u(ks[7], (4 * H,)),
        w_out=u(ks[8], (n_out, d_hidden + input_size)),
        b_out=u(ks[9], (n_out,)),
    )


def lstm_decoder_forward(params, inp, h_enc, h=None, c=None):
    """Mirrors LSTMDecoder.forward. inp: (B,T,d_in), h_enc: (B,T,d_enc)."""
    x = jnp.concatenate([inp, h_enc], axis=-1).astype(jnp.float32)  # (B, T, D)
    B, T, D = x.shape
    H = params["w_hh_l0"].shape[1]
    n_out = params["w_out"].shape[0]
    Hp = ((H + 127) // 128) * 128          # pad hidden to a lane multiple
    # 16-row tile covers both the f32 (8,128) and bf16-packed (16,128) tilings,
    # so every per-step gx load and bf16 hseq store is whole-tile aligned.
    Bp = ((B + 15) // 16) * 16
    Np = ((n_out + 127) // 128) * 128      # lane-dense logits output

    if h is None:
        h = jnp.zeros((2, B, H), jnp.float32)
    if c is None:
        c = jnp.zeros((2, B, H), jnp.float32)

    pad_h = Hp - H
    pad_b = Bp - B
    pad_n = Np - n_out

    # Time-major, flattened to 2-D: row index = t * Bp + b. Padded rows are zero.
    xp = jnp.pad(x, ((0, pad_b), (0, 0), (0, 0)))
    x2d = jnp.transpose(xp, (1, 0, 2)).reshape(T * Bp, D)
    h0p = jnp.pad(h, ((0, 0), (0, pad_b), (0, pad_h)))
    c0p = jnp.pad(c, ((0, 0), (0, pad_b), (0, pad_h)))

    def gate_pad_cols(w_t):                # (in, 4H) -> (in, 4Hp), zero-padded gates
        parts = [jnp.pad(w_t[:, k * H:(k + 1) * H], ((0, 0), (0, pad_h)))
                 for k in range(4)]
        return jnp.concatenate(parts, axis=1)

    def gate_pad_vec(b):                   # (4H,) -> (1, 4Hp)
        parts = [jnp.pad(b[k * H:(k + 1) * H], (0, pad_h)) for k in range(4)]
        return jnp.concatenate(parts)[None, :]

    bf16 = jnp.bfloat16
    wih0 = gate_pad_cols(params["w_ih_l0"].T).astype(bf16)                        # (D, 4Hp)
    whh0 = gate_pad_cols(jnp.pad(params["w_hh_l0"].T,
                                 ((0, pad_h), (0, 0)))).astype(bf16)              # (Hp, 4Hp)
    b0 = gate_pad_vec(params["b_ih_l0"] + params["b_hh_l0"])                      # (1, 4Hp)
    wih1 = gate_pad_cols(jnp.pad(params["w_ih_l1"].T, ((0, pad_h), (0, 0))))
    whh1 = gate_pad_cols(jnp.pad(params["w_hh_l1"].T, ((0, pad_h), (0, 0))))
    wl1 = jnp.concatenate([wih1, whh1], axis=0).astype(bf16)                      # (2Hp, 4Hp)
    b1 = gate_pad_vec(params["b_ih_l1"] + params["b_hh_l1"])                      # (1, 4Hp)
    wox = jnp.pad(params["w_out"][:, :D].T, ((0, 0), (0, pad_n))).astype(bf16)    # (D, Np)
    woh = jnp.pad(params["w_out"][:, D:].T,
                  ((0, pad_h), (0, pad_n))).astype(bf16)                          # (Hp, Np)
    bo = jnp.pad(params["b_out"], (0, pad_n))[None, :].astype(jnp.float32)        # (1, Np)

    cost = pl.CostEstimate(
        flops=int(2 * T * Bp * (D * 4 * Hp + 3 * Hp * 4 * Hp + D * Np + Hp * Np)),
        transcendentals=int(T * Bp * 2 * 5 * Hp),
        bytes_accessed=int(4 * (x2d.size + 2 * h0p.size + 2 * c0p.size + T * Bp * Np)
                           + 2 * (wih0.size + whh0.size + wl1.size
                                  + wox.size + woh.size)),
    )

    # Explicit VMEM budget: inputs + outputs + scratch (f32 gx, bf16 hseq) + slack.
    vmem_need = (4 * x2d.size + 4 * 2 * (h0p.size + c0p.size)
                 + 2 * (wih0.size + whh0.size + wl1.size + wox.size + woh.size)
                 + 4 * (b0.size + b1.size + bo.size)
                 + 4 * T * Bp * Np + 2 * 4 * Bp * Hp * 2
                 + 4 * T * Bp * 4 * Hp + 2 * T * Bp * Hp)
    vmem_limit = int(min(48 * 2**20, max(32 * 2**20, 2 * vmem_need + (2 << 20))))

    vmem = pl.BlockSpec(memory_space=pltpu.MemorySpace.VMEM)
    logits2d, h_out, c_out = pl.pallas_call(
        _lstm_decoder_kernel,
        out_shape=(
            jax.ShapeDtypeStruct((T * Bp, Np), jnp.float32),
            jax.ShapeDtypeStruct((2, Bp, Hp), jnp.float32),
            jax.ShapeDtypeStruct((2, Bp, Hp), jnp.float32),
        ),
        in_specs=[vmem] * 11,
        out_specs=(vmem, vmem, vmem),
        scratch_shapes=[pltpu.VMEM((T * Bp, 4 * Hp), jnp.float32),   # precomputed gate-x
                        pltpu.VMEM((T * Bp, Hp), jnp.bfloat16)],     # per-step h2 sequence
        compiler_params=pltpu.CompilerParams(vmem_limit_bytes=vmem_limit),
        cost_estimate=cost,
    )(x2d, h0p, c0p, wih0, whh0, b0, wl1, b1, wox, woh, bo)

    logits = jnp.transpose(logits2d.reshape(T, Bp, Np), (1, 0, 2))[:B, :, :n_out]
    return logits, (h_out[:, :B, :H], c_out[:, :B, :H])


def _mm(a, b):
    return jnp.matmul(a, b, precision=jax.lax.Precision.HIGHEST)


def lstm_decoder_reference(params, inp, h_enc, h=None, c=None):
    """Pure-JAX f32 reference matching PyTorch nn.LSTM semantics."""
    x = jnp.concatenate([inp, h_enc], axis=-1).astype(jnp.float32)
    B, T, D = x.shape
    H = params["w_hh_l0"].shape[1]
    if h is None:
        h = jnp.zeros((2, B, H), jnp.float32)
    if c is None:
        c = jnp.zeros((2, B, H), jnp.float32)

    def cell(x_t, h_prev, c_prev, w_ih, w_hh, b_ih, b_hh):
        g = _mm(x_t, w_ih.T) + b_ih + _mm(h_prev, w_hh.T) + b_hh
        i, f, gg, o = jnp.split(g, 4, axis=-1)
        c_new = jax.nn.sigmoid(f) * c_prev + jax.nn.sigmoid(i) * jnp.tanh(gg)
        h_new = jax.nn.sigmoid(o) * jnp.tanh(c_new)
        return h_new, c_new

    def step(carry, x_t):
        h1, c1, h2, c2 = carry
        h1, c1 = cell(x_t, h1, c1, params["w_ih_l0"], params["w_hh_l0"],
                      params["b_ih_l0"], params["b_hh_l0"])
        h2, c2 = cell(h1, h2, c2, params["w_ih_l1"], params["w_hh_l1"],
                      params["b_ih_l1"], params["b_hh_l1"])
        return (h1, c1, h2, c2), h2

    (h1, c1, h2, c2), out_tm = lax.scan(
        step, (h[0], c[0], h[1], c[1]), jnp.transpose(x, (1, 0, 2)))
    out = jnp.transpose(out_tm, (1, 0, 2))
    cat = jnp.concatenate([x, out], axis=-1)
    logits = _mm(cat, params["w_out"].T) + params["b_out"]
    return logits, (jnp.stack([h1, h2]), jnp.stack([c1, c2]))


if __name__ == "__main__":
    key = jax.random.PRNGKey(0)
    B, T = 2, 8
    d_input, d_enc = 16, 7            # cat([input, h_enc]) dim = 23 = LSTM input_size
    input_size = d_input + d_enc
    d_hidden = 64                     # module default

    kp, ki, ke = jax.random.split(key, 3)
    params = init_params(kp, input_size=input_size, d_hidden=d_hidden)
    inp = jax.random.normal(ki, (B, T, d_input), jnp.float32)
    h_enc = jax.random.normal(ke, (B, T, d_enc), jnp.float32)

    # Case 1: h is None and c is None  (fresh decode, zero initial state)
    logits, (h, c) = lstm_decoder_forward(params, inp, h_enc, None, None)
    jax.block_until_ready((logits, h, c))

    # Case 2: provided (h, c) carried from a previous call
    logits2, (h2, c2) = lstm_decoder_forward(params, inp, h_enc, h, c)
    jax.block_until_ready((logits2, h2, c2))

    # Correctness check vs. pure-JAX f32 reference (kernel feeds bf16 to the MXU).
    tol = dict(atol=3e-2, rtol=3e-2)
    ref_logits, (ref_h, ref_c) = lstm_decoder_reference(params, inp, h_enc, None, None)
    assert jnp.allclose(logits, ref_logits, **tol)
    assert jnp.allclose(h, ref_h, **tol)
    assert jnp.allclose(c, ref_c, **tol)

    ref_logits2, (ref_h2, ref_c2) = lstm_decoder_reference(params, inp, h_enc, ref_h, ref_c)
    assert jnp.allclose(logits2, ref_logits2, **tol)
    assert jnp.allclose(h2, ref_h2, **tol)
    assert jnp.allclose(c2, ref_c2, **tol)

    print("KERNEL_OK")
</pallas_src>

<mosaic_0001>
module attributes {stable_mosaic.version = 11 : i64} {
  func.func @_lstm_decoder_kernel(%arg0: memref<128x23xf32, #tpu.memory_space<vmem>>, %arg1: memref<2x16x128xf32, #tpu.memory_space<vmem>>, %arg2: memref<2x16x128xf32, #tpu.memory_space<vmem>>, %arg3: memref<23x512xbf16, #tpu.memory_space<vmem>>, %arg4: memref<128x512xbf16, #tpu.memory_space<vmem>>, %arg5: memref<1x512xf32, #tpu.memory_space<vmem>>, %arg6: memref<256x512xbf16, #tpu.memory_space<vmem>>, %arg7: memref<1x512xf32, #tpu.memory_space<vmem>>, %arg8: memref<23x128xbf16, #tpu.memory_space<vmem>>, %arg9: memref<128x128xbf16, #tpu.memory_space<vmem>>, %arg10: memref<1x128xf32, #tpu.memory_space<vmem>>, %arg11: memref<128x128xf32, #tpu.memory_space<vmem>>, %arg12: memref<2x16x128xf32, #tpu.memory_space<vmem>>, %arg13: memref<2x16x128xf32, #tpu.memory_space<vmem>>, %arg14: memref<128x512xf32, #tpu.memory_space<vmem>>, %arg15: memref<128x128xbf16, #tpu.memory_space<vmem>>) attributes {dimension_semantics = [], scalar_prefetch = 0 : i64, scratch_operands = 2 : i64, tpu.core_type = #tpu.core_type<tc>} {
    %c0 = arith.constant 0 : index
    %c0_0 = arith.constant 0 : index
    %0 = vector.load %arg4[%c0, %c0_0] : memref<128x512xbf16, #tpu.memory_space<vmem>>, vector<128x512xbf16>
    %c0_1 = arith.constant 0 : index
    %c0_2 = arith.constant 0 : index
    %1 = vector.load %arg6[%c0_1, %c0_2] : memref<256x512xbf16, #tpu.memory_space<vmem>>, vector<256x512xbf16>
    %c0_3 = arith.constant 0 : index
    %c0_4 = arith.constant 0 : index
    %2 = vector.load %arg9[%c0_3, %c0_4] : memref<128x128xbf16, #tpu.memory_space<vmem>>, vector<128x128xbf16>
    %c0_5 = arith.constant 0 : index
    %c0_6 = arith.constant 0 : index
    %3 = vector.load %arg0[%c0_5, %c0_6] : memref<128x23xf32, #tpu.memory_space<vmem>>, vector<128x23xf32>
    %4 = arith.truncf %3 : vector<128x23xf32> to vector<128x23xbf16>
    %c0_7 = arith.constant 0 : index
    %c0_8 = arith.constant 0 : index
    %5 = vector.load %arg3[%c0_7, %c0_8] : memref<23x512xbf16, #tpu.memory_space<vmem>>, vector<23x512xbf16>
    %cst = arith.constant dense<0.000000e+00> : vector<128x512xf32>
    %6 = tpu.matmul %4, %5, %cst {dimension_numbers = #tpu.dot_dimension_numbers<[1], [0], [0], [1], [0, 0, 1, 1], [], []>} : vector<128x23xbf16>, vector<23x512xbf16>, vector<128x512xf32> -> vector<128x512xf32>
    %c0_9 = arith.constant 0 : index
    %c0_10 = arith.constant 0 : index
    %7 = vector.load %arg5[%c0_9, %c0_10] : memref<1x512xf32, #tpu.memory_space<vmem>>, vector<1x512xf32>
    %8 = vector.broadcast %7 : vector<1x512xf32> to vector<128x512xf32>
    %9 = arith.addf %6, %8 : vector<128x512xf32>
    %c0_11 = arith.constant 0 : index
    %c0_12 = arith.constant 0 : index
    %10 = vector.load %arg14[%c0_11, %c0_12] : memref<128x512xf32, #tpu.memory_space<vmem>>, vector<128x512xf32>
    tpu.vector_store %arg14[%c0_11, %c0_12], %9 {strides = array<i32>} : memref<128x512xf32, #tpu.memory_space<vmem>>, vector<128x512xf32>,
    %c0_13 = arith.constant 0 : index
    %c0_14 = arith.constant 0 : index
    %11 = vector.load %arg8[%c0_13, %c0_14] : memref<23x128xbf16, #tpu.memory_space<vmem>>, vector<23x128xbf16>
    %cst_15 = arith.constant dense<0.000000e+00> : vector<128x128xf32>
    %12 = tpu.matmul %4, %11, %cst_15 {dimension_numbers = #tpu.dot_dimension_numbers<[1], [0], [0], [1], [0, 0, 1, 1], [], []>} : vector<128x23xbf16>, vector<23x128xbf16>, vector<128x128xf32> -> vector<128x128xf32>
    %c0_16 = arith.constant 0 : index
    %c0_17 = arith.constant 0 : index
    %13 = vector.load %arg10[%c0_16, %c0_17] : memref<1x128xf32, #tpu.memory_space<vmem>>, vector<1x128xf32>
    %14 = vector.broadcast %13 : vector<1x128xf32> to vector<128x128xf32>
    %15 = arith.addf %12, %14 : vector<128x128xf32>
    %c0_18 = arith.constant 0 : index
    %c0_19 = arith.constant 0 : index
    %16 = vector.load %arg11[%c0_18, %c0_19] : memref<128x128xf32, #tpu.memory_space<vmem>>, vector<128x128xf32>
    tpu.vector_store %arg11[%c0_18, %c0_19], %15 {strides = array<i32>} : memref<128x128xf32, #tpu.memory_space<vmem>>, vector<128x128xf32>,
    %c0_20 = arith.constant 0 : index
    %c0_21 = arith.constant 0 : index
    %17 = vector.load %arg7[%c0_20, %c0_21] : memref<1x512xf32, #tpu.memory_space<vmem>>, vector<1x512xf32>
    %18 = vector.shape_cast %17 : vector<1x512xf32> to vector<1x512xf32>
    %19 = vector.broadcast %18 : vector<1x512xf32> to vector<16x512xf32>
    %c0_22 = arith.constant 0 : index
    %c0_23 = arith.constant 0 : index
    %c0_24 = arith.constant 0 : index
    %20 = vector.load %arg1[%c0_22, %c0_23, %c0_24] : memref<2x16x128xf32, #tpu.memory_space<vmem>>, vector<1x16x128xf32>
    %21 = vector.shape_cast %20 : vector<1x16x128xf32> to vector<16x128xf32>
    %c0_25 = arith.constant 0 : index
    %c0_26 = arith.constant 0 : index
    %c0_27 = arith.constant 0 : index
    %22 = vector.load %arg2[%c0_25, %c0_26, %c0_27] : memref<2x16x128xf32, #tpu.memory_space<vmem>>, vector<1x16x128xf32>
    %23 = vector.shape_cast %22 : vector<1x16x128xf32> to vector<16x128xf32>
    %c1 = arith.constant 1 : index
    %c0_28 = arith.constant 0 : index
    %c0_29 = arith.constant 0 : index
    %24 = vector.load %arg1[%c1, %c0_28, %c0_29] : memref<2x16x128xf32, #tpu.memory_space<vmem>>, vector<1x16x128xf32>
    %25 = vector.shape_cast %24 : vector<1x16x128xf32> to vector<16x128xf32>
    %c1_30 = arith.constant 1 : index
    %c0_31 = arith.constant 0 : index
    %c0_32 = arith.constant 0 : index
    %26 = vector.load %arg2[%c1_30, %c0_31, %c0_32] : memref<2x16x128xf32, #tpu.memory_space<vmem>>, vector<1x16x128xf32>
    %27 = vector.shape_cast %26 : vector<1x16x128xf32> to vector<16x128xf32>
    %c0_i32 = arith.constant 0 : i32
    %c16_i32 = arith.constant 16 : i32
    %28 = arith.muli %c0_i32, %c16_i32 : i32
    %29 = tpu.assume_multiple %28, 16 : i32
    %30 = arith.index_cast %29 : i32 to index
    %c0_33 = arith.constant 0 : index
    %31 = vector.load %arg14[%30, %c0_33] : memref<128x512xf32, #tpu.memory_space<vmem>>, vector<16x512xf32>
    %32 = arith.truncf %21 : vector<16x128xf32> to vector<16x128xbf16>
    %cst_34 = arith.constant dense<0.000000e+00> : vector<16x512xf32>
    %33 = tpu.matmul %32, %0, %cst_34 {dimension_numbers = #tpu.dot_dimension_numbers<[1], [0], [0], [1], [0, 0, 1, 1], [], []>} : vector<16x128xbf16>, vector<128x512xbf16>, vector<16x512xf32> -> vector<16x512xf32>
    %34 = arith.addf %31, %33 : vector<16x512xf32>
    %35 = vector.extract_strided_slice %34 {offsets = [0, 0], sizes = [16, 128], strides = [1, 1]} : vector<16x512xf32> to vector<16x128xf32>
    %cst_35 = arith.constant 5.000000e-01 : f32
    %36 = vector.broadcast %cst_35 : f32 to vector<16x128xf32>
    %37 = arith.mulf %36, %35 : vector<16x128xf32>
    %38 = math.tanh %37 : vector<16x128xf32>
    %cst_36 = arith.constant 5.000000e-01 : f32
    %39 = vector.broadcast %cst_36 : f32 to vector<16x128xf32>
    %40 = arith.mulf %39, %38 : vector<16x128xf32>
    %cst_37 = arith.constant 5.000000e-01 : f32
    %41 = vector.broadcast %cst_37 : f32 to vector<16x128xf32>
    %42 = arith.addf %40, %41 : vector<16x128xf32>
    %43 = vector.extract_strided_slice %34 {offsets = [0, 128], sizes = [16, 128], strides = [1, 1]} : vector<16x512xf32> to vector<16x128xf32>
    %cst_38 = arith.constant 5.000000e-01 : f32
    %44 = vector.broadcast %cst_38 : f32 to vector<16x128xf32>
    %45 = arith.mulf %44, %43 : vector<16x128xf32>
    %46 = math.tanh %45 : vector<16x128xf32>
    %cst_39 = arith.constant 5.000000e-01 : f32
    %47 = vector.broadcast %cst_39 : f32 to vector<16x128xf32>
    %48 = arith.mulf %47, %46 : vector<16x128xf32>
    %cst_40 = arith.constant 5.000000e-01 : f32
    %49 = vector.broadcast %cst_40 : f32 to vector<16x128xf32>
    %50 = arith.addf %48, %49 : vector<16x128xf32>
    %51 = vector.extract_strided_slice %34 {offsets = [0, 256], sizes = [16, 128], strides = [1, 1]} : vector<16x512xf32> to vector<16x128xf32>
    %52 = math.tanh %51 : vector<16x128xf32>
    %53 = vector.extract_strided_slice %34 {offsets = [0, 384], sizes = [16, 128], strides = [1, 1]} : vector<16x512xf32> to vector<16x128xf32>
    %cst_41 = arith.constant 5.000000e-01 : f32
    %54 = vector.broadcast %cst_41 : f32 to vector<16x128xf32>
    %55 = arith.mulf %54, %53 : vector<16x128xf32>
    %56 = math.tanh %55 : vector<16x128xf32>
    %cst_42 = arith.constant 5.000000e-01 : f32
    %57 = vector.broadcast %cst_42 : f32 to vector<16x128xf32>
    %58 = arith.mulf %57, %56 : vector<16x128xf32>
    %cst_43 = arith.constant 5.000000e-01 : f32
    %59 = vector.broadcast %cst_43 : f32 to vector<16x128xf32>
    %60 = arith.addf %58, %59 : vector<16x128xf32>
    %61 = arith.mulf %50, %23 : vector<16x128xf32>
    %62 = arith.mulf %42, %52 : vector<16x128xf32>
    %63 = arith.addf %61, %62 : vector<16x128xf32>
    %64 = math.tanh %63 : vector<16x128xf32>
    %65 = arith.mulf %60, %64 : vector<16x128xf32>
    %66 = arith.truncf %65 : vector<16x128xf32> to vector<16x128xbf16>
    %67 = arith.truncf %25 : vector<16x128xf32> to vector<16x128xbf16>
    %68 = tpu.concatenate %66, %67 in 1 : vector<16x128xbf16>, vector<16x128xbf16> -> vector<16x256xbf16>
    %cst_44 = arith.constant dense<0.000000e+00> : vector<16x512xf32>
    %69 = tpu.matmul %68, %1, %cst_44 {dimension_numbers = #tpu.dot_dimension_numbers<[1], [0], [0], [1], [0, 0, 1, 1], [], []>} : vector<16x256xbf16>, vector<256x512xbf16>, vector<16x512xf32> -> vector<16x512xf32>
    %70 = arith.addf %69, %19 : vector<16x512xf32>
    %71 = vector.extract_strided_slice %70 {offsets = [0, 0], sizes = [16, 128], strides = [1, 1]} : vector<16x512xf32> to vector<16x128xf32>
    %cst_45 = arith.constant 5.000000e-01 : f32
    %72 = vector.broadcast %cst_45 : f32 to vector<16x128xf32>
    %73 = arith.mulf %72, %71 : vector<16x128xf32>
    %74 = math.tanh %73 : vector<16x128xf32>
    %cst_46 = arith.constant 5.000000e-01 : f32
    %75 = vector.broadcast %cst_46 : f32 to vector<16x128xf32>
    %76 = arith.mulf %75, %74 : vector<16x128xf32>
    %cst_47 = arith.constant 5.000000e-01 : f32
    %77 = vector.broadcast %cst_47 : f32 to vector<16x128xf32>
    %78 = arith.addf %76, %77 : vector<16x128xf32>
    %79 = vector.extract_strided_slice %70 {offsets = [0, 128], sizes = [16, 128], strides = [1, 1]} : vector<16x512xf32> to vector<16x128xf32>
    %cst_48 = arith.constant 5.000000e-01 : f32
    %80 = vector.broadcast %cst_48 : f32 to vector<16x128xf32>
    %81 = arith.mulf %80, %79 : vector<16x128xf32>
    %82 = math.tanh %81 : vector<16x128xf32>
    %cst_49 = arith.constant 5.000000e-01 : f32
    %83 = vector.broadcast %cst_49 : f32 to vector<16x128xf32>
    %84 = arith.mulf %83, %82 : vector<16x128xf32>
    %cst_50 = arith.constant 5.000000e-01 : f32
    %85 = vector.broadcast %cst_50 : f32 to vector<16x128xf32>
    %86 = arith.addf %84, %85 : vector<16x128xf32>
    %87 = vector.extract_strided_slice %70 {offsets = [0, 256], sizes = [16, 128], strides = [1, 1]} : vector<16x512xf32> to vector<16x128xf32>
    %88 = math.tanh %87 : vector<16x128xf32>
    %89 = vector.extract_strided_slice %70 {offsets = [0, 384], sizes = [16, 128], strides = [1, 1]} : vector<16x512xf32> to vector<16x128xf32>
    %cst_51 = arith.constant 5.000000e-01 : f32
    %90 = vector.broadcast %cst_51 : f32 to vector<16x128xf32>
    %91 = arith.mulf %90, %89 : vector<16x128xf32>
    %92 = math.tanh %91 : vector<16x128xf32>
    %cst_52 = arith.constant 5.000000e-01 : f32
    %93 = vector.broadcast %cst_52 : f32 to vector<16x128xf32>
    %94 = arith.mulf %93, %92 : vector<16x128xf32>
    %cst_53 = arith.constant 5.000000e-01 : f32
    %95 = vector.broadcast %cst_53 : f32 to vector<16x128xf32>
    %96 = arith.addf %94, %95 : vector<16x128xf32>
    %97 = arith.mulf %86, %27 : vector<16x128xf32>
    %98 = arith.mulf %78, %88 : vector<16x128xf32>
    %99 = arith.addf %97, %98 : vector<16x128xf32>
    %100 = math.tanh %99 : vector<16x128xf32>
    %101 = arith.mulf %96, %100 : vector<16x128xf32>
    %102 = arith.truncf %101 : vector<16x128xf32> to vector<16x128xbf16>
    %103 = arith.index_cast %29 : i32 to index
    %c0_54 = arith.constant 0 : index
    %104 = vector.load %arg15[%103, %c0_54] : memref<128x128xbf16, #tpu.memory_space<vmem>>, vector<16x128xbf16>
    tpu.vector_store %arg15[%103, %c0_54], %102 {strides = array<i32>} : memref<128x128xbf16, #tpu.memory_space<vmem>>, vector<16x128xbf16>,
    %c1_i32 = arith.constant 1 : i32
    %c16_i32_55 = arith.constant 16 : i32
    %105 = arith.muli %c1_i32, %c16_i32_55 : i32
    %106 = tpu.assume_multiple %105, 16 : i32
    %107 = arith.index_cast %106 : i32 to index
    %c0_56 = arith.constant 0 : index
    %108 = vector.load %arg14[%107, %c0_56] : memref<128x512xf32, #tpu.memory_space<vmem>>, vector<16x512xf32>
    %109 = arith.truncf %65 : vector<16x128xf32> to vector<16x128xbf16>
    %cst_57 = arith.constant dense<0.000000e+00> : vector<16x512xf32>
    %110 = tpu.matmul %109, %0, %cst_57 {dimension_numbers = #tpu.dot_dimension_numbers<[1], [0], [0], [1], [0, 0, 1, 1], [], []>} : vector<16x128xbf16>, vector<128x512xbf16>, vector<16x512xf32> -> vector<16x512xf32>
    %111 = arith.addf %108, %110 : vector<16x512xf32>
    %112 = vector.extract_strided_slice %111 {offsets = [0, 0], sizes = [16, 128], strides = [1, 1]} : vector<16x512xf32> to vector<16x128xf32>
    %cst_58 = arith.constant 5.000000e-01 : f32
    %113 = vector.broadcast %cst_58 : f32 to vector<16x128xf32>
    %114 = arith.mulf %113, %112 : vector<16x128xf32>
    %115 = math.tanh %114 : vector<16x128xf32>
    %cst_59 = arith.constant 5.000000e-01 : f32
    %116 = vector.broadcast %cst_59 : f32 to vector<16x128xf32>
    %117 = arith.mulf %116, %115 : vector<16x128xf32>
    %cst_60 = arith.constant 5.000000e-01 : f32
    %118 = vector.broadcast %cst_60 : f32 to vector<16x128xf32>
    %119 = arith.addf %117, %118 : vector<16x128xf32>
    %120 = vector.extract_strided_slice %111 {offsets = [0, 128], sizes = [16, 128], strides = [1, 1]} : vector<16x512xf32> to vector<16x128xf32>
    %cst_61 = arith.constant 5.000000e-01 : f32
    %121 = vector.broadcast %cst_61 : f32 to vector<16x128xf32>
    %122 = arith.mulf %121, %120 : vector<16x128xf32>
    %123 = math.tanh %122 : vector<16x128xf32>
    %cst_62 = arith.constant 5.000000e-01 : f32
    %124 = vector.broadcast %cst_62 : f32 to vector<16x128xf32>
    %125 = arith.mulf %124, %123 : vector<16x128xf32>
    %cst_63 = arith.constant 5.000000e-01 : f32
    %126 = vector.broadcast %cst_63 : f32 to vector<16x128xf32>
    %127 = arith.addf %125, %126 : vector<16x128xf32>
    %128 = vector.extract_strided_slice %111 {offsets = [0, 256], sizes = [16, 128], strides = [1, 1]} : vector<16x512xf32> to vector<16x128xf32>
    %129 = math.tanh %128 : vector<16x128xf32>
    %130 = vector.extract_strided_slice %111 {offsets = [0, 384], sizes = [16, 128], strides = [1, 1]} : vector<16x512xf32> to vector<16x128xf32>
    %cst_64 = arith.constant 5.000000e-01 : f32
    %131 = vector.broadcast %cst_64 : f32 to vector<16x128xf32>
    %132 = arith.mulf %131, %130 : vector<16x128xf32>
    %133 = math.tanh %132 : vector<16x128xf32>
    %cst_65 = arith.constant 5.000000e-01 : f32
    %134 = vector.broadcast %cst_65 : f32 to vector<16x128xf32>
    %135 = arith.mulf %134, %133 : vector<16x128xf32>
    %cst_66 = arith.constant 5.000000e-01 : f32
    %136 = vector.broadcast %cst_66 : f32 to vector<16x128xf32>
    %137 = arith.addf %135, %136 : vector<16x128xf32>
    %138 = arith.mulf %127, %63 : vector<16x128xf32>
    %139 = arith.mulf %119, %129 : vector<16x128xf32>
    %140 = arith.addf %138, %139 : vector<16x128xf32>
    %141 = math.tanh %140 : vector<16x128xf32>
    %142 = arith.mulf %137, %141 : vector<16x128xf32>
    %143 = arith.truncf %142 : vector<16x128xf32> to vector<16x128xbf16>
    %144 = arith.truncf %101 : vector<16x128xf32> to vector<16x128xbf16>
    %145 = tpu.concatenate %143, %144 in 1 : vector<16x128xbf16>, vector<16x128xbf16> -> vector<16x256xbf16>
    %cst_67 = arith.constant dense<0.000000e+00> : vector<16x512xf32>
    %146 = tpu.matmul %145, %1, %cst_67 {dimension_numbers = #tpu.dot_dimension_numbers<[1], [0], [0], [1], [0, 0, 1, 1], [], []>} : vector<16x256xbf16>, vector<256x512xbf16>, vector<16x512xf32> -> vector<16x512xf32>
    %147 = arith.addf %146, %19 : vector<16x512xf32>
    %148 = vector.extract_strided_slice %147 {offsets = [0, 0], sizes = [16, 128], strides = [1, 1]} : vector<16x512xf32> to vector<16x128xf32>
    %cst_68 = arith.constant 5.000000e-01 : f32
    %149 = vector.broadcast %cst_68 : f32 to vector<16x128xf32>
    %150 = arith.mulf %149, %148 : vector<16x128xf32>
    %151 = math.tanh %150 : vector<16x128xf32>
    %cst_69 = arith.constant 5.000000e-01 : f32
    %152 = vector.broadcast %cst_69 : f32 to vector<16x128xf32>
    %153 = arith.mulf %152, %151 : vector<16x128xf32>
    %cst_70 = arith.constant 5.000000e-01 : f32
    %154 = vector.broadcast %cst_70 : f32 to vector<16x128xf32>
    %155 = arith.addf %153, %154 : vector<16x128xf32>
    %156 = vector.extract_strided_slice %147 {offsets = [0, 128], sizes = [16, 128], strides = [1, 1]} : vector<16x512xf32> to vector<16x128xf32>
    %cst_71 = arith.constant 5.000000e-01 : f32
    %157 = vector.broadcast %cst_71 : f32 to vector<16x128xf32>
    %158 = arith.mulf %157, %156 : vector<16x128xf32>
    %159 = math.tanh %158 : vector<16x128xf32>
    %cst_72 = arith.constant 5.000000e-01 : f32
    %160 = vector.broadcast %cst_72 : f32 to vector<16x128xf32>
    %161 = arith.mulf %160, %159 : vector<16x128xf32>
    %cst_73 = arith.constant 5.000000e-01 : f32
    %162 = vector.broadcast %cst_73 : f32 to vector<16x128xf32>
    %163 = arith.addf %161, %162 : vector<16x128xf32>
    %164 = vector.extract_strided_slice %147 {offsets = [0, 256], sizes = [16, 128], strides = [1, 1]} : vector<16x512xf32> to vector<16x128xf32>
    %165 = math.tanh %164 : vector<16x128xf32>
    %166 = vector.extract_strided_slice %147 {offsets = [0, 384], sizes = [16, 128], strides = [1, 1]} : vector<16x512xf32> to vector<16x128xf32>
    %cst_74 = arith.constant 5.000000e-01 : f32
    %167 = vector.broadcast %cst_74 : f32 to vector<16x128xf32>
    %168 = arith.mulf %167, %166 : vector<16x128xf32>
    %169 = math.tanh %168 : vector<16x128xf32>
    %cst_75 = arith.constant 5.000000e-01 : f32
    %170 = vector.broadcast %cst_75 : f32 to vector<16x128xf32>
    %171 = arith.mulf %170, %169 : vector<16x128xf32>
    %cst_76 = arith.constant 5.000000e-01 : f32
    %172 = vector.broadcast %cst_76 : f32 to vector<16x128xf32>
    %173 = arith.addf %171, %172 : vector<16x128xf32>
    %174 = arith.mulf %163, %99 : vector<16x128xf32>
    %175 = arith.mulf %155, %165 : vector<16x128xf32>
    %176 = arith.addf %174, %175 : vector<16x128xf32>
    %177 = math.tanh %176 : vector<16x128xf32>
    %178 = arith.mulf %173, %177 : vector<16x128xf32>
    %179 = arith.truncf %178 : vector<16x128xf32> to vector<16x128xbf16>
    %180 = arith.index_cast %106 : i32 to index
    %c0_77 = arith.constant 0 : index
    %181 = vector.load %arg15[%180, %c0_77] : memref<128x128xbf16, #tpu.memory_space<vmem>>, vector<16x128xbf16>
    tpu.vector_store %arg15[%180, %c0_77], %179 {strides = array<i32>} : memref<128x128xbf16, #tpu.memory_space<vmem>>, vector<16x128xbf16>,
    %c2_i32 = arith.constant 2 : i32
    %c16_i32_78 = arith.constant 16 : i32
    %182 = arith.muli %c2_i32, %c16_i32_78 : i32
    %183 = tpu.assume_multiple %182, 16 : i32
    %184 = arith.index_cast %183 : i32 to index
    %c0_79 = arith.constant 0 : index
    %185 = vector.load %arg14[%184, %c0_79] : memref<128x512xf32, #tpu.memory_space<vmem>>, vector<16x512xf32>
    %186 = arith.truncf %142 : vector<16x128xf32> to vector<16x128xbf16>
    %cst_80 = arith.constant dense<0.000000e+00> : vector<16x512xf32>
    %187 = tpu.matmul %186, %0, %cst_80 {dimension_numbers = #tpu.dot_dimension_numbers<[1], [0], [0], [1], [0, 0, 1, 1], [], []>} : vector<16x128xbf16>, vector<128x512xbf16>, vector<16x512xf32> -> vector<16x512xf32>
    %188 = arith.addf %185, %187 : vector<16x512xf32>
    %189 = vector.extract_strided_slice %188 {offsets = [0, 0], sizes = [16, 128], strides = [1, 1]} : vector<16x512xf32> to vector<16x128xf32>
    %cst_81 = arith.constant 5.000000e-01 : f32
    %190 = vector.broadcast %cst_81 : f32 to vector<16x128xf32>
    %191 = arith.mulf %190, %189 : vector<16x128xf32>
    %192 = math.tanh %191 : vector<16x128xf32>
    %cst_82 = arith.constant 5.000000e-01 : f32
    %193 = vector.broadcast %cst_82 : f32 to vector<16x128xf32>
    %194 = arith.mulf %193, %192 : vector<16x128xf32>
    %cst_83 = arith.constant 5.000000e-01 : f32
    %195 = vector.broadcast %cst_83 : f32 to vector<16x128xf32>
    %196 = arith.addf %194, %195 : vector<16x128xf32>
    %197 = vector.extract_strided_slice %188 {offsets = [0, 128], sizes = [16, 128], strides = [1, 1]} : vector<16x512xf32> to vector<16x128xf32>
    %cst_84 = arith.constant 5.000000e-01 : f32
    %198 = vector.broadcast %cst_84 : f32 to vector<16x128xf32>
    %199 = arith.mulf %198, %197 : vector<16x128xf32>
    %200 = math.tanh %199 : vector<16x128xf32>
    %cst_85 = arith.constant 5.000000e-01 : f32
    %201 = vector.broadcast %cst_85 : f32 to vector<16x128xf32>
    %202 = arith.mulf %201, %200 : vector<16x128xf32>
    %cst_86 = arith.constant 5.000000e-01 : f32
    %203 = vector.broadcast %cst_86 : f32 to vector<16x128xf32>
    %204 = arith.addf %202, %203 : vector<16x128xf32>
    %205 = vector.extract_strided_slice %188 {offsets = [0, 256], sizes = [16, 128], strides = [1, 1]} : vector<16x512xf32> to vector<16x128xf32>
    %206 = math.tanh %205 : vector<16x128xf32>
    %207 = vector.extract_strided_slice %188 {offsets = [0, 384], sizes = [16, 128], strides = [1, 1]} : vector<16x512xf32> to vector<16x128xf32>
    %cst_87 = arith.constant 5.000000e-01 : f32
    %208 = vector.broadcast %cst_87 : f32 to vector<16x128xf32>
    %209 = arith.mulf %208, %207 : vector<16x128xf32>
    %210 = math.tanh %209 : vector<16x128xf32>
    %cst_88 = arith.constant 5.000000e-01 : f32
    %211 = vector.broadcast %cst_88 : f32 to vector<16x128xf32>
    %212 = arith.mulf %211, %210 : vector<16x128xf32>
    %cst_89 = arith.constant 5.000000e-01 : f32
    %213 = vector.broadcast %cst_89 : f32 to vector<16x128xf32>
    %214 = arith.addf %212, %213 : vector<16x128xf32>
    %215 = arith.mulf %204, %140 : vector<16x128xf32>
    %216 = arith.mulf %196, %206 : vector<16x128xf32>
    %217 = arith.addf %215, %216 : vector<16x128xf32>
    %218 = math.tanh %217 : vector<16x128xf32>
    %219 = arith.mulf %214, %218 : vector<16x128xf32>
    %220 = arith.truncf %219 : vector<16x128xf32> to vector<16x128xbf16>
    %221 = arith.truncf %178 : vector<16x128xf32> to vector<16x128xbf16>
    %222 = tpu.concatenate %220, %221 in 1 : vector<16x128xbf16>, vector<16x128xbf16> -> vector<16x256xbf16>
    %cst_90 = arith.constant dense<0.000000e+00> : vector<16x512xf32>
    %223 = tpu.matmul %222, %1, %cst_90 {dimension_numbers = #tpu.dot_dimension_numbers<[1], [0], [0], [1], [0, 0, 1, 1], [], []>} : vector<16x256xbf16>, vector<256x512xbf16>, vector<16x512xf32> -> vector<16x512xf32>
    %224 = arith.addf %223, %19 : vector<16x512xf32>
    %225 = vector.extract_strided_slice %224 {offsets = [0, 0], sizes = [16, 128], strides = [1, 1]} : vector<16x512xf32> to vector<16x128xf32>
    %cst_91 = arith.constant 5.000000e-01 : f32
    %226 = vector.broadcast %cst_91 : f32 to vector<16x128xf32>
    %227 = arith.mulf %226, %225 : vector<16x128xf32>
    %228 = math.tanh %227 : vector<16x128xf32>
    %cst_92 = arith.constant 5.000000e-01 : f32
    %229 = vector.broadcast %cst_92 : f32 to vector<16x128xf32>
    %230 = arith.mulf %229, %228 : vector<16x128xf32>
    %cst_93 = arith.constant 5.000000e-01 : f32
    %231 = vector.broadcast %cst_93 : f32 to vector<16x128xf32>
    %232 = arith.addf %230, %231 : vector<16x128xf32>
    %233 = vector.extract_strided_slice %224 {offsets = [0, 128], sizes = [16, 128], strides = [1, 1]} : vector<16x512xf32> to vector<16x128xf32>
    %cst_94 = arith.constant 5.000000e-01 : f32
    %234 = vector.broadcast %cst_94 : f32 to vector<16x128xf32>
    %235 = arith.mulf %234, %233 : vector<16x128xf32>
    %236 = math.tanh %235 : vector<16x128xf32>
    %cst_95 = arith.constant 5.000000e-01 : f32
    %237 = vector.broadcast %cst_95 : f32 to vector<16x128xf32>
    %238 = arith.mulf %237, %236 : vector<16x128xf32>
    %cst_96 = arith.constant 5.000000e-01 : f32
    %239 = vector.broadcast %cst_96 : f32 to vector<16x128xf32>
    %240 = arith.addf %238, %239 : vector<16x128xf32>
    %241 = vector.extract_strided_slice %224 {offsets = [0, 256], sizes = [16, 128], strides = [1, 1]} : vector<16x512xf32> to vector<16x128xf32>
    %242 = math.tanh %241 : vector<16x128xf32>
    %243 = vector.extract_strided_slice %224 {offsets = [0, 384], sizes = [16, 128], strides = [1, 1]} : vector<16x512xf32> to vector<16x128xf32>
    %cst_97 = arith.constant 5.000000e-01 : f32
    %244 = vector.broadcast %cst_97 : f32 to vector<16x128xf32>
    %245 = arith.mulf %244, %243 : vector<16x128xf32>
    %246 = math.tanh %245 : vector<16x128xf32>
    %cst_98 = arith.constant 5.000000e-01 : f32
    %247 = vector.broadcast %cst_98 : f32 to vector<16x128xf32>
    %248 = arith.mulf %247, %246 : vector<16x128xf32>
    %cst_99 = arith.constant 5.000000e-01 : f32
    %249 = vector.broadcast %cst_99 : f32 to vector<16x128xf32>
    %250 = arith.addf %248, %249 : vector<16x128xf32>
    %251 = arith.mulf %240, %176 : vector<16x128xf32>
    %252 = arith.mulf %232, %242 : vector<16x128xf32>
    %253 = arith.addf %251, %252 : vector<16x128xf32>
    %254 = math.tanh %253 : vector<16x128xf32>
    %255 = arith.mulf %250, %254 : vector<16x128xf32>
    %256 = arith.truncf %255 : vector<16x128xf32> to vector<16x128xbf16>
    %257 = arith.index_cast %183 : i32 to index
    %c0_100 = arith.constant 0 : index
    %258 = vector.load %arg15[%257, %c0_100] : memref<128x128xbf16, #tpu.memory_space<vmem>>, vector<16x128xbf16>
    tpu.vector_store %arg15[%257, %c0_100], %256 {strides = array<i32>} : memref<128x128xbf16, #tpu.memory_space<vmem>>, vector<16x128xbf16>,
    %c3_i32 = arith.constant 3 : i32
    %c16_i32_101 = arith.constant 16 : i32
    %259 = arith.muli %c3_i32, %c16_i32_101 : i32
    %260 = tpu.assume_multiple %259, 16 : i32
    %261 = arith.index_cast %260 : i32 to index
    %c0_102 = arith.constant 0 : index
    %262 = vector.load %arg14[%261, %c0_102] : memref<128x512xf32, #tpu.memory_space<vmem>>, vector<16x512xf32>
    %263 = arith.truncf %219 : vector<16x128xf32> to vector<16x128xbf16>
    %cst_103 = arith.constant dense<0.000000e+00> : vector<16x512xf32>
    %264 = tpu.matmul %263, %0, %cst_103 {dimension_numbers = #tpu.dot_dimension_numbers<[1], [0], [0], [1], [0, 0, 1, 1], [], []>} : vector<16x128xbf16>, vector<128x512xbf16>, vector<16x512xf32> -> vector<16x512xf32>
    %265 = arith.addf %262, %264 : vector<16x512xf32>
    %266 = vector.extract_strided_slice %265 {offsets = [0, 0], sizes = [16, 128], strides = [1, 1]} : vector<16x512xf32> to vector<16x128xf32>
    %cst_104 = arith.constant 5.000000e-01 : f32
    %267 = vector.broadcast %cst_104 : f32 to vector<16x128xf32>
    %268 = arith.mulf %267, %266 : vector<16x128xf32>
    %269 = math.tanh %268 : vector<16x128xf32>
    %cst_105 = arith.constant 5.000000e-01 : f32
    %270 = vector.broadcast %cst_105 : f32 to vector<16x128xf32>
    %271 = arith.mulf %270, %269 : vector<16x128xf32>
    %cst_106 = arith.constant 5.000000e-01 : f32
    %272 = vector.broadcast %cst_106 : f32 to vector<16x128xf32>
    %273 = arith.addf %271, %272 : vector<16x128xf32>
    %274 = vector.extract_strided_slice %265 {offsets = [0, 128], sizes = [16, 128], strides = [1, 1]} : vector<16x512xf32> to vector<16x128xf32>
    %cst_107 = arith.constant 5.000000e-01 : f32
    %275 = vector.broadcast %cst_107 : f32 to vector<16x128xf32>
    %276 = arith.mulf %275, %274 : vector<16x128xf32>
    %277 = math.tanh %276 : vector<16x128xf32>
    %cst_108 = arith.constant 5.000000e-01 : f32
    %278 = vector.broadcast %cst_108 : f32 to vector<16x128xf32>
    %279 = arith.mulf %278, %277 : vector<16x128xf32>
    %cst_109 = arith.constant 5.000000e-01 : f32
    %280 = vector.broadcast %cst_109 : f32 to vector<16x128xf32>
    %281 = arith.addf %279, %280 : vector<16x128xf32>
    %282 = vector.extract_strided_slice %265 {offsets = [0, 256], sizes = [16, 128], strides = [1, 1]} : vector<16x512xf32> to vector<16x128xf32>
    %283 = math.tanh %282 : vector<16x128xf32>
    %284 = vector.extract_strided_slice %265 {offsets = [0, 384], sizes = [16, 128], strides = [1, 1]} : vector<16x512xf32> to vector<16x128xf32>
    %cst_110 = arith.constant 5.000000e-01 : f32
    %285 = vector.broadcast %cst_110 : f32 to vector<16x128xf32>
    %286 = arith.mulf %285, %284 : vector<16x128xf32>
    %287 = math.tanh %286 : vector<16x128xf32>
    %cst_111 = arith.constant 5.000000e-01 : f32
    %288 = vector.broadcast %cst_111 : f32 to vector<16x128xf32>
    %289 = arith.mulf %288, %287 : vector<16x128xf32>
    %cst_112 = arith.constant 5.000000e-01 : f32
    %290 = vector.broadcast %cst_112 : f32 to vector<16x128xf32>
    %291 = arith.addf %289, %290 : vector<16x128xf32>
    %292 = arith.mulf %281, %217 : vector<16x128xf32>
    %293 = arith.mulf %273, %283 : vector<16x128xf32>
    %294 = arith.addf %292, %293 : vector<16x128xf32>
    %295 = math.tanh %294 : vector<16x128xf32>
    %296 = arith.mulf %291, %295 : vector<16x128xf32>
    %297 = arith.truncf %296 : vector<16x128xf32> to vector<16x128xbf16>
    %298 = arith.truncf %255 : vector<16x128xf32> to vector<16x128xbf16>
    %299 = tpu.concatenate %297, %298 in 1 : vector<16x128xbf16>, vector<16x128xbf16> -> vector<16x256xbf16>
    %cst_113 = arith.constant dense<0.000000e+00> : vector<16x512xf32>
    %300 = tpu.matmul %299, %1, %cst_113 {dimension_numbers = #tpu.dot_dimension_numbers<[1], [0], [0], [1], [0, 0, 1, 1], [], []>} : vector<16x256xbf16>, vector<256x512xbf16>, vector<16x512xf32> -> vector<16x512xf32>
    %301 = arith.addf %300, %19 : vector<16x512xf32>
    %302 = vector.extract_strided_slice %301 {offsets = [0, 0], sizes = [16, 128], strides = [1, 1]} : vector<16x512xf32> to vector<16x128xf32>
    %cst_114 = arith.constant 5.000000e-01 : f32
    %303 = vector.broadcast %cst_114 : f32 to vector<16x128xf32>
    %304 = arith.mulf %303, %302 : vector<16x128xf32>
    %305 = math.tanh %304 : vector<16x128xf32>
    %cst_115 = arith.constant 5.000000e-01 : f32
    %306 = vector.broadcast %cst_115 : f32 to vector<16x128xf32>
    %307 = arith.mulf %306, %305 : vector<16x128xf32>
    %cst_116 = arith.constant 5.000000e-01 : f32
    %308 = vector.broadcast %cst_116 : f32 to vector<16x128xf32>
    %309 = arith.addf %307, %308 : vector<16x128xf32>
    %310 = vector.extract_strided_slice %301 {offsets = [0, 128], sizes = [16, 128], strides = [1, 1]} : vector<16x512xf32> to vector<16x128xf32>
    %cst_117 = arith.constant 5.000000e-01 : f32
    %311 = vector.broadcast %cst_117 : f32 to vector<16x128xf32>
    %312 = arith.mulf %311, %310 : vector<16x128xf32>
    %313 = math.tanh %312 : vector<16x128xf32>
    %cst_118 = arith.constant 5.000000e-01 : f32
    %314 = vector.broadcast %cst_118 : f32 to vector<16x128xf32>
    %315 = arith.mulf %314, %313 : vector<16x128xf32>
    %cst_119 = arith.constant 5.000000e-01 : f32
    %316 = vector.broadcast %cst_119 : f32 to vector<16x128xf32>
    %317 = arith.addf %315, %316 : vector<16x128xf32>
    %318 = vector.extract_strided_slice %301 {offsets = [0, 256], sizes = [16, 128], strides = [1, 1]} : vector<16x512xf32> to vector<16x128xf32>
    %319 = math.tanh %318 : vector<16x128xf32>
    %320 = vector.extract_strided_slice %301 {offsets = [0, 384], sizes = [16, 128], strides = [1, 1]} : vector<16x512xf32> to vector<16x128xf32>
    %cst_120 = arith.constant 5.000000e-01 : f32
    %321 = vector.broadcast %cst_120 : f32 to vector<16x128xf32>
    %322 = arith.mulf %321, %320 : vector<16x128xf32>
    %323 = math.tanh %322 : vector<16x128xf32>
    %cst_121 = arith.constant 5.000000e-01 : f32
    %324 = vector.broadcast %cst_121 : f32 to vector<16x128xf32>
    %325 = arith.mulf %324, %323 : vector<16x128xf32>
    %cst_122 = arith.constant 5.000000e-01 : f32
    %326 = vector.broadcast %cst_122 : f32 to vector<16x128xf32>
    %327 = arith.addf %325, %326 : vector<16x128xf32>
    %328 = arith.mulf %317, %253 : vector<16x128xf32>
    %329 = arith.mulf %309, %319 : vector<16x128xf32>
    %330 = arith.addf %328, %329 : vector<16x128xf32>
    %331 = math.tanh %330 : vector<16x128xf32>
    %332 = arith.mulf %327, %331 : vector<16x128xf32>
    %333 = arith.truncf %332 : vector<16x128xf32> to vector<16x128xbf16>
    %334 = arith.index_cast %260 : i32 to index
    %c0_123 = arith.constant 0 : index
    %335 = vector.load %arg15[%334, %c0_123] : memref<128x128xbf16, #tpu.memory_space<vmem>>, vector<16x128xbf16>
    tpu.vector_store %arg15[%334, %c0_123], %333 {strides = array<i32>} : memref<128x128xbf16, #tpu.memory_space<vmem>>, vector<16x128xbf16>,
    %c4_i32 = arith.constant 4 : i32
    %c16_i32_124 = arith.constant 16 : i32
    %336 = arith.muli %c4_i32, %c16_i32_124 : i32
    %337 = tpu.assume_multiple %336, 16 : i32
    %338 = arith.index_cast %337 : i32 to index
    %c0_125 = arith.constant 0 : index
    %339 = vector.load %arg14[%338, %c0_125] : memref<128x512xf32, #tpu.memory_space<vmem>>, vector<16x512xf32>
    %340 = arith.truncf %296 : vector<16x128xf32> to vector<16x128xbf16>
    %cst_126 = arith.constant dense<0.000000e+00> : vector<16x512xf32>
    %341 = tpu.matmul %340, %0, %cst_126 {dimension_numbers = #tpu.dot_dimension_numbers<[1], [0], [0], [1], [0, 0, 1, 1], [], []>} : vector<16x128xbf16>, vector<128x512xbf16>, vector<16x512xf32> -> vector<16x512xf32>
    %342 = arith.addf %339, %341 : vector<16x512xf32>
    %343 = vector.extract_strided_slice %342 {offsets = [0, 0], sizes = [16, 128], strides = [1, 1]} : vector<16x512xf32> to vector<16x128xf32>
    %cst_127 = arith.constant 5.000000e-01 : f32
    %344 = vector.broadcast %cst_127 : f32 to vector<16x128xf32>
    %345 = arith.mulf %344, %343 : vector<16x128xf32>
    %346 = math.tanh %345 : vector<16x128xf32>
    %cst_128 = arith.constant 5.000000e-01 : f32
    %347 = vector.broadcast %cst_128 : f32 to vector<16x128xf32>
    %348 = arith.mulf %347, %346 : vector<16x128xf32>
    %cst_129 = arith.constant 5.000000e-01 : f32
    %349 = vector.broadcast %cst_129 : f32 to vector<16x128xf32>
    %350 = arith.addf %348, %349 : vector<16x128xf32>
    %351 = vector.extract_strided_slice %342 {offsets = [0, 128], sizes = [16, 128], strides = [1, 1]} : vector<16x512xf32> to vector<16x128xf32>
    %cst_130 = arith.constant 5.000000e-01 : f32
    %352 = vector.broadcast %cst_130 : f32 to vector<16x128xf32>
    %353 = arith.mulf %352, %351 : vector<16x128xf32>
    %354 = math.tanh %353 : vector<16x128xf32>
    %cst_131 = arith.constant 5.000000e-01 : f32
    %355 = vector.broadcast %cst_131 : f32 to vector<16x128xf32>
    %356 = arith.mulf %355, %354 : vector<16x128xf32>
    %cst_132 = arith.constant 5.000000e-01 : f32
    %357 = vector.broadcast %cst_132 : f32 to vector<16x128xf32>
    %358 = arith.addf %356, %357 : vector<16x128xf32>
    %359 = vector.extract_strided_slice %342 {offsets = [0, 256], sizes = [16, 128], strides = [1, 1]} : vector<16x512xf32> to vector<16x128xf32>
    %360 = math.tanh %359 : vector<16x128xf32>
    %361 = vector.extract_strided_slice %342 {offsets = [0, 384], sizes = [16, 128], strides = [1, 1]} : vector<16x512xf32> to vector<16x128xf32>
    %cst_133 = arith.constant 5.000000e-01 : f32
    %362 = vector.broadcast %cst_133 : f32 to vector<16x128xf32>
    %363 = arith.mulf %362, %361 : vector<16x128xf32>
    %364 = math.tanh %363 : vector<16x128xf32>
    %cst_134 = arith.constant 5.000000e-01 : f32
    %365 = vector.broadcast %cst_134 : f32 to vector<16x128xf32>
    %366 = arith.mulf %365, %364 : vector<16x128xf32>
    %cst_135 = arith.constant 5.000000e-01 : f32
    %367 = vector.broadcast %cst_135 : f32 to vector<16x128xf32>
    %368 = arith.addf %366, %367 : vector<16x128xf32>
    %369 = arith.mulf %358, %294 : vector<16x128xf32>
    %370 = arith.mulf %350, %360 : vector<16x128xf32>
    %371 = arith.addf %369, %370 : vector<16x128xf32>
    %372 = math.tanh %371 : vector<16x128xf32>
    %373 = arith.mulf %368, %372 : vector<16x128xf32>
    %374 = arith.truncf %373 : vector<16x128xf32> to vector<16x128xbf16>
    %375 = arith.truncf %332 : vector<16x128xf32> to vector<16x128xbf16>
    %376 = tpu.concatenate %374, %375 in 1 : vector<16x128xbf16>, vector<16x128xbf16> -> vector<16x256xbf16>
    %cst_136 = arith.constant dense<0.000000e+00> : vector<16x512xf32>
    %377 = tpu.matmul %376, %1, %cst_136 {dimension_numbers = #tpu.dot_dimension_numbers<[1], [0], [0], [1], [0, 0, 1, 1], [], []>} : vector<16x256xbf16>, vector<256x512xbf16>, vector<16x512xf32> -> vector<16x512xf32>
    %378 = arith.addf %377, %19 : vector<16x512xf32>
    %379 = vector.extract_strided_slice %378 {offsets = [0, 0], sizes = [16, 128], strides = [1, 1]} : vector<16x512xf32> to vector<16x128xf32>
    %cst_137 = arith.constant 5.000000e-01 : f32
    %380 = vector.broadcast %cst_137 : f32 to vector<16x128xf32>
    %381 = arith.mulf %380, %379 : vector<16x128xf32>
    %382 = math.tanh %381 : vector<16x128xf32>
    %cst_138 = arith.constant 5.000000e-01 : f32
    %383 = vector.broadcast %cst_138 : f32 to vector<16x128xf32>
    %384 = arith.mulf %383, %382 : vector<16x128xf32>
    %cst_139 = arith.constant 5.000000e-01 : f32
    %385 = vector.broadcast %cst_139 : f32 to vector<16x128xf32>
    %386 = arith.addf %384, %385 : vector<16x128xf32>
    %387 = vector.extract_strided_slice %378 {offsets = [0, 128], sizes = [16, 128], strides = [1, 1]} : vector<16x512xf32> to vector<16x128xf32>
    %cst_140 = arith.constant 5.000000e-01 : f32
    %388 = vector.broadcast %cst_140 : f32 to vector<16x128xf32>
    %389 = arith.mulf %388, %387 : vector<16x128xf32>
    %390 = math.tanh %389 : vector<16x128xf32>
    %cst_141 = arith.constant 5.000000e-01 : f32
    %391 = vector.broadcast %cst_141 : f32 to vector<16x128xf32>
    %392 = arith.mulf %391, %390 : vector<16x128xf32>
    %cst_142 = arith.constant 5.000000e-01 : f32
    %393 = vector.broadcast %cst_142 : f32 to vector<16x128xf32>
    %394 = arith.addf %392, %393 : vector<16x128xf32>
    %395 = vector.extract_strided_slice %378 {offsets = [0, 256], sizes = [16, 128], strides = [1, 1]} : vector<16x512xf32> to vector<16x128xf32>
    %396 = math.tanh %395 : vector<16x128xf32>
    %397 = vector.extract_strided_slice %378 {offsets = [0, 384], sizes = [16, 128], strides = [1, 1]} : vector<16x512xf32> to vector<16x128xf32>
    %cst_143 = arith.constant 5.000000e-01 : f32
    %398 = vector.broadcast %cst_143 : f32 to vector<16x128xf32>
    %399 = arith.mulf %398, %397 : vector<16x128xf32>
    %400 = math.tanh %399 : vector<16x128xf32>
    %cst_144 = arith.constant 5.000000e-01 : f32
    %401 = vector.broadcast %cst_144 : f32 to vector<16x128xf32>
    %402 = arith.mulf %401, %400 : vector<16x128xf32>
    %cst_145 = arith.constant 5.000000e-01 : f32
    %403 = vector.broadcast %cst_145 : f32 to vector<16x128xf32>
    %404 = arith.addf %402, %403 : vector<16x128xf32>
    %405 = arith.mulf %394, %330 : vector<16x128xf32>
    %406 = arith.mulf %386, %396 : vector<16x128xf32>
    %407 = arith.addf %405, %406 : vector<16x128xf32>
    %408 = math.tanh %407 : vector<16x128xf32>
    %409 = arith.mulf %404, %408 : vector<16x128xf32>
    %410 = arith.truncf %409 : vector<16x128xf32> to vector<16x128xbf16>
    %411 = arith.index_cast %337 : i32 to index
    %c0_146 = arith.constant 0 : index
    %412 = vector.load %arg15[%411, %c0_146] : memref<128x128xbf16, #tpu.memory_space<vmem>>, vector<16x128xbf16>
    tpu.vector_store %arg15[%411, %c0_146], %410 {strides = array<i32>} : memref<128x128xbf16, #tpu.memory_space<vmem>>, vector<16x128xbf16>,
    %c5_i32 = arith.constant 5 : i32
    %c16_i32_147 = arith.constant 16 : i32
    %413 = arith.muli %c5_i32, %c16_i32_147 : i32
    %414 = tpu.assume_multiple %413, 16 : i32
    %415 = arith.index_cast %414 : i32 to index
    %c0_148 = arith.constant 0 : index
    %416 = vector.load %arg14[%415, %c0_148] : memref<128x512xf32, #tpu.memory_space<vmem>>, vector<16x512xf32>
    %417 = arith.truncf %373 : vector<16x128xf32> to vector<16x128xbf16>
    %cst_149 = arith.constant dense<0.000000e+00> : vector<16x512xf32>
    %418 = tpu.matmul %417, %0, %cst_149 {dimension_numbers = #tpu.dot_dimension_numbers<[1], [0], [0], [1], [0, 0, 1, 1], [], []>} : vector<16x128xbf16>, vector<128x512xbf16>, vector<16x512xf32> -> vector<16x512xf32>
    %419 = arith.addf %416, %418 : vector<16x512xf32>
    %420 = vector.extract_strided_slice %419 {offsets = [0, 0], sizes = [16, 128], strides = [1, 1]} : vector<16x512xf32> to vector<16x128xf32>
    %cst_150 = arith.constant 5.000000e-01 : f32
    %421 = vector.broadcast %cst_150 : f32 to vector<16x128xf32>
    %422 = arith.mulf %421, %420 : vector<16x128xf32>
    %423 = math.tanh %422 : vector<16x128xf32>
    %cst_151 = arith.constant 5.000000e-01 : f32
    %424 = vector.broadcast %cst_151 : f32 to vector<16x128xf32>
    %425 = arith.mulf %424, %423 : vector<16x128xf32>
    %cst_152 = arith.constant 5.000000e-01 : f32
    %426 = vector.broadcast %cst_152 : f32 to vector<16x128xf32>
    %427 = arith.addf %425, %426 : vector<16x128xf32>
    %428 = vector.extract_strided_slice %419 {offsets = [0, 128], sizes = [16, 128], strides = [1, 1]} : vector<16x512xf32> to vector<16x128xf32>
    %cst_153 = arith.constant 5.000000e-01 : f32
    %429 = vector.broadcast %cst_153 : f32 to vector<16x128xf32>
    %430 = arith.mulf %429, %428 : vector<16x128xf32>
    %431 = math.tanh %430 : vector<16x128xf32>
    %cst_154 = arith.constant 5.000000e-01 : f32
    %432 = vector.broadcast %cst_154 : f32 to vector<16x128xf32>
    %433 = arith.mulf %432, %431 : vector<16x128xf32>
    %cst_155 = arith.constant 5.000000e-01 : f32
    %434 = vector.broadcast %cst_155 : f32 to vector<16x128xf32>
    %435 = arith.addf %433, %434 : vector<16x128xf32>
    %436 = vector.extract_strided_slice %419 {offsets = [0, 256], sizes = [16, 128], strides = [1, 1]} : vector<16x512xf32> to vector<16x128xf32>
    %437 = math.tanh %436 : vector<16x128xf32>
    %438 = vector.extract_strided_slice %419 {offsets = [0, 384], sizes = [16, 128], strides = [1, 1]} : vector<16x512xf32> to vector<16x128xf32>
    %cst_156 = arith.constant 5.000000e-01 : f32
    %439 = vector.broadcast %cst_156 : f32 to vector<16x128xf32>
    %440 = arith.mulf %439, %438 : vector<16x128xf32>
    %441 = math.tanh %440 : vector<16x128xf32>
    %cst_157 = arith.constant 5.000000e-01 : f32
    %442 = vector.broadcast %cst_157 : f32 to vector<16x128xf32>
    %443 = arith.mulf %442, %441 : vector<16x128xf32>
    %cst_158 = arith.constant 5.000000e-01 : f32
    %444 = vector.broadcast %cst_158 : f32 to vector<16x128xf32>
    %445 = arith.addf %443, %444 : vector<16x128xf32>
    %446 = arith.mulf %435, %371 : vector<16x128xf32>
    %447 = arith.mulf %427, %437 : vector<16x128xf32>
    %448 = arith.addf %446, %447 : vector<16x128xf32>
    %449 = math.tanh %448 : vector<16x128xf32>
    %450 = arith.mulf %445, %449 : vector<16x128xf32>
    %451 = arith.truncf %450 : vector<16x128xf32> to vector<16x128xbf16>
    %452 = arith.truncf %409 : vector<16x128xf32> to vector<16x128xbf16>
    %453 = tpu.concatenate %451, %452 in 1 : vector<16x128xbf16>, vector<16x128xbf16> -> vector<16x256xbf16>
    %cst_159 = arith.constant dense<0.000000e+00> : vector<16x512xf32>
    %454 = tpu.matmul %453, %1, %cst_159 {dimension_numbers = #tpu.dot_dimension_numbers<[1], [0], [0], [1], [0, 0, 1, 1], [], []>} : vector<16x256xbf16>, vector<256x512xbf16>, vector<16x512xf32> -> vector<16x512xf32>
    %455 = arith.addf %454, %19 : vector<16x512xf32>
    %456 = vector.extract_strided_slice %455 {offsets = [0, 0], sizes = [16, 128], strides = [1, 1]} : vector<16x512xf32> to vector<16x128xf32>
    %cst_160 = arith.constant 5.000000e-01 : f32
    %457 = vector.broadcast %cst_160 : f32 to vector<16x128xf32>
    %458 = arith.mulf %457, %456 : vector<16x128xf32>
    %459 = math.tanh %458 : vector<16x128xf32>
    %cst_161 = arith.constant 5.000000e-01 : f32
    %460 = vector.broadcast %cst_161 : f32 to vector<16x128xf32>
    %461 = arith.mulf %460, %459 : vector<16x128xf32>
    %cst_162 = arith.constant 5.000000e-01 : f32
    %462 = vector.broadcast %cst_162 : f32 to vector<16x128xf32>
    %463 = arith.addf %461, %462 : vector<16x128xf32>
    %464 = vector.extract_strided_slice %455 {offsets = [0, 128], sizes = [16, 128], strides = [1, 1]} : vector<16x512xf32> to vector<16x128xf32>
    %cst_163 = arith.constant 5.000000e-01 : f32
    %465 = vector.broadcast %cst_163 : f32 to vector<16x128xf32>
    %466 = arith.mulf %465, %464 : vector<16x128xf32>
    %467 = math.tanh %466 : vector<16x128xf32>
    %cst_164 = arith.constant 5.000000e-01 : f32
    %468 = vector.broadcast %cst_164 : f32 to vector<16x128xf32>
    %469 = arith.mulf %468, %467 : vector<16x128xf32>
    %cst_165 = arith.constant 5.000000e-01 : f32
    %470 = vector.broadcast %cst_165 : f32 to vector<16x128xf32>
    %471 = arith.addf %469, %470 : vector<16x128xf32>
    %472 = vector.extract_strided_slice %455 {offsets = [0, 256], sizes = [16, 128], strides = [1, 1]} : vector<16x512xf32> to vector<16x128xf32>
    %473 = math.tanh %472 : vector<16x128xf32>
    %474 = vector.extract_strided_slice %455 {offsets = [0, 384], sizes = [16, 128], strides = [1, 1]} : vector<16x512xf32> to vector<16x128xf32>
    %cst_166 = arith.constant 5.000000e-01 : f32
    %475 = vector.broadcast %cst_166 : f32 to vector<16x128xf32>
    %476 = arith.mulf %475, %474 : vector<16x128xf32>
    %477 = math.tanh %476 : vector<16x128xf32>
    %cst_167 = arith.constant 5.000000e-01 : f32
    %478 = vector.broadcast %cst_167 : f32 to vector<16x128xf32>
    %479 = arith.mulf %478, %477 : vector<16x128xf32>
    %cst_168 = arith.constant 5.000000e-01 : f32
    %480 = vector.broadcast %cst_168 : f32 to vector<16x128xf32>
    %481 = arith.addf %479, %480 : vector<16x128xf32>
    %482 = arith.mulf %471, %407 : vector<16x128xf32>
    %483 = arith.mulf %463, %473 : vector<16x128xf32>
    %484 = arith.addf %482, %483 : vector<16x128xf32>
    %485 = math.tanh %484 : vector<16x128xf32>
    %486 = arith.mulf %481, %485 : vector<16x128xf32>
    %487 = arith.truncf %486 : vector<16x128xf32> to vector<16x128xbf16>
    %488 = arith.index_cast %414 : i32 to index
    %c0_169 = arith.constant 0 : index
    %489 = vector.load %arg15[%488, %c0_169] : memref<128x128xbf16, #tpu.memory_space<vmem>>, vector<16x128xbf16>
    tpu.vector_store %arg15[%488, %c0_169], %487 {strides = array<i32>} : memref<128x128xbf16, #tpu.memory_space<vmem>>, vector<16x128xbf16>,
    %c6_i32 = arith.constant 6 : i32
    %c16_i32_170 = arith.constant 16 : i32
    %490 = arith.muli %c6_i32, %c16_i32_170 : i32
    %491 = tpu.assume_multiple %490, 16 : i32
    %492 = arith.index_cast %491 : i32 to index
    %c0_171 = arith.constant 0 : index
    %493 = vector.load %arg14[%492, %c0_171] : memref<128x512xf32, #tpu.memory_space<vmem>>, vector<16x512xf32>
    %494 = arith.truncf %450 : vector<16x128xf32> to vector<16x128xbf16>
    %cst_172 = arith.constant dense<0.000000e+00> : vector<16x512xf32>
    %495 = tpu.matmul %494, %0, %cst_172 {dimension_numbers = #tpu.dot_dimension_numbers<[1], [0], [0], [1], [0, 0, 1, 1], [], []>} : vector<16x128xbf16>, vector<128x512xbf16>, vector<16x512xf32> -> vector<16x512xf32>
    %496 = arith.addf %493, %495 : vector<16x512xf32>
    %497 = vector.extract_strided_slice %496 {offsets = [0, 0], sizes = [16, 128], strides = [1, 1]} : vector<16x512xf32> to vector<16x128xf32>
    %cst_173 = arith.constant 5.000000e-01 : f32
    %498 = vector.broadcast %cst_173 : f32 to vector<16x128xf32>
    %499 = arith.mulf %498, %497 : vector<16x128xf32>
    %500 = math.tanh %499 : vector<16x128xf32>
    %cst_174 = arith.constant 5.000000e-01 : f32
    %501 = vector.broadcast %cst_174 : f32 to vector<16x128xf32>
    %502 = arith.mulf %501, %500 : vector<16x128xf32>
    %cst_175 = arith.constant 5.000000e-01 : f32
    %503 = vector.broadcast %cst_175 : f32 to vector<16x128xf32>
    %504 = arith.addf %502, %503 : vector<16x128xf32>
    %505 = vector.extract_strided_slice %496 {offsets = [0, 128], sizes = [16, 128], strides = [1, 1]} : vector<16x512xf32> to vector<16x128xf32>
    %cst_176 = arith.constant 5.000000e-01 : f32
    %506 = vector.broadcast %cst_176 : f32 to vector<16x128xf32>
    %507 = arith.mulf %506, %505 : vector<16x128xf32>
    %508 = math.tanh %507 : vector<16x128xf32>
    %cst_177 = arith.constant 5.000000e-01 : f32
    %509 = vector.broadcast %cst_177 : f32 to vector<16x128xf32>
    %510 = arith.mulf %509, %508 : vector<16x128xf32>
    %cst_178 = arith.constant 5.000000e-01 : f32
    %511 = vector.broadcast %cst_178 : f32 to vector<16x128xf32>
    %512 = arith.addf %510, %511 : vector<16x128xf32>
    %513 = vector.extract_strided_slice %496 {offsets = [0, 256], sizes = [16, 128], strides = [1, 1]} : vector<16x512xf32> to vector<16x128xf32>
    %514 = math.tanh %513 : vector<16x128xf32>
    %515 = vector.extract_strided_slice %496 {offsets = [0, 384], sizes = [16, 128], strides = [1, 1]} : vector<16x512xf32> to vector<16x128xf32>
    %cst_179 = arith.constant 5.000000e-01 : f32
    %516 = vector.broadcast %cst_179 : f32 to vector<16x128xf32>
    %517 = arith.mulf %516, %515 : vector<16x128xf32>
    %518 = math.tanh %517 : vector<16x128xf32>
    %cst_180 = arith.constant 5.000000e-01 : f32
    %519 = vector.broadcast %cst_180 : f32 to vector<16x128xf32>
    %520 = arith.mulf %519, %518 : vector<16x128xf32>
    %cst_181 = arith.constant 5.000000e-01 : f32
    %521 = vector.broadcast %cst_181 : f32 to vector<16x128xf32>
    %522 = arith.addf %520, %521 : vector<16x128xf32>
    %523 = arith.mulf %512, %448 : vector<16x128xf32>
    %524 = arith.mulf %504, %514 : vector<16x128xf32>
    %525 = arith.addf %523, %524 : vector<16x128xf32>
    %526 = math.tanh %525 : vector<16x128xf32>
    %527 = arith.mulf %522, %526 : vector<16x128xf32>
    %528 = arith.truncf %527 : vector<16x128xf32> to vector<16x128xbf16>
    %529 = arith.truncf %486 : vector<16x128xf32> to vector<16x128xbf16>
    %530 = tpu.concatenate %528, %529 in 1 : vector<16x128xbf16>, vector<16x128xbf16> -> vector<16x256xbf16>
    %cst_182 = arith.constant dense<0.000000e+00> : vector<16x512xf32>
    %531 = tpu.matmul %530, %1, %cst_182 {dimension_numbers = #tpu.dot_dimension_numbers<[1], [0], [0], [1], [0, 0, 1, 1], [], []>} : vector<16x256xbf16>, vector<256x512xbf16>, vector<16x512xf32> -> vector<16x512xf32>
    %532 = arith.addf %531, %19 : vector<16x512xf32>
    %533 = vector.extract_strided_slice %532 {offsets = [0, 0], sizes = [16, 128], strides = [1, 1]} : vector<16x512xf32> to vector<16x128xf32>
    %cst_183 = arith.constant 5.000000e-01 : f32
    %534 = vector.broadcast %cst_183 : f32 to vector<16x128xf32>
    %535 = arith.mulf %534, %533 : vector<16x128xf32>
    %536 = math.tanh %535 : vector<16x128xf32>
    %cst_184 = arith.constant 5.000000e-01 : f32
    %537 = vector.broadcast %cst_184 : f32 to vector<16x128xf32>
    %538 = arith.mulf %537, %536 : vector<16x128xf32>
    %cst_185 = arith.constant 5.000000e-01 : f32
    %539 = vector.broadcast %cst_185 : f32 to vector<16x128xf32>
    %540 = arith.addf %538, %539 : vector<16x128xf32>
    %541 = vector.extract_strided_slice %532 {offsets = [0, 128], sizes = [16, 128], strides = [1, 1]} : vector<16x512xf32> to vector<16x128xf32>
    %cst_186 = arith.constant 5.000000e-01 : f32
    %542 = vector.broadcast %cst_186 : f32 to vector<16x128xf32>
    %543 = arith.mulf %542, %541 : vector<16x128xf32>
    %544 = math.tanh %543 : vector<16x128xf32>
    %cst_187 = arith.constant 5.000000e-01 : f32
    %545 = vector.broadcast %cst_187 : f32 to vector<16x128xf32>
    %546 = arith.mulf %545, %544 : vector<16x128xf32>
    %cst_188 = arith.constant 5.000000e-01 : f32
    %547 = vector.broadcast %cst_188 : f32 to vector<16x128xf32>
    %548 = arith.addf %546, %547 : vector<16x128xf32>
    %549 = vector.extract_strided_slice %532 {offsets = [0, 256], sizes = [16, 128], strides = [1, 1]} : vector<16x512xf32> to vector<16x128xf32>
    %550 = math.tanh %549 : vector<16x128xf32>
    %551 = vector.extract_strided_slice %532 {offsets = [0, 384], sizes = [16, 128], strides = [1, 1]} : vector<16x512xf32> to vector<16x128xf32>
    %cst_189 = arith.constant 5.000000e-01 : f32
    %552 = vector.broadcast %cst_189 : f32 to vector<16x128xf32>
    %553 = arith.mulf %552, %551 : vector<16x128xf32>
    %554 = math.tanh %553 : vector<16x128xf32>
    %cst_190 = arith.constant 5.000000e-01 : f32
    %555 = vector.broadcast %cst_190 : f32 to vector<16x128xf32>
    %556 = arith.mulf %555, %554 : vector<16x128xf32>
    %cst_191 = arith.constant 5.000000e-01 : f32
    %557 = vector.broadcast %cst_191 : f32 to vector<16x128xf32>
    %558 = arith.addf %556, %557 : vector<16x128xf32>
    %559 = arith.mulf %548, %484 : vector<16x128xf32>
    %560 = arith.mulf %540, %550 : vector<16x128xf32>
    %561 = arith.addf %559, %560 : vector<16x128xf32>
    %562 = math.tanh %561 : vector<16x128xf32>
    %563 = arith.mulf %558, %562 : vector<16x128xf32>
    %564 = arith.truncf %563 : vector<16x128xf32> to vector<16x128xbf16>
    %565 = arith.index_cast %491 : i32 to index
    %c0_192 = arith.constant 0 : index
    %566 = vector.load %arg15[%565, %c0_192] : memref<128x128xbf16, #tpu.memory_space<vmem>>, vector<16x128xbf16>
    tpu.vector_store %arg15[%565, %c0_192], %564 {strides = array<i32>} : memref<128x128xbf16, #tpu.memory_space<vmem>>, vector<16x128xbf16>,
    %c7_i32 = arith.constant 7 : i32
    %c16_i32_193 = arith.constant 16 : i32
    %567 = arith.muli %c7_i32, %c16_i32_193 : i32
    %568 = tpu.assume_multiple %567, 16 : i32
    %569 = arith.index_cast %568 : i32 to index
    %c0_194 = arith.constant 0 : index
    %570 = vector.load %arg14[%569, %c0_194] : memref<128x512xf32, #tpu.memory_space<vmem>>, vector<16x512xf32>
    %571 = arith.truncf %527 : vector<16x128xf32> to vector<16x128xbf16>
    %cst_195 = arith.constant dense<0.000000e+00> : vector<16x512xf32>
    %572 = tpu.matmul %571, %0, %cst_195 {dimension_numbers = #tpu.dot_dimension_numbers<[1], [0], [0], [1], [0, 0, 1, 1], [], []>} : vector<16x128xbf16>, vector<128x512xbf16>, vector<16x512xf32> -> vector<16x512xf32>
    %573 = arith.addf %570, %572 : vector<16x512xf32>
    %574 = vector.extract_strided_slice %573 {offsets = [0, 0], sizes = [16, 128], strides = [1, 1]} : vector<16x512xf32> to vector<16x128xf32>
    %cst_196 = arith.constant 5.000000e-01 : f32
    %575 = vector.broadcast %cst_196 : f32 to vector<16x128xf32>
    %576 = arith.mulf %575, %574 : vector<16x128xf32>
    %577 = math.tanh %576 : vector<16x128xf32>
    %cst_197 = arith.constant 5.000000e-01 : f32
    %578 = vector.broadcast %cst_197 : f32 to vector<16x128xf32>
    %579 = arith.mulf %578, %577 : vector<16x128xf32>
    %cst_198 = arith.constant 5.000000e-01 : f32
    %580 = vector.broadcast %cst_198 : f32 to vector<16x128xf32>
    %581 = arith.addf %579, %580 : vector<16x128xf32>
    %582 = vector.extract_strided_slice %573 {offsets = [0, 128], sizes = [16, 128], strides = [1, 1]} : vector<16x512xf32> to vector<16x128xf32>
    %cst_199 = arith.constant 5.000000e-01 : f32
    %583 = vector.broadcast %cst_199 : f32 to vector<16x128xf32>
    %584 = arith.mulf %583, %582 : vector<16x128xf32>
    %585 = math.tanh %584 : vector<16x128xf32>
    %cst_200 = arith.constant 5.000000e-01 : f32
    %586 = vector.broadcast %cst_200 : f32 to vector<16x128xf32>
    %587 = arith.mulf %586, %585 : vector<16x128xf32>
    %cst_201 = arith.constant 5.000000e-01 : f32
    %588 = vector.broadcast %cst_201 : f32 to vector<16x128xf32>
    %589 = arith.addf %587, %588 : vector<16x128xf32>
    %590 = vector.extract_strided_slice %573 {offsets = [0, 256], sizes = [16, 128], strides = [1, 1]} : vector<16x512xf32> to vector<16x128xf32>
    %591 = math.tanh %590 : vector<16x128xf32>
    %592 = vector.extract_strided_slice %573 {offsets = [0, 384], sizes = [16, 128], strides = [1, 1]} : vector<16x512xf32> to vector<16x128xf32>
    %cst_202 = arith.constant 5.000000e-01 : f32
    %593 = vector.broadcast %cst_202 : f32 to vector<16x128xf32>
    %594 = arith.mulf %593, %592 : vector<16x128xf32>
    %595 = math.tanh %594 : vector<16x128xf32>
    %cst_203 = arith.constant 5.000000e-01 : f32
    %596 = vector.broadcast %cst_203 : f32 to vector<16x128xf32>
    %597 = arith.mulf %596, %595 : vector<16x128xf32>
    %cst_204 = arith.constant 5.000000e-01 : f32
    %598 = vector.broadcast %cst_204 : f32 to vector<16x128xf32>
    %599 = arith.addf %597, %598 : vector<16x128xf32>
    %600 = arith.mulf %589, %525 : vector<16x128xf32>
    %601 = arith.mulf %581, %591 : vector<16x128xf32>
    %602 = arith.addf %600, %601 : vector<16x128xf32>
    %603 = math.tanh %602 : vector<16x128xf32>
    %604 = arith.mulf %599, %603 : vector<16x128xf32>
    %605 = arith.truncf %604 : vector<16x128xf32> to vector<16x128xbf16>
    %606 = arith.truncf %563 : vector<16x128xf32> to vector<16x128xbf16>
    %607 = tpu.concatenate %605, %606 in 1 : vector<16x128xbf16>, vector<16x128xbf16> -> vector<16x256xbf16>
    %cst_205 = arith.constant dense<0.000000e+00> : vector<16x512xf32>
    %608 = tpu.matmul %607, %1, %cst_205 {dimension_numbers = #tpu.dot_dimension_numbers<[1], [0], [0], [1], [0, 0, 1, 1], [], []>} : vector<16x256xbf16>, vector<256x512xbf16>, vector<16x512xf32> -> vector<16x512xf32>
    %609 = arith.addf %608, %19 : vector<16x512xf32>
    %610 = vector.extract_strided_slice %609 {offsets = [0, 0], sizes = [16, 128], strides = [1, 1]} : vector<16x512xf32> to vector<16x128xf32>
    %cst_206 = arith.constant 5.000000e-01 : f32
    %611 = vector.broadcast %cst_206 : f32 to vector<16x128xf32>
    %612 = arith.mulf %611, %610 : vector<16x128xf32>
    %613 = math.tanh %612 : vector<16x128xf32>
    %cst_207 = arith.constant 5.000000e-01 : f32
    %614 = vector.broadcast %cst_207 : f32 to vector<16x128xf32>
    %615 = arith.mulf %614, %613 : vector<16x128xf32>
    %cst_208 = arith.constant 5.000000e-01 : f32
    %616 = vector.broadcast %cst_208 : f32 to vector<16x128xf32>
    %617 = arith.addf %615, %616 : vector<16x128xf32>
    %618 = vector.extract_strided_slice %609 {offsets = [0, 128], sizes = [16, 128], strides = [1, 1]} : vector<16x512xf32> to vector<16x128xf32>
    %cst_209 = arith.constant 5.000000e-01 : f32
    %619 = vector.broadcast %cst_209 : f32 to vector<16x128xf32>
    %620 = arith.mulf %619, %618 : vector<16x128xf32>
    %621 = math.tanh %620 : vector<16x128xf32>
    %cst_210 = arith.constant 5.000000e-01 : f32
    %622 = vector.broadcast %cst_210 : f32 to vector<16x128xf32>
    %623 = arith.mulf %622, %621 : vector<16x128xf32>
    %cst_211 = arith.constant 5.000000e-01 : f32
    %624 = vector.broadcast %cst_211 : f32 to vector<16x128xf32>
    %625 = arith.addf %623, %624 : vector<16x128xf32>
    %626 = vector.extract_strided_slice %609 {offsets = [0, 256], sizes = [16, 128], strides = [1, 1]} : vector<16x512xf32> to vector<16x128xf32>
    %627 = math.tanh %626 : vector<16x128xf32>
    %628 = vector.extract_strided_slice %609 {offsets = [0, 384], sizes = [16, 128], strides = [1, 1]} : vector<16x512xf32> to vector<16x128xf32>
    %cst_212 = arith.constant 5.000000e-01 : f32
    %629 = vector.broadcast %cst_212 : f32 to vector<16x128xf32>
    %630 = arith.mulf %629, %628 : vector<16x128xf32>
    %631 = math.tanh %630 : vector<16x128xf32>
    %cst_213 = arith.constant 5.000000e-01 : f32
    %632 = vector.broadcast %cst_213 : f32 to vector<16x128xf32>
    %633 = arith.mulf %632, %631 : vector<16x128xf32>
    %cst_214 = arith.constant 5.000000e-01 : f32
    %634 = vector.broadcast %cst_214 : f32 to vector<16x128xf32>
    %635 = arith.addf %633, %634 : vector<16x128xf32>
    %636 = arith.mulf %625, %561 : vector<16x128xf32>
    %637 = arith.mulf %617, %627 : vector<16x128xf32>
    %638 = arith.addf %636, %637 : vector<16x128xf32>
    %639 = math.tanh %638 : vector<16x128xf32>
    %640 = arith.mulf %635, %639 : vector<16x128xf32>
    %641 = arith.truncf %640 : vector<16x128xf32> to vector<16x128xbf16>
    %642 = arith.index_cast %568 : i32 to index
    %c0_215 = arith.constant 0 : index
    %643 = vector.load %arg15[%642, %c0_215] : memref<128x128xbf16, #tpu.memory_space<vmem>>, vector<16x128xbf16>
    tpu.vector_store %arg15[%642, %c0_215], %641 {strides = array<i32>} : memref<128x128xbf16, #tpu.memory_space<vmem>>, vector<16x128xbf16>,
    %c8_i32 = arith.constant 8 : i32
    %c0_216 = arith.constant 0 : index
    %c0_217 = arith.constant 0 : index
    %c0_218 = arith.constant 0 : index
    %644 = vector.load %arg12[%c0_216, %c0_217, %c0_218] : memref<2x16x128xf32, #tpu.memory_space<vmem>>, vector<1x16x128xf32>
    %645 = vector.shape_cast %644 : vector<1x16x128xf32> to vector<16x128xf32>
    %646 = vector.shape_cast %604 : vector<16x128xf32> to vector<1x16x128xf32>
    tpu.vector_store %arg12[%c0_216, %c0_217, %c0_218], %646 {strides = array<i32>} : memref<2x16x128xf32, #tpu.memory_space<vmem>>, vector<1x16x128xf32>,
    %c1_219 = arith.constant 1 : index
    %c0_220 = arith.constant 0 : index
    %c0_221 = arith.constant 0 : index
    %647 = vector.load %arg12[%c1_219, %c0_220, %c0_221] : memref<2x16x128xf32, #tpu.memory_space<vmem>>, vector<1x16x128xf32>
    %648 = vector.shape_cast %647 : vector<1x16x128xf32> to vector<16x128xf32>
    %649 = vector.shape_cast %640 : vector<16x128xf32> to vector<1x16x128xf32>
    tpu.vector_store %arg12[%c1_219, %c0_220, %c0_221], %649 {strides = array<i32>} : memref<2x16x128xf32, #tpu.memory_space<vmem>>, vector<1x16x128xf32>,
    %c0_222 = arith.constant 0 : index
    %c0_223 = arith.constant 0 : index
    %c0_224 = arith.constant 0 : index
    %650 = vector.load %arg13[%c0_222, %c0_223, %c0_224] : memref<2x16x128xf32, #tpu.memory_space<vmem>>, vector<1x16x128xf32>
    %651 = vector.shape_cast %650 : vector<1x16x128xf32> to vector<16x128xf32>
    %652 = vector.shape_cast %602 : vector<16x128xf32> to vector<1x16x128xf32>
    tpu.vector_store %arg13[%c0_222, %c0_223, %c0_224], %652 {strides = array<i32>} : memref<2x16x128xf32, #tpu.memory_space<vmem>>, vector<1x16x128xf32>,
    %c1_225 = arith.constant 1 : index
    %c0_226 = arith.constant 0 : index
    %c0_227 = arith.constant 0 : index
    %653 = vector.load %arg13[%c1_225, %c0_226, %c0_227] : memref<2x16x128xf32, #tpu.memory_space<vmem>>, vector<1x16x128xf32>
    %654 = vector.shape_cast %653 : vector<1x16x128xf32> to vector<16x128xf32>
    %655 = vector.shape_cast %638 : vector<16x128xf32> to vector<1x16x128xf32>
    tpu.vector_store %arg13[%c1_225, %c0_226, %c0_227], %655 {strides = array<i32>} : memref<2x16x128xf32, #tpu.memory_space<vmem>>, vector<1x16x128xf32>,
    %c0_228 = arith.constant 0 : index
    %c0_229 = arith.constant 0 : index
    %656 = vector.load %arg11[%c0_228, %c0_229] : memref<128x128xf32, #tpu.memory_space<vmem>>, vector<128x128xf32>
    %c0_230 = arith.constant 0 : index
    %c0_231 = arith.constant 0 : index
    %657 = vector.load %arg15[%c0_230, %c0_231] : memref<128x128xbf16, #tpu.memory_space<vmem>>, vector<128x128xbf16>
    %cst_232 = arith.constant dense<0.000000e+00> : vector<128x128xf32>
    %658 = tpu.matmul %657, %2, %cst_232 {dimension_numbers = #tpu.dot_dimension_numbers<[1], [0], [0], [1], [0, 0, 1, 1], [], []>} : vector<128x128xbf16>, vector<128x128xbf16>, vector<128x128xf32> -> vector<128x128xf32>
    %659 = arith.addf %656, %658 : vector<128x128xf32>
    %c0_233 = arith.constant 0 : index
    %c0_234 = arith.constant 0 : index
    %660 = vector.load %arg11[%c0_233, %c0_234] : memref<128x128xf32, #tpu.memory_space<vmem>>, vector<128x128xf32>
    tpu.vector_store %arg11[%c0_233, %c0_234], %659 {strides = array<i32>} : memref<128x128xf32, #tpu.memory_space<vmem>>, vector<128x128xf32>,
    return
  }
}

</mosaic_0001>

<bundles_post_ra>
// kernel: tpu_custom_call.1
= control target key start
LH: loop header
LB: loop body
LE: loop exit
PB: predicated region body
PF: predicated region fallthrough
CT: control target
= control target key end

     0   :  { %19 = vsyncpa [#allocation5], 0  ;;  %s6693_s0 = inlined_call_operand.vmem [shape: f32[128,23], index: 0, kind: input, shape index: {}]   ;;  %s6694_s1 = inlined_call_operand.vmem [shape: f32[2,16,128], index: 1, kind: input, shape index: {}]   ;;  %s6695_s2 = inlined_call_operand.hbm [shape: f32[2,16,128], index: 2, kind: input, shape index: {}]   ;;  %s6696_s3 = inlined_call_operand.vmem [shape: bf16[23,512], index: 3, kind: input, shape index: {}]   ;;  %s6697_s4 = inlined_call_operand.hbm [shape: bf16[128,512], index: 4, kind: input, shape index: {}]   ;;  %s6698_s5 = inlined_call_operand.hbm [shape: f32[1,512], index: 5, kind: input, shape index: {}]   ;;  %s6699_s6 = inlined_call_operand.hbm [shape: bf16[256,512], index: 6, kind: input, shape index: {}]   ;;  %s6700_s7 = inlined_call_operand.hbm [shape: f32[1,512], index: 7, kind: input, shape index: {}]   ;;  %s6701_s8 = inlined_call_operand.vmem [shape: bf16[23,128], index: 8, kind: input, shape index: {}]   ;;  %s6702_s9 = inlined_call_operand.vmem [shape: bf16[128,128], index: 9, kind: input, shape index: {}]   ;;  %s6703_s10 = inlined_call_operand.vmem [shape: f32[1,128], index: 10, kind: input, shape index: {}]   ;;  %s6704_s11 = inlined_call_operand.hbm [shape: f32[128,128], index: 11, kind: output, shape index: {0}]   ;;  %s6705_s12 = inlined_call_operand.hbm [shape: f32[2,16,128], index: 12, kind: output, shape index: {1}]   ;;  %s6706_s13 = inlined_call_operand.hbm [shape: f32[2,16,128], index: 13, kind: output, shape index: {2}]  }
   0x1   :  { %20 = vsyncpa [#allocation8], 0 }
   0x2   :  { %21 = vsyncpa [#allocation11], 0 }
   0x3   :  { %22 = vsyncpa [#allocation6], 0  ;;  %s47_s27 = sshll.u32 %s6697_s4, 4  ;;  %s48_s27 = int_to_ptr.hbm [resolvable:$true] %s47_s27 }
   0x4   :  { %23 = vsyncpa [#allocation15], 0  ;;  %s4900_s28 = smov [#allocation7]   ;;  %s71_s15 = sshll.u32 %s6699_s6, 4  ;;  %s72_s15 = int_to_ptr.hbm [resolvable:$true] %s71_s15 }
   0x5   :  { %s49_s29 = sshll.u32 %s4900_s28, 4  ;;  %s4901_s16 = smov 256   ;;  %s50_s29 = int_to_ptr.vmem [resolvable:$true] %s49_s29 }
   0x6   :  { %s4902_s17 = smov 16   ;;  %s4903_s18 = smov [#allocation10]  }
   0x7   :  { %55 = dma.hbm_to_vmem [thread:$0]  %s48_s27, 4096, %s50_s29, [#allocation8], %s4901_s16, %s4901_s16, %s4902_s17  }
   0x8   :  { %s73_s19 = sshll.u32 %s4903_s18, 4  ;;  %s32_s22 = sshll.u32 %s6695_s2, 4  ;;  %s74_s19 = int_to_ptr.vmem [resolvable:$true] %s73_s19  ;;  %s33_s22 = int_to_ptr.hbm [resolvable:$true] %s32_s22 }
   0x9   :  { %79 = dma.hbm_to_vmem [thread:$0]  %s72_s15, 8192, %s74_s19, [#allocation11], %s4901_s16, %s4901_s16, %s4902_s17  }
   0xa   :  { %s4904_s4 = smov [#allocation4]   ;;  %s61_s6 = sshll.u32 %s6698_s5, 4  ;;  %s62_s6 = int_to_ptr.hbm [resolvable:$true] %s61_s6 }
   0xb   :  { %s34_s23 = sshll.u32 %s4904_s4, 4  ;;  %s4905_s26 = smov 128   ;;  %s35_s23 = int_to_ptr.vmem [resolvable:$true] %s34_s23 }
   0xc   :  { %s4906_s28 = smov 8   ;;  %s4907_s27 = smov [#allocation9]  }
   0xd   :  { %40 = dma.hbm_to_vmem [thread:$0]  %s33_s22, 512, %s35_s23, [#allocation5], %s4905_s26, %s4905_s26, %s4906_s28  }
   0xe   :  { %s63_s29 = sshll.u32 %s4907_s27, 4  ;;  %s85_s14 = sshll.u32 %s6700_s7, 4  ;;  %s64_s29 = int_to_ptr.vmem [resolvable:$true] %s63_s29  ;;  %s86_s14 = int_to_ptr.hbm [resolvable:$true] %s85_s14 }
   0xf   :  { %66 = dma.hbm_to_vmem [thread:$0]  %s62_s6, 64, %s64_s29, [#allocation8]  }
  0x10   :  { %s4908_s15 = smov [#allocation12]  }
  0x11   :  { %s87_s16 = sshll.u32 %s4908_s15, 4  ;;  %s88_s16 = int_to_ptr.vmem [resolvable:$true] %s87_s16 }
  0x12   :  { %90 = dma.hbm_to_vmem [thread:$0]  %s86_s14, 64, %s88_s16, [#allocation11]  }
  0x13   :  { %4890 = dma.done.wait [#allocation5], 512  }
  0x14   :  { %4891 = vsyncadd [#allocation5], 4294966784 }
  0x15   :  { %4892 = dma.done.wait [#allocation8], 4160  }
  0x16   :  { %4893 = vsyncadd [#allocation8], 4294963136 }
  0x17   :  { %4894 = dma.done.wait [#allocation11], 8256  }
  0x18   :  { %4895 = vsyncadd [#allocation11], 4294959040  ;;  %vm325_vm0 = vcmask 1042432   ;;  %vm326_vm1 = vcmask 1043456   ;;  %v4909_v0 = vmov 65535   ;;  %v258_v2 = vld [vmem:[%s6696_s3 + $0x20] sm:$0xff] }
  0x19   :  { %v327_v1 = vsel %vm325_vm0, 4294967295, %v4909_v0  ;;  %v284_v3 = vunpack.c.l.b16 %v258_v2  ;;  %v285_v4 = vunpack.c.h.b16 %v258_v2  ;;  %v259_v7 = vld [vmem:[%s6696_s3 + $0x28] sm:$0xff]  ;;  %v3695_v8 = vld [vmem:[%s6696_s3] sm:$0xf]  ;;  %v4309_v9 = vld [vmem:[%s6696_s3 + $0xc] sm:$0xf0] }
  0x1a   :  { %v5004_v5 = vsel %vm326_vm1, %v327_v1, 0  ;;  %v286_v10 = vunpack.c.l.b16 %v259_v7  ;;  %v287_v11 = vunpack.c.h.b16 %v259_v7  ;;  %v230_v14 = vld [vmem:[%s6693_s0] sm:$0xff]  ;;  %v3696_v17 = vor.u32 %v4309_v9, %v3695_v8  ;;  %v231_v18 = vld [vmem:[%s6693_s0 + $0x8] sm:$0xff]  ;;  %v236_v19 = vld [vmem:[%s6693_s0 + $0x30] sm:$0xff]  ;;  %s4911_s15 = smov [#allocation16]   ;;  %s3662_s5 = sshll.u32 %s6706_s13, 4  ;;  %s3663_s5 = int_to_ptr.hbm [resolvable:$true] %s3662_s5 }
  0x1b   :  { %v292_v6 = vpack.c.b16 %v284_v3, %v284_v3  ;;  %v293_v13 = vpack.c.b16 %v285_v4, %v285_v4  ;;  %v237_v20 = vld [vmem:[%s6693_s0 + $0x38] sm:$0xff]  ;;  %v242_v21 = vld [vmem:[%s6693_s0 + $0x60] sm:$0xff]  ;;  %v243_v22 = vld [vmem:[%s6693_s0 + $0x68] sm:$0xff]  ;;  %v5037_v26 = vpack.c.bf16 %v231_v18, %v230_v14  ;;  %vm300_vm2 = vcmask 187392   ;;  %s3660_s16 = sshll.u32 %s4911_s15, 4  ;;  %s3636_s7 = sshll.u32 %s6704_s11, 4  ;;  %s3661_s16 = int_to_ptr.vmem [resolvable:$true] %s3660_s16  ;;  %s3637_s7 = int_to_ptr.hbm [resolvable:$true] %s3636_s7 }
  0x1c   :  { %v294_v15 = vpack.c.b16 %v286_v10, %v286_v10  ;;  %v295_v16 = vpack.c.b16 %v287_v11, %v287_v11  ;;  %v5039_v27 = vpack.c.bf16 %v237_v20, %v236_v19  ;;  %v4308_v28 = vld [vmem:[%s6696_s3 + $0xc] sm:$0xf]  ;;  %v3705_v29 = vld [vmem:[%s6696_s3 + $0x18] sm:$0xf0]  ;;  %v5047_v30 = vpack.c.bf16 %v243_v22, %v242_v21  ;;  %v3703_v32 = vld [vmem:[%s6696_s3 + $0x8] sm:$0xf] }
  0x1d   :  { %v330_v12 = vand.u32 %v5004_v5, %v292_v6  ;;  %v333_v24 = vand.u32 %v5004_v5, %v293_v13  ;;  %v3708_v31 = vor.u32 %v4308_v28, %v3705_v29  ;;  %v4310_v33 = vld [vmem:[%s6696_s3 + $0x14] sm:$0xf0]  ;;  %v4307_v34 = vld [vmem:[%s6696_s3 + $0x4] sm:$0xf]  ;;  %v3697_v36 = vld [vmem:[%s6696_s3 + $0x10] sm:$0xf0] }
  0x1e   :  { %v336_v23 = vand.u32 %v5004_v5, %v294_v15  ;;  %v339_v25 = vand.u32 %v5004_v5, %v295_v16  ;;  %v3704_v35 = vor.u32 %v4310_v33, %v3703_v32  ;;  %v3700_v37 = vor.u32 %v4307_v34, %v3697_v36  ;;  %v232_v38 = vld [vmem:[%s6693_s0 + $0x10] sm:$0xff]  ;;  %v233_v39 = vld [vmem:[%s6693_s0 + $0x18] sm:$0xff]  ;;  %v238_v40 = vld [vmem:[%s6693_s0 + $0x40] sm:$0xff] }
  0x1f   :  { %347 = vmatpush.bf16.msra.mxu1 %v330_v12  ;;  %4360 = vmatpush.bf16.msra.mxu2 %v330_v12  ;;  %v239_v41 = vld [vmem:[%s6693_s0 + $0x48] sm:$0xff]  ;;  %v244_v42 = vld [vmem:[%s6693_s0 + $0x70] sm:$0xff]  ;;  %v245_v43 = vld [vmem:[%s6693_s0 + $0x78] sm:$0xff]  ;;  %v5085_v44 = vpack.c.bf16 %v233_v39, %v232_v38 }
  0x20   :  { %4361 = vmatpush.bf16.msra.mxu3 %v330_v12  ;;  %v5087_v45 = vpack.c.bf16 %v239_v41, %v238_v40  ;;  %v5089_v46 = vpack.c.bf16 %v245_v43, %v244_v42  ;;  %v4231_v47 = vld [vmem:[#allocation7 + $0xe4] sm:$0xf]  ;;  %v3871_v48 = vld [vmem:[#allocation7 + $0xf0] sm:$0xf0]  ;;  %v3869_v49 = vld [vmem:[#allocation7 + $0xe0] sm:$0xf] }
  0x21   :  { %v5097_v50 = vor.u32 %v4231_v47, %v3871_v48  ;;  %v4233_v51 = vld [vmem:[#allocation7 + $0xec] sm:$0xf0]  ;;  %v234_v53 = vld [vmem:[%s6693_s0 + $0x20] sm:$0xff]  ;;  %v235_v54 = vld [vmem:[%s6693_s0 + $0x28] sm:$0xff] }
  0x22   :  { %v5099_v52 = vor.u32 %v4233_v51, %v3869_v49  ;;  %v240_v55 = vld [vmem:[%s6693_s0 + $0x50] sm:$0xff]  ;;  %v241_v56 = vld [vmem:[%s6693_s0 + $0x58] sm:$0xff]  ;;  %v5115_v57 = vpack.c.bf16 %v235_v54, %v234_v53  ;;  %v3877_v59 = vld [vmem:[#allocation7 + $0xe8] sm:$0xf] }
  0x23   :  { %348 = vmatpush.bf16.msra.mxu1 %v3696_v17  ;;  %4362 = vmatpush.bf16.msra.mxu2 %v3696_v17  ;;  %v5117_v58 = vpack.c.bf16 %v241_v56, %v240_v55  ;;  %v4234_v60 = vld [vmem:[#allocation7 + $0xf4] sm:$0xf0]  ;;  %v4227_v61 = vld [vmem:[#allocation7 + $0xc4] sm:$0xf]  ;;  %v3855_v63 = vld [vmem:[#allocation7 + $0xd0] sm:$0xf0] }
  0x24   :  { %4363 = vmatpush.bf16.msra.mxu3 %v3696_v17  ;;  %6894 = vst [vmem:[#allocation22_spill] sm:$0xff] %v5099_v52  ;;  %v5125_v62 = vor.u32 %v4234_v60, %v3877_v59  ;;  %v3853_v0 = vld [vmem:[#allocation7 + $0xc0] sm:$0xf]  ;;  %v4229_v1 = vld [vmem:[#allocation7 + $0xcc] sm:$0xf0]  ;;  %v5127_v2 = vor.u32 %v4227_v61, %v3855_v63 }
  0x25   :  { %v5129_v3 = vor.u32 %v4229_v1, %v3853_v0  ;;  %v3861_v4 = vld [vmem:[#allocation7 + $0xc8] sm:$0xf]  ;;  %v4230_v6 = vld [vmem:[#allocation7 + $0xd4] sm:$0xf0]  ;;  %v4223_v7 = vld [vmem:[#allocation7 + $0xa4] sm:$0xf] }
  0x26   :  { %3709 = vmatmul.msk.bf16.vlgmr.msra.gmra.mxu1 %vm300_vm2, %v5037_v26  ;;  %3712 = vmatmul.msk.bf16.vlgmr.msra.gmra.mxu2 %vm300_vm2, %v5039_v27  ;;  %v5140_v8 = vor.u32 %v4230_v6, %v3861_v4  ;;  %v3839_v9 = vld [vmem:[#allocation7 + $0xb0] sm:$0xf0]  ;;  %v3837_v10 = vld [vmem:[#allocation7 + $0xa0] sm:$0xf]  ;;  %v4225_v11 = vld [vmem:[#allocation7 + $0xac] sm:$0xf0] }
  0x27   :  { %445 = vmatpush.bf16.msrb.mxu2 %v336_v23  ;;  %396 = vmatpush.bf16.msrb.mxu1 %v333_v24  ;;  %6895 = vst [vmem:[#allocation23_spill] sm:$0xff] %v5129_v3  ;;  %v5142_v12 = vor.u32 %v4223_v7, %v3839_v9  ;;  %v5144_v13 = vor.u32 %v4225_v11, %v3837_v10  ;;  %v3845_v14 = vld [vmem:[#allocation7 + $0xa8] sm:$0xf]  ;;  %v4226_v15 = vld [vmem:[#allocation7 + $0xb4] sm:$0xf0] }
  0x28   :  { %494 = vmatpush.bf16.msrb.mxu3 %v339_v25  ;;  %v4219_v16 = vld [vmem:[#allocation7 + $0x84] sm:$0xf]  ;;  %v5155_v17 = vor.u32 %v4226_v15, %v3845_v14  ;;  %v3823_v18 = vld [vmem:[#allocation7 + $0x90] sm:$0xf0]  ;;  %v3821_v19 = vld [vmem:[#allocation7 + $0x80] sm:$0xf] }
  0x29   :  { %3715 = vmatmul.msk.bf16.vlgmr.msra.gmra.mxu3 %vm300_vm2, %v5047_v30  ;;  %6896 = vst [vmem:[#allocation24_spill] sm:$0xff] %v5144_v13  ;;  %v4221_v20 = vld [vmem:[#allocation7 + $0x8c] sm:$0xf0]  ;;  %v5157_v21 = vor.u32 %v4219_v16, %v3823_v18  ;;  %v3829_v23 = vld [vmem:[#allocation7 + $0x88] sm:$0xf] }
  0x2a   :  { %v5159_v22 = vor.u32 %v4221_v20, %v3821_v19  ;;  %v4222_v24 = vld [vmem:[#allocation7 + $0x94] sm:$0xf0]  ;;  %v4215_v25 = vld [vmem:[#allocation7 + $0x64] sm:$0xf]  ;;  %v3807_v29 = vld [vmem:[#allocation7 + $0x70] sm:$0xf0] }
  0x2b   :  { %446 = vmatpush.bf16.msrb.mxu2 %v3704_v35  ;;  %397 = vmatpush.bf16.msrb.mxu1 %v3700_v37  ;;  %v5170_v28 = vor.u32 %v4222_v24, %v3829_v23  ;;  %v3805_v32 = vld [vmem:[#allocation7 + $0x60] sm:$0xf]  ;;  %v4217_v33 = vld [vmem:[#allocation7 + $0x6c] sm:$0xf0]  ;;  %v3813_v35 = vld [vmem:[#allocation7 + $0x68] sm:$0xf] }
  0x2c   :  { %495 = vmatpush.bf16.msrb.mxu3 %v3708_v31  ;;  %6897 = vst [vmem:[#allocation25_spill] sm:$0xff] %v5159_v22  ;;  %v5172_v31 = vor.u32 %v4215_v25, %v3807_v29  ;;  %v5176_v34 = vor.u32 %v4217_v33, %v3805_v32  ;;  %v4218_v36 = vld [vmem:[#allocation7 + $0x74] sm:$0xf0]  ;;  %v4211_v38 = vld [vmem:[#allocation7 + $0x44] sm:$0xf] }
  0x2d   :  { %v5185_v37 = vor.u32 %v4218_v36, %v3813_v35  ;;  %v3791_v39 = vld [vmem:[#allocation7 + $0x50] sm:$0xf0]  ;;  %v3789_v41 = vld [vmem:[#allocation7 + $0x40] sm:$0xf]  ;;  %v4213_v42 = vld [vmem:[#allocation7 + $0x4c] sm:$0xf0] }
  0x2e   :  { %6898 = vst [vmem:[#allocation26_spill] sm:$0xff] %v5176_v34  ;;  %v5188_v40 = vor.u32 %v4211_v38, %v3791_v39  ;;  %v5190_v43 = vor.u32 %v4213_v42, %v3789_v41  ;;  %v3797_v47 = vld [vmem:[#allocation7 + $0x48] sm:$0xf]  ;;  %v4214_v48 = vld [vmem:[#allocation7 + $0x54] sm:$0xf0] }
  0x2f   :  { %891 = vmatpush.bf16.msra.mxu2 %v5097_v50  ;;  %877 = vmatpush.bf16.msra.mxu1 %v5099_v52  ;;  %6899 = vst [vmem:[#allocation27_spill] sm:$0xff] %v5185_v37  ;;  %v5200_v49 = vor.u32 %v4214_v48, %v3797_v47  ;;  %v3781_v51 = vld [vmem:[#allocation7 + $0x28] sm:$0xf]  ;;  %v4210_v53 = vld [vmem:[#allocation7 + $0x34] sm:$0xf0] }
  0x30   :  { %905 = vmatpush.bf16.msra.mxu3 %v5125_v62  ;;  %6900 = vst [vmem:[#allocation28_spill] sm:$0xff] %v5190_v43  ;;  %v5203_v54 = vor.u32 %v4210_v53, %v3781_v51  ;;  %v3773_v55 = vld [vmem:[#allocation7 + $0x20] sm:$0xf]  ;;  %v4209_v56 = vld [vmem:[#allocation7 + $0x2c] sm:$0xf0] }
  0x31   :  { %6901 = vst [vmem:[#allocation29_spill] sm:$0xff] %v5200_v49  ;;  %v5206_v59 = vor.u32 %v4209_v56, %v3773_v55  ;;  %v3765_v60 = vld [vmem:[#allocation7 + $0x8] sm:$0xf]  ;;  %v4206_v61 = vld [vmem:[#allocation7 + $0x14] sm:$0xf0] }
  0x32   :  { %6902 = vst [vmem:[#allocation30_spill] sm:$0xff] %v5203_v54  ;;  %v5208_v63 = vor.u32 %v4206_v61, %v3765_v60  ;;  %v4207_v1 = vld [vmem:[#allocation7 + $0x24] sm:$0xf]  ;;  %v3775_v4 = vld [vmem:[#allocation7 + $0x30] sm:$0xf0] }
  0x33   :  { %892 = vmatpush.bf16.msra.mxu2 %v5127_v2  ;;  %878 = vmatpush.bf16.msra.mxu1 %v5129_v3  ;;  %6903 = vst [vmem:[#allocation31_spill] sm:$0xff] %v5206_v59  ;;  %v5213_v6 = vor.u32 %v4207_v1, %v3775_v4  ;;  %v3757_v7 = vld [vmem:[#allocation7] sm:$0xf]  ;;  %v4205_v9 = vld [vmem:[#allocation7 + $0xc] sm:$0xf0] }
  0x34   :  { %906 = vmatpush.bf16.msra.mxu3 %v5140_v8  ;;  %6904 = vst [vmem:[#allocation32_spill] sm:$0xff] %v5208_v63  ;;  %v5216_v10 = vld [vmem:[#allocation9] sm:$0xf]  ;;  %v5218_v11 = vor.u32 %v4205_v9, %v3757_v7  ;;  %v4232_v14 = vld [vmem:[#allocation7 + $0xec] sm:$0xf] }
  0x35   :  { %v3879_v15 = vld [vmem:[#allocation7 + $0xf8] sm:$0xf0]  ;;  %v5230_v18 = vperm.slane %v5216_v10, 0  ;;  %v4228_v20 = vld [vmem:[#allocation7 + $0xcc] sm:$0xf] }
  0x36   :  { %3710 = vmatmul.msk.bf16.gmra.mxu1 %vm300_vm2, %v5085_v44  ;;  %3713 = vmatmul.msk.bf16.gmra.mxu2 %vm300_vm2, %v5087_v45  ;;  %6905 = vst [vmem:[#allocation33_spill] sm:$0xff] %v5218_v11  ;;  %v5224_v16 = vor.u32 %v4232_v14, %v3879_v15  ;;  %v3863_v23 = vld [vmem:[#allocation7 + $0xd8] sm:$0xf0]  ;;  %v4224_v35 = vld [vmem:[#allocation7 + $0xac] sm:$0xf] }
  0x37   :  { %893 = vmatpush.bf16.msra.mxu2 %v5142_v12  ;;  %879 = vmatpush.bf16.msra.mxu1 %v5144_v13  ;;  %6906 = vst [vmem:[#allocation34_spill] sm:$0xff] %v5230_v18  ;;  %v5237_v29 = vor.u32 %v4228_v20, %v3863_v23  ;;  %v3847_v36 = vld [vmem:[#allocation7 + $0xb8] sm:$0xf0]  ;;  %v4203_v41 = vld [vmem:[#allocation7 + $0x4] sm:$0xf] }
  0x38   :  { %907 = vmatpush.bf16.msra.mxu3 %v5155_v17  ;;  %v5245_v38 = vor.u32 %v4224_v35, %v3847_v36  ;;  %v3759_v42 = vld [vmem:[#allocation7 + $0x10] sm:$0xf0]  ;;  %v4220_v47 = vld [vmem:[#allocation7 + $0x8c] sm:$0xf]  ;;  %v3831_v53 = vld [vmem:[#allocation7 + $0x98] sm:$0xf0] }
  0x39   :  { %3716 = vmatmul.msk.bf16.gmra.mxu3 %vm300_vm2, %v5089_v46  ;;  %v5252_v51 = vor.u32 %v4203_v41, %v3759_v42  ;;  %v5254_v56 = vor.u32 %v4220_v47, %v3831_v53  ;;  %v4216_v61 = vld [vmem:[#allocation7 + $0x6c] sm:$0xf]  ;;  %v3815_v1 = vld [vmem:[#allocation7 + $0x78] sm:$0xf0]  ;;  %v695_v42 = vld [vmem:[%s6694_s1] sm:$0xff] }
  0x3a   :  { %v5265_v4 = vor.u32 %v4216_v61, %v3815_v1  ;;  %v4212_v9 = vld [vmem:[#allocation7 + $0x4c] sm:$0xf]  ;;  %v3799_v14 = vld [vmem:[#allocation7 + $0x58] sm:$0xf0] }
  0x3b   :  { %894 = vmatpush.bf16.msra.mxu2 %v5157_v21  ;;  %880 = vmatpush.bf16.msra.mxu1 %v5159_v22  ;;  %v5273_v20 = vor.u32 %v4212_v9, %v3799_v14  ;;  %v4208_v35 = vld [vmem:[#allocation7 + $0x2c] sm:$0xf]  ;;  %v3783_v36 = vld [vmem:[#allocation7 + $0x38] sm:$0xf0] }
  0x3c   :  { %908 = vmatpush.bf16.msra.mxu3 %v5170_v28  ;;  %v5281_v41 = vor.u32 %v4208_v35, %v3783_v36  ;;  %v696_v47 = vld [vmem:[%s6694_s1 + $0x8] sm:$0xff]  ;;  %v3767_v61 = vld [vmem:[#allocation7 + $0x18] sm:$0xf0] }
  0x3d   :  { %v716_v14 = vpack.c.bf16 %v696_v47, %v695_v42 }
  0x3f   :  { %895 = vmatpush.bf16.msra.mxu2 %v5172_v31  ;;  %881 = vmatpush.bf16.msra.mxu1 %v5176_v34 }
  0x40   :  { %909 = vmatpush.bf16.msra.mxu3 %v5185_v37 }
  0x43   :  { %896 = vmatpush.bf16.msra.mxu2 %v5188_v40  ;;  %882 = vmatpush.bf16.msra.mxu1 %v5190_v43 }
  0x44   :  { %910 = vmatpush.bf16.msra.mxu3 %v5200_v49 }
  0x46   :  { %3711 = vmatmul.msk.bf16.gmra.mxu1 %vm300_vm2, %v5115_v57  ;;  %3714 = vmatmul.msk.bf16.gmra.mxu2 %vm300_vm2, %v5117_v58 }
  0x47   :  { %883 = vmatpush.bf16.msra.mxu1 %v5206_v59  ;;  %897 = vmatpush.bf16.msra.mxu2 %v5213_v6 }
  0x48   :  { %911 = vmatpush.bf16.msra.mxu3 %v5203_v54 }
  0x49   :  { %3733 = vmatmul.msk.bf16.vlgmr.msrb.gmra.mxu3 %vm300_vm2, %v5037_v26 }
  0x4b   :  { %884 = vmatpush.bf16.msra.mxu1 %v5218_v11  ;;  %898 = vmatpush.bf16.msra.mxu2 %v5252_v51 }
  0x4c   :  { %912 = vmatpush.bf16.msra.mxu3 %v5208_v63  ;;  %v4238_v63 = vld [vmem:[#allocation10 + $0x14] sm:$0xf0] }
  0x56   :  { %3717 = vmatmul.msk.bf16.vlgmr.msrb.gmra.mxu1 %vm300_vm2, %v5037_v26  ;;  %3725 = vmatmul.msk.bf16.vlgmr.msrb.gmra.mxu2 %vm300_vm2, %v5037_v26 }
  0x57   :  { %919 = vmatpush.bf16.msrb.mxu1 %v5224_v16 }
  0x59   :  { %3734 = vmatmul.msk.bf16.gmra.mxu3 %vm300_vm2, %v5085_v44 }
  0x5b   :  { %920 = vmatpush.bf16.msrb.mxu1 %v5237_v29 }
  0x5f   :  { %921 = vmatpush.bf16.msrb.mxu1 %v5245_v38 }
  0x63   :  { %922 = vmatpush.bf16.msrb.mxu1 %v5254_v56 }
  0x66   :  { %3718 = vmatmul.msk.bf16.gmra.mxu1 %vm300_vm2, %v5085_v44  ;;  %3726 = vmatmul.msk.bf16.gmra.mxu2 %vm300_vm2, %v5085_v44 }
  0x67   :  { %923 = vmatpush.bf16.msrb.mxu1 %v5265_v4 }
  0x69   :  { %3735 = vmatmul.msk.bf16.gmra.mxu3 %vm300_vm2, %v5115_v57 }
  0x6b   :  { %924 = vmatpush.bf16.msrb.mxu1 %v5273_v20 }
  0x6f   :  { %925 = vmatpush.bf16.msrb.mxu1 %v5281_v41 }
  0x76   :  { %3719 = vmatmul.msk.bf16.gmra.mxu1 %vm300_vm2, %v5115_v57  ;;  %3727 = vmatmul.msk.bf16.gmra.mxu2 %vm300_vm2, %v5115_v57 }
  0x79   :  { %3736 = vmatmul.msk.bf16.gmra.mxu3 %vm300_vm2, %v5039_v27 }
  0x86   :  { %3720 = vmatmul.msk.bf16.gmra.mxu1 %vm300_vm2, %v5039_v27  ;;  %3728 = vmatmul.msk.bf16.gmra.mxu2 %vm300_vm2, %v5039_v27 }
  0x89   :  { %3737 = vmatmul.msk.bf16.gmra.mxu3 %vm300_vm2, %v5087_v45 }
  0x96   :  { %3721 = vmatmul.msk.bf16.gmra.mxu1 %vm300_vm2, %v5087_v45  ;;  %3729 = vmatmul.msk.bf16.gmra.mxu2 %vm300_vm2, %v5087_v45 }
  0x99   :  { %3738 = vmatmul.msk.bf16.gmra.mxu3 %vm300_vm2, %v5117_v58 }
  0xa3   :  { %v5210_v0 = vpop.f32.mrf.mxu1 }
  0xa6   :  { %3722 = vmatmul.msk.bf16.gmra.mxu1 %vm300_vm2, %v5117_v58  ;;  %3730 = vmatmul.msk.bf16.gmra.mxu2 %vm300_vm2, %v5117_v58 }
  0xa9   :  { %3739 = vmatmul.msk.bf16.gmra.mxu3 %vm300_vm2, %v5047_v30  ;;  %v365_v19 = vpop.f32.mrf.mxu2 }
  0xaa   :  { %v5235_v24 = vadd.f32 %v365_v19, %v5230_v18 }
  0xab   :  { %v5242_v33 = vpop.f32.mrf.mxu1 }
  0xac   :  { %6907 = vst [vmem:[#allocation35_spill] sm:$0xff] %v5235_v24  ;;  %v380_v25 = vpop.f32.mrf.mxu3 }
  0xad   :  { %v5240_v32 = vadd.f32 %v380_v25, %v5230_v18 }
  0xaf   :  { %6908 = vst [vmem:[#allocation36_spill] sm:$0xff] %v5240_v32 }
  0xb1   :  { %v5247_v39 = vpop.f32.mrf.mxu2 }
  0xb2   :  { %6909 = vst [vmem:[#allocation37_spill] sm:$0xff] %v5247_v39 }
  0xb3   :  { %v355_v55 = vpop.f32.mrf.mxu1 }
  0xb4   :  { %v5250_v48 = vpop.f32.mrf.mxu3  ;;  %v5257_v60 = vadd.f32 %v355_v55, %v5230_v18  ;;  %v4204_v55 = vld [vmem:[#allocation7 + $0xc] sm:$0xf] }
  0xb5   :  { %6910 = vst [vmem:[#allocation38_spill] sm:$0xff] %v5250_v48 }
  0xb6   :  { %6911 = vst [vmem:[#allocation39_spill] sm:$0xff] %v5257_v60  ;;  %3723 = vmatmul.msk.bf16.gmra.mxu1 %vm300_vm2, %v5047_v30  ;;  %3731 = vmatmul.msk.bf16.gmra.mxu2 %vm300_vm2, %v5047_v30  ;;  %v3941_v60 = vld [vmem:[#allocation10 + $0x68] sm:$0xf] }
  0xb9   :  { %3740 = vmatmul.msk.bf16.gmra.mxu3 %vm300_vm2, %v5089_v46  ;;  %v370_v7 = vpop.f32.mrf.mxu2 }
  0xba   :  { %v5271_v15 = vadd.f32 %v370_v7, %v5230_v18  ;;  %v5294_v7 = vor.u32 %v4204_v55, %v3767_v61 }
  0xbb   :  { %v5278_v25 = vpop.f32.mrf.mxu1 }
  0xbc   :  { %6912 = vst [vmem:[#allocation40_spill] sm:$0xff] %v5271_v15  ;;  %v385_v19 = vpop.f32.mrf.mxu3  ;;  %926 = vmatpush.bf16.msrb.mxu1 %v5294_v7 }
  0xbd   :  { %v5276_v23 = vadd.f32 %v385_v19, %v5230_v18  ;;  %6914 = vst [vmem:[#allocation42_spill] sm:$0xff] %v5278_v25  ;;  %v4258_v25 = vld [vmem:[#allocation10 + $0xb4] sm:$0xf0] }
  0xbf   :  { %6913 = vst [vmem:[#allocation41_spill] sm:$0xff] %v5276_v23 }
  0xc1   :  { %v5289_v53 = vpop.f32.mrf.mxu2 }
  0xc2   :  { %6915 = vst [vmem:[#allocation43_spill] sm:$0xff] %v5289_v53  ;;  %v4311_v53 = vld [vmem:[%s6701_s8] sm:$0xff] }
  0xc3   :  { %v360_v9 = vpop.f32.mrf.mxu1 }
  0xc4   :  { %v5292_v1 = vpop.f32.mrf.mxu3  ;;  %v5297_v19 = vadd.f32 %v360_v9, %v5230_v18 }
  0xc5   :  { %6916 = vst [vmem:[#allocation44_spill] sm:$0xff] %v5292_v1  ;;  %v603_v1 = vld [vmem:[%s6701_s8 + $0x8] sm:$0xf]  ;;  %s3649_s8 = sshll.u32 %s6705_s12, 4  ;;  %s4912_s12 = smov [#allocation13]   ;;  %s3650_s8 = int_to_ptr.hbm [resolvable:$true] %s3649_s8 }
  0xc6   :  { %6917 = vst [vmem:[#allocation45_spill] sm:$0xff] %v5297_v19  ;;  %3724 = vmatmul.msk.bf16.gmra.mxu1 %vm300_vm2, %v5089_v46  ;;  %3732 = vmatmul.msk.bf16.gmra.mxu2 %vm300_vm2, %v5089_v46  ;;  %v613_v23 = vunpack.c.l.b16 %v603_v1  ;;  %s3634_s13 = sshll.u32 %s4912_s12, 4  ;;  %s3635_s13 = int_to_ptr.vmem [resolvable:$true] %s3634_s13 }
  0xc8   :  { %v615_v32 = vpack.c.b16 %v613_v23, %v613_v23 }
  0xc9   :  { %913 = vmatmul.bf16.vlgmr.msra.gmra.mxu3 %v716_v14  ;;  %v375_v35 = vpop.f32.mrf.mxu2 }
  0xca   :  { %v5305_v36 = vadd.f32 %v375_v35, %v5230_v18 }
  0xcb   :  { %v5309_v61 = vpop.f32.mrf.mxu1 }
  0xcc   :  { %6918 = vst [vmem:[#allocation46_spill] sm:$0xff] %v5305_v36  ;;  %v5307_v55 = vpop.f32.mrf.mxu3 }
  0xcd   :  { %6919 = vst [vmem:[#allocation47_spill] sm:$0xff] %v5309_v61 }
  0xd1   :  { %v5311_v42 = vpop.f32.mrf.mxu2 }
  0xd2   :  { %6920 = vst [vmem:[#allocation48_spill] sm:$0xff] %v5311_v42  ;;  %v618_v42 = vand.u32 %v615_v32, %v5004_v5 }
  0xd3   :  { %v5315_v9 = vpop.f32.mrf.mxu1 }
  0xd4   :  { %v5313_v47 = vpop.f32.mrf.mxu3  ;;  %626 = vmatpush.bf16.msra.mxu0 %v618_v42 }
  0xd6   :  { %885 = vmatmul.bf16.vlgmr.msra.gmra.mxu1 %v716_v14  ;;  %899 = vmatmul.bf16.vlgmr.msra.gmra.mxu2 %v716_v14 }
  0xd8   :  { %627 = vmatpush.bf16.msra.mxu0 %v4311_v53 }
  0xd9   :  { %v5320_v48 = vpop.f32.mrf.mxu2 }
  0xdb   :  { %v5324_v36 = vpop.f32.mrf.mxu1  ;;  %3745 = vmatmul.msk.bf16.vlgmr.msra.gmra.mxu0 %vm300_vm2, %v5037_v26 }
  0xdc   :  { %v5322_v35 = vpop.f32.mrf.mxu3  ;;  %1476 = vmatpush.bf16.msrb.mxu0 %v5099_v52 }
  0xdd   :  { %6921 = vst [vmem:[#allocation49_spill] sm:$0xff] %v5322_v35 }
  0xe0   :  { %1477 = vmatpush.bf16.msrb.mxu0 %v5129_v3  ;;  %v3999_v3 = vld [vmem:[#allocation10 + $0xf0] sm:$0xf0] }
  0xe1   :  { %v5330_v15 = vpop.f32.mrf.mxu2 }
  0xe3   :  { %v5334_v1 = vpop.f32.mrf.mxu1 }
  0xe4   :  { %v5332_v39 = vpop.f32.mrf.mxu3  ;;  %6923 = vst [vmem:[#allocation51_spill] sm:$0xff] %v5334_v1  ;;  %1478 = vmatpush.bf16.msrb.mxu0 %v5144_v13  ;;  %v4250_v1 = vld [vmem:[#allocation10 + $0x74] sm:$0xf0] }
  0xe5   :  { %6922 = vst [vmem:[#allocation50_spill] sm:$0xff] %v5332_v39  ;;  %v4005_v39 = vld [vmem:[#allocation10 + $0xe8] sm:$0xf] }
  0xe6   :  { %927 = vmatmul.bf16.vlgmr.msrb.gmra.mxu1 %v716_v14 }
  0xe8   :  { %1479 = vmatpush.bf16.msrb.mxu0 %v5159_v22 }
  0xe9   :  { %v5340_v5 = vpop.f32.mrf.mxu2 }
  0xea   :  { %6924 = vst [vmem:[#allocation52_spill] sm:$0xff] %v5340_v5 }
  0xeb   :  { %v5344_v23 = vpop.f32.mrf.mxu1  ;;  %3746 = vmatmul.msk.bf16.gmra.mxu0 %vm300_vm2, %v5085_v44 }
  0xec   :  { %v5342_v32 = vpop.f32.mrf.mxu3  ;;  %6926 = vst [vmem:[#allocation54_spill] sm:$0xff] %v5344_v23  ;;  %1480 = vmatpush.bf16.msrb.mxu0 %v5176_v34  ;;  %v4281_v34 = vld [vmem:[#allocation10 + $0x16c] sm:$0xf0]  ;;  %v3933_v23 = vld [vmem:[#allocation10 + $0x60] sm:$0xf] }
  0xed   :  { %6925 = vst [vmem:[#allocation53_spill] sm:$0xff] %v5342_v32 }
  0xf0   :  { %1481 = vmatpush.bf16.msrb.mxu0 %v5190_v43 }
  0xf1   :  { %v5348_v53 = vpop.f32.mrf.mxu2 }
  0xf2   :  { %6927 = vst [vmem:[#allocation55_spill] sm:$0xff] %v5348_v53 }
  0xf3   :  { %v5352_v24 = vpop.f32.mrf.mxu1 }
  0xf4   :  { %v5350_v42 = vpop.f32.mrf.mxu3  ;;  %6929 = vst [vmem:[#allocation57_spill] sm:$0xff] %v5352_v24  ;;  %1482 = vmatpush.bf16.msrb.mxu0 %v5206_v59  ;;  %v4297_v24 = vld [vmem:[#allocation10 + $0x1ec] sm:$0xf0] }
  0xf5   :  { %6928 = vst [vmem:[#allocation56_spill] sm:$0xff] %v5350_v42 }
  0xf8   :  { %1483 = vmatpush.bf16.msrb.mxu0 %v5218_v11  ;;  %v4293_v11 = vld [vmem:[#allocation10 + $0x1cc] sm:$0xf0] }
  0xf9   :  { %v5358_v26 = vpop.f32.mrf.mxu2 }
  0xfa   :  { %6930 = vst [vmem:[#allocation58_spill] sm:$0xff] %v5358_v26 }
  0xfb   :  { %v5362_v61 = vpop.f32.mrf.mxu1  ;;  %3747 = vmatmul.msk.bf16.gmra.mxu0 %vm300_vm2, %v5115_v57 }
  0xfc   :  { %v5360_v14 = vpop.f32.mrf.mxu3  ;;  %6932 = vst [vmem:[#allocation60_spill] sm:$0xff] %v5362_v61  ;;  %v4125_v61 = vld [vmem:[#allocation10 + $0x1e0] sm:$0xf] }
  0xfd   :  { %6931 = vst [vmem:[#allocation59_spill] sm:$0xff] %v5360_v14  ;;  %v5380_v59 = vor.u32 %v4297_v24, %v4125_v61  ;;  %v4077_v61 = vld [vmem:[#allocation10 + $0x180] sm:$0xf] }
  0xff   :  { %1327 = vmatpush.bf16.msrb.mxu3 %v5380_v59 }
 0x101   :  { %v5366_v42 = vpop.f32.mrf.mxu2 }
 0x102   :  { %6933 = vst [vmem:[#allocation61_spill] sm:$0xff] %v5366_v42  ;;  %v4109_v42 = vld [vmem:[#allocation10 + $0x1c0] sm:$0xf] }
 0x103   :  { %v5370_v19 = vpop.f32.mrf.mxu1 }
 0x104   :  { %v5368_v32 = vpop.f32.mrf.mxu3  ;;  %6935 = vst [vmem:[#allocation63_spill] sm:$0xff] %v5370_v19  ;;  %v5385_v19 = vor.u32 %v4293_v11, %v4109_v42 }
 0x105   :  { %6934 = vst [vmem:[#allocation62_spill] sm:$0xff] %v5368_v32 }
 0x106   :  { %1328 = vmatpush.bf16.msrb.mxu3 %v5385_v19 }
 0x109   :  { %v5374_v44 = vpop.f32.mrf.mxu2 }
 0x10a   :  { %6936 = vst [vmem:[#allocation64_spill] sm:$0xff] %v5374_v44  ;;  %v4289_v44 = vld [vmem:[#allocation10 + $0x1ac] sm:$0xf0] }
 0x10b   :  { %v5378_v14 = vpop.f32.mrf.mxu1  ;;  %3748 = vmatmul.msk.bf16.gmra.mxu0 %vm300_vm2, %v5039_v27  ;;  %v4045_v27 = vld [vmem:[#allocation10 + $0x140] sm:$0xf] }
 0x10c   :  { %v5376_v26 = vpop.f32.mrf.mxu3  ;;  %6938 = vst [vmem:[#allocation66_spill] sm:$0xff] %v5378_v14  ;;  %v4285_v14 = vld [vmem:[#allocation10 + $0x18c] sm:$0xf0] }
 0x10d   :  { %6937 = vst [vmem:[#allocation65_spill] sm:$0xff] %v5376_v26  ;;  %v4093_v26 = vld [vmem:[#allocation10 + $0x1a0] sm:$0xf]  ;;  %v5399_v11 = vor.u32 %v4285_v14, %v4077_v61 }
 0x10e   :  { %v5394_v24 = vor.u32 %v4289_v44, %v4093_v26  ;;  %v4277_v26 = vld [vmem:[#allocation10 + $0x14c] sm:$0xf0] }
 0x10f   :  { %6943 = vst [vmem:[#allocation71_spill] sm:$0xff] %v5399_v11  ;;  %v5411_v13 = vor.u32 %v4277_v26, %v4045_v27 }
 0x110   :  { %1329 = vmatpush.bf16.msrb.mxu3 %v5394_v24 }
 0x111   :  { %v5383_v32 = vpop.f32.mrf.mxu2  ;;  %6948 = vst [vmem:[#allocation76_spill] sm:$0xff] %v5411_v13 }
 0x112   :  { %6939 = vst [vmem:[#allocation67_spill] sm:$0xff] %v5383_v32 }
 0x113   :  { %v5389_v57 = vpop.f32.mrf.mxu1 }
 0x114   :  { %v5387_v43 = vpop.f32.mrf.mxu3  ;;  %6941 = vst [vmem:[#allocation69_spill] sm:$0xff] %v5389_v57  ;;  %1330 = vmatpush.bf16.msrb.mxu3 %v5399_v11  ;;  %v4061_v57 = vld [vmem:[#allocation10 + $0x160] sm:$0xf] }
 0x115   :  { %6940 = vst [vmem:[#allocation68_spill] sm:$0xff] %v5387_v43  ;;  %v5406_v22 = vor.u32 %v4281_v34, %v4061_v57  ;;  %v3997_v57 = vld [vmem:[#allocation10 + $0xe0] sm:$0xf] }
 0x117   :  { %6946 = vst [vmem:[#allocation74_spill] sm:$0xff] %v5406_v22 }
 0x118   :  { %1331 = vmatpush.bf16.msrb.mxu3 %v5406_v22 }
 0x119   :  { %v5397_v32 = vpop.f32.mrf.mxu2 }
 0x11a   :  { %6942 = vst [vmem:[#allocation70_spill] sm:$0xff] %v5397_v32  ;;  %v4273_v32 = vld [vmem:[#allocation10 + $0x12c] sm:$0xf0] }
 0x11b   :  { %v5403_v43 = vpop.f32.mrf.mxu1  ;;  %3749 = vmatmul.msk.bf16.gmra.mxu0 %vm300_vm2, %v5087_v45  ;;  %v4266_v45 = vld [vmem:[#allocation10 + $0xf4] sm:$0xf0] }
 0x11c   :  { %v5401_v42 = vpop.f32.mrf.mxu3  ;;  %6945 = vst [vmem:[#allocation73_spill] sm:$0xff] %v5403_v43  ;;  %1332 = vmatpush.bf16.msrb.mxu3 %v5411_v13  ;;  %v4265_v43 = vld [vmem:[#allocation10 + $0xec] sm:$0xf0]  ;;  %v5586_v13 = vperm.slane %v5216_v10, 1 }
 0x11d   :  { %6944 = vst [vmem:[#allocation72_spill] sm:$0xff] %v5401_v42  ;;  %v4029_v42 = vld [vmem:[#allocation10 + $0x120] sm:$0xf]  ;;  %v5425_v26 = vor.u32 %v4265_v43, %v3997_v57  ;;  %v4261_v57 = vld [vmem:[#allocation10 + $0xcc] sm:$0xf0] }
 0x11e   :  { %v5420_v34 = vor.u32 %v4273_v32, %v4029_v42  ;;  %v5434_v42 = vor.u32 %v4266_v45, %v4005_v39  ;;  %v3981_v43 = vld [vmem:[#allocation10 + $0xc0] sm:$0xf]  ;;  %v4262_v39 = vld [vmem:[#allocation10 + $0xd4] sm:$0xf0]  ;;  %7001 = vst [vmem:[#allocation129_spill] sm:$0xff] %v5586_v13 }
 0x11f   :  { %6953 = vst [vmem:[#allocation81_spill] sm:$0xff] %v5425_v26  ;;  %1313 = vmatpush.bf16.msrb.mxu2 %v5425_v26  ;;  %1590 = vmatpush.bf16.msra.mxu0 %v5425_v26  ;;  %v3965_v26 = vld [vmem:[#allocation10 + $0xa0] sm:$0xf] }
 0x120   :  { %6951 = vst [vmem:[#allocation79_spill] sm:$0xff] %v5420_v34  ;;  %1333 = vmatpush.bf16.msrb.mxu3 %v5420_v34 }
 0x121   :  { %v5409_v44 = vpop.f32.mrf.mxu2  ;;  %6957 = vst [vmem:[#allocation85_spill] sm:$0xff] %v5434_v42 }
 0x122   :  { %6947 = vst [vmem:[#allocation75_spill] sm:$0xff] %v5409_v44  ;;  %v4013_v44 = vld [vmem:[#allocation10 + $0x100] sm:$0xf] }
 0x123   :  { %v5415_v61 = vpop.f32.mrf.mxu1 }
 0x124   :  { %v5413_v14 = vpop.f32.mrf.mxu3  ;;  %6950 = vst [vmem:[#allocation78_spill] sm:$0xff] %v5415_v61  ;;  %v4263_v61 = vld [vmem:[#allocation10 + $0xe4] sm:$0xf] }
 0x125   :  { %6949 = vst [vmem:[#allocation77_spill] sm:$0xff] %v5413_v14  ;;  %v4269_v14 = vld [vmem:[#allocation10 + $0x10c] sm:$0xf0]  ;;  %v5429_v53 = vor.u32 %v4263_v61, %v3999_v3  ;;  %v5442_v3 = vor.u32 %v4261_v57, %v3981_v43  ;;  %v3983_v61 = vld [vmem:[#allocation10 + $0xd0] sm:$0xf0] }
 0x126   :  { %v5427_v52 = vor.u32 %v4269_v14, %v4013_v44  ;;  %v4259_v14 = vld [vmem:[#allocation10 + $0xc4] sm:$0xf] }
 0x127   :  { %6955 = vst [vmem:[#allocation83_spill] sm:$0xff] %v5429_v53  ;;  %1341 = vmatpush.bf16.msra.mxu1 %v5429_v53  ;;  %1314 = vmatpush.bf16.msrb.mxu2 %v5442_v3  ;;  %v4255_v57 = vld [vmem:[#allocation10 + $0xa4] sm:$0xf]  ;;  %v3887_v53 = vld [vmem:[#allocation10 + $0x10] sm:$0xf0] }
 0x128   :  { %6954 = vst [vmem:[#allocation82_spill] sm:$0xff] %v5427_v52  ;;  %1334 = vmatpush.bf16.msrb.mxu3 %v5427_v52  ;;  %1591 = vmatpush.bf16.msra.mxu0 %v5442_v3  ;;  %v4295_v52 = vld [vmem:[#allocation10 + $0x1e4] sm:$0xf] }
 0x129   :  { %v5423_v27 = vpop.f32.mrf.mxu2  ;;  %6959 = vst [vmem:[#allocation87_spill] sm:$0xff] %v5442_v3  ;;  %v4253_v3 = vld [vmem:[#allocation10 + $0x8c] sm:$0xf0] }
 0x12a   :  { %6952 = vst [vmem:[#allocation80_spill] sm:$0xff] %v5423_v27  ;;  %v3989_v27 = vld [vmem:[#allocation10 + $0xc8] sm:$0xf] }
 0x12b   :  { %v5431_v32 = vpop.f32.mrf.mxu1  ;;  %v5447_v45 = vor.u32 %v4262_v39, %v3989_v27  ;;  %3750 = vmatmul.msk.bf16.gmra.mxu0 %vm300_vm2, %v5117_v58  ;;  %v4249_v58 = vld [vmem:[#allocation10 + $0x6c] sm:$0xf0] }
 0x12c   :  { %6956 = vst [vmem:[#allocation84_spill] sm:$0xff] %v5431_v32  ;;  %v5439_v44 = vpop.f32.mrf.mxu3  ;;  %1369 = vmatpush.bf16.msra.mxu3 %v5434_v42  ;;  %v5444_v32 = vor.u32 %v4259_v14, %v3983_v61  ;;  %v3967_v14 = vld [vmem:[#allocation10 + $0xb0] sm:$0xf0]  ;;  %v3973_v61 = vld [vmem:[#allocation10 + $0xa8] sm:$0xf] }
 0x12d   :  { %6958 = vst [vmem:[#allocation86_spill] sm:$0xff] %v5439_v44  ;;  %v4257_v44 = vld [vmem:[#allocation10 + $0xac] sm:$0xf0]  ;;  %v5456_v35 = vor.u32 %v4255_v57, %v3967_v14  ;;  %v5461_v39 = vor.u32 %v4258_v25, %v3973_v61  ;;  %v3951_v57 = vld [vmem:[#allocation10 + $0x90] sm:$0xf0] }
 0x12e   :  { %6960 = vst [vmem:[#allocation88_spill] sm:$0xff] %v5444_v32  ;;  %1342 = vmatpush.bf16.msra.mxu1 %v5444_v32  ;;  %v5454_v43 = vor.u32 %v4257_v44, %v3965_v26  ;;  %v4251_v44 = vld [vmem:[#allocation10 + $0x84] sm:$0xf]  ;;  %v3957_v14 = vld [vmem:[#allocation10 + $0x88] sm:$0xf] }
 0x12f   :  { %6961 = vst [vmem:[#allocation89_spill] sm:$0xff] %v5447_v45  ;;  %v4254_v25 = vld [vmem:[#allocation10 + $0x94] sm:$0xf0] }
 0x130   :  { %1370 = vmatpush.bf16.msra.mxu3 %v5447_v45  ;;  %6963 = vst [vmem:[#allocation91_spill] sm:$0xff] %v5454_v43  ;;  %1315 = vmatpush.bf16.msrb.mxu2 %v5454_v43 }
 0x131   :  { %v5451_v5 = vpop.f32.mrf.mxu2  ;;  %6964 = vst [vmem:[#allocation92_spill] sm:$0xff] %v5456_v35  ;;  %1592 = vmatpush.bf16.msra.mxu0 %v5454_v43  ;;  %v5475_v43 = vor.u32 %v4254_v25, %v3957_v14  ;;  %v5489_v25 = vor.u32 %v4250_v1, %v3941_v60  ;;  %v3901_v1 = vld [vmem:[#allocation10 + $0x20] sm:$0xf] }
 0x132   :  { %6962 = vst [vmem:[#allocation90_spill] sm:$0xff] %v5451_v5  ;;  %1343 = vmatpush.bf16.msra.mxu1 %v5456_v35  ;;  %v3949_v5 = vld [vmem:[#allocation10 + $0x80] sm:$0xf]  ;;  %v3909_v35 = vld [vmem:[#allocation10 + $0x28] sm:$0xf] }
 0x133   :  { %v5458_v27 = vpop.f32.mrf.mxu1  ;;  %6966 = vst [vmem:[#allocation94_spill] sm:$0xff] %v5461_v39  ;;  %v5468_v26 = vor.u32 %v4253_v3, %v3949_v5  ;;  %v5482_v3 = vor.u32 %v4249_v58, %v3933_v23  ;;  %v4243_v58 = vld [vmem:[#allocation10 + $0x44] sm:$0xf] }
 0x134   :  { %6965 = vst [vmem:[#allocation93_spill] sm:$0xff] %v5458_v27  ;;  %1371 = vmatpush.bf16.msra.mxu3 %v5461_v39  ;;  %v5470_v27 = vor.u32 %v4251_v44, %v3951_v57  ;;  %v5472_v61 = vpop.f32.mrf.mxu3  ;;  %v4247_v44 = vld [vmem:[#allocation10 + $0x64] sm:$0xf]  ;;  %v3935_v57 = vld [vmem:[#allocation10 + $0x70] sm:$0xf0] }
 0x135   :  { %6967 = vst [vmem:[#allocation95_spill] sm:$0xff] %v5468_v26  ;;  %1316 = vmatpush.bf16.msrb.mxu2 %v5468_v26  ;;  %1593 = vmatpush.bf16.msra.mxu0 %v5468_v26  ;;  %v4245_v26 = vld [vmem:[#allocation10 + $0x4c] sm:$0xf0] }
 0x136   :  { %6968 = vst [vmem:[#allocation96_spill] sm:$0xff] %v5470_v27  ;;  %1344 = vmatpush.bf16.msra.mxu1 %v5470_v27 }
 0x137   :  { %6969 = vst [vmem:[#allocation97_spill] sm:$0xff] %v5472_v61  ;;  %v5484_v61 = vor.u32 %v4247_v44, %v3935_v57  ;;  %v3919_v44 = vld [vmem:[#allocation10 + $0x50] sm:$0xf0]  ;;  %v3925_v57 = vld [vmem:[#allocation10 + $0x48] sm:$0xf] }
 0x138   :  { %6970 = vst [vmem:[#allocation98_spill] sm:$0xff] %v5475_v43  ;;  %1372 = vmatpush.bf16.msra.mxu3 %v5475_v43  ;;  %v5496_v27 = vor.u32 %v4243_v58, %v3919_v44  ;;  %v4239_v58 = vld [vmem:[#allocation10 + $0x24] sm:$0xf]  ;;  %v3903_v44 = vld [vmem:[#allocation10 + $0x30] sm:$0xf0] }
 0x139   :  { %v5479_v5 = vpop.f32.mrf.mxu2  ;;  %6972 = vst [vmem:[#allocation100_spill] sm:$0xff] %v5482_v3  ;;  %1317 = vmatpush.bf16.msrb.mxu2 %v5482_v3  ;;  %1594 = vmatpush.bf16.msra.mxu0 %v5482_v3  ;;  %v4241_v3 = vld [vmem:[#allocation10 + $0x2c] sm:$0xf0]  ;;  %v5510_v32 = vor.u32 %v4239_v58, %v3903_v44  ;;  %v3885_v58 = vld [vmem:[#allocation10] sm:$0xf] }
 0x13a   :  { %6971 = vst [vmem:[#allocation99_spill] sm:$0xff] %v5479_v5  ;;  %1345 = vmatpush.bf16.msra.mxu1 %v5484_v61  ;;  %v3917_v5 = vld [vmem:[#allocation10 + $0x40] sm:$0xf]  ;;  %v4237_v44 = vld [vmem:[#allocation10 + $0xc] sm:$0xf0] }
 0x13b   :  { %6973 = vst [vmem:[#allocation101_spill] sm:$0xff] %v5484_v61  ;;  %v5486_v14 = vpop.f32.mrf.mxu1  ;;  %v5494_v23 = vor.u32 %v4245_v26, %v3917_v5  ;;  %v5508_v5 = vor.u32 %v4241_v3, %v3901_v1  ;;  %3751 = vmatmul.msk.bf16.gmra.mxu0 %vm300_vm2, %v5047_v30  ;;  %v4133_v30 = vld [vmem:[#allocation10 + $0x1e8] sm:$0xf] }
 0x13c   :  { %6974 = vst [vmem:[#allocation102_spill] sm:$0xff] %v5486_v14  ;;  %1373 = vmatpush.bf16.msra.mxu3 %v5489_v25  ;;  %v4246_v14 = vld [vmem:[#allocation10 + $0x54] sm:$0xf0]  ;;  %v5503_v61 = vpop.f32.mrf.mxu3 }
 0x13d   :  { %6975 = vst [vmem:[#allocation103_spill] sm:$0xff] %v5489_v25  ;;  %1318 = vmatpush.bf16.msrb.mxu2 %v5494_v23  ;;  %v5499_v60 = vor.u32 %v4246_v14, %v3925_v57  ;;  %1595 = vmatpush.bf16.msra.mxu0 %v5494_v23  ;;  %v4242_v14 = vld [vmem:[#allocation10 + $0x34] sm:$0xf0]  ;;  %v3753_v57 = vld [vmem:[%s6694_s1 + $0x10] sm:$0xff] }
 0x13e   :  { %6976 = vst [vmem:[#allocation104_spill] sm:$0xff] %v5494_v23  ;;  %1346 = vmatpush.bf16.msra.mxu1 %v5496_v27  ;;  %v5521_v3 = vor.u32 %v4242_v14, %v3909_v35  ;;  %v979_v1 = vpack.c.bf16 %v3753_v57, %v3753_v57 }
 0x13f   :  { %6977 = vst [vmem:[#allocation105_spill] sm:$0xff] %v5496_v27  ;;  %v5528_v27 = vor.u32 %v4237_v44, %v3885_v58  ;;  %v4298_v58 = vld [vmem:[#allocation10 + $0x1f4] sm:$0xf0]  ;;  %v4296_v44 = vld [vmem:[#allocation10 + $0x1ec] sm:$0xf] }
 0x140   :  { %6978 = vst [vmem:[#allocation106_spill] sm:$0xff] %v5499_v60  ;;  %1374 = vmatpush.bf16.msra.mxu3 %v5499_v60  ;;  %v989_v35 = vunpack.c.l.b16 %v979_v1  ;;  %v5540_v1 = vor.u32 %v4298_v58, %v4133_v30 }
 0x141   :  { %6979 = vst [vmem:[#allocation107_spill] sm:$0xff] %v5503_v61  ;;  %v5505_v26 = vpop.f32.mrf.mxu2  ;;  %v3754_v61 = vld [vmem:[%s6694_s1 + $0x18] sm:$0xff]  ;;  %1319 = vmatpush.bf16.msrb.mxu2 %v5508_v5  ;;  %1596 = vmatpush.bf16.msra.mxu0 %v5508_v5 }
 0x142   :  { %6980 = vst [vmem:[#allocation108_spill] sm:$0xff] %v5505_v26  ;;  %v980_v26 = vpack.c.bf16 %v3754_v61, %v3754_v61  ;;  %1347 = vmatpush.bf16.msra.mxu1 %v5510_v32  ;;  %v4127_v61 = vld [vmem:[#allocation10 + $0x1f0] sm:$0xf0] }
 0x143   :  { %6981 = vst [vmem:[#allocation109_spill] sm:$0xff] %v5508_v5  ;;  %v5518_v23 = vpop.f32.mrf.mxu1  ;;  %v5533_v5 = vor.u32 %v4295_v52, %v4127_v61  ;;  %v4292_v61 = vld [vmem:[#allocation10 + $0x1cc] sm:$0xf] }
 0x144   :  { %6982 = vst [vmem:[#allocation110_spill] sm:$0xff] %v5510_v32  ;;  %1375 = vmatpush.bf16.msra.mxu3 %v5521_v3  ;;  %v990_v14 = vunpack.c.l.b16 %v980_v26  ;;  %v3893_v32 = vld [vmem:[#allocation10 + $0x8] sm:$0xf]  ;;  %v5553_v30 = vpop.f32.mrf.mxu3 }
 0x145   :  { %6983 = vst [vmem:[#allocation111_spill] sm:$0xff] %v5518_v23  ;;  %v4235_v23 = vld [vmem:[#allocation10 + $0x4] sm:$0xf]  ;;  %1320 = vmatpush.bf16.msrb.mxu2 %v5528_v27  ;;  %v5535_v34 = vor.u32 %v4238_v63, %v3893_v32  ;;  %1597 = vmatpush.bf16.msra.mxu0 %v5528_v27  ;;  %v4111_v32 = vld [vmem:[#allocation10 + $0x1d0] sm:$0xf0] }
 0x146   :  { %6984 = vst [vmem:[#allocation112_spill] sm:$0xff] %v5521_v3  ;;  %v5530_v57 = vor.u32 %v4235_v23, %v3887_v53  ;;  %v5537_v54 = vpack.c.b16 %v990_v14, %v989_v35  ;;  %v4135_v53 = vld [vmem:[#allocation10 + $0x1f8] sm:$0xf0]  ;;  %v4291_v63 = vld [vmem:[#allocation10 + $0x1c4] sm:$0xf] }
 0x147   :  { %6985 = vst [vmem:[#allocation113_spill] sm:$0xff] %v5528_v27  ;;  %v5547_v52 = vor.u32 %v4296_v44, %v4135_v53  ;;  %v5551_v26 = vor.u32 %v4291_v63, %v4111_v32  ;;  %v4117_v35 = vld [vmem:[#allocation10 + $0x1c8] sm:$0xf]  ;;  %v4294_v14 = vld [vmem:[#allocation10 + $0x1d4] sm:$0xf0] }
 0x148   :  { %6986 = vst [vmem:[#allocation114_spill] sm:$0xff] %v5530_v57  ;;  %1348 = vmatpush.bf16.msra.mxu1 %v5530_v57  ;;  %1376 = vmatpush.bf16.msra.mxu3 %v5535_v34  ;;  %v4119_v44 = vld [vmem:[#allocation10 + $0x1d8] sm:$0xf0]  ;;  %v4287_v27 = vld [vmem:[#allocation10 + $0x1a4] sm:$0xf] }
 0x149   :  { %6987 = vst [vmem:[#allocation115_spill] sm:$0xff] %v5535_v34  ;;  %v5543_v23 = vpop.f32.mrf.mxu2  ;;  %1355 = vmatpush.bf16.msra.mxu2 %v5533_v5  ;;  %1335 = vmatmul.bf16.vlgmr.msrb.gmra.mxu3 %v5537_v54  ;;  %v5560_v53 = vor.u32 %v4292_v61, %v4119_v44  ;;  %v4095_v57 = vld [vmem:[#allocation10 + $0x1b0] sm:$0xf0]  ;;  %v4101_v32 = vld [vmem:[#allocation10 + $0x1a8] sm:$0xf]  ;;  %v5572_v61 = vperm.slane %v5216_v10, 2 }
 0x14a   :  { %6988 = vst [vmem:[#allocation116_spill] sm:$0xff] %v5540_v1  ;;  %v5564_v63 = vor.u32 %v4287_v27, %v4095_v57  ;;  %v4079_v27 = vld [vmem:[#allocation10 + $0x190] sm:$0xf0]  ;;  %v351_v57 = vadd.f32 %v5210_v0, %v5230_v18 }
 0x14b   :  { %6989 = vst [vmem:[#allocation117_spill] sm:$0xff] %v5543_v23  ;;  %v5555_v58 = vpop.f32.mrf.mxu1  ;;  %v5558_v23 = vor.u32 %v4294_v14, %v4117_v35  ;;  %v4103_v35 = vld [vmem:[#allocation10 + $0x1b8] sm:$0xf0]  ;;  %3752 = vmatmul.msk.bf16.gmra.mxu0 %vm300_vm2, %v5089_v46  ;;  %v400_v46 = vadd.f32 %v5315_v9, %v5586_v13  ;;  %v4276_v9 = vld [vmem:[#allocation10 + $0x14c] sm:$0xf] }
 0x14c   :  { %6990 = vst [vmem:[#allocation118_spill] sm:$0xff] %v5547_v52  ;;  %1383 = vmatpush.bf16.msrb.mxu1 %v5540_v1  ;;  %1411 = vmatpush.bf16.msrb.mxu3 %v5547_v52  ;;  %v4290_v1 = vld [vmem:[#allocation10 + $0x1b4] sm:$0xf0]  ;;  %v914_v0 = vpop.f32.mrf.mxu3 }
 0x14d   :  { %6991 = vst [vmem:[#allocation119_spill] sm:$0xff] %v5553_v30  ;;  %1356 = vmatpush.bf16.msra.mxu2 %v5551_v26  ;;  %v4288_v30 = vld [vmem:[#allocation10 + $0x1ac] sm:$0xf] }
 0x14e   :  { %6992 = vst [vmem:[#allocation120_spill] sm:$0xff] %v5555_v58  ;;  %v5567_v58 = vor.u32 %v4290_v1, %v4101_v32  ;;  %v5569_v14 = vor.u32 %v4288_v30, %v4103_v35  ;;  %v4085_v1 = vld [vmem:[#allocation10 + $0x188] sm:$0xf]  ;;  %v4286_v32 = vld [vmem:[#allocation10 + $0x194] sm:$0xf0] }
 0x14f   :  { %6993 = vst [vmem:[#allocation121_spill] sm:$0xff] %v5558_v23  ;;  %v4284_v30 = vld [vmem:[#allocation10 + $0x18c] sm:$0xf]  ;;  %v5583_v52 = vor.u32 %v4286_v32, %v4085_v1 }
 0x150   :  { %6994 = vst [vmem:[#allocation122_spill] sm:$0xff] %v5560_v53  ;;  %1384 = vmatpush.bf16.msrb.mxu1 %v5558_v23  ;;  %1412 = vmatpush.bf16.msrb.mxu3 %v5560_v53  ;;  %v4283_v23 = vld [vmem:[#allocation10 + $0x184] sm:$0xf] }
 0x151   :  { %6995 = vst [vmem:[#allocation123_spill] sm:$0xff] %v5564_v63  ;;  %v5574_v44 = vpop.f32.mrf.mxu2  ;;  %1357 = vmatpush.bf16.msra.mxu2 %v5564_v63  ;;  %v5580_v53 = vor.u32 %v4283_v23, %v4079_v27  ;;  %v4279_v23 = vld [vmem:[#allocation10 + $0x164] sm:$0xf]  ;;  %v4063_v27 = vld [vmem:[#allocation10 + $0x170] sm:$0xf0] }
 0x152   :  { %6996 = vst [vmem:[#allocation124_spill] sm:$0xff] %v5567_v58  ;;  %v5596_v32 = vor.u32 %v4279_v23, %v4063_v27  ;;  %v4047_v23 = vld [vmem:[#allocation10 + $0x150] sm:$0xf0]  ;;  %v353_v27 = vadd.f32 %v5242_v33, %v5230_v18  ;;  %v4271_v33 = vld [vmem:[#allocation10 + $0x124] sm:$0xf] }
 0x153   :  { %6997 = vst [vmem:[#allocation125_spill] sm:$0xff] %v5569_v14  ;;  %v886_v35 = vpop.f32.mrf.mxu1 }
 0x154   :  { %6998 = vst [vmem:[#allocation126_spill] sm:$0xff] %v5574_v44  ;;  %1385 = vmatpush.bf16.msrb.mxu1 %v5567_v58  ;;  %1413 = vmatpush.bf16.msrb.mxu3 %v5569_v14  ;;  %v4087_v44 = vld [vmem:[#allocation10 + $0x198] sm:$0xf0]  ;;  %v933_v49 = vadd.f32 %v886_v35, %v351_v57  ;;  %v449_v14 = vadd.f32 %v5320_v48, %v5572_v61  ;;  %v4069_v58 = vld [vmem:[#allocation10 + $0x168] sm:$0xf] }
 0x155   :  { %6999 = vst [vmem:[#allocation127_spill] sm:$0xff] %v5580_v53  ;;  %v5588_v22 = vor.u32 %v4284_v30, %v4087_v44  ;;  %1358 = vmatpush.bf16.msra.mxu2 %v5580_v53  ;;  %v4282_v57 = vld [vmem:[#allocation10 + $0x174] sm:$0xf0]  ;;  %v4280_v30 = vld [vmem:[#allocation10 + $0x16c] sm:$0xf] }
 0x156   :  { %7000 = vst [vmem:[#allocation128_spill] sm:$0xff] %v5583_v52  ;;  %v941_v1 = vmul.f32 0.5, %v933_v49  ;;  %v5599_v44 = vor.u32 %v4282_v57, %v4069_v58  ;;  %v4071_v35 = vld [vmem:[#allocation10 + $0x178] sm:$0xf0]  ;;  %v935_v37 = vadd.f32 %v914_v0, %v449_v14  ;;  %v4275_v48 = vld [vmem:[#allocation10 + $0x144] sm:$0xf] }
 0x157   :  { %7002 = vst [vmem:[#allocation130_spill] sm:$0xff] %v5588_v22  ;;  %v5603_v53 = vor.u32 %v4280_v30, %v4071_v35  ;;  %v5609_v58 = vor.u32 %v4275_v48, %v4047_v23  ;;  %v4053_v57 = vld [vmem:[#allocation10 + $0x148] sm:$0xf]  ;;  %v5618_v48 = vperm.slane %v5216_v10, 3 }
 0x158   :  { %1386 = vmatpush.bf16.msrb.mxu1 %v5583_v52  ;;  %7003 = vst [vmem:[#allocation131_spill] sm:$0xff] %v5596_v32  ;;  %1414 = vmatpush.bf16.msrb.mxu3 %v5588_v22  ;;  %4378 = vtanh.f32 %v941_v1  ;;  %v4278_v52 = vld [vmem:[#allocation10 + $0x154] sm:$0xf0]  ;;  %v4055_v1 = vld [vmem:[#allocation10 + $0x158] sm:$0xf0] }
 0x159   :  { %7004 = vst [vmem:[#allocation132_spill] sm:$0xff] %v5599_v44  ;;  %v900_v49 = vpop.f32.mrf.mxu2  ;;  %1359 = vmatpush.bf16.msra.mxu2 %v5596_v32  ;;  %v5612_v0 = vor.u32 %v4278_v52, %v4053_v57  ;;  %4380 = vtanh.f32 %v935_v37  ;;  %v5614_v32 = vor.u32 %v4276_v9, %v4055_v1  ;;  %v4037_v57 = vld [vmem:[#allocation10 + $0x128] sm:$0xf]  ;;  %v4274_v37 = vld [vmem:[#allocation10 + $0x134] sm:$0xf0]  ;;  %v402_v1 = vadd.f32 %v5324_v36, %v5586_v13 }
 0x15a   :  { %7005 = vst [vmem:[#allocation133_spill] sm:$0xff] %v5603_v53  ;;  %v934_v22 = vadd.f32 %v900_v49, %v400_v46  ;;  %v4031_v46 = vld [vmem:[#allocation10 + $0x130] sm:$0xf0]  ;;  %v4272_v9 = vld [vmem:[#allocation10 + $0x12c] sm:$0xf] }
 0x15b   :  { %7006 = vst [vmem:[#allocation134_spill] sm:$0xff] %v5609_v58  ;;  %v888_v14 = vpop.f32.mrf.mxu1  ;;  %v5621_v52 = vor.u32 %v4271_v33, %v4031_v46  ;;  %v4267_v33 = vld [vmem:[#allocation10 + $0x104] sm:$0xf]  ;;  %v4015_v46 = vld [vmem:[#allocation10 + $0x110] sm:$0xf0] }
 0x15c   :  { %1387 = vmatpush.bf16.msrb.mxu1 %v5599_v44  ;;  %1415 = vmatpush.bf16.msrb.mxu3 %v5603_v53  ;;  %7007 = vst [vmem:[#allocation135_spill] sm:$0xff] %v5612_v0  ;;  %v949_v30 = vmul.f32 0.5, %v934_v22  ;;  %v937_v35 = vadd.f32 %v888_v14, %v353_v27  ;;  %v5624_v27 = vor.u32 %v4274_v37, %v4037_v57  ;;  %v4039_v14 = vld [vmem:[#allocation10 + $0x138] sm:$0xf0] }
 0x15d   :  { %7008 = vst [vmem:[#allocation136_spill] sm:$0xff] %v5614_v32  ;;  %1360 = vmatpush.bf16.msra.mxu2 %v5609_v58  ;;  %v5628_v10 = vor.u32 %v4272_v9, %v4039_v14  ;;  %v5637_v36 = vld [vmem:[%s6703_s10] ss:$0 sm:$0xff]  ;;  %v5639_v37 = vor.u32 %v4267_v33, %v4015_v46  ;;  %v4270_v9 = vld [vmem:[#allocation10 + $0x114] sm:$0xf0]  ;;  %v916_v14 = vpop.f32.mrf.mxu3 }
 0x15e   :  { %v4379_v49 = vpop.eup %4378  ;;  %7009 = vst [vmem:[#allocation137_spill] sm:$0xff] %v5618_v48  ;;  %4382 = vtanh.f32 %v949_v30  ;;  %v942_v23 = vmul.f32 0.5, %v937_v35  ;;  %v4023_v33 = vld [vmem:[#allocation10 + $0x118] sm:$0xf0] }
 0x15f   :  { %7010 = vst [vmem:[#allocation138_spill] sm:$0xff] %v5621_v52  ;;  %v945_v22 = vmul.f32 0.5, %v4379_v49  ;;  %v4381_v18 = vpop.eup %4380  ;;  %v498_v49 = vadd.f32 %v5307_v55, %v5618_v48  ;;  %v4268_v55 = vld [vmem:[#allocation10 + $0x10c] sm:$0xf] }
 0x160   :  { %1388 = vmatpush.bf16.msrb.mxu1 %v5612_v0  ;;  %1416 = vmatpush.bf16.msrb.mxu3 %v5614_v32  ;;  %7011 = vst [vmem:[#allocation139_spill] sm:$0xff] %v5624_v27  ;;  %4384 = vtanh.f32 %v942_v23  ;;  %v629_v23 = vpop.f32.mrf.mxu0 }
 0x161   :  { %7012 = vst [vmem:[#allocation140_spill] sm:$0xff] %v5628_v10  ;;  %v947_v30 = vadd.f32 0.5, %v945_v22  ;;  %v902_v35 = vpop.f32.mrf.mxu2  ;;  %1361 = vmatpush.bf16.msra.mxu2 %v5621_v52  ;;  %v4021_v22 = vld [vmem:[#allocation10 + $0x108] sm:$0xf]  ;;  %v630_v44 = vadd.f32 %v5637_v36, %v629_v23  ;;  %v5648_v52 = vor.u32 %v4268_v55, %v4023_v33 }
 0x162   :  { %v938_v57 = vadd.f32 %v902_v35, %v402_v1  ;;  %7013 = vst [vmem:[#allocation141_spill] sm:$0xff] %v5639_v37  ;;  %v5642_v0 = vor.u32 %v4270_v9, %v4021_v22  ;;  %v451_v35 = vadd.f32 %v5330_v15, %v5572_v61  ;;  %v698_v33 = vld [vmem:[#allocation4 + $0x8] sm:$0xff] }
 0x163   :  { %v969_v13 = vmul.f32 %v4381_v18, %v947_v30  ;;  %v928_v32 = vpop.f32.mrf.mxu1  ;;  %7015 = vst [vmem:[#allocation143_spill] sm:$0xff] %v5648_v52 }
 0x164   :  { %1389 = vmatpush.bf16.msrb.mxu1 %v5624_v27  ;;  %1417 = vmatpush.bf16.msrb.mxu3 %v5628_v10  ;;  %7014 = vst [vmem:[#allocation142_spill] sm:$0xff] %v5642_v0  ;;  %v4383_v1 = vpop.eup %4382  ;;  %v950_v27 = vmul.f32 0.5, %v938_v57  ;;  %v936_v53 = vadd.f32 %v928_v32, %v498_v49  ;;  %v939_v30 = vadd.f32 %v916_v14, %v451_v35  ;;  %v697_v10 = vld [vmem:[#allocation4] sm:$0xff] }
 0x165   :  { %v953_v46 = vmul.f32 0.5, %v4383_v1  ;;  %1362 = vmatpush.bf16.msra.mxu2 %v5639_v37  ;;  %669 = vst [vmem:[#allocation13] sm:$0xff] %v630_v44  ;;  %v500_v49 = vadd.f32 %v5313_v47, %v5618_v48 }
 0x166   :  { %v4385_v18 = vpop.eup %4384  ;;  %4386 = vtanh.f32 %v950_v27  ;;  %v959_v22 = vmul.f32 0.5, %v936_v53 }
 0x167   :  { %v955_v9 = vadd.f32 0.5, %v953_v46  ;;  %v946_v32 = vmul.f32 0.5, %v4385_v18 }
 0x168   :  { %1390 = vmatpush.bf16.msrb.mxu1 %v5642_v0  ;;  %1418 = vmatpush.bf16.msrb.mxu3 %v5648_v52  ;;  %4388 = vtanh.f32 %v959_v22  ;;  %v631_v57 = vpop.f32.mrf.mxu0 }
 0x169   :  { %v967_v15 = vmul.f32 %v955_v9, %v697_v10  ;;  %4390 = vtanh.f32 %v939_v30  ;;  %v632_v27 = vadd.f32 %v5637_v36, %v631_v57  ;;  %v948_v55 = vadd.f32 0.5, %v946_v32 }
 0x16b   :  { %v5654_v23 = vadd.f32 %v969_v13, %v967_v15  ;;  %v930_v14 = vpop.f32.mrf.mxu1  ;;  %670 = vst [vmem:[#allocation13 + $0x8] sm:$0xff] %v632_v27 }
 0x16c   :  { %v4387_v53 = vpop.eup %4386  ;;  %v940_v44 = vadd.f32 %v930_v14, %v500_v49 }
 0x16d   :  { %v954_v1 = vmul.f32 0.5, %v4387_v53  ;;  %4392 = vtanh.f32 %v5654_v23 }
 0x16e   :  { %v4389_v35 = vpop.eup %4388  ;;  %v960_v46 = vmul.f32 0.5, %v940_v44 }
 0x16f   :  { %v956_v10 = vadd.f32 0.5, %v954_v1  ;;  %v4391_v18 = vpop.eup %4390  ;;  %v963_v47 = vmul.f32 0.5, %v4389_v35 }
 0x170   :  { %4394 = vtanh.f32 %v960_v46  ;;  %v970_v30 = vmul.f32 %v4391_v18, %v948_v55  ;;  %v634_v22 = vpop.f32.mrf.mxu0  ;;  %v4007_v18 = vld [vmem:[#allocation10 + $0xf8] sm:$0xf0] }
 0x171   :  { %v968_v13 = vmul.f32 %v956_v10, %v698_v33  ;;  %v635_v15 = vadd.f32 %v5637_v36, %v634_v22  ;;  %v965_v49 = vadd.f32 0.5, %v963_v47  ;;  %v4264_v10 = vld [vmem:[#allocation10 + $0xec] sm:$0xf] }
 0x173   :  { %v5658_v9 = vadd.f32 %v970_v30, %v968_v13  ;;  %v4393_v32 = vpop.eup %4392  ;;  %671 = vst [vmem:[#allocation13 + $0x10] sm:$0xff] %v635_v15  ;;  %v5663_v13 = vor.u32 %v4264_v10, %v4007_v18  ;;  %v4260_v15 = vld [vmem:[#allocation10 + $0xcc] sm:$0xf]  ;;  %v3943_v18 = vld [vmem:[#allocation10 + $0x78] sm:$0xf0] }
 0x174   :  { %v975_v27 = vmul.f32 %v4393_v32, %v965_v49  ;;  %v4248_v10 = vld [vmem:[#allocation10 + $0x6c] sm:$0xf] }
 0x175   :  { %4396 = vtanh.f32 %v5658_v9  ;;  %7016 = vst [vmem:[#allocation144_spill] sm:$0xff] %v5663_v13 }
 0x176   :  { %v4395_v57 = vpop.eup %4394  ;;  %v977_v55 = vpack.c.bf16 %v975_v27, %v975_v27  ;;  %v4256_v27 = vld [vmem:[#allocation10 + $0xac] sm:$0xf] }
 0x177   :  { %v964_v14 = vmul.f32 0.5, %v4395_v57  ;;  %v3991_v57 = vld [vmem:[#allocation10 + $0xd8] sm:$0xf0] }
 0x178   :  { %v636_v44 = vpop.f32.mrf.mxu0  ;;  %v983_v30 = vunpack.c.l.b16 %v977_v55 }
 0x179   :  { %v966_v53 = vadd.f32 0.5, %v964_v14  ;;  %v637_v35 = vadd.f32 %v5637_v36, %v636_v44  ;;  %v5672_v14 = vor.u32 %v4260_v15, %v3991_v57  ;;  %v3927_v15 = vld [vmem:[#allocation10 + $0x58] sm:$0xf0] }
 0x17b   :  { %v4397_v1 = vpop.eup %4396  ;;  %672 = vst [vmem:[#allocation13 + $0x18] sm:$0xff] %v637_v35  ;;  %v3959_v35 = vld [vmem:[#allocation10 + $0x98] sm:$0xf0] }
 0x17c   :  { %v976_v33 = vmul.f32 %v4397_v1, %v966_v53  ;;  %7017 = vst [vmem:[#allocation145_spill] sm:$0xff] %v5672_v14  ;;  %v3975_v53 = vld [vmem:[#allocation10 + $0xb8] sm:$0xf0]  ;;  %v4252_v1 = vld [vmem:[#allocation10 + $0x8c] sm:$0xf] }
 0x17d   :  { %v5679_v44 = vor.u32 %v4256_v27, %v3975_v53  ;;  %v4240_v27 = vld [vmem:[#allocation10 + $0x2c] sm:$0xf]  ;;  %v3911_v53 = vld [vmem:[#allocation10 + $0x38] sm:$0xf0] }
 0x17e   :  { %v978_v46 = vpack.c.bf16 %v976_v33, %v976_v33 }
 0x17f   :  { %7018 = vst [vmem:[#allocation146_spill] sm:$0xff] %v5679_v44 }
 0x180   :  { %v984_v47 = vunpack.c.l.b16 %v978_v46  ;;  %v639_v49 = vpop.f32.mrf.mxu0  ;;  %v5686_v46 = vor.u32 %v4252_v1, %v3959_v35  ;;  %v5708_v1 = vor.u32 %v4240_v27, %v3911_v53  ;;  %v4236_v35 = vld [vmem:[#allocation10 + $0xc] sm:$0xf] }
 0x181   :  { %v640_v32 = vadd.f32 %v5637_v36, %v639_v49  ;;  %v7025_v27 = vld [vmem:[#allocation27_spill] sm:$0xff] }
 0x182   :  { %v5665_v22 = vpack.c.b16 %v984_v47, %v983_v30  ;;  %7019 = vst [vmem:[#allocation147_spill] sm:$0xff] %v5686_v46  ;;  %v5692_v30 = vor.u32 %v4248_v10, %v3943_v18  ;;  %v4244_v47 = vld [vmem:[#allocation10 + $0x4c] sm:$0xf] }
 0x183   :  { %673 = vst [vmem:[#allocation13 + $0x20] sm:$0xff] %v640_v32  ;;  %v5702_v32 = vor.u32 %v4244_v47, %v3927_v15 }
 0x184   :  { %1321 = vmatmul.bf16.vlgmr.msrb.gmra.mxu2 %v5665_v22  ;;  %1349 = vmatmul.bf16.vlgmr.msra.gmra.mxu1 %v5665_v22  ;;  %7020 = vst [vmem:[#allocation148_spill] sm:$0xff] %v5692_v30 }
 0x185   :  { %1377 = vmatmul.bf16.vlgmr.msra.gmra.mxu3 %v5665_v22  ;;  %1397 = vmatpush.bf16.msrb.mxu2 %v5663_v13  ;;  %7021 = vst [vmem:[#allocation149_spill] sm:$0xff] %v5702_v32 }
 0x186   :  { %1484 = vmatmul.bf16.vlgmr.msrb.gmra.mxu0 %v5665_v22  ;;  %1490 = vmatpush.bf16.msra.mxu1 %v5097_v50  ;;  %7022 = vst [vmem:[#allocation150_spill] sm:$0xff] %v5708_v1 }
 0x187   :  { %1518 = vmatpush.bf16.msra.mxu3 %v5224_v16  ;;  %1646 = vmatpush.bf16.msrb.mxu0 %v5434_v42  ;;  %v7040_v42 = vld [vmem:[#allocation122_spill] sm:$0xff] }
 0x188   :  { %v641_v55 = vpop.f32.mrf.mxu0 }
 0x189   :  { %1398 = vmatpush.bf16.msrb.mxu2 %v5672_v14  ;;  %v642_v33 = vadd.f32 %v5637_v36, %v641_v55  ;;  %v3895_v55 = vld [vmem:[#allocation10 + $0x18] sm:$0xf0] }
 0x18a   :  { %1491 = vmatpush.bf16.msra.mxu1 %v5127_v2  ;;  %v5715_v10 = vor.u32 %v4236_v35, %v3895_v55  ;;  %v7026_v55 = vld [vmem:[#allocation74_spill] sm:$0xff] }
 0x18b   :  { %1519 = vmatpush.bf16.msra.mxu3 %v5237_v29  ;;  %1647 = vmatpush.bf16.msrb.mxu0 %v5447_v45  ;;  %674 = vst [vmem:[#allocation13 + $0x28] sm:$0xff] %v642_v33  ;;  %v7038_v45 = vld [vmem:[#allocation88_spill] sm:$0xff] }
 0x18c   :  { %7023 = vst [vmem:[#allocation151_spill] sm:$0xff] %v5715_v10 }
 0x18d   :  { %1399 = vmatpush.bf16.msrb.mxu2 %v5679_v44 }
 0x18e   :  { %1492 = vmatpush.bf16.msra.mxu1 %v5142_v12 }
 0x18f   :  { %1520 = vmatpush.bf16.msra.mxu3 %v5245_v38  ;;  %1648 = vmatpush.bf16.msrb.mxu0 %v5461_v39 }
 0x190   :  { %v644_v57 = vpop.f32.mrf.mxu0 }
 0x191   :  { %1400 = vmatpush.bf16.msrb.mxu2 %v5686_v46  ;;  %v645_v49 = vadd.f32 %v5637_v36, %v644_v57 }
 0x192   :  { %1493 = vmatpush.bf16.msra.mxu1 %v5157_v21 }
 0x193   :  { %1521 = vmatpush.bf16.msra.mxu3 %v5254_v56  ;;  %1649 = vmatpush.bf16.msrb.mxu0 %v5475_v43  ;;  %675 = vst [vmem:[#allocation13 + $0x30] sm:$0xff] %v645_v49  ;;  %v7024_v49 = vld [vmem:[#allocation127_spill] sm:$0xff]  ;;  %v7037_v43 = vld [vmem:[#allocation118_spill] sm:$0xff] }
 0x194   :  { %1363 = vmatmul.bf16.vlgmr.msra.gmra.mxu2 %v5537_v54  ;;  %1391 = vmatmul.bf16.vlgmr.msrb.gmra.mxu1 %v5537_v54 }
 0x195   :  { %1401 = vmatpush.bf16.msrb.mxu2 %v5692_v30  ;;  %1419 = vmatmul.bf16.vlgmr.msrb.gmra.mxu3 %v5537_v54 }
 0x196   :  { %1494 = vmatpush.bf16.msra.mxu1 %v5172_v31 }
 0x197   :  { %1522 = vmatpush.bf16.msra.mxu3 %v5265_v4  ;;  %1650 = vmatpush.bf16.msrb.mxu0 %v5489_v25  ;;  %v7036_v25 = vld [vmem:[#allocation116_spill] sm:$0xff] }
 0x198   :  { %v646_v54 = vpop.f32.mrf.mxu0 }
 0x199   :  { %1402 = vmatpush.bf16.msrb.mxu2 %v5702_v32  ;;  %v647_v33 = vadd.f32 %v5637_v36, %v646_v54  ;;  %v7027_v54 = vld [vmem:[#allocation131_spill] sm:$0xff] }
 0x19a   :  { %1495 = vmatpush.bf16.msra.mxu1 %v5188_v40 }
 0x19b   :  { %1523 = vmatpush.bf16.msra.mxu3 %v5273_v20  ;;  %1651 = vmatpush.bf16.msrb.mxu0 %v5499_v60  ;;  %676 = vst [vmem:[#allocation13 + $0x38] sm:$0xff] %v647_v33  ;;  %v7028_v33 = vld [vmem:[#allocation29_spill] sm:$0xff]  ;;  %v7034_v60 = vld [vmem:[#allocation82_spill] sm:$0xff] }
 0x19d   :  { %1403 = vmatpush.bf16.msrb.mxu2 %v5708_v1 }
 0x19e   :  { %1496 = vmatpush.bf16.msra.mxu1 %v5213_v6 }
 0x19f   :  { %1524 = vmatpush.bf16.msra.mxu3 %v5281_v41  ;;  %1652 = vmatpush.bf16.msrb.mxu0 %v5521_v3  ;;  %v7032_v3 = vld [vmem:[#allocation138_spill] sm:$0xff] }
 0x1a0   :  { %v649_v18 = vpop.f32.mrf.mxu0 }
 0x1a1   :  { %1404 = vmatpush.bf16.msrb.mxu2 %v5715_v10  ;;  %v650_v47 = vadd.f32 %v5637_v36, %v649_v18  ;;  %v7029_v18 = vld [vmem:[#allocation76_spill] sm:$0xff] }
 0x1a2   :  { %1497 = vmatpush.bf16.msra.mxu1 %v5252_v51 }
 0x1a3   :  { %1525 = vmatpush.bf16.msra.mxu3 %v5294_v7  ;;  %677 = vst [vmem:[#allocation13 + $0x40] sm:$0xff] %v650_v47  ;;  %1653 = vmatpush.bf16.msrb.mxu0 %v5535_v34  ;;  %v7030_v47 = vld [vmem:[#allocation30_spill] sm:$0xff]  ;;  %v7031_v34 = vld [vmem:[#allocation79_spill] sm:$0xff] }
 0x1a4   :  { %1405 = vmatmul.bf16.vlgmr.msrb.gmra.mxu2 %v5665_v22 }
 0x1a5   :  { %1504 = vmatpush.bf16.msra.mxu2 %v5125_v62  ;;  %1498 = vmatmul.bf16.vlgmr.msra.gmra.mxu1 %v5665_v22 }
 0x1a6   :  { %1604 = vmatpush.bf16.msrb.mxu1 %v5380_v59  ;;  %1526 = vmatmul.bf16.vlgmr.msra.gmra.mxu3 %v5665_v22 }
 0x1a7   :  { %1632 = vmatpush.bf16.msrb.mxu3 %v5533_v5 }
 0x1a8   :  { %v651_v15 = vpop.f32.mrf.mxu0 }
 0x1a9   :  { %1505 = vmatpush.bf16.msra.mxu2 %v5140_v8  ;;  %v652_v57 = vadd.f32 %v5637_v36, %v651_v15 }
 0x1aa   :  { %1605 = vmatpush.bf16.msrb.mxu1 %v5385_v19 }
 0x1ab   :  { %1633 = vmatpush.bf16.msrb.mxu3 %v5551_v26  ;;  %678 = vst [vmem:[#allocation13 + $0x48] sm:$0xff] %v652_v57 }
 0x1ad   :  { %1506 = vmatpush.bf16.msra.mxu2 %v5155_v17 }
 0x1ae   :  { %1606 = vmatpush.bf16.msrb.mxu1 %v5394_v24 }
 0x1af   :  { %1634 = vmatpush.bf16.msrb.mxu3 %v5564_v63 }
 0x1b0   :  { %v654_v53 = vpop.f32.mrf.mxu0 }
 0x1b1   :  { %1507 = vmatpush.bf16.msra.mxu2 %v5170_v28  ;;  %v655_v35 = vadd.f32 %v5637_v36, %v654_v53  ;;  %v7033_v53 = vld [vmem:[#allocation32_spill] sm:$0xff] }
 0x1b2   :  { %1607 = vmatpush.bf16.msrb.mxu1 %v5399_v11 }
 0x1b3   :  { %1635 = vmatpush.bf16.msrb.mxu3 %v7024_v49  ;;  %679 = vst [vmem:[#allocation13 + $0x50] sm:$0xff] %v655_v35  ;;  %v7035_v35 = vld [vmem:[#allocation83_spill] sm:$0xff] }
 0x1b5   :  { %1508 = vmatpush.bf16.msra.mxu2 %v7025_v27 }
 0x1b6   :  { %1608 = vmatpush.bf16.msrb.mxu1 %v7026_v55 }
 0x1b7   :  { %1636 = vmatpush.bf16.msrb.mxu3 %v7027_v54 }
 0x1b8   :  { %v656_v15 = vpop.f32.mrf.mxu0 }
 0x1b9   :  { %1509 = vmatpush.bf16.msra.mxu2 %v7028_v33  ;;  %v657_v57 = vadd.f32 %v5637_v36, %v656_v15 }
 0x1ba   :  { %1609 = vmatpush.bf16.msrb.mxu1 %v7029_v18 }
 0x1bb   :  { %1637 = vmatpush.bf16.msrb.mxu3 %v5609_v58  ;;  %680 = vst [vmem:[#allocation13 + $0x58] sm:$0xff] %v657_v57  ;;  %v7039_v57 = vld [vmem:[#allocation121_spill] sm:$0xff] }
 0x1bd   :  { %1510 = vmatpush.bf16.msra.mxu2 %v7030_v47 }
 0x1be   :  { %1610 = vmatpush.bf16.msrb.mxu1 %v7031_v34  ;;  %v7070_v34 = vld [vmem:[#allocation52_spill] sm:$0xff] }
 0x1bf   :  { %1638 = vmatpush.bf16.msrb.mxu3 %v7032_v3 }
 0x1c0   :  { %v659_v15 = vpop.f32.mrf.mxu0 }
 0x1c1   :  { %1511 = vmatpush.bf16.msra.mxu2 %v7033_v53  ;;  %v660_v39 = vadd.f32 %v5637_v36, %v659_v15  ;;  %v7041_v53 = vld [vmem:[#allocation92_spill] sm:$0xff]  ;;  %v7046_v15 = vld [vmem:[#allocation130_spill] sm:$0xff] }
 0x1c2   :  { %1611 = vmatpush.bf16.msrb.mxu1 %v7034_v60  ;;  %v7045_v60 = vld [vmem:[#allocation128_spill] sm:$0xff] }
 0x1c3   :  { %1639 = vmatpush.bf16.msrb.mxu3 %v5639_v37  ;;  %681 = vst [vmem:[#allocation13 + $0x60] sm:$0xff] %v660_v39  ;;  %v7043_v37 = vld [vmem:[#allocation125_spill] sm:$0xff]  ;;  %v7048_v39 = vld [vmem:[#allocation132_spill] sm:$0xff] }
 0x1c4   :  { %1512 = vmatmul.bf16.vlgmr.msra.gmra.mxu2 %v5665_v22 }
 0x1c5   :  { %1618 = vmatpush.bf16.msrb.mxu2 %v7035_v35  ;;  %v7042_v35 = vld [vmem:[#allocation124_spill] sm:$0xff] }
 0x1c6   :  { %1660 = vmatpush.bf16.msra.mxu1 %v7036_v25 }
 0x1c7   :  { %1688 = vmatpush.bf16.msra.mxu3 %v7037_v43  ;;  %v7044_v43 = vld [vmem:[#allocation96_spill] sm:$0xff] }
 0x1c8   :  { %v661_v25 = vpop.f32.mrf.mxu0 }
 0x1c9   :  { %1619 = vmatpush.bf16.msrb.mxu2 %v7038_v45  ;;  %v662_v22 = vadd.f32 %v5637_v36, %v661_v25  ;;  %v7047_v45 = vld [vmem:[#allocation101_spill] sm:$0xff]  ;;  %v7052_v25 = vld [vmem:[#allocation136_spill] sm:$0xff] }
 0x1ca   :  { %1661 = vmatpush.bf16.msra.mxu1 %v7039_v57  ;;  %v7051_v57 = vld [vmem:[#allocation135_spill] sm:$0xff] }
 0x1cb   :  { %1689 = vmatpush.bf16.msra.mxu3 %v7040_v42  ;;  %682 = vst [vmem:[#allocation13 + $0x68] sm:$0xff] %v662_v22  ;;  %v7049_v42 = vld [vmem:[#allocation133_spill] sm:$0xff]  ;;  %v7054_v22 = vld [vmem:[#allocation139_spill] sm:$0xff] }
 0x1cd   :  { %1620 = vmatpush.bf16.msrb.mxu2 %v7041_v53 }
 0x1ce   :  { %1662 = vmatpush.bf16.msra.mxu1 %v7042_v35 }
 0x1cf   :  { %1690 = vmatpush.bf16.msra.mxu3 %v7043_v37  ;;  %v7050_v37 = vld [vmem:[#allocation105_spill] sm:$0xff] }
 0x1d0   :  { %v664_v53 = vpop.f32.mrf.mxu0 }
 0x1d1   :  { %1621 = vmatpush.bf16.msrb.mxu2 %v7044_v43  ;;  %v665_v35 = vadd.f32 %v5637_v36, %v664_v53  ;;  %v7053_v43 = vld [vmem:[#allocation110_spill] sm:$0xff] }
 0x1d2   :  { %1663 = vmatpush.bf16.msra.mxu1 %v7045_v60 }
 0x1d3   :  { %1691 = vmatpush.bf16.msra.mxu3 %v7046_v15  ;;  %683 = vst [vmem:[#allocation13 + $0x70] sm:$0xff] %v665_v35  ;;  %v7055_v15 = vld [vmem:[#allocation140_spill] sm:$0xff] }
 0x1d5   :  { %1622 = vmatpush.bf16.msrb.mxu2 %v7047_v45 }
 0x1d6   :  { %1664 = vmatpush.bf16.msra.mxu1 %v7048_v39 }
 0x1d7   :  { %1692 = vmatpush.bf16.msra.mxu3 %v7049_v42  ;;  %v7056_v42 = vld [vmem:[#allocation114_spill] sm:$0xff] }
 0x1d8   :  { %v666_v45 = vpop.f32.mrf.mxu0 }
 0x1d9   :  { %1623 = vmatpush.bf16.msrb.mxu2 %v7050_v37  ;;  %v667_v39 = vadd.f32 %v5637_v36, %v666_v45  ;;  %v1336_v45 = vpop.f32.mrf.mxu3 }
 0x1da   :  { %1665 = vmatpush.bf16.msra.mxu1 %v7051_v57 }
 0x1db   :  { %1693 = vmatpush.bf16.msra.mxu3 %v7052_v25  ;;  %684 = vst [vmem:[#allocation13 + $0x78] sm:$0xff] %v667_v39  ;;  %v685_v39 = vld [vmem:[#allocation12] sm:$0xf] }
 0x1dc   :  { %v5799_v37 = vperm.slane %v685_v39, 2 }
 0x1dd   :  { %1624 = vmatpush.bf16.msrb.mxu2 %v7053_v43 }
 0x1de   :  { %1666 = vmatpush.bf16.msra.mxu1 %v7054_v22  ;;  %7059 = vst [vmem:[#allocation153_spill] sm:$0xff] %v5799_v37 }
 0x1df   :  { %1694 = vmatpush.bf16.msra.mxu3 %v7055_v15 }
 0x1e1   :  { %1625 = vmatpush.bf16.msrb.mxu2 %v7056_v42  ;;  %v1338_v35 = vpop.f32.mrf.mxu3  ;;  %v5792_v42 = vperm.slane %v685_v39, 0 }
 0x1e2   :  { %1667 = vmatpush.bf16.msra.mxu1 %v5642_v0 }
 0x1e3   :  { %1695 = vmatpush.bf16.msra.mxu3 %v5648_v52  ;;  %7057 = vst [vmem:[#allocation27_spill] sm:$0xff] %v5792_v42 }
 0x1e5   :  { %1674 = vmatpush.bf16.msra.mxu2 %v5663_v13 }
 0x1e9   :  { %1675 = vmatpush.bf16.msra.mxu2 %v5672_v14 }
 0x1ed   :  { %1676 = vmatpush.bf16.msra.mxu2 %v5679_v44  ;;  %v5794_v44 = vperm.slane %v685_v39, 1 }
 0x1ef   :  { %7058 = vst [vmem:[#allocation152_spill] sm:$0xff] %v5794_v44 }
 0x1f1   :  { %1677 = vmatpush.bf16.msra.mxu2 %v5686_v46 }
 0x1f5   :  { %1678 = vmatpush.bf16.msra.mxu2 %v5692_v30 }
 0x1f9   :  { %1679 = vmatpush.bf16.msra.mxu2 %v5702_v32 }
 0x1fd   :  { %1680 = vmatpush.bf16.msra.mxu2 %v5708_v1 }
 0x201   :  { %1681 = vmatpush.bf16.msra.mxu2 %v5715_v10  ;;  %v1350_v36 = vpop.f32.mrf.mxu1 }
 0x202   :  { %v1351_v32 = vadd.f32 %v1350_v36, %v5794_v44 }
 0x207   :  { %v1322_v53 = vpop.f32.mrf.mxu2 }
 0x208   :  { %v1378_v46 = vpop.f32.mrf.mxu3  ;;  %v1323_v30 = vadd.f32 %v1322_v53, %v5792_v42 }
 0x209   :  { %v1352_v14 = vpop.f32.mrf.mxu1  ;;  %v1379_v53 = vadd.f32 %v1378_v46, %v5799_v37 }
 0x20a   :  { %v1337_v1 = vadd.f32 %v1336_v45, %v1323_v30  ;;  %v1353_v60 = vadd.f32 %v1352_v14, %v5794_v44 }
 0x20c   :  { %v1425_v22 = vmul.f32 0.5, %v1337_v1 }
 0x20f   :  { %v1324_v13 = vpop.f32.mrf.mxu2 }
 0x210   :  { %v1325_v10 = vadd.f32 %v1324_v13, %v5792_v42  ;;  %v1380_v57 = vpop.f32.mrf.mxu3 }
 0x211   :  { %v1392_v43 = vpop.f32.mrf.mxu1  ;;  %v1381_v1 = vadd.f32 %v1380_v57, %v5799_v37 }
 0x212   :  { %v1339_v25 = vadd.f32 %v1338_v35, %v1325_v10 }
 0x214   :  { %v1426_v3 = vmul.f32 0.5, %v1339_v25 }
 0x217   :  { %v1364_v52 = vpop.f32.mrf.mxu2 }
 0x218   :  { %v1365_v0 = vadd.f32 %v1364_v52, %v1351_v32  ;;  %v1393_v52 = vadd.f32 %v1392_v43, %v1379_v53  ;;  %v1420_v14 = vpop.f32.mrf.mxu3  ;;  %v703_v43 = vld [vmem:[#allocation4 + $0x10] sm:$0xff] }
 0x219   :  { %v1394_v13 = vpop.f32.mrf.mxu1 }
 0x21a   :  { %v1433_v15 = vmul.f32 0.5, %v1365_v0  ;;  %v5803_v0 = vperm.slane %v685_v39, 3  ;;  %v1395_v45 = vadd.f32 %v1394_v13, %v1381_v1  ;;  %v704_v13 = vld [vmem:[#allocation4 + $0x18] sm:$0xff] }
 0x21c   :  { %4398 = vtanh.f32 %v1433_v15  ;;  %7060 = vst [vmem:[#allocation154_spill] sm:$0xff] %v5803_v0 }
 0x21d   :  { %4400 = vtanh.f32 %v1425_v22 }
 0x21f   :  { %v1366_v47 = vpop.f32.mrf.mxu2 }
 0x220   :  { %v1367_v36 = vadd.f32 %v1366_v47, %v1353_v60 }
 0x222   :  { %v4399_v30 = vpop.eup %4398  ;;  %v1434_v32 = vmul.f32 0.5, %v1367_v36  ;;  %v1499_v44 = vpop.f32.mrf.mxu1 }
 0x223   :  { %v1437_v10 = vmul.f32 0.5, %v4399_v30  ;;  %v4401_v15 = vpop.eup %4400 }
 0x224   :  { %4402 = vtanh.f32 %v1434_v32  ;;  %v1429_v60 = vmul.f32 0.5, %v4401_v15 }
 0x225   :  { %4404 = vtanh.f32 %v1426_v3  ;;  %v1439_v47 = vadd.f32 0.5, %v1437_v10 }
 0x226   :  { %4406 = vtanh.f32 %v1393_v52  ;;  %v1431_v32 = vadd.f32 0.5, %v1429_v60  ;;  %v7063_v60 = vld [vmem:[#allocation51_spill] sm:$0xff] }
 0x227   :  { %v1406_v22 = vpop.f32.mrf.mxu2  ;;  %4408 = vtanh.f32 %v1395_v45  ;;  %v1451_v57 = vmul.f32 %v1439_v47, %v703_v43 }
 0x228   :  { %v1407_v46 = vadd.f32 %v1406_v22, %v5803_v0  ;;  %v1485_v22 = vpop.f32.mrf.mxu0 }
 0x22a   :  { %v4403_v25 = vpop.eup %4402  ;;  %v1421_v35 = vadd.f32 %v1420_v14, %v1407_v46  ;;  %v1422_v14 = vpop.f32.mrf.mxu3 }
 0x22b   :  { %v4405_v53 = vpop.eup %4404  ;;  %v1438_v39 = vmul.f32 0.5, %v4403_v25 }
 0x22c   :  { %v4407_v36 = vpop.eup %4406  ;;  %v1443_v3 = vmul.f32 0.5, %v1421_v35  ;;  %v1430_v30 = vmul.f32 0.5, %v4405_v53  ;;  %v7062_v35 = vld [vmem:[#allocation129_spill] sm:$0xff] }
 0x22d   :  { %v1440_v37 = vadd.f32 0.5, %v1438_v39  ;;  %v1453_v52 = vmul.f32 %v4407_v36, %v1431_v32  ;;  %v4409_v10 = vpop.eup %4408  ;;  %v405_v47 = vadd.f32 %v7063_v60, %v7062_v35 }
 0x22e   :  { %4410 = vtanh.f32 %v1443_v3  ;;  %v1432_v45 = vadd.f32 0.5, %v1430_v30 }
 0x22f   :  { %v1408_v1 = vpop.f32.mrf.mxu2  ;;  %v5808_v42 = vadd.f32 %v1453_v52, %v1451_v57  ;;  %v1452_v46 = vmul.f32 %v1440_v37, %v704_v13  ;;  %v1533_v36 = vadd.f32 %v1499_v44, %v405_v47  ;;  %v1501_v37 = vpop.f32.mrf.mxu1  ;;  %v7066_v13 = vld [vmem:[#allocation54_spill] sm:$0xff] }
 0x230   :  { %v1409_v15 = vadd.f32 %v1408_v1, %v5803_v0  ;;  %v1454_v53 = vmul.f32 %v4409_v10, %v1432_v45  ;;  %v7065_v1 = vld [vmem:[#allocation39_spill] sm:$0xff]  ;;  %v7068_v44 = vld [vmem:[#allocation42_spill] sm:$0xff] }
 0x231   :  { %7061 = vst [vmem:[#allocation155_spill] sm:$0xff] %v5808_v42  ;;  %4412 = vtanh.f32 %v5808_v42  ;;  %v1532_v57 = vadd.f32 %v1485_v22, %v7065_v1  ;;  %v1548_v52 = vmul.f32 0.5, %v1533_v36 }
 0x232   :  { %v1423_v25 = vadd.f32 %v1422_v14, %v1409_v15  ;;  %v5813_v32 = vadd.f32 %v1454_v53, %v1452_v46  ;;  %v407_v15 = vadd.f32 %v7066_v13, %v7062_v35  ;;  %v1487_v14 = vpop.f32.mrf.mxu0  ;;  %v1527_v47 = vpop.f32.mrf.mxu3  ;;  %v7069_v13 = vld [vmem:[#allocation49_spill] sm:$0xff] }
 0x233   :  { %v1540_v10 = vmul.f32 0.5, %v1532_v57  ;;  %v503_v57 = vadd.f32 %v7069_v13, %v5618_v48 }
 0x234   :  { %v4411_v43 = vpop.eup %4410  ;;  %v1444_v39 = vmul.f32 0.5, %v1423_v25  ;;  %7064 = vst [vmem:[#allocation51_spill] sm:$0xff] %v5813_v32  ;;  %v7067_v25 = vld [vmem:[#allocation34_spill] sm:$0xff] }
 0x235   :  { %v1447_v3 = vmul.f32 0.5, %v4411_v43  ;;  %v358_v60 = vadd.f32 %v7068_v44, %v7067_v25  ;;  %v1537_v43 = vadd.f32 %v1501_v37, %v407_v15  ;;  %v454_v44 = vadd.f32 %v7070_v34, %v5572_v61 }
 0x236   :  { %4414 = vtanh.f32 %v1444_v39 }
 0x237   :  { %v1449_v0 = vadd.f32 0.5, %v1447_v3  ;;  %4416 = vtanh.f32 %v5813_v32  ;;  %v4413_v30 = vpop.eup %4412  ;;  %v1536_v53 = vadd.f32 %v1487_v14, %v358_v60  ;;  %v1549_v1 = vmul.f32 0.5, %v1537_v43 }
 0x238   :  { %4418 = vtanh.f32 %v1548_v52 }
 0x239   :  { %v1459_v46 = vmul.f32 %v4413_v30, %v1449_v0  ;;  %4420 = vtanh.f32 %v1540_v10  ;;  %v1541_v42 = vmul.f32 0.5, %v1536_v53  ;;  %v1535_v30 = vadd.f32 %v1527_v47, %v503_v57  ;;  %v7071_v53 = vld [vmem:[#allocation50_spill] sm:$0xff] }
 0x23a   :  { %4422 = vtanh.f32 %v1549_v1  ;;  %v1529_v43 = vpop.f32.mrf.mxu3 }
 0x23b   :  { %v1461_v3 = vpack.c.bf16 %v1459_v46, %v1459_v46  ;;  %4424 = vtanh.f32 %v1541_v42  ;;  %v1558_v34 = vmul.f32 0.5, %v1535_v30  ;;  %v7072_v42 = vld [vmem:[#allocation55_spill] sm:$0xff] }
 0x23c   :  { %v4415_v45 = vpop.eup %4414 }
 0x23d   :  { %v1448_v22 = vmul.f32 0.5, %v4415_v45  ;;  %v4417_v36 = vpop.eup %4416  ;;  %v1586_v14 = vunpack.c.l.b16 %v1461_v3 }
 0x23e   :  { %v4419_v35 = vpop.eup %4418 }
 0x23f   :  { %v1450_v39 = vadd.f32 0.5, %v1448_v22  ;;  %v4421_v15 = vpop.eup %4420  ;;  %v1552_v60 = vmul.f32 0.5, %v4419_v35  ;;  %v456_v35 = vadd.f32 %v7072_v42, %v5572_v61 }
 0x240   :  { %v4423_v47 = vpop.eup %4422 }
 0x241   :  { %v1460_v32 = vmul.f32 %v4417_v36, %v1450_v39  ;;  %v505_v39 = vadd.f32 %v7071_v53, %v5618_v48  ;;  %v1544_v36 = vmul.f32 0.5, %v4421_v15  ;;  %v4425_v3 = vpop.eup %4424 }
 0x242   :  { %v1545_v15 = vmul.f32 0.5, %v4425_v3 }
 0x243   :  { %v1462_v52 = vpack.c.bf16 %v1460_v32, %v1460_v32  ;;  %v4323_v0 = vpack.c.bf16 %v1460_v32, %v1459_v46  ;;  %v1554_v32 = vadd.f32 0.5, %v1552_v60  ;;  %v1539_v46 = vadd.f32 %v1529_v43, %v505_v39 }
 0x244   :  { %v1546_v1 = vadd.f32 0.5, %v1544_v36  ;;  %v1547_v60 = vadd.f32 0.5, %v1545_v15  ;;  %v7077_v15 = vld [vmem:[#allocation26_spill] sm:$0xff] }
 0x245   :  { %4324 = vst [vmem:[#allocation3 + $0x30] sm:$0xff] %v4323_v0   ;;  %v1587_v10 = vunpack.c.l.b16 %v1462_v52  ;;  %v1566_v52 = vmul.f32 %v1554_v32, %v5654_v23  ;;  %v1553_v0 = vmul.f32 0.5, %v4423_v47  ;;  %v1559_v30 = vmul.f32 0.5, %v1539_v46 }
 0x247   :  { %v1513_v37 = vpop.f32.mrf.mxu2  ;;  %v1588_v22 = vpack.c.b16 %v1587_v10, %v1586_v14  ;;  %v1555_v10 = vadd.f32 0.5, %v1553_v0  ;;  %v7074_v0 = vld [vmem:[#allocation23_spill] sm:$0xff] }
 0x248   :  { %v1534_v45 = vadd.f32 %v1513_v37, %v454_v44 }
 0x249   :  { %1612 = vmatmul.bf16.vlgmr.msrb.gmra.mxu1 %v1588_v22  ;;  %1640 = vmatmul.bf16.vlgmr.msrb.gmra.mxu3 %v1588_v22  ;;  %v1567_v43 = vmul.f32 %v1555_v10, %v5658_v9  ;;  %v7078_v10 = vld [vmem:[#allocation28_spill] sm:$0xff] }
 0x24a   :  { %4426 = vtanh.f32 %v1534_v45  ;;  %1768 = vmatpush.bf16.msrb.mxu1 %v5097_v50  ;;  %1796 = vmatpush.bf16.msrb.mxu3 %v5224_v16 }
 0x24b   :  { %4428 = vtanh.f32 %v1558_v34 }
 0x24e   :  { %1769 = vmatpush.bf16.msrb.mxu1 %v5127_v2  ;;  %1797 = vmatpush.bf16.msrb.mxu3 %v5237_v29 }
 0x24f   :  { %v1515_v13 = vpop.f32.mrf.mxu2 }
 0x250   :  { %v4427_v57 = vpop.eup %4426  ;;  %v1538_v44 = vadd.f32 %v1515_v13, %v456_v35 }
 0x251   :  { %v1568_v37 = vmul.f32 %v4427_v57, %v1546_v1  ;;  %v4429_v45 = vpop.eup %4428 }
 0x252   :  { %4430 = vtanh.f32 %v1538_v44  ;;  %1770 = vmatpush.bf16.msrb.mxu1 %v5142_v12  ;;  %1798 = vmatpush.bf16.msrb.mxu3 %v5245_v38  ;;  %v1562_v39 = vmul.f32 0.5, %v4429_v45  ;;  %v7079_v45 = vld [vmem:[#allocation79_spill] sm:$0xff] }
 0x253   :  { %v5834_v14 = vadd.f32 %v1568_v37, %v1566_v52  ;;  %4432 = vtanh.f32 %v1559_v30  ;;  %v7073_v52 = vld [vmem:[#allocation22_spill] sm:$0xff]  ;;  %v7075_v30 = vld [vmem:[#allocation24_spill] sm:$0xff]  ;;  %v7076_v37 = vld [vmem:[#allocation25_spill] sm:$0xff] }
 0x254   :  { %v1564_v46 = vadd.f32 0.5, %v1562_v39  ;;  %v7084_v39 = vld [vmem:[#allocation141_spill] sm:$0xff] }
 0x255   :  { %4434 = vtanh.f32 %v5834_v14 }
 0x256   :  { %1771 = vmatpush.bf16.msrb.mxu1 %v5157_v21  ;;  %1799 = vmatpush.bf16.msrb.mxu3 %v5254_v56 }
 0x258   :  { %v4431_v23 = vpop.eup %4430 }
 0x259   :  { %v1569_v53 = vmul.f32 %v4431_v23, %v1547_v60  ;;  %v4433_v36 = vpop.eup %4432  ;;  %1668 = vmatmul.bf16.vlgmr.msra.gmra.mxu1 %v1588_v22  ;;  %1696 = vmatmul.bf16.vlgmr.msra.gmra.mxu3 %v1588_v22  ;;  %v7080_v60 = vld [vmem:[#allocation138_spill] sm:$0xff]  ;;  %v7081_v23 = vld [vmem:[#allocation31_spill] sm:$0xff] }
 0x25a   :  { %1772 = vmatpush.bf16.msrb.mxu1 %v5172_v31  ;;  %1800 = vmatpush.bf16.msrb.mxu3 %v5265_v4  ;;  %v1563_v9 = vmul.f32 0.5, %v4433_v36  ;;  %v7085_v36 = vld [vmem:[#allocation116_spill] sm:$0xff] }
 0x25b   :  { %v5842_v34 = vadd.f32 %v1569_v53, %v1567_v43  ;;  %v4435_v32 = vpop.eup %4434  ;;  %v7082_v43 = vld [vmem:[#allocation30_spill] sm:$0xff] }
 0x25c   :  { %v1574_v47 = vmul.f32 %v4435_v32, %v1564_v46  ;;  %v1565_v42 = vadd.f32 0.5, %v1563_v9  ;;  %v7083_v53 = vld [vmem:[#allocation82_spill] sm:$0xff]  ;;  %v7087_v46 = vld [vmem:[#allocation33_spill] sm:$0xff]  ;;  %v7088_v9 = vld [vmem:[#allocation32_spill] sm:$0xff] }
 0x25d   :  { %4436 = vtanh.f32 %v5842_v34  ;;  %v7086_v32 = vld [vmem:[#allocation118_spill] sm:$0xff] }
 0x25e   :  { %1773 = vmatpush.bf16.msrb.mxu1 %v5188_v40  ;;  %1801 = vmatpush.bf16.msrb.mxu3 %v5273_v20  ;;  %v1576_v3 = vpack.c.bf16 %v1574_v47, %v1574_v47  ;;  %v7089_v47 = vld [vmem:[#allocation81_spill] sm:$0xff] }
 0x260   :  { %v1580_v13 = vunpack.c.l.b16 %v1576_v3  ;;  %v7092_v3 = vld [vmem:[#allocation122_spill] sm:$0xff] }
 0x262   :  { %1774 = vmatpush.bf16.msrb.mxu1 %v5213_v6  ;;  %1802 = vmatpush.bf16.msrb.mxu3 %v5281_v41 }
 0x263   :  { %v4437_v35 = vpop.eup %4436 }
 0x264   :  { %v1575_v1 = vmul.f32 %v4437_v35, %v1565_v42  ;;  %v7090_v42 = vld [vmem:[#allocation83_spill] sm:$0xff]  ;;  %v7091_v35 = vld [vmem:[#allocation121_spill] sm:$0xff] }
 0x266   :  { %v1577_v22 = vpack.c.bf16 %v1575_v1, %v1575_v1  ;;  %1775 = vmatpush.bf16.msrb.mxu1 %v5252_v51  ;;  %1803 = vmatpush.bf16.msrb.mxu3 %v5294_v7  ;;  %v7093_v1 = vld [vmem:[#allocation87_spill] sm:$0xff] }
 0x268   :  { %v1581_v57 = vunpack.c.l.b16 %v1577_v22  ;;  %v7094_v22 = vld [vmem:[#allocation88_spill] sm:$0xff] }
 0x26a   :  { %v1582_v44 = vpack.c.b16 %v1581_v57, %v1580_v13  ;;  %1882 = vmatpush.bf16.msra.mxu1 %v5380_v59  ;;  %1910 = vmatpush.bf16.msra.mxu3 %v5533_v5  ;;  %v7095_v13 = vld [vmem:[#allocation124_spill] sm:$0xff]  ;;  %v7096_v57 = vld [vmem:[#allocation125_spill] sm:$0xff] }
 0x26c   :  { %1598 = vmatmul.bf16.vlgmr.msra.gmra.mxu0 %v1582_v44  ;;  %1626 = vmatmul.bf16.vlgmr.msrb.gmra.mxu2 %v1582_v44 }
 0x26d   :  { %1754 = vmatpush.bf16.msra.mxu0 %v7073_v52  ;;  %1776 = vmatmul.bf16.vlgmr.msrb.gmra.mxu1 %v1582_v44 }
 0x26e   :  { %1782 = vmatpush.bf16.msrb.mxu2 %v5125_v62  ;;  %1804 = vmatmul.bf16.vlgmr.msrb.gmra.mxu3 %v1582_v44 }
 0x26f   :  { %1883 = vmatpush.bf16.msra.mxu1 %v5385_v19  ;;  %1911 = vmatpush.bf16.msra.mxu3 %v5551_v26 }
 0x271   :  { %1755 = vmatpush.bf16.msra.mxu0 %v7074_v0 }
 0x272   :  { %1783 = vmatpush.bf16.msrb.mxu2 %v5140_v8 }
 0x273   :  { %1884 = vmatpush.bf16.msra.mxu1 %v5394_v24  ;;  %1912 = vmatpush.bf16.msra.mxu3 %v5564_v63 }
 0x275   :  { %1756 = vmatpush.bf16.msra.mxu0 %v7075_v30 }
 0x276   :  { %1784 = vmatpush.bf16.msrb.mxu2 %v5155_v17 }
 0x277   :  { %1885 = vmatpush.bf16.msra.mxu1 %v5399_v11  ;;  %1913 = vmatpush.bf16.msra.mxu3 %v7024_v49  ;;  %v7137_v49 = vld [vmem:[#allocation153_spill] sm:$0xff] }
 0x279   :  { %1757 = vmatpush.bf16.msra.mxu0 %v7076_v37 }
 0x27a   :  { %1785 = vmatpush.bf16.msrb.mxu2 %v5170_v28 }
 0x27b   :  { %1886 = vmatpush.bf16.msra.mxu1 %v7026_v55  ;;  %1914 = vmatpush.bf16.msra.mxu3 %v7027_v54 }
 0x27c   :  { %1654 = vmatmul.bf16.vlgmr.msrb.gmra.mxu0 %v1582_v44  ;;  %1682 = vmatmul.bf16.vlgmr.msra.gmra.mxu2 %v1582_v44 }
 0x27d   :  { %1758 = vmatpush.bf16.msra.mxu0 %v7077_v15 }
 0x27e   :  { %1786 = vmatpush.bf16.msrb.mxu2 %v7025_v27 }
 0x27f   :  { %1887 = vmatpush.bf16.msra.mxu1 %v7029_v18  ;;  %1915 = vmatpush.bf16.msra.mxu3 %v5609_v58  ;;  %v7135_v58 = vld [vmem:[#allocation27_spill] sm:$0xff] }
 0x281   :  { %1759 = vmatpush.bf16.msra.mxu0 %v7078_v10 }
 0x282   :  { %1787 = vmatpush.bf16.msrb.mxu2 %v7028_v33 }
 0x283   :  { %1888 = vmatpush.bf16.msra.mxu1 %v7079_v45  ;;  %1916 = vmatpush.bf16.msra.mxu3 %v7080_v60  ;;  %v7104_v60 = vld [vmem:[#allocation133_spill] sm:$0xff]  ;;  %v7105_v45 = vld [vmem:[#allocation100_spill] sm:$0xff] }
 0x285   :  { %1760 = vmatpush.bf16.msra.mxu0 %v7081_v23 }
 0x286   :  { %1788 = vmatpush.bf16.msrb.mxu2 %v7082_v43 }
 0x287   :  { %1889 = vmatpush.bf16.msra.mxu1 %v7083_v53  ;;  %1917 = vmatpush.bf16.msra.mxu3 %v7084_v39  ;;  %v7099_v39 = vld [vmem:[#allocation128_spill] sm:$0xff]  ;;  %v7100_v53 = vld [vmem:[#allocation130_spill] sm:$0xff] }
 0x289   :  { %1761 = vmatpush.bf16.msra.mxu0 %v7087_v46 }
 0x28a   :  { %1789 = vmatpush.bf16.msrb.mxu2 %v7088_v9 }
 0x28b   :  { %1938 = vmatpush.bf16.msrb.mxu1 %v7085_v36  ;;  %1966 = vmatpush.bf16.msrb.mxu3 %v7086_v32  ;;  %v7097_v32 = vld [vmem:[#allocation91_spill] sm:$0xff]  ;;  %v7098_v36 = vld [vmem:[#allocation92_spill] sm:$0xff] }
 0x28c   :  { %1762 = vmatmul.bf16.vlgmr.msra.gmra.mxu0 %v1582_v44 }
 0x28d   :  { %1868 = vmatpush.bf16.msrb.mxu0 %v7089_v47  ;;  %1790 = vmatmul.bf16.vlgmr.msrb.gmra.mxu2 %v1582_v44  ;;  %v7102_v44 = vld [vmem:[#allocation96_spill] sm:$0xff] }
 0x28e   :  { %1896 = vmatpush.bf16.msra.mxu2 %v7090_v42  ;;  %v7136_v42 = vld [vmem:[#allocation152_spill] sm:$0xff] }
 0x28f   :  { %1939 = vmatpush.bf16.msrb.mxu1 %v7091_v35  ;;  %1967 = vmatpush.bf16.msrb.mxu3 %v7092_v3  ;;  %v7101_v35 = vld [vmem:[#allocation95_spill] sm:$0xff]  ;;  %v7103_v3 = vld [vmem:[#allocation132_spill] sm:$0xff] }
 0x291   :  { %1869 = vmatpush.bf16.msrb.mxu0 %v7093_v1 }
 0x292   :  { %1897 = vmatpush.bf16.msra.mxu2 %v7094_v22 }
 0x293   :  { %1940 = vmatpush.bf16.msrb.mxu1 %v7095_v13  ;;  %1968 = vmatpush.bf16.msrb.mxu3 %v7096_v57  ;;  %v7106_v13 = vld [vmem:[#allocation101_spill] sm:$0xff]  ;;  %v7107_v57 = vld [vmem:[#allocation135_spill] sm:$0xff] }
 0x295   :  { %1870 = vmatpush.bf16.msrb.mxu0 %v7097_v32  ;;  %v7108_v32 = vld [vmem:[#allocation136_spill] sm:$0xff] }
 0x296   :  { %1898 = vmatpush.bf16.msra.mxu2 %v7098_v36  ;;  %v7109_v36 = vld [vmem:[#allocation104_spill] sm:$0xff] }
 0x297   :  { %1941 = vmatpush.bf16.msrb.mxu1 %v7099_v39  ;;  %1969 = vmatpush.bf16.msrb.mxu3 %v7100_v53  ;;  %v7110_v39 = vld [vmem:[#allocation105_spill] sm:$0xff]  ;;  %v7111_v53 = vld [vmem:[#allocation139_spill] sm:$0xff] }
 0x299   :  { %1871 = vmatpush.bf16.msrb.mxu0 %v7101_v35  ;;  %v7112_v35 = vld [vmem:[#allocation140_spill] sm:$0xff] }
 0x29a   :  { %1899 = vmatpush.bf16.msra.mxu2 %v7102_v44  ;;  %v7113_v44 = vld [vmem:[#allocation109_spill] sm:$0xff] }
 0x29b   :  { %1942 = vmatpush.bf16.msrb.mxu1 %v7103_v3  ;;  %1970 = vmatpush.bf16.msrb.mxu3 %v7104_v60  ;;  %v7114_v3 = vld [vmem:[#allocation110_spill] sm:$0xff] }
 0x29c   :  { %v7115_v60 = vld [vmem:[#allocation142_spill] sm:$0xff] }
 0x29d   :  { %1872 = vmatpush.bf16.msrb.mxu0 %v7105_v45  ;;  %v7116_v45 = vld [vmem:[#allocation143_spill] sm:$0xff] }
 0x29e   :  { %1900 = vmatpush.bf16.msra.mxu2 %v7106_v13  ;;  %v7117_v13 = vld [vmem:[#allocation113_spill] sm:$0xff] }
 0x29f   :  { %1943 = vmatpush.bf16.msrb.mxu1 %v7107_v57  ;;  %1971 = vmatpush.bf16.msrb.mxu3 %v7108_v32  ;;  %v7118_v57 = vld [vmem:[#allocation114_spill] sm:$0xff]  ;;  %v7119_v32 = vld [vmem:[#allocation85_spill] sm:$0xff] }
 0x2a1   :  { %1873 = vmatpush.bf16.msrb.mxu0 %v7109_v36  ;;  %v7120_v36 = vld [vmem:[#allocation144_spill] sm:$0xff] }
 0x2a2   :  { %1901 = vmatpush.bf16.msra.mxu2 %v7110_v39  ;;  %v7121_v39 = vld [vmem:[#allocation89_spill] sm:$0xff] }
 0x2a3   :  { %1944 = vmatpush.bf16.msrb.mxu1 %v7111_v53  ;;  %1972 = vmatpush.bf16.msrb.mxu3 %v7112_v35  ;;  %v7122_v53 = vld [vmem:[#allocation145_spill] sm:$0xff]  ;;  %v7123_v35 = vld [vmem:[#allocation94_spill] sm:$0xff] }
 0x2a5   :  { %1874 = vmatpush.bf16.msrb.mxu0 %v7113_v44  ;;  %v7124_v44 = vld [vmem:[#allocation146_spill] sm:$0xff] }
 0x2a6   :  { %1902 = vmatpush.bf16.msra.mxu2 %v7114_v3  ;;  %v7125_v3 = vld [vmem:[#allocation98_spill] sm:$0xff] }
 0x2a7   :  { %1945 = vmatpush.bf16.msrb.mxu1 %v7115_v60  ;;  %1973 = vmatpush.bf16.msrb.mxu3 %v7116_v45  ;;  %v7126_v60 = vld [vmem:[#allocation147_spill] sm:$0xff] }
 0x2a8   :  { %v7127_v45 = vld [vmem:[#allocation103_spill] sm:$0xff] }
 0x2a9   :  { %1875 = vmatpush.bf16.msrb.mxu0 %v7117_v13  ;;  %v7128_v13 = vld [vmem:[#allocation148_spill] sm:$0xff] }
 0x2aa   :  { %1903 = vmatpush.bf16.msra.mxu2 %v7118_v57  ;;  %v7129_v57 = vld [vmem:[#allocation106_spill] sm:$0xff] }
 0x2ad   :  { %1924 = vmatpush.bf16.msra.mxu0 %v7119_v32  ;;  %v7130_v32 = vld [vmem:[#allocation149_spill] sm:$0xff] }
 0x2ae   :  { %1952 = vmatpush.bf16.msrb.mxu2 %v7120_v36  ;;  %v7131_v36 = vld [vmem:[#allocation112_spill] sm:$0xff] }
 0x2b1   :  { %1925 = vmatpush.bf16.msra.mxu0 %v7121_v39  ;;  %v7132_v39 = vld [vmem:[#allocation150_spill] sm:$0xff] }
 0x2b2   :  { %1953 = vmatpush.bf16.msrb.mxu2 %v7122_v53  ;;  %v7133_v53 = vld [vmem:[#allocation115_spill] sm:$0xff] }
 0x2b5   :  { %1926 = vmatpush.bf16.msra.mxu0 %v7123_v35  ;;  %v7134_v35 = vld [vmem:[#allocation151_spill] sm:$0xff] }
 0x2b6   :  { %1954 = vmatpush.bf16.msrb.mxu2 %v7124_v44 }
 0x2b9   :  { %1927 = vmatpush.bf16.msra.mxu0 %v7125_v3 }
 0x2ba   :  { %1955 = vmatpush.bf16.msrb.mxu2 %v7126_v60 }
 0x2bd   :  { %1928 = vmatpush.bf16.msra.mxu0 %v7127_v45 }
 0x2be   :  { %1956 = vmatpush.bf16.msrb.mxu2 %v7128_v13 }
 0x2c1   :  { %1929 = vmatpush.bf16.msra.mxu0 %v7129_v57 }
 0x2c2   :  { %1957 = vmatpush.bf16.msrb.mxu2 %v7130_v32 }
 0x2c5   :  { %1930 = vmatpush.bf16.msra.mxu0 %v7131_v36 }
 0x2c6   :  { %1958 = vmatpush.bf16.msrb.mxu2 %v7132_v39  ;;  %v1613_v44 = vpop.f32.mrf.mxu1 }
 0x2c9   :  { %1931 = vmatpush.bf16.msra.mxu0 %v7133_v53 }
 0x2ca   :  { %1959 = vmatpush.bf16.msrb.mxu2 %v7134_v35 }
 0x2cc   :  { %v1641_v22 = vpop.f32.mrf.mxu3 }
 0x2ce   :  { %v1615_v3 = vpop.f32.mrf.mxu1 }
 0x2d4   :  { %v1643_v45 = vpop.f32.mrf.mxu3 }
 0x2d6   :  { %v1669_v60 = vpop.f32.mrf.mxu1 }
 0x2dc   :  { %v1697_v35 = vpop.f32.mrf.mxu3 }
 0x2de   :  { %v1671_v36 = vpop.f32.mrf.mxu1 }
 0x2e9   :  { %v1599_v1 = vpop.f32.mrf.mxu0 }
 0x2ea   :  { %v1600_v13 = vadd.f32 %v1599_v1, %v7135_v58  ;;  %v1777_v11 = vpop.f32.mrf.mxu1 }
 0x2ec   :  { %v1614_v57 = vadd.f32 %v1613_v44, %v1600_v13 }
 0x2ee   :  { %v1702_v53 = vmul.f32 0.5, %v1614_v57 }
 0x2ef   :  { %v1627_v18 = vpop.f32.mrf.mxu2 }
 0x2f0   :  { %v1628_v32 = vadd.f32 %v1627_v18, %v7136_v42 }
 0x2f1   :  { %v1601_v47 = vpop.f32.mrf.mxu0 }
 0x2f2   :  { %v1642_v9 = vadd.f32 %v1641_v22, %v1628_v32  ;;  %v1602_v39 = vadd.f32 %v1601_v47, %v7135_v58  ;;  %v7138_v47 = vld [vmem:[#allocation129_spill] sm:$0xff] }
 0x2f4   :  { %v1710_v46 = vmul.f32 0.5, %v1642_v9  ;;  %v1616_v54 = vadd.f32 %v1615_v3, %v1602_v39  ;;  %v7139_v9 = vld [vmem:[#allocation57_spill] sm:$0xff] }
 0x2f5   :  { %v410_v57 = vadd.f32 %v7139_v9, %v7138_v47 }
 0x2f6   :  { %4438 = vtanh.f32 %v1710_v46  ;;  %v1703_v44 = vmul.f32 0.5, %v1616_v54  ;;  %v1699_v46 = vpop.f32.mrf.mxu3 }
 0x2f7   :  { %v1629_v55 = vpop.f32.mrf.mxu2  ;;  %4440 = vtanh.f32 %v1702_v53 }
 0x2f8   :  { %v1630_v43 = vadd.f32 %v1629_v55, %v7136_v42  ;;  %v7140_v55 = vld [vmem:[#allocation154_spill] sm:$0xff] }
 0x2f9   :  { %v1655_v23 = vpop.f32.mrf.mxu0 }
 0x2fa   :  { %v1644_v1 = vadd.f32 %v1643_v45, %v1630_v43  ;;  %v1656_v13 = vadd.f32 %v1655_v23, %v7137_v49  ;;  %v1811_v43 = vadd.f32 %v1777_v11, %v410_v57 }
 0x2fc   :  { %v4439_v18 = vpop.eup %4438  ;;  %v1711_v33 = vmul.f32 0.5, %v1644_v1  ;;  %v1670_v32 = vadd.f32 %v1669_v60, %v1656_v13  ;;  %v1826_v9 = vmul.f32 0.5, %v1811_v43 }
 0x2fd   :  { %v4441_v22 = vpop.eup %4440  ;;  %v1714_v39 = vmul.f32 0.5, %v4439_v18  ;;  %v1779_v18 = vpop.f32.mrf.mxu1 }
 0x2fe   :  { %4442 = vtanh.f32 %v1711_v33  ;;  %v1706_v45 = vmul.f32 0.5, %v4441_v22  ;;  %v7142_v22 = vld [vmem:[#allocation155_spill] sm:$0xff] }
 0x2ff   :  { %4444 = vtanh.f32 %v1703_v44  ;;  %v1683_v53 = vpop.f32.mrf.mxu2  ;;  %v1716_v1 = vadd.f32 0.5, %v1714_v39 }
 0x300   :  { %4446 = vtanh.f32 %v1670_v32  ;;  %v1684_v3 = vadd.f32 %v1683_v53, %v7140_v55  ;;  %v1708_v10 = vadd.f32 0.5, %v1706_v45  ;;  %v7141_v32 = vld [vmem:[#allocation60_spill] sm:$0xff] }
 0x301   :  { %v1657_v23 = vpop.f32.mrf.mxu0  ;;  %v412_v53 = vadd.f32 %v7141_v32, %v7138_v47  ;;  %v1728_v11 = vmul.f32 %v1716_v1, %v7142_v22  ;;  %v7144_v22 = vld [vmem:[#allocation51_spill] sm:$0xff] }
 0x302   :  { %v1698_v54 = vadd.f32 %v1697_v35, %v1684_v3  ;;  %v1658_v42 = vadd.f32 %v1657_v23, %v7137_v49 }
 0x304   :  { %v4443_v60 = vpop.eup %4442  ;;  %v1720_v13 = vmul.f32 0.5, %v1698_v54  ;;  %v1672_v33 = vadd.f32 %v1671_v36, %v1658_v42  ;;  %v1805_v36 = vpop.f32.mrf.mxu3  ;;  %v1815_v42 = vadd.f32 %v1779_v18, %v412_v53  ;;  %v7145_v53 = vld [vmem:[#allocation53_spill] sm:$0xff] }
 0x305   :  { %v4445_v58 = vpop.eup %4444  ;;  %v1715_v44 = vmul.f32 0.5, %v4443_v60  ;;  %v7143_v60 = vld [vmem:[#allocation45_spill] sm:$0xff] }
 0x306   :  { %v4447_v63 = vpop.eup %4446  ;;  %4448 = vtanh.f32 %v1720_v13  ;;  %v1707_v3 = vmul.f32 0.5, %v4445_v58  ;;  %v1827_v58 = vmul.f32 0.5, %v1815_v42 }
 0x307   :  { %v1730_v57 = vmul.f32 %v4447_v63, %v1708_v10  ;;  %4450 = vtanh.f32 %v1672_v33  ;;  %v1685_v35 = vpop.f32.mrf.mxu2  ;;  %v1717_v23 = vadd.f32 0.5, %v1715_v44  ;;  %v508_v44 = vadd.f32 %v7145_v53, %v5618_v48 }
 0x308   :  { %v1686_v39 = vadd.f32 %v1685_v35, %v7140_v55  ;;  %4452 = vtanh.f32 %v1826_v9  ;;  %v1709_v32 = vadd.f32 0.5, %v1707_v3 }
 0x309   :  { %v5946_v45 = vadd.f32 %v1730_v57, %v1728_v11  ;;  %v1763_v43 = vpop.f32.mrf.mxu0  ;;  %v1729_v9 = vmul.f32 %v1717_v23, %v7144_v22  ;;  %v7147_v57 = vld [vmem:[#allocation47_spill] sm:$0xff]  ;;  %v1813_v42 = vadd.f32 %v1805_v36, %v508_v44 }
 0x30a   :  { %v1700_v54 = vadd.f32 %v1699_v46, %v1686_v39  ;;  %v1810_v13 = vadd.f32 %v1763_v43, %v7143_v60  ;;  %v7146_v46 = vld [vmem:[#allocation58_spill] sm:$0xff]  ;;  %v363_v3 = vadd.f32 %v7147_v57, %v7067_v25 }
 0x30b   :  { %4454 = vtanh.f32 %v5946_v45  ;;  %v459_v11 = vadd.f32 %v7146_v46, %v5572_v61 }
 0x30c   :  { %v4449_v49 = vpop.eup %4448  ;;  %v1721_v63 = vmul.f32 0.5, %v1700_v54  ;;  %v1818_v10 = vmul.f32 0.5, %v1810_v13 }
 0x30d   :  { %v4451_v1 = vpop.eup %4450  ;;  %v1724_v33 = vmul.f32 0.5, %v4449_v49 }
 0x30e   :  { %v1731_v35 = vmul.f32 %v4451_v1, %v1709_v32  ;;  %4456 = vtanh.f32 %v1721_v63  ;;  %v4453_v18 = vpop.eup %4452  ;;  %v1807_v63 = vpop.f32.mrf.mxu3 }
 0x30f   :  { %4458 = vtanh.f32 %v1818_v10  ;;  %v1726_v49 = vadd.f32 0.5, %v1724_v33  ;;  %v1830_v13 = vmul.f32 0.5, %v4453_v18  ;;  %v7148_v10 = vld [vmem:[#allocation56_spill] sm:$0xff]  ;;  %v7149_v18 = vld [vmem:[#allocation61_spill] sm:$0xff] }
 0x310   :  { %v5957_v39 = vadd.f32 %v1731_v35, %v1729_v9  ;;  %v1791_v43 = vpop.f32.mrf.mxu2  ;;  %4460 = vtanh.f32 %v1827_v58  ;;  %v510_v22 = vadd.f32 %v7148_v10, %v5618_v48  ;;  %v1836_v35 = vmul.f32 0.5, %v1813_v42 }
 0x311   :  { %v1812_v23 = vadd.f32 %v1791_v43, %v459_v11  ;;  %v1765_v54 = vpop.f32.mrf.mxu0  ;;  %v4455_v60 = vpop.eup %4454  ;;  %v1832_v58 = vadd.f32 0.5, %v1830_v13  ;;  %v461_v57 = vadd.f32 %v7149_v18, %v5572_v61 }
 0x312   :  { %4462 = vtanh.f32 %v5957_v39  ;;  %v1814_v32 = vadd.f32 %v1765_v54, %v363_v3  ;;  %v1736_v46 = vmul.f32 %v4455_v60, %v1726_v49  ;;  %v1817_v33 = vadd.f32 %v1807_v63, %v510_v22 }
 0x313   :  { %4464 = vtanh.f32 %v1812_v23  ;;  %v1844_v42 = vmul.f32 %v1832_v58, %v5834_v14 }
 0x314   :  { %v4457_v1 = vpop.eup %4456  ;;  %v1819_v53 = vmul.f32 0.5, %v1814_v32  ;;  %v1738_v10 = vpack.c.bf16 %v1736_v46, %v1736_v46  ;;  %v1837_v60 = vmul.f32 0.5, %v1817_v33 }
 0x315   :  { %v4459_v9 = vpop.eup %4458  ;;  %v1725_v36 = vmul.f32 0.5, %v4457_v1 }
 0x316   :  { %v1822_v44 = vmul.f32 0.5, %v4459_v9  ;;  %4466 = vtanh.f32 %v1819_v53  ;;  %v4461_v11 = vpop.eup %4460  ;;  %v1864_v9 = vunpack.c.l.b16 %v1738_v10 }
 0x317   :  { %v1727_v3 = vadd.f32 0.5, %v1725_v36  ;;  %4468 = vtanh.f32 %v1836_v35  ;;  %v1831_v49 = vmul.f32 0.5, %v4461_v11 }
 0x318   :  { %v4463_v43 = vpop.eup %4462  ;;  %v1824_v23 = vadd.f32 0.5, %v1822_v44  ;;  %v1793_v54 = vpop.f32.mrf.mxu2 }
 0x319   :  { %v4465_v25 = vpop.eup %4464  ;;  %v1737_v32 = vmul.f32 %v4463_v43, %v1727_v3  ;;  %v1816_v48 = vadd.f32 %v1793_v54, %v461_v57  ;;  %v1833_v18 = vadd.f32 0.5, %v1831_v49 }
 0x31a   :  { %v1846_v13 = vmul.f32 %v4465_v25, %v1824_v23 }
 0x31b   :  { %v1739_v63 = vpack.c.bf16 %v1737_v32, %v1737_v32  ;;  %v4328_v1 = vpack.c.bf16 %v1737_v32, %v1736_v46  ;;  %4470 = vtanh.f32 %v1816_v48  ;;  %v1845_v25 = vmul.f32 %v1833_v18, %v5842_v34  ;;  %v7155_v18 = vld [vmem:[#allocation31_spill] sm:$0xff] }
 0x31c   :  { %v4467_v22 = vpop.eup %4466  ;;  %v5965_v53 = vadd.f32 %v1846_v13, %v1844_v42  ;;  %4472 = vtanh.f32 %v1837_v60 }
 0x31d   :  { %4329 = vst [vmem:[#allocation3] sm:$0xff] %v4328_v1   ;;  %v1865_v36 = vunpack.c.l.b16 %v1739_v63  ;;  %v1823_v44 = vmul.f32 0.5, %v4467_v22  ;;  %v4469_v35 = vpop.eup %4468  ;;  %v7150_v1 = vld [vmem:[#allocation123_spill] sm:$0xff]  ;;  %v7151_v22 = vld [vmem:[#allocation28_spill] sm:$0xff] }
 0x31e   :  { %4474 = vtanh.f32 %v5965_v53  ;;  %v1840_v46 = vmul.f32 0.5, %v4469_v35  ;;  %v7156_v35 = vld [vmem:[#allocation30_spill] sm:$0xff] }
 0x31f   :  { %v1825_v3 = vadd.f32 0.5, %v1823_v44  ;;  %v1866_v57 = vpack.c.b16 %v1865_v36, %v1864_v9  ;;  %v7152_v9 = vld [vmem:[#allocation29_spill] sm:$0xff]  ;;  %v7153_v36 = vld [vmem:[#allocation71_spill] sm:$0xff] }
 0x320   :  { %v1842_v43 = vadd.f32 0.5, %v1840_v46  ;;  %v7154_v44 = vld [vmem:[#allocation127_spill] sm:$0xff] }
 0x321   :  { %v4471_v14 = vpop.eup %4470  ;;  %1890 = vmatmul.bf16.vlgmr.msra.gmra.mxu1 %v1866_v57  ;;  %1918 = vmatmul.bf16.vlgmr.msra.gmra.mxu3 %v1866_v57  ;;  %v7162_v46 = vld [vmem:[#allocation83_spill] sm:$0xff] }
 0x322   :  { %v1847_v48 = vmul.f32 %v4471_v14, %v1825_v3  ;;  %2046 = vmatpush.bf16.msra.mxu1 %v5097_v50  ;;  %2074 = vmatpush.bf16.msra.mxu3 %v5224_v16  ;;  %v4473_v58 = vpop.eup %4472  ;;  %v7157_v3 = vld [vmem:[#allocation74_spill] sm:$0xff]  ;;  %v7159_v14 = vld [vmem:[#allocation33_spill] sm:$0xff] }
 0x323   :  { %v1841_v23 = vmul.f32 0.5, %v4473_v58  ;;  %v7163_v58 = vld [vmem:[#allocation76_spill] sm:$0xff] }
 0x324   :  { %v5971_v33 = vadd.f32 %v1847_v48, %v1845_v25  ;;  %v4475_v11 = vpop.eup %4474  ;;  %v7160_v25 = vld [vmem:[#allocation32_spill] sm:$0xff]  ;;  %v7161_v48 = vld [vmem:[#allocation81_spill] sm:$0xff] }
 0x325   :  { %v1852_v54 = vmul.f32 %v4475_v11, %v1842_v43  ;;  %v1843_v34 = vadd.f32 0.5, %v1841_v23  ;;  %v7164_v11 = vld [vmem:[#allocation134_spill] sm:$0xff]  ;;  %v7165_v43 = vld [vmem:[#allocation87_spill] sm:$0xff]  ;;  %v7166_v23 = vld [vmem:[#allocation88_spill] sm:$0xff] }
 0x326   :  { %4476 = vtanh.f32 %v5971_v33  ;;  %2047 = vmatpush.bf16.msra.mxu1 %v5127_v2  ;;  %2075 = vmatpush.bf16.msra.mxu3 %v5237_v29 }
 0x327   :  { %v1854_v32 = vpack.c.bf16 %v1852_v54, %v1852_v54  ;;  %v7167_v54 = vld [vmem:[#allocation79_spill] sm:$0xff] }
 0x329   :  { %v1858_v60 = vunpack.c.l.b16 %v1854_v32  ;;  %v7170_v32 = vld [vmem:[#allocation92_spill] sm:$0xff] }
 0x32a   :  { %2048 = vmatpush.bf16.msra.mxu1 %v5142_v12  ;;  %2076 = vmatpush.bf16.msra.mxu3 %v5245_v38 }
 0x32c   :  { %v4477_v10 = vpop.eup %4476 }
 0x32d   :  { %v1853_v42 = vmul.f32 %v4477_v10, %v1843_v34  ;;  %v7168_v34 = vld [vmem:[#allocation138_spill] sm:$0xff]  ;;  %v7169_v10 = vld [vmem:[#allocation91_spill] sm:$0xff] }
 0x32e   :  { %2049 = vmatpush.bf16.msra.mxu1 %v5157_v21  ;;  %2077 = vmatpush.bf16.msra.mxu3 %v5254_v56 }
 0x32f   :  { %v1855_v49 = vpack.c.bf16 %v1853_v42, %v1853_v42  ;;  %v7171_v42 = vld [vmem:[#allocation82_spill] sm:$0xff] }
 0x331   :  { %v1859_v13 = vunpack.c.l.b16 %v1855_v49  ;;  %1946 = vmatmul.bf16.vlgmr.msrb.gmra.mxu1 %v1866_v57  ;;  %1974 = vmatmul.bf16.vlgmr.msrb.gmra.mxu3 %v1866_v57  ;;  %v7158_v57 = vld [vmem:[#allocation131_spill] sm:$0xff]  ;;  %v7172_v49 = vld [vmem:[#allocation141_spill] sm:$0xff] }
 0x332   :  { %2050 = vmatpush.bf16.msra.mxu1 %v5172_v31  ;;  %2078 = vmatpush.bf16.msra.mxu3 %v5265_v4 }
 0x333   :  { %v1860_v63 = vpack.c.b16 %v1859_v13, %v1858_v60  ;;  %v7173_v60 = vld [vmem:[#allocation116_spill] sm:$0xff]  ;;  %v7174_v13 = vld [vmem:[#allocation118_spill] sm:$0xff] }
 0x335   :  { %1876 = vmatmul.bf16.vlgmr.msrb.gmra.mxu0 %v1860_v63  ;;  %1904 = vmatmul.bf16.vlgmr.msra.gmra.mxu2 %v1860_v63 }
 0x336   :  { %2032 = vmatpush.bf16.msrb.mxu0 %v7073_v52  ;;  %2060 = vmatpush.bf16.msra.mxu2 %v5125_v62 }
 0x337   :  { %2051 = vmatpush.bf16.msra.mxu1 %v5188_v40  ;;  %2079 = vmatpush.bf16.msra.mxu3 %v5273_v20 }
 0x33a   :  { %2033 = vmatpush.bf16.msrb.mxu0 %v7074_v0  ;;  %2061 = vmatpush.bf16.msra.mxu2 %v5140_v8 }
 0x33b   :  { %2052 = vmatpush.bf16.msra.mxu1 %v5213_v6  ;;  %2080 = vmatpush.bf16.msra.mxu3 %v5281_v41 }
 0x33e   :  { %2034 = vmatpush.bf16.msrb.mxu0 %v7075_v30  ;;  %2062 = vmatpush.bf16.msra.mxu2 %v5155_v17 }
 0x33f   :  { %2053 = vmatpush.bf16.msra.mxu1 %v5252_v51  ;;  %2081 = vmatpush.bf16.msra.mxu3 %v5294_v7 }
 0x342   :  { %2035 = vmatpush.bf16.msrb.mxu0 %v7076_v37  ;;  %2054 = vmatmul.bf16.vlgmr.msra.gmra.mxu1 %v1860_v63 }
 0x343   :  { %2160 = vmatpush.bf16.msrb.mxu1 %v5380_v59  ;;  %2188 = vmatpush.bf16.msrb.mxu3 %v5533_v5 }
 0x344   :  { %2063 = vmatpush.bf16.msra.mxu2 %v5170_v28  ;;  %2082 = vmatmul.bf16.vlgmr.msra.gmra.mxu3 %v1860_v63 }
 0x345   :  { %1932 = vmatmul.bf16.vlgmr.msra.gmra.mxu0 %v1860_v63  ;;  %1960 = vmatmul.bf16.vlgmr.msrb.gmra.mxu2 %v1860_v63 }
 0x346   :  { %2036 = vmatpush.bf16.msrb.mxu0 %v7077_v15 }
 0x347   :  { %2161 = vmatpush.bf16.msrb.mxu1 %v5385_v19  ;;  %2189 = vmatpush.bf16.msrb.mxu3 %v5551_v26 }
 0x348   :  { %2064 = vmatpush.bf16.msra.mxu2 %v7025_v27 }
 0x34a   :  { %2037 = vmatpush.bf16.msrb.mxu0 %v7151_v22 }
 0x34b   :  { %2162 = vmatpush.bf16.msrb.mxu1 %v5394_v24  ;;  %2190 = vmatpush.bf16.msrb.mxu3 %v7150_v1 }
 0x34c   :  { %2065 = vmatpush.bf16.msra.mxu2 %v7152_v9 }
 0x34e   :  { %2038 = vmatpush.bf16.msrb.mxu0 %v7155_v18 }
 0x34f   :  { %2163 = vmatpush.bf16.msrb.mxu1 %v7153_v36  ;;  %2191 = vmatpush.bf16.msrb.mxu3 %v7154_v44 }
 0x350   :  { %2066 = vmatpush.bf16.msra.mxu2 %v7156_v35 }
 0x352   :  { %2039 = vmatpush.bf16.msrb.mxu0 %v7159_v14 }
 0x353   :  { %2164 = vmatpush.bf16.msrb.mxu1 %v7157_v3  ;;  %2192 = vmatpush.bf16.msrb.mxu3 %v7158_v57 }
 0x354   :  { %2067 = vmatpush.bf16.msra.mxu2 %v7160_v25  ;;  %v7216_v25 = vld [vmem:[#allocation152_spill] sm:$0xff] }
 0x355   :  { %2040 = vmatmul.bf16.vlgmr.msrb.gmra.mxu0 %v1860_v63 }
 0x356   :  { %2146 = vmatpush.bf16.msra.mxu0 %v7161_v48 }
 0x357   :  { %2165 = vmatpush.bf16.msrb.mxu1 %v7163_v58  ;;  %2193 = vmatpush.bf16.msrb.mxu3 %v7164_v11 }
 0x358   :  { %2174 = vmatpush.bf16.msrb.mxu2 %v7162_v46  ;;  %v7215_v46 = vld [vmem:[#allocation27_spill] sm:$0xff] }
 0x359   :  { %2068 = vmatmul.bf16.vlgmr.msra.gmra.mxu2 %v1860_v63  ;;  %v7175_v63 = vld [vmem:[#allocation95_spill] sm:$0xff] }
 0x35a   :  { %2147 = vmatpush.bf16.msra.mxu0 %v7165_v43  ;;  %v7176_v43 = vld [vmem:[#allocation96_spill] sm:$0xff] }
 0x35b   :  { %2166 = vmatpush.bf16.msrb.mxu1 %v7167_v54  ;;  %2194 = vmatpush.bf16.msrb.mxu3 %v7168_v34  ;;  %v7178_v54 = vld [vmem:[#allocation122_spill] sm:$0xff]  ;;  %v7179_v34 = vld [vmem:[#allocation100_spill] sm:$0xff] }
 0x35c   :  { %2175 = vmatpush.bf16.msrb.mxu2 %v7166_v23  ;;  %v7177_v23 = vld [vmem:[#allocation121_spill] sm:$0xff] }
 0x35e   :  { %2148 = vmatpush.bf16.msra.mxu0 %v7169_v10  ;;  %v7180_v10 = vld [vmem:[#allocation101_spill] sm:$0xff] }
 0x35f   :  { %2167 = vmatpush.bf16.msrb.mxu1 %v7171_v42  ;;  %2195 = vmatpush.bf16.msrb.mxu3 %v7172_v49  ;;  %v7182_v42 = vld [vmem:[#allocation125_spill] sm:$0xff]  ;;  %v7183_v49 = vld [vmem:[#allocation104_spill] sm:$0xff] }
 0x360   :  { %2176 = vmatpush.bf16.msrb.mxu2 %v7170_v32  ;;  %v7181_v32 = vld [vmem:[#allocation124_spill] sm:$0xff] }
 0x362   :  { %2149 = vmatpush.bf16.msra.mxu0 %v7175_v63  ;;  %v7186_v63 = vld [vmem:[#allocation130_spill] sm:$0xff] }
 0x363   :  { %2216 = vmatpush.bf16.msra.mxu1 %v7173_v60  ;;  %2244 = vmatpush.bf16.msra.mxu3 %v7174_v13  ;;  %v7184_v60 = vld [vmem:[#allocation105_spill] sm:$0xff]  ;;  %v7185_v13 = vld [vmem:[#allocation128_spill] sm:$0xff] }
 0x364   :  { %2177 = vmatpush.bf16.msrb.mxu2 %v7176_v43  ;;  %v7187_v43 = vld [vmem:[#allocation109_spill] sm:$0xff] }
 0x366   :  { %2150 = vmatpush.bf16.msra.mxu0 %v7179_v34  ;;  %v7190_v34 = vld [vmem:[#allocation133_spill] sm:$0xff] }
 0x367   :  { %2217 = vmatpush.bf16.msra.mxu1 %v7177_v23  ;;  %2245 = vmatpush.bf16.msra.mxu3 %v7178_v54  ;;  %v7188_v23 = vld [vmem:[#allocation110_spill] sm:$0xff]  ;;  %v7189_v54 = vld [vmem:[#allocation132_spill] sm:$0xff] }
 0x368   :  { %2178 = vmatpush.bf16.msrb.mxu2 %v7180_v10  ;;  %v7191_v10 = vld [vmem:[#allocation113_spill] sm:$0xff] }
 0x36a   :  { %2151 = vmatpush.bf16.msra.mxu0 %v7183_v49  ;;  %v7194_v49 = vld [vmem:[#allocation144_spill] sm:$0xff] }
 0x36b   :  { %2218 = vmatpush.bf16.msra.mxu1 %v7181_v32  ;;  %2246 = vmatpush.bf16.msra.mxu3 %v7182_v42  ;;  %v7192_v32 = vld [vmem:[#allocation114_spill] sm:$0xff]  ;;  %v7193_v42 = vld [vmem:[#allocation85_spill] sm:$0xff] }
 0x36c   :  { %2179 = vmatpush.bf16.msrb.mxu2 %v7184_v60  ;;  %v7195_v60 = vld [vmem:[#allocation135_spill] sm:$0xff] }
 0x36e   :  { %2152 = vmatpush.bf16.msra.mxu0 %v7187_v43  ;;  %v7198_v43 = vld [vmem:[#allocation145_spill] sm:$0xff] }
 0x36f   :  { %2219 = vmatpush.bf16.msra.mxu1 %v7185_v13  ;;  %2247 = vmatpush.bf16.msra.mxu3 %v7186_v63  ;;  %v7196_v13 = vld [vmem:[#allocation136_spill] sm:$0xff]  ;;  %v7197_v63 = vld [vmem:[#allocation89_spill] sm:$0xff] }
 0x370   :  { %2180 = vmatpush.bf16.msrb.mxu2 %v7188_v23  ;;  %v7199_v23 = vld [vmem:[#allocation139_spill] sm:$0xff] }
 0x372   :  { %2153 = vmatpush.bf16.msra.mxu0 %v7191_v10  ;;  %v7202_v10 = vld [vmem:[#allocation146_spill] sm:$0xff] }
 0x373   :  { %2220 = vmatpush.bf16.msra.mxu1 %v7189_v54  ;;  %2248 = vmatpush.bf16.msra.mxu3 %v7190_v34  ;;  %v7200_v54 = vld [vmem:[#allocation140_spill] sm:$0xff]  ;;  %v7201_v34 = vld [vmem:[#allocation94_spill] sm:$0xff] }
 0x374   :  { %2181 = vmatpush.bf16.msrb.mxu2 %v7192_v32  ;;  %v7203_v32 = vld [vmem:[#allocation142_spill] sm:$0xff] }
 0x376   :  { %2202 = vmatpush.bf16.msrb.mxu0 %v7193_v42  ;;  %v7204_v42 = vld [vmem:[#allocation143_spill] sm:$0xff] }
 0x377   :  { %2221 = vmatpush.bf16.msra.mxu1 %v7195_v60  ;;  %2249 = vmatpush.bf16.msra.mxu3 %v7196_v13  ;;  %v7206_v60 = vld [vmem:[#allocation147_spill] sm:$0xff] }
 0x378   :  { %2230 = vmatpush.bf16.msra.mxu2 %v7194_v49  ;;  %v7205_v49 = vld [vmem:[#allocation98_spill] sm:$0xff]  ;;  %v7207_v13 = vld [vmem:[#allocation103_spill] sm:$0xff] }
 0x37a   :  { %2203 = vmatpush.bf16.msrb.mxu0 %v7197_v63  ;;  %v7208_v63 = vld [vmem:[#allocation148_spill] sm:$0xff] }
 0x37b   :  { %2222 = vmatpush.bf16.msra.mxu1 %v7199_v23  ;;  %2250 = vmatpush.bf16.msra.mxu3 %v7200_v54  ;;  %v7210_v23 = vld [vmem:[#allocation149_spill] sm:$0xff]  ;;  %v7211_v54 = vld [vmem:[#allocation112_spill] sm:$0xff] }
 0x37c   :  { %2231 = vmatpush.bf16.msra.mxu2 %v7198_v43  ;;  %v7209_v43 = vld [vmem:[#allocation106_spill] sm:$0xff] }
 0x37e   :  { %2204 = vmatpush.bf16.msrb.mxu0 %v7201_v34  ;;  %v7212_v34 = vld [vmem:[#allocation150_spill] sm:$0xff] }
 0x37f   :  { %2223 = vmatpush.bf16.msra.mxu1 %v7203_v32  ;;  %2251 = vmatpush.bf16.msra.mxu3 %v7204_v42  ;;  %v7214_v32 = vld [vmem:[#allocation151_spill] sm:$0xff] }
 0x380   :  { %2232 = vmatpush.bf16.msra.mxu2 %v7202_v10  ;;  %v7213_v10 = vld [vmem:[#allocation115_spill] sm:$0xff] }
 0x382   :  { %2205 = vmatpush.bf16.msrb.mxu0 %v7205_v49 }
 0x384   :  { %2233 = vmatpush.bf16.msra.mxu2 %v7206_v60 }
 0x386   :  { %2206 = vmatpush.bf16.msrb.mxu0 %v7207_v13 }
 0x388   :  { %2234 = vmatpush.bf16.msra.mxu2 %v7208_v63 }
 0x38a   :  { %2207 = vmatpush.bf16.msrb.mxu0 %v7209_v43 }
 0x38c   :  { %2235 = vmatpush.bf16.msra.mxu2 %v7210_v23 }
 0x38e   :  { %2208 = vmatpush.bf16.msrb.mxu0 %v7211_v54 }
 0x390   :  { %2236 = vmatpush.bf16.msra.mxu2 %v7212_v34 }
 0x392   :  { %2209 = vmatpush.bf16.msrb.mxu0 %v7213_v10 }
 0x394   :  { %2237 = vmatpush.bf16.msra.mxu2 %v7214_v32 }
 0x39e   :  { %v1891_v42 = vpop.f32.mrf.mxu1 }
 0x3a4   :  { %v1919_v11 = vpop.f32.mrf.mxu3 }
 0x3a6   :  { %v1893_v49 = vpop.f32.mrf.mxu1 }
 0x3ac   :  { %v1921_v13 = vpop.f32.mrf.mxu3 }
 0x3ae   :  { %v1947_v60 = vpop.f32.mrf.mxu1 }
 0x3b2   :  { %v1877_v58 = vpop.f32.mrf.mxu0 }
 0x3b3   :  { %v1878_v63 = vadd.f32 %v1877_v58, %v7215_v46 }
 0x3b4   :  { %v1975_v32 = vpop.f32.mrf.mxu3 }
 0x3b5   :  { %v1892_v48 = vadd.f32 %v1891_v42, %v1878_v63  ;;  %v7217_v63 = vld [vmem:[#allocation153_spill] sm:$0xff] }
 0x3b6   :  { %v1949_v54 = vpop.f32.mrf.mxu1 }
 0x3b7   :  { %v1980_v10 = vmul.f32 0.5, %v1892_v48 }
 0x3b8   :  { %v1905_v43 = vpop.f32.mrf.mxu2 }
 0x3b9   :  { %v1906_v23 = vadd.f32 %v1905_v43, %v7216_v25 }
 0x3ba   :  { %v1879_v14 = vpop.f32.mrf.mxu0 }
 0x3bb   :  { %v1920_v57 = vadd.f32 %v1919_v11, %v1906_v23  ;;  %v1880_v34 = vadd.f32 %v1879_v14, %v7215_v46 }
 0x3bc   :  { %v1977_v48 = vpop.f32.mrf.mxu3 }
 0x3bd   :  { %v1988_v3 = vmul.f32 0.5, %v1920_v57  ;;  %v1894_v35 = vadd.f32 %v1893_v49, %v1880_v34  ;;  %v7218_v57 = vld [vmem:[#allocation63_spill] sm:$0xff] }
 0x3bf   :  { %4478 = vtanh.f32 %v1988_v3  ;;  %v1981_v36 = vmul.f32 0.5, %v1894_v35  ;;  %v2055_v22 = vpop.f32.mrf.mxu1  ;;  %v415_v3 = vadd.f32 %v7218_v57, %v7138_v47 }
 0x3c0   :  { %4480 = vtanh.f32 %v1980_v10  ;;  %v1907_v18 = vpop.f32.mrf.mxu2 }
 0x3c1   :  { %v1908_v44 = vadd.f32 %v1907_v18, %v7216_v25  ;;  %4482 = vtanh.f32 %v1981_v36 }
 0x3c2   :  { %v1933_v58 = vpop.f32.mrf.mxu0 }
 0x3c3   :  { %v1922_v42 = vadd.f32 %v1921_v13, %v1908_v44  ;;  %v1934_v9 = vadd.f32 %v1933_v58, %v7217_v63  ;;  %v2089_v44 = vadd.f32 %v2055_v22, %v415_v3  ;;  %v7219_v22 = vld [vmem:[#allocation66_spill] sm:$0xff] }
 0x3c4   :  { %v417_v3 = vadd.f32 %v7219_v22, %v7138_v47  ;;  %v7222_v22 = vld [vmem:[#allocation59_spill] sm:$0xff] }
 0x3c5   :  { %v4479_v43 = vpop.eup %4478  ;;  %v1989_v1 = vmul.f32 0.5, %v1922_v42  ;;  %v1948_v11 = vadd.f32 %v1947_v60, %v1934_v9  ;;  %v2104_v25 = vmul.f32 0.5, %v2089_v44 }
 0x3c6   :  { %v4481_v23 = vpop.eup %4480  ;;  %v1992_v14 = vmul.f32 0.5, %v4479_v43 }
 0x3c7   :  { %4484 = vtanh.f32 %v1989_v1  ;;  %v1984_v18 = vmul.f32 0.5, %v4481_v23  ;;  %v4483_v9 = vpop.eup %4482  ;;  %v2057_v23 = vpop.f32.mrf.mxu1 }
 0x3c8   :  { %4486 = vtanh.f32 %v1948_v11  ;;  %v1961_v34 = vpop.f32.mrf.mxu2  ;;  %v1994_v49 = vadd.f32 0.5, %v1992_v14  ;;  %v1985_v14 = vmul.f32 0.5, %v4483_v9 }
 0x3c9   :  { %v1962_v35 = vadd.f32 %v1961_v34, %v7140_v55  ;;  %v1986_v36 = vadd.f32 0.5, %v1984_v18 }
 0x3ca   :  { %v1935_v10 = vpop.f32.mrf.mxu0  ;;  %v2006_v57 = vmul.f32 %v1994_v49, %v5946_v45  ;;  %v7220_v49 = vld [vmem:[#allocation35_spill] sm:$0xff] }
 0x3cb   :  { %v1976_v13 = vadd.f32 %v1975_v32, %v1962_v35  ;;  %v1936_v58 = vadd.f32 %v1935_v10, %v7217_v63  ;;  %v2093_v35 = vadd.f32 %v2057_v23, %v417_v3  ;;  %v7221_v23 = vld [vmem:[#allocation137_spill] sm:$0xff] }
 0x3cd   :  { %v4485_v60 = vpop.eup %4484  ;;  %v1998_v42 = vmul.f32 0.5, %v1976_v13  ;;  %v1950_v1 = vadd.f32 %v1949_v54, %v1936_v58  ;;  %v2083_v54 = vpop.f32.mrf.mxu3  ;;  %v2105_v9 = vmul.f32 0.5, %v2093_v35 }
 0x3ce   :  { %v4487_v43 = vpop.eup %4486  ;;  %v1993_v11 = vmul.f32 0.5, %v4485_v60  ;;  %v1987_v60 = vadd.f32 0.5, %v1985_v14  ;;  %v7225_v14 = vld [vmem:[#allocation37_spill] sm:$0xff] }
 0x3cf   :  { %v2008_v46 = vmul.f32 %v4487_v43, %v1986_v36  ;;  %4488 = vtanh.f32 %v1998_v42 }
 0x3d0   :  { %4490 = vtanh.f32 %v1950_v1  ;;  %v1963_v32 = vpop.f32.mrf.mxu2  ;;  %v1995_v10 = vadd.f32 0.5, %v1993_v11  ;;  %v513_v11 = vadd.f32 %v7222_v22, %v7221_v23 }
 0x3d1   :  { %v6080_v34 = vadd.f32 %v2008_v46, %v2006_v57  ;;  %v1964_v18 = vadd.f32 %v1963_v32, %v7140_v55  ;;  %4492 = vtanh.f32 %v2104_v25  ;;  %v7224_v32 = vld [vmem:[#allocation34_spill] sm:$0xff] }
 0x3d2   :  { %v2041_v44 = vpop.f32.mrf.mxu0  ;;  %v2007_v43 = vmul.f32 %v1995_v10, %v5957_v39  ;;  %v2091_v35 = vadd.f32 %v2083_v54, %v513_v11 }
 0x3d3   :  { %v1978_v45 = vadd.f32 %v1977_v48, %v1964_v18  ;;  %v2088_v13 = vadd.f32 %v2041_v44, %v7220_v49  ;;  %4494 = vtanh.f32 %v6080_v34  ;;  %v7223_v48 = vld [vmem:[#allocation64_spill] sm:$0xff]  ;;  %v368_v18 = vadd.f32 %v7225_v14, %v7224_v32 }
 0x3d4   :  { %v464_v3 = vadd.f32 %v7223_v48, %v5572_v61 }
 0x3d5   :  { %v4489_v58 = vpop.eup %4488  ;;  %v1999_v36 = vmul.f32 0.5, %v1978_v45  ;;  %v2096_v42 = vmul.f32 0.5, %v2088_v13 }
 0x3d6   :  { %v4491_v1 = vpop.eup %4490  ;;  %v2002_v46 = vmul.f32 0.5, %v4489_v58 }
 0x3d7   :  { %v2009_v57 = vmul.f32 %v4491_v1, %v1987_v60  ;;  %4496 = vtanh.f32 %v1999_v36  ;;  %v4493_v25 = vpop.eup %4492  ;;  %v2085_v36 = vpop.f32.mrf.mxu3 }
 0x3d8   :  { %4498 = vtanh.f32 %v2096_v42  ;;  %v2004_v49 = vadd.f32 0.5, %v2002_v46  ;;  %v2108_v58 = vmul.f32 0.5, %v4493_v25  ;;  %v7227_v42 = vld [vmem:[#allocation62_spill] sm:$0xff]  ;;  %v7228_v25 = vld [vmem:[#allocation67_spill] sm:$0xff] }
 0x3d9   :  { %v6092_v44 = vadd.f32 %v2009_v57, %v2007_v43  ;;  %4500 = vtanh.f32 %v2105_v9  ;;  %v4495_v13 = vpop.eup %4494  ;;  %v515_v22 = vadd.f32 %v7227_v42, %v7221_v23  ;;  %v2114_v57 = vmul.f32 0.5, %v2091_v35 }
 0x3da   :  { %v2043_v10 = vpop.f32.mrf.mxu0  ;;  %v2014_v14 = vmul.f32 %v4495_v13, %v2004_v49  ;;  %v2110_v9 = vadd.f32 0.5, %v2108_v58 }
 0x3db   :  { %7226 = vst [vmem:[#allocation39_spill] sm:$0xff] %v6092_v44  ;;  %4502 = vtanh.f32 %v6092_v44  ;;  %v2092_v60 = vadd.f32 %v2043_v10, %v368_v18  ;;  %v2095_v46 = vadd.f32 %v2085_v36, %v515_v22 }
 0x3dc   :  { %v2069_v45 = vpop.f32.mrf.mxu2  ;;  %v2016_v42 = vpack.c.bf16 %v2014_v14, %v2014_v14  ;;  %v2122_v35 = vmul.f32 %v2110_v9, %v5965_v53 }
 0x3dd   :  { %v2090_v39 = vadd.f32 %v2069_v45, %v464_v3  ;;  %v4497_v1 = vpop.eup %4496  ;;  %v2097_v48 = vmul.f32 0.5, %v2092_v60  ;;  %v466_v45 = vadd.f32 %v7228_v25, %v5572_v61  ;;  %v2115_v13 = vmul.f32 0.5, %v2095_v46 }
 0x3de   :  { %v4499_v43 = vpop.eup %4498  ;;  %v2003_v54 = vmul.f32 0.5, %v4497_v1 }
 0x3df   :  { %4504 = vtanh.f32 %v2090_v39  ;;  %v2100_v11 = vmul.f32 0.5, %v4499_v43  ;;  %v4501_v3 = vpop.eup %4500  ;;  %v2142_v43 = vunpack.c.l.b16 %v2016_v42 }
 0x3e0   :  { %4506 = vtanh.f32 %v2097_v48  ;;  %v2005_v18 = vadd.f32 0.5, %v2003_v54  ;;  %v2109_v49 = vmul.f32 0.5, %v4501_v3 }
 0x3e1   :  { %v4503_v10 = vpop.eup %4502  ;;  %v2102_v39 = vadd.f32 0.5, %v2100_v11  ;;  %4508 = vtanh.f32 %v2114_v57 }
 0x3e2   :  { %v2015_v60 = vmul.f32 %v4503_v10, %v2005_v18  ;;  %v2111_v25 = vadd.f32 0.5, %v2109_v49 }
 0x3e4   :  { %v2071_v32 = vpop.f32.mrf.mxu2  ;;  %v2017_v36 = vpack.c.bf16 %v2015_v60, %v2015_v60  ;;  %v4333_v1 = vpack.c.bf16 %v2015_v60, %v2014_v14 }
 0x3e5   :  { %v4505_v44 = vpop.eup %4504  ;;  %v2094_v23 = vadd.f32 %v2071_v32, %v466_v45 }
 0x3e6   :  { %v2124_v58 = vmul.f32 %v4505_v44, %v2102_v39  ;;  %v4507_v22 = vpop.eup %4506  ;;  %4334 = vst [vmem:[#allocation3 + $0x18] sm:$0xff] %v4333_v1   ;;  %v2143_v54 = vunpack.c.l.b16 %v2017_v36  ;;  %v2123_v44 = vmul.f32 %v2111_v25, %v5971_v33  ;;  %v7229_v1 = vld [vmem:[#allocation123_spill] sm:$0xff] }
 0x3e7   :  { %4510 = vtanh.f32 %v2094_v23  ;;  %v2101_v11 = vmul.f32 0.5, %v4507_v22  ;;  %v4509_v57 = vpop.eup %4508  ;;  %v7230_v22 = vld [vmem:[#allocation28_spill] sm:$0xff]  ;;  %v7234_v25 = vld [vmem:[#allocation31_spill] sm:$0xff] }
 0x3e8   :  { %v6100_v48 = vadd.f32 %v2124_v58, %v2122_v35  ;;  %4512 = vtanh.f32 %v2115_v13  ;;  %v2144_v32 = vpack.c.b16 %v2143_v54, %v2142_v43  ;;  %v2118_v14 = vmul.f32 0.5, %v4509_v57  ;;  %v7231_v43 = vld [vmem:[#allocation29_spill] sm:$0xff]  ;;  %v7232_v54 = vld [vmem:[#allocation71_spill] sm:$0xff]  ;;  %v7235_v57 = vld [vmem:[#allocation30_spill] sm:$0xff] }
 0x3e9   :  { %v2103_v18 = vadd.f32 0.5, %v2101_v11  ;;  %v7233_v11 = vld [vmem:[#allocation127_spill] sm:$0xff] }
 0x3ea   :  { %4514 = vtanh.f32 %v6100_v48  ;;  %2168 = vmatmul.bf16.vlgmr.msrb.gmra.mxu1 %v2144_v32  ;;  %2196 = vmatmul.bf16.vlgmr.msrb.gmra.mxu3 %v2144_v32  ;;  %v2120_v45 = vadd.f32 0.5, %v2118_v14  ;;  %v7241_v14 = vld [vmem:[#allocation83_spill] sm:$0xff] }
 0x3eb   :  { %2324 = vmatpush.bf16.msrb.mxu1 %v5097_v50  ;;  %2352 = vmatpush.bf16.msrb.mxu3 %v5224_v16 }
 0x3ed   :  { %v4511_v53 = vpop.eup %4510 }
 0x3ee   :  { %v2125_v23 = vmul.f32 %v4511_v53, %v2103_v18  ;;  %v4513_v9 = vpop.eup %4512  ;;  %v7236_v18 = vld [vmem:[#allocation74_spill] sm:$0xff]  ;;  %v7238_v53 = vld [vmem:[#allocation33_spill] sm:$0xff] }
 0x3ef   :  { %2325 = vmatpush.bf16.msrb.mxu1 %v5127_v2  ;;  %2353 = vmatpush.bf16.msrb.mxu3 %v5237_v29  ;;  %v2119_v10 = vmul.f32 0.5, %v4513_v9  ;;  %v7242_v9 = vld [vmem:[#allocation76_spill] sm:$0xff] }
 0x3f0   :  { %v6106_v46 = vadd.f32 %v2125_v23, %v2123_v44  ;;  %v4515_v3 = vpop.eup %4514  ;;  %v7239_v44 = vld [vmem:[#allocation32_spill] sm:$0xff]  ;;  %v7240_v23 = vld [vmem:[#allocation81_spill] sm:$0xff] }
 0x3f1   :  { %v2130_v39 = vmul.f32 %v4515_v3, %v2120_v45  ;;  %v2121_v33 = vadd.f32 0.5, %v2119_v10  ;;  %v7243_v3 = vld [vmem:[#allocation134_spill] sm:$0xff]  ;;  %v7244_v45 = vld [vmem:[#allocation87_spill] sm:$0xff]  ;;  %v7245_v10 = vld [vmem:[#allocation88_spill] sm:$0xff] }
 0x3f2   :  { %4516 = vtanh.f32 %v6106_v46 }
 0x3f3   :  { %2326 = vmatpush.bf16.msrb.mxu1 %v5142_v12  ;;  %2354 = vmatpush.bf16.msrb.mxu3 %v5245_v38  ;;  %v2132_v60 = vpack.c.bf16 %v2130_v39, %v2130_v39  ;;  %v7246_v39 = vld [vmem:[#allocation79_spill] sm:$0xff] }
 0x3f5   :  { %v2136_v13 = vunpack.c.l.b16 %v2132_v60  ;;  %v7249_v60 = vld [vmem:[#allocation92_spill] sm:$0xff] }
 0x3f7   :  { %2327 = vmatpush.bf16.msrb.mxu1 %v5157_v21  ;;  %2355 = vmatpush.bf16.msrb.mxu3 %v5254_v56 }
 0x3f8   :  { %v4517_v42 = vpop.eup %4516 }
 0x3f9   :  { %v2131_v35 = vmul.f32 %v4517_v42, %v2121_v33  ;;  %v7247_v33 = vld [vmem:[#allocation138_spill] sm:$0xff]  ;;  %v7248_v42 = vld [vmem:[#allocation91_spill] sm:$0xff] }
 0x3fa   :  { %2224 = vmatmul.bf16.vlgmr.msra.gmra.mxu1 %v2144_v32  ;;  %2252 = vmatmul.bf16.vlgmr.msra.gmra.mxu3 %v2144_v32  ;;  %v7237_v32 = vld [vmem:[#allocation131_spill] sm:$0xff] }
 0x3fb   :  { %v2133_v49 = vpack.c.bf16 %v2131_v35, %v2131_v35  ;;  %2328 = vmatpush.bf16.msrb.mxu1 %v5172_v31  ;;  %2356 = vmatpush.bf16.msrb.mxu3 %v5265_v4  ;;  %v7250_v35 = vld [vmem:[#allocation82_spill] sm:$0xff] }
 0x3fd   :  { %v2137_v58 = vunpack.c.l.b16 %v2133_v49  ;;  %v7251_v49 = vld [vmem:[#allocation141_spill] sm:$0xff] }
 0x3ff   :  { %v2138_v36 = vpack.c.b16 %v2137_v58, %v2136_v13  ;;  %2329 = vmatpush.bf16.msrb.mxu1 %v5188_v40  ;;  %2357 = vmatpush.bf16.msrb.mxu3 %v5273_v20  ;;  %v7252_v13 = vld [vmem:[#allocation116_spill] sm:$0xff]  ;;  %v7253_v58 = vld [vmem:[#allocation118_spill] sm:$0xff] }
 0x401   :  { %2154 = vmatmul.bf16.vlgmr.msra.gmra.mxu0 %v2138_v36  ;;  %2182 = vmatmul.bf16.vlgmr.msrb.gmra.mxu2 %v2138_v36 }
 0x402   :  { %2310 = vmatpush.bf16.msra.mxu0 %v7073_v52  ;;  %2338 = vmatpush.bf16.msrb.mxu2 %v5125_v62 }
 0x403   :  { %2330 = vmatpush.bf16.msrb.mxu1 %v5213_v6  ;;  %2358 = vmatpush.bf16.msrb.mxu3 %v5281_v41 }
 0x406   :  { %2311 = vmatpush.bf16.msra.mxu0 %v7074_v0  ;;  %2339 = vmatpush.bf16.msrb.mxu2 %v5140_v8 }
 0x407   :  { %2331 = vmatpush.bf16.msrb.mxu1 %v5252_v51  ;;  %2359 = vmatpush.bf16.msrb.mxu3 %v5294_v7 }
 0x40a   :  { %2312 = vmatpush.bf16.msra.mxu0 %v7075_v30  ;;  %2340 = vmatpush.bf16.msrb.mxu2 %v5155_v17 }
 0x40b   :  { %2438 = vmatpush.bf16.msra.mxu1 %v5380_v59  ;;  %2466 = vmatpush.bf16.msra.mxu3 %v5533_v5 }
 0x40c   :  { %2332 = vmatmul.bf16.vlgmr.msrb.gmra.mxu1 %v2138_v36  ;;  %2360 = vmatmul.bf16.vlgmr.msrb.gmra.mxu3 %v2138_v36 }
 0x40e   :  { %2313 = vmatpush.bf16.msra.mxu0 %v7076_v37  ;;  %2341 = vmatpush.bf16.msrb.mxu2 %v5170_v28 }
 0x40f   :  { %2439 = vmatpush.bf16.msra.mxu1 %v5385_v19  ;;  %2467 = vmatpush.bf16.msra.mxu3 %v5551_v26 }
 0x411   :  { %2210 = vmatmul.bf16.vlgmr.msrb.gmra.mxu0 %v2138_v36  ;;  %2238 = vmatmul.bf16.vlgmr.msra.gmra.mxu2 %v2138_v36 }
 0x412   :  { %2314 = vmatpush.bf16.msra.mxu0 %v7077_v15  ;;  %2342 = vmatpush.bf16.msrb.mxu2 %v7025_v27 }
 0x413   :  { %2440 = vmatpush.bf16.msra.mxu1 %v5394_v24  ;;  %2468 = vmatpush.bf16.msra.mxu3 %v7229_v1 }
 0x416   :  { %2315 = vmatpush.bf16.msra.mxu0 %v7230_v22  ;;  %2343 = vmatpush.bf16.msrb.mxu2 %v7231_v43 }
 0x417   :  { %2441 = vmatpush.bf16.msra.mxu1 %v7232_v54  ;;  %2469 = vmatpush.bf16.msra.mxu3 %v7233_v11 }
 0x41a   :  { %2316 = vmatpush.bf16.msra.mxu0 %v7234_v25  ;;  %2344 = vmatpush.bf16.msrb.mxu2 %v7235_v57 }
 0x41b   :  { %2442 = vmatpush.bf16.msra.mxu1 %v7236_v18  ;;  %2470 = vmatpush.bf16.msra.mxu3 %v7237_v32 }
 0x41e   :  { %2317 = vmatpush.bf16.msra.mxu0 %v7238_v53  ;;  %2345 = vmatpush.bf16.msrb.mxu2 %v7239_v44  ;;  %v7295_v44 = vld [vmem:[#allocation152_spill] sm:$0xff] }
 0x41f   :  { %2443 = vmatpush.bf16.msra.mxu1 %v7242_v9  ;;  %2471 = vmatpush.bf16.msra.mxu3 %v7243_v3 }
 0x421   :  { %2318 = vmatmul.bf16.vlgmr.msra.gmra.mxu0 %v2138_v36  ;;  %2346 = vmatmul.bf16.vlgmr.msrb.gmra.mxu2 %v2138_v36  ;;  %v7254_v36 = vld [vmem:[#allocation95_spill] sm:$0xff] }
 0x422   :  { %2424 = vmatpush.bf16.msrb.mxu0 %v7240_v23  ;;  %2452 = vmatpush.bf16.msra.mxu2 %v7241_v14  ;;  %v7294_v14 = vld [vmem:[#allocation27_spill] sm:$0xff] }
 0x423   :  { %2444 = vmatpush.bf16.msra.mxu1 %v7246_v39  ;;  %2472 = vmatpush.bf16.msra.mxu3 %v7247_v33  ;;  %v7257_v39 = vld [vmem:[#allocation122_spill] sm:$0xff]  ;;  %v7258_v33 = vld [vmem:[#allocation100_spill] sm:$0xff] }
 0x426   :  { %2425 = vmatpush.bf16.msrb.mxu0 %v7244_v45  ;;  %2453 = vmatpush.bf16.msra.mxu2 %v7245_v10  ;;  %v7255_v45 = vld [vmem:[#allocation96_spill] sm:$0xff]  ;;  %v7256_v10 = vld [vmem:[#allocation121_spill] sm:$0xff] }
 0x427   :  { %2445 = vmatpush.bf16.msra.mxu1 %v7250_v35  ;;  %2473 = vmatpush.bf16.msra.mxu3 %v7251_v49  ;;  %v7261_v35 = vld [vmem:[#allocation125_spill] sm:$0xff]  ;;  %v7262_v49 = vld [vmem:[#allocation104_spill] sm:$0xff] }
 0x42a   :  { %2426 = vmatpush.bf16.msrb.mxu0 %v7248_v42  ;;  %2454 = vmatpush.bf16.msra.mxu2 %v7249_v60  ;;  %v7259_v42 = vld [vmem:[#allocation101_spill] sm:$0xff]  ;;  %v7260_v60 = vld [vmem:[#allocation124_spill] sm:$0xff] }
 0x42b   :  { %2494 = vmatpush.bf16.msrb.mxu1 %v7252_v13  ;;  %2522 = vmatpush.bf16.msrb.mxu3 %v7253_v58  ;;  %v7263_v13 = vld [vmem:[#allocation105_spill] sm:$0xff]  ;;  %v7264_v58 = vld [vmem:[#allocation128_spill] sm:$0xff] }
 0x42e   :  { %2427 = vmatpush.bf16.msrb.mxu0 %v7254_v36  ;;  %2455 = vmatpush.bf16.msra.mxu2 %v7255_v45  ;;  %v7265_v36 = vld [vmem:[#allocation130_spill] sm:$0xff]  ;;  %v7266_v45 = vld [vmem:[#allocation109_spill] sm:$0xff] }
 0x42f   :  { %2495 = vmatpush.bf16.msrb.mxu1 %v7256_v10  ;;  %2523 = vmatpush.bf16.msrb.mxu3 %v7257_v39  ;;  %v7267_v10 = vld [vmem:[#allocation110_spill] sm:$0xff]  ;;  %v7268_v39 = vld [vmem:[#allocation132_spill] sm:$0xff] }
 0x432   :  { %2428 = vmatpush.bf16.msrb.mxu0 %v7258_v33  ;;  %2456 = vmatpush.bf16.msra.mxu2 %v7259_v42  ;;  %v7269_v33 = vld [vmem:[#allocation133_spill] sm:$0xff] }
 0x433   :  { %2496 = vmatpush.bf16.msrb.mxu1 %v7260_v60  ;;  %2524 = vmatpush.bf16.msrb.mxu3 %v7261_v35  ;;  %v7270_v42 = vld [vmem:[#allocation113_spill] sm:$0xff]  ;;  %v7271_v60 = vld [vmem:[#allocation114_spill] sm:$0xff] }
 0x434   :  { %v7272_v35 = vld [vmem:[#allocation85_spill] sm:$0xff] }
 0x436   :  { %2429 = vmatpush.bf16.msrb.mxu0 %v7262_v49  ;;  %2457 = vmatpush.bf16.msra.mxu2 %v7263_v13  ;;  %v7273_v49 = vld [vmem:[#allocation144_spill] sm:$0xff]  ;;  %v7274_v13 = vld [vmem:[#allocation135_spill] sm:$0xff] }
 0x437   :  { %2497 = vmatpush.bf16.msrb.mxu1 %v7264_v58  ;;  %2525 = vmatpush.bf16.msrb.mxu3 %v7265_v36  ;;  %v7275_v58 = vld [vmem:[#allocation136_spill] sm:$0xff]  ;;  %v7276_v36 = vld [vmem:[#allocation89_spill] sm:$0xff] }
 0x43a   :  { %2430 = vmatpush.bf16.msrb.mxu0 %v7266_v45  ;;  %2458 = vmatpush.bf16.msra.mxu2 %v7267_v10  ;;  %v7277_v45 = vld [vmem:[#allocation145_spill] sm:$0xff]  ;;  %v7278_v10 = vld [vmem:[#allocation139_spill] sm:$0xff] }
 0x43b   :  { %2498 = vmatpush.bf16.msrb.mxu1 %v7268_v39  ;;  %2526 = vmatpush.bf16.msrb.mxu3 %v7269_v33  ;;  %v7279_v39 = vld [vmem:[#allocation140_spill] sm:$0xff]  ;;  %v7280_v33 = vld [vmem:[#allocation94_spill] sm:$0xff] }
 0x43e   :  { %2431 = vmatpush.bf16.msrb.mxu0 %v7270_v42  ;;  %2459 = vmatpush.bf16.msra.mxu2 %v7271_v60  ;;  %v7281_v42 = vld [vmem:[#allocation146_spill] sm:$0xff] }
 0x43f   :  { %2499 = vmatpush.bf16.msrb.mxu1 %v7274_v13  ;;  %2527 = vmatpush.bf16.msrb.mxu3 %v7275_v58  ;;  %v7282_v60 = vld [vmem:[#allocation142_spill] sm:$0xff]  ;;  %v7285_v13 = vld [vmem:[#allocation147_spill] sm:$0xff] }
 0x440   :  { %v7286_v58 = vld [vmem:[#allocation103_spill] sm:$0xff] }
 0x442   :  { %2480 = vmatpush.bf16.msra.mxu0 %v7272_v35  ;;  %2508 = vmatpush.bf16.msrb.mxu2 %v7273_v49  ;;  %v7283_v35 = vld [vmem:[#allocation143_spill] sm:$0xff]  ;;  %v7284_v49 = vld [vmem:[#allocation98_spill] sm:$0xff] }
 0x443   :  { %2500 = vmatpush.bf16.msrb.mxu1 %v7278_v10  ;;  %2528 = vmatpush.bf16.msrb.mxu3 %v7279_v39  ;;  %v7289_v10 = vld [vmem:[#allocation149_spill] sm:$0xff]  ;;  %v7290_v39 = vld [vmem:[#allocation112_spill] sm:$0xff] }
 0x446   :  { %2481 = vmatpush.bf16.msra.mxu0 %v7276_v36  ;;  %2509 = vmatpush.bf16.msrb.mxu2 %v7277_v45  ;;  %v7287_v36 = vld [vmem:[#allocation148_spill] sm:$0xff]  ;;  %v7288_v45 = vld [vmem:[#allocation106_spill] sm:$0xff] }
 0x447   :  { %2501 = vmatpush.bf16.msrb.mxu1 %v7282_v60  ;;  %2529 = vmatpush.bf16.msrb.mxu3 %v7283_v35  ;;  %v7293_v60 = vld [vmem:[#allocation151_spill] sm:$0xff] }
 0x44a   :  { %2482 = vmatpush.bf16.msra.mxu0 %v7280_v33  ;;  %2510 = vmatpush.bf16.msrb.mxu2 %v7281_v42  ;;  %v7291_v33 = vld [vmem:[#allocation150_spill] sm:$0xff]  ;;  %v7292_v42 = vld [vmem:[#allocation115_spill] sm:$0xff] }
 0x44e   :  { %2483 = vmatpush.bf16.msra.mxu0 %v7284_v49  ;;  %2511 = vmatpush.bf16.msrb.mxu2 %v7285_v13 }
 0x452   :  { %2484 = vmatpush.bf16.msra.mxu0 %v7286_v58  ;;  %2512 = vmatpush.bf16.msrb.mxu2 %v7287_v36 }
 0x456   :  { %2485 = vmatpush.bf16.msra.mxu0 %v7288_v45  ;;  %2513 = vmatpush.bf16.msrb.mxu2 %v7289_v10 }
 0x45a   :  { %2486 = vmatpush.bf16.msra.mxu0 %v7290_v39  ;;  %2514 = vmatpush.bf16.msrb.mxu2 %v7291_v33 }
 0x45e   :  { %2487 = vmatpush.bf16.msra.mxu0 %v7292_v42  ;;  %2515 = vmatpush.bf16.msrb.mxu2 %v7293_v60 }
 0x467   :  { %v2169_v35 = vpop.f32.mrf.mxu1 }
 0x46d   :  { %v2197_v3 = vpop.f32.mrf.mxu3 }
 0x46f   :  { %v2171_v49 = vpop.f32.mrf.mxu1 }
 0x475   :  { %v2199_v58 = vpop.f32.mrf.mxu3 }
 0x477   :  { %v2225_v13 = vpop.f32.mrf.mxu1 }
 0x47d   :  { %v2253_v60 = vpop.f32.mrf.mxu3 }
 0x47e   :  { %v2155_v9 = vpop.f32.mrf.mxu0 }
 0x47f   :  { %v2156_v36 = vadd.f32 %v2155_v9, %v7294_v14  ;;  %v2227_v39 = vpop.f32.mrf.mxu1 }
 0x481   :  { %v2170_v23 = vadd.f32 %v2169_v35, %v2156_v36 }
 0x483   :  { %v2258_v42 = vmul.f32 0.5, %v2170_v23 }
 0x484   :  { %v2183_v45 = vpop.f32.mrf.mxu2 }
 0x485   :  { %v2184_v10 = vadd.f32 %v2183_v45, %v7295_v44  ;;  %v2255_v23 = vpop.f32.mrf.mxu3 }
 0x486   :  { %v2157_v53 = vpop.f32.mrf.mxu0 }
 0x487   :  { %v2198_v32 = vadd.f32 %v2197_v3, %v2184_v10  ;;  %v2158_v33 = vadd.f32 %v2157_v53, %v7294_v14 }
 0x489   :  { %v2266_v18 = vmul.f32 0.5, %v2198_v32  ;;  %v2172_v57 = vadd.f32 %v2171_v49, %v2158_v33  ;;  %v2333_v43 = vpop.f32.mrf.mxu1  ;;  %v7296_v32 = vld [vmem:[#allocation69_spill] sm:$0xff] }
 0x48b   :  { %4518 = vtanh.f32 %v2266_v18  ;;  %v2259_v54 = vmul.f32 0.5, %v2172_v57  ;;  %v420_v18 = vadd.f32 %v7296_v32, %v7138_v47 }
 0x48c   :  { %4520 = vtanh.f32 %v2258_v42  ;;  %v2185_v25 = vpop.f32.mrf.mxu2 }
 0x48d   :  { %v2186_v11 = vadd.f32 %v2185_v25, %v7295_v44  ;;  %4522 = vtanh.f32 %v2259_v54 }
 0x48e   :  { %v2211_v9 = vpop.f32.mrf.mxu0 }
 0x48f   :  { %v2200_v35 = vadd.f32 %v2199_v58, %v2186_v11  ;;  %v2212_v36 = vadd.f32 %v2211_v9, %v7217_v63  ;;  %v2367_v11 = vadd.f32 %v2333_v43, %v420_v18  ;;  %v7297_v43 = vld [vmem:[#allocation73_spill] sm:$0xff] }
 0x490   :  { %v422_v18 = vadd.f32 %v7297_v43, %v7138_v47 }
 0x491   :  { %v4519_v45 = vpop.eup %4518  ;;  %v2267_v22 = vmul.f32 0.5, %v2200_v35  ;;  %v2226_v3 = vadd.f32 %v2225_v13, %v2212_v36  ;;  %v2382_v44 = vmul.f32 0.5, %v2367_v11 }
 0x492   :  { %v4521_v10 = vpop.eup %4520  ;;  %v2270_v53 = vmul.f32 0.5, %v4519_v45 }
 0x493   :  { %4524 = vtanh.f32 %v2267_v22  ;;  %v2262_v25 = vmul.f32 0.5, %v4521_v10  ;;  %v4523_v13 = vpop.eup %4522  ;;  %v2335_v10 = vpop.f32.mrf.mxu1 }
 0x494   :  { %4526 = vtanh.f32 %v2226_v3  ;;  %v2239_v33 = vpop.f32.mrf.mxu2  ;;  %v2272_v49 = vadd.f32 0.5, %v2270_v53  ;;  %v2263_v53 = vmul.f32 0.5, %v4523_v13 }
 0x495   :  { %v2240_v57 = vadd.f32 %v2239_v33, %v7140_v55  ;;  %v2264_v54 = vadd.f32 0.5, %v2262_v25 }
 0x496   :  { %v2213_v42 = vpop.f32.mrf.mxu0  ;;  %v2284_v32 = vmul.f32 %v2272_v49, %v6080_v34  ;;  %v7299_v49 = vld [vmem:[#allocation40_spill] sm:$0xff] }
 0x497   :  { %v2254_v58 = vadd.f32 %v2253_v60, %v2240_v57  ;;  %v2214_v9 = vadd.f32 %v2213_v42, %v7217_v63  ;;  %v2371_v57 = vadd.f32 %v2335_v10, %v422_v18  ;;  %v7301_v10 = vld [vmem:[#allocation137_spill] sm:$0xff] }
 0x498   :  { %v7302_v18 = vld [vmem:[#allocation65_spill] sm:$0xff] }
 0x499   :  { %v4525_v35 = vpop.eup %4524  ;;  %v2276_v36 = vmul.f32 0.5, %v2254_v58  ;;  %v2228_v22 = vadd.f32 %v2227_v39, %v2214_v9  ;;  %v2361_v39 = vpop.f32.mrf.mxu3  ;;  %v2383_v13 = vmul.f32 0.5, %v2371_v57 }
 0x49a   :  { %v4527_v45 = vpop.eup %4526  ;;  %v2271_v3 = vmul.f32 0.5, %v4525_v35  ;;  %v2265_v35 = vadd.f32 0.5, %v2263_v53  ;;  %v7304_v53 = vld [vmem:[#allocation34_spill] sm:$0xff] }
 0x49b   :  { %v2286_v14 = vmul.f32 %v4527_v45, %v2264_v54  ;;  %4528 = vtanh.f32 %v2276_v36  ;;  %v7300_v45 = vld [vmem:[#allocation39_spill] sm:$0xff] }
 0x49c   :  { %4530 = vtanh.f32 %v2228_v22  ;;  %v2241_v60 = vpop.f32.mrf.mxu2  ;;  %v2273_v42 = vadd.f32 0.5, %v2271_v3  ;;  %v518_v3 = vadd.f32 %v7302_v18, %v7301_v10 }
 0x49d   :  { %v6215_v33 = vadd.f32 %v2286_v14, %v2284_v32  ;;  %v2242_v25 = vadd.f32 %v2241_v60, %v7140_v55  ;;  %4532 = vtanh.f32 %v2382_v44 }
 0x49e   :  { %v2319_v11 = vpop.f32.mrf.mxu0  ;;  %v2285_v32 = vmul.f32 %v2273_v42, %v7300_v45  ;;  %v2369_v57 = vadd.f32 %v2361_v39, %v518_v3 }
 0x49f   :  { %7298 = vst [vmem:[#allocation54_spill] sm:$0xff] %v6215_v33  ;;  %v2256_v34 = vadd.f32 %v2255_v23, %v2242_v25  ;;  %v2366_v58 = vadd.f32 %v2319_v11, %v7299_v49  ;;  %4534 = vtanh.f32 %v6215_v33  ;;  %v7303_v23 = vld [vmem:[#allocation70_spill] sm:$0xff]  ;;  %v7305_v25 = vld [vmem:[#allocation43_spill] sm:$0xff] }
 0x4a0   :  { %v469_v60 = vadd.f32 %v7303_v23, %v5572_v61  ;;  %v373_v11 = vadd.f32 %v7305_v25, %v7304_v53 }
 0x4a1   :  { %v4529_v9 = vpop.eup %4528  ;;  %v2277_v54 = vmul.f32 0.5, %v2256_v34  ;;  %v2374_v36 = vmul.f32 0.5, %v2366_v58  ;;  %v2363_v45 = vpop.f32.mrf.mxu3 }
 0x4a2   :  { %v4531_v22 = vpop.eup %4530  ;;  %v2280_v14 = vmul.f32 0.5, %v4529_v9 }
 0x4a3   :  { %v2287_v43 = vmul.f32 %v4531_v22, %v2265_v35  ;;  %4536 = vtanh.f32 %v2277_v54  ;;  %v4533_v44 = vpop.eup %4532 }
 0x4a4   :  { %4538 = vtanh.f32 %v2374_v36  ;;  %v2347_v49 = vpop.f32.mrf.mxu2  ;;  %v2282_v58 = vadd.f32 0.5, %v2280_v14  ;;  %v2386_v54 = vmul.f32 0.5, %v4533_v44  ;;  %v7307_v36 = vld [vmem:[#allocation68_spill] sm:$0xff]  ;;  %v7308_v44 = vld [vmem:[#allocation75_spill] sm:$0xff] }
 0x4a5   :  { %v6227_v34 = vadd.f32 %v2287_v43, %v2285_v32  ;;  %4540 = vtanh.f32 %v2383_v13  ;;  %v2368_v42 = vadd.f32 %v2347_v49, %v469_v60  ;;  %v4535_v35 = vpop.eup %4534  ;;  %v520_v23 = vadd.f32 %v7307_v36, %v7301_v10 }
 0x4a6   :  { %v2321_v9 = vpop.f32.mrf.mxu0  ;;  %v2392_v43 = vmul.f32 0.5, %v2369_v57  ;;  %v2292_v53 = vmul.f32 %v4535_v35, %v2282_v58  ;;  %v2388_v13 = vadd.f32 0.5, %v2386_v54  ;;  %v471_v49 = vadd.f32 %v7308_v44, %v5572_v61 }
 0x4a7   :  { %7306 = vst [vmem:[#allocation42_spill] sm:$0xff] %v6227_v34  ;;  %4542 = vtanh.f32 %v6227_v34  ;;  %v2370_v22 = vadd.f32 %v2321_v9, %v373_v11  ;;  %v2373_v14 = vadd.f32 %v2363_v45, %v520_v23 }
 0x4a8   :  { %4544 = vtanh.f32 %v2368_v42  ;;  %v2294_v36 = vpack.c.bf16 %v2292_v53, %v2292_v53  ;;  %v2400_v57 = vmul.f32 %v2388_v13, %v6100_v48 }
 0x4a9   :  { %v4537_v18 = vpop.eup %4536  ;;  %v2375_v25 = vmul.f32 0.5, %v2370_v22  ;;  %v2393_v35 = vmul.f32 0.5, %v2373_v14 }
 0x4aa   :  { %v4539_v32 = vpop.eup %4538  ;;  %v2281_v39 = vmul.f32 0.5, %v4537_v18 }
 0x4ab   :  { %v2378_v3 = vmul.f32 0.5, %v4539_v32  ;;  %4546 = vtanh.f32 %v2375_v25  ;;  %v4541_v60 = vpop.eup %4540  ;;  %v2420_v32 = vunpack.c.l.b16 %v2294_v36 }
 0x4ac   :  { %v2283_v11 = vadd.f32 0.5, %v2281_v39  ;;  %v2349_v34 = vpop.f32.mrf.mxu2  ;;  %4548 = vtanh.f32 %v2392_v43  ;;  %v2387_v58 = vmul.f32 0.5, %v4541_v60 }
 0x4ad   :  { %v4543_v9 = vpop.eup %4542  ;;  %v2380_v42 = vadd.f32 0.5, %v2378_v3  ;;  %v2372_v10 = vadd.f32 %v2349_v34, %v471_v49 }
 0x4ae   :  { %v4545_v33 = vpop.eup %4544  ;;  %v2293_v22 = vmul.f32 %v4543_v9, %v2283_v11  ;;  %v2389_v44 = vadd.f32 0.5, %v2387_v58 }
 0x4af   :  { %v2402_v54 = vmul.f32 %v4545_v33, %v2380_v42  ;;  %4550 = vtanh.f32 %v2372_v10 }
 0x4b0   :  { %v2295_v45 = vpack.c.bf16 %v2293_v22, %v2293_v22  ;;  %v4338_v18 = vpack.c.bf16 %v2293_v22, %v2292_v53  ;;  %4552 = vtanh.f32 %v2393_v35  ;;  %v2401_v33 = vmul.f32 %v2389_v44, %v6106_v46  ;;  %v7314_v44 = vld [vmem:[#allocation30_spill] sm:$0xff] }
 0x4b1   :  { %v4547_v23 = vpop.eup %4546  ;;  %v6235_v25 = vadd.f32 %v2402_v54, %v2400_v57 }
 0x4b2   :  { %4339 = vst [vmem:[#allocation3 + $0x10] sm:$0xff] %v4338_v18   ;;  %v2421_v39 = vunpack.c.l.b16 %v2295_v45  ;;  %v2379_v3 = vmul.f32 0.5, %v4547_v23  ;;  %v4549_v43 = vpop.eup %4548  ;;  %v7309_v18 = vld [vmem:[#allocation28_spill] sm:$0xff]  ;;  %v7310_v23 = vld [vmem:[#allocation29_spill] sm:$0xff] }
 0x4b3   :  { %4554 = vtanh.f32 %v6235_v25  ;;  %v2396_v53 = vmul.f32 0.5, %v4549_v43  ;;  %v7315_v43 = vld [vmem:[#allocation74_spill] sm:$0xff] }
 0x4b4   :  { %v2381_v11 = vadd.f32 0.5, %v2379_v3  ;;  %v2422_v34 = vpack.c.b16 %v2421_v39, %v2420_v32  ;;  %v7311_v32 = vld [vmem:[#allocation71_spill] sm:$0xff] }
 0x4b5   :  { %v4551_v48 = vpop.eup %4550  ;;  %v2398_v49 = vadd.f32 0.5, %v2396_v53  ;;  %v7312_v39 = vld [vmem:[#allocation127_spill] sm:$0xff]  ;;  %v7321_v53 = vld [vmem:[#allocation76_spill] sm:$0xff] }
 0x4b6   :  { %2446 = vmatmul.bf16.vlgmr.msra.gmra.mxu1 %v2422_v34  ;;  %2474 = vmatmul.bf16.vlgmr.msra.gmra.mxu3 %v2422_v34  ;;  %v2403_v10 = vmul.f32 %v4551_v48, %v2381_v11  ;;  %v4553_v13 = vpop.eup %4552  ;;  %v7313_v3 = vld [vmem:[#allocation31_spill] sm:$0xff]  ;;  %v7318_v48 = vld [vmem:[#allocation32_spill] sm:$0xff] }
 0x4b7   :  { %2602 = vmatpush.bf16.msra.mxu1 %v5097_v50  ;;  %2630 = vmatpush.bf16.msra.mxu3 %v5224_v16  ;;  %v2397_v9 = vmul.f32 0.5, %v4553_v13  ;;  %v7316_v11 = vld [vmem:[#allocation131_spill] sm:$0xff]  ;;  %v7322_v13 = vld [vmem:[#allocation134_spill] sm:$0xff] }
 0x4b8   :  { %v6241_v14 = vadd.f32 %v2403_v10, %v2401_v33  ;;  %v7319_v33 = vld [vmem:[#allocation81_spill] sm:$0xff]  ;;  %v7320_v10 = vld [vmem:[#allocation83_spill] sm:$0xff] }
 0x4b9   :  { %v4555_v60 = vpop.eup %4554  ;;  %v2399_v46 = vadd.f32 0.5, %v2397_v9  ;;  %v7325_v9 = vld [vmem:[#allocation79_spill] sm:$0xff] }
 0x4ba   :  { %4556 = vtanh.f32 %v6241_v14  ;;  %v2408_v42 = vmul.f32 %v4555_v60, %v2398_v49  ;;  %v7323_v60 = vld [vmem:[#allocation87_spill] sm:$0xff]  ;;  %v7324_v49 = vld [vmem:[#allocation88_spill] sm:$0xff] }
 0x4bb   :  { %2603 = vmatpush.bf16.msra.mxu1 %v5127_v2  ;;  %2631 = vmatpush.bf16.msra.mxu3 %v5237_v29 }
 0x4bc   :  { %v2410_v22 = vpack.c.bf16 %v2408_v42, %v2408_v42  ;;  %v7326_v42 = vld [vmem:[#allocation138_spill] sm:$0xff] }
 0x4be   :  { %v2414_v35 = vunpack.c.l.b16 %v2410_v22  ;;  %v7329_v22 = vld [vmem:[#allocation82_spill] sm:$0xff] }
 0x4bf   :  { %2604 = vmatpush.bf16.msra.mxu1 %v5142_v12  ;;  %2632 = vmatpush.bf16.msra.mxu3 %v5245_v38 }
 0x4c0   :  { %v4557_v36 = vpop.eup %4556 }
 0x4c1   :  { %v2409_v57 = vmul.f32 %v4557_v36, %v2399_v46  ;;  %v7327_v46 = vld [vmem:[#allocation91_spill] sm:$0xff]  ;;  %v7328_v36 = vld [vmem:[#allocation92_spill] sm:$0xff] }
 0x4c3   :  { %2605 = vmatpush.bf16.msra.mxu1 %v5157_v21  ;;  %2633 = vmatpush.bf16.msra.mxu3 %v5254_v56  ;;  %v2411_v58 = vpack.c.bf16 %v2409_v57, %v2409_v57  ;;  %v7330_v57 = vld [vmem:[#allocation141_spill] sm:$0xff] }
 0x4c5   :  { %v2415_v54 = vunpack.c.l.b16 %v2411_v58  ;;  %v7331_v58 = vld [vmem:[#allocation116_spill] sm:$0xff] }
 0x4c6   :  { %2502 = vmatmul.bf16.vlgmr.msrb.gmra.mxu1 %v2422_v34  ;;  %2530 = vmatmul.bf16.vlgmr.msrb.gmra.mxu3 %v2422_v34  ;;  %v7317_v34 = vld [vmem:[#allocation33_spill] sm:$0xff] }
 0x4c7   :  { %2606 = vmatpush.bf16.msra.mxu1 %v5172_v31  ;;  %2634 = vmatpush.bf16.msra.mxu3 %v5265_v4  ;;  %v2416_v45 = vpack.c.b16 %v2415_v54, %v2414_v35  ;;  %v7332_v35 = vld [vmem:[#allocation118_spill] sm:$0xff]  ;;  %v7333_v54 = vld [vmem:[#allocation95_spill] sm:$0xff] }
 0x4c9   :  { %2432 = vmatmul.bf16.vlgmr.msrb.gmra.mxu0 %v2416_v45  ;;  %2460 = vmatmul.bf16.vlgmr.msra.gmra.mxu2 %v2416_v45 }
 0x4ca   :  { %2588 = vmatpush.bf16.msrb.mxu0 %v7073_v52  ;;  %2616 = vmatpush.bf16.msra.mxu2 %v5125_v62 }
 0x4cb   :  { %2607 = vmatpush.bf16.msra.mxu1 %v5188_v40  ;;  %2635 = vmatpush.bf16.msra.mxu3 %v5273_v20 }
 0x4ce   :  { %2589 = vmatpush.bf16.msrb.mxu0 %v7074_v0  ;;  %2617 = vmatpush.bf16.msra.mxu2 %v5140_v8 }
 0x4cf   :  { %2608 = vmatpush.bf16.msra.mxu1 %v5213_v6  ;;  %2636 = vmatpush.bf16.msra.mxu3 %v5281_v41 }
 0x4d2   :  { %2590 = vmatpush.bf16.msrb.mxu0 %v7075_v30  ;;  %2618 = vmatpush.bf16.msra.mxu2 %v5155_v17 }
 0x4d3   :  { %2609 = vmatpush.bf16.msra.mxu1 %v5252_v51  ;;  %2637 = vmatpush.bf16.msra.mxu3 %v5294_v7 }
 0x4d6   :  { %2591 = vmatpush.bf16.msrb.mxu0 %v7076_v37  ;;  %2610 = vmatmul.bf16.vlgmr.msra.gmra.mxu1 %v2416_v45 }
 0x4d7   :  { %2716 = vmatpush.bf16.msrb.mxu1 %v5380_v59  ;;  %2744 = vmatpush.bf16.msrb.mxu3 %v5533_v5 }
 0x4d8   :  { %2619 = vmatpush.bf16.msra.mxu2 %v5170_v28  ;;  %2638 = vmatmul.bf16.vlgmr.msra.gmra.mxu3 %v2416_v45 }
 0x4d9   :  { %2488 = vmatmul.bf16.vlgmr.msra.gmra.mxu0 %v2416_v45  ;;  %2516 = vmatmul.bf16.vlgmr.msrb.gmra.mxu2 %v2416_v45 }
 0x4da   :  { %2592 = vmatpush.bf16.msrb.mxu0 %v7077_v15 }
 0x4db   :  { %2717 = vmatpush.bf16.msrb.mxu1 %v5385_v19  ;;  %2745 = vmatpush.bf16.msrb.mxu3 %v5551_v26 }
 0x4dc   :  { %2620 = vmatpush.bf16.msra.mxu2 %v7025_v27 }
 0x4de   :  { %2593 = vmatpush.bf16.msrb.mxu0 %v7309_v18 }
 0x4df   :  { %2718 = vmatpush.bf16.msrb.mxu1 %v5394_v24  ;;  %2746 = vmatpush.bf16.msrb.mxu3 %v7229_v1 }
 0x4e0   :  { %2621 = vmatpush.bf16.msra.mxu2 %v7310_v23 }
 0x4e2   :  { %2594 = vmatpush.bf16.msrb.mxu0 %v7313_v3 }
 0x4e3   :  { %2719 = vmatpush.bf16.msrb.mxu1 %v7311_v32  ;;  %2747 = vmatpush.bf16.msrb.mxu3 %v7312_v39 }
 0x4e4   :  { %2622 = vmatpush.bf16.msra.mxu2 %v7314_v44 }
 0x4e6   :  { %2595 = vmatpush.bf16.msrb.mxu0 %v7317_v34 }
 0x4e7   :  { %2720 = vmatpush.bf16.msrb.mxu1 %v7315_v43  ;;  %2748 = vmatpush.bf16.msrb.mxu3 %v7316_v11 }
 0x4e8   :  { %2623 = vmatpush.bf16.msra.mxu2 %v7318_v48 }
 0x4e9   :  { %2596 = vmatmul.bf16.vlgmr.msrb.gmra.mxu0 %v2416_v45 }
 0x4ea   :  { %2702 = vmatpush.bf16.msra.mxu0 %v7319_v33  ;;  %v7374_v33 = vld [vmem:[#allocation152_spill] sm:$0xff] }
 0x4eb   :  { %2721 = vmatpush.bf16.msrb.mxu1 %v7321_v53  ;;  %2749 = vmatpush.bf16.msrb.mxu3 %v7322_v13  ;;  %v7373_v53 = vld [vmem:[#allocation27_spill] sm:$0xff] }
 0x4ec   :  { %2730 = vmatpush.bf16.msrb.mxu2 %v7320_v10 }
 0x4ed   :  { %2624 = vmatmul.bf16.vlgmr.msra.gmra.mxu2 %v2416_v45  ;;  %v7334_v45 = vld [vmem:[#allocation96_spill] sm:$0xff] }
 0x4ee   :  { %2703 = vmatpush.bf16.msra.mxu0 %v7323_v60 }
 0x4ef   :  { %2722 = vmatpush.bf16.msrb.mxu1 %v7325_v9  ;;  %2750 = vmatpush.bf16.msrb.mxu3 %v7326_v42  ;;  %v7336_v9 = vld [vmem:[#allocation122_spill] sm:$0xff]  ;;  %v7337_v42 = vld [vmem:[#allocation100_spill] sm:$0xff] }
 0x4f0   :  { %2731 = vmatpush.bf16.msrb.mxu2 %v7324_v49  ;;  %v7335_v49 = vld [vmem:[#allocation121_spill] sm:$0xff] }
 0x4f2   :  { %2704 = vmatpush.bf16.msra.mxu0 %v7327_v46  ;;  %v7338_v46 = vld [vmem:[#allocation101_spill] sm:$0xff] }
 0x4f3   :  { %2723 = vmatpush.bf16.msrb.mxu1 %v7329_v22  ;;  %2751 = vmatpush.bf16.msrb.mxu3 %v7330_v57  ;;  %v7340_v22 = vld [vmem:[#allocation125_spill] sm:$0xff]  ;;  %v7341_v57 = vld [vmem:[#allocation104_spill] sm:$0xff] }
 0x4f4   :  { %2732 = vmatpush.bf16.msrb.mxu2 %v7328_v36  ;;  %v7339_v36 = vld [vmem:[#allocation124_spill] sm:$0xff] }
 0x4f6   :  { %2705 = vmatpush.bf16.msra.mxu0 %v7333_v54  ;;  %v7344_v54 = vld [vmem:[#allocation130_spill] sm:$0xff] }
 0x4f7   :  { %2772 = vmatpush.bf16.msra.mxu1 %v7331_v58  ;;  %2800 = vmatpush.bf16.msra.mxu3 %v7332_v35  ;;  %v7342_v58 = vld [vmem:[#allocation105_spill] sm:$0xff]  ;;  %v7343_v35 = vld [vmem:[#allocation128_spill] sm:$0xff] }
 0x4f8   :  { %2733 = vmatpush.bf16.msrb.mxu2 %v7334_v45  ;;  %v7345_v45 = vld [vmem:[#allocation109_spill] sm:$0xff] }
 0x4fa   :  { %2706 = vmatpush.bf16.msra.mxu0 %v7337_v42  ;;  %v7348_v42 = vld [vmem:[#allocation133_spill] sm:$0xff] }
 0x4fb   :  { %2773 = vmatpush.bf16.msra.mxu1 %v7335_v49  ;;  %2801 = vmatpush.bf16.msra.mxu3 %v7336_v9  ;;  %v7346_v49 = vld [vmem:[#allocation110_spill] sm:$0xff]  ;;  %v7347_v9 = vld [vmem:[#allocation132_spill] sm:$0xff] }
 0x4fc   :  { %2734 = vmatpush.bf16.msrb.mxu2 %v7338_v46  ;;  %v7349_v46 = vld [vmem:[#allocation113_spill] sm:$0xff] }
 0x4fe   :  { %2707 = vmatpush.bf16.msra.mxu0 %v7341_v57  ;;  %v7352_v57 = vld [vmem:[#allocation144_spill] sm:$0xff] }
 0x4ff   :  { %2774 = vmatpush.bf16.msra.mxu1 %v7339_v36  ;;  %2802 = vmatpush.bf16.msra.mxu3 %v7340_v22  ;;  %v7350_v36 = vld [vmem:[#allocation114_spill] sm:$0xff]  ;;  %v7351_v22 = vld [vmem:[#allocation85_spill] sm:$0xff] }
 0x500   :  { %2735 = vmatpush.bf16.msrb.mxu2 %v7342_v58  ;;  %v7353_v58 = vld [vmem:[#allocation135_spill] sm:$0xff] }
 0x502   :  { %2708 = vmatpush.bf16.msra.mxu0 %v7345_v45  ;;  %v7356_v45 = vld [vmem:[#allocation145_spill] sm:$0xff] }
 0x503   :  { %2775 = vmatpush.bf16.msra.mxu1 %v7343_v35  ;;  %2803 = vmatpush.bf16.msra.mxu3 %v7344_v54  ;;  %v7354_v35 = vld [vmem:[#allocation136_spill] sm:$0xff]  ;;  %v7355_v54 = vld [vmem:[#allocation89_spill] sm:$0xff] }
 0x504   :  { %2736 = vmatpush.bf16.msrb.mxu2 %v7346_v49  ;;  %v7357_v49 = vld [vmem:[#allocation139_spill] sm:$0xff] }
 0x506   :  { %2709 = vmatpush.bf16.msra.mxu0 %v7349_v46  ;;  %v7360_v46 = vld [vmem:[#allocation146_spill] sm:$0xff] }
 0x507   :  { %2776 = vmatpush.bf16.msra.mxu1 %v7347_v9  ;;  %2804 = vmatpush.bf16.msra.mxu3 %v7348_v42  ;;  %v7358_v9 = vld [vmem:[#allocation140_spill] sm:$0xff]  ;;  %v7359_v42 = vld [vmem:[#allocation94_spill] sm:$0xff] }
 0x508   :  { %2737 = vmatpush.bf16.msrb.mxu2 %v7350_v36  ;;  %v7361_v36 = vld [vmem:[#allocation142_spill] sm:$0xff] }
 0x50a   :  { %2758 = vmatpush.bf16.msrb.mxu0 %v7351_v22  ;;  %v7362_v22 = vld [vmem:[#allocation143_spill] sm:$0xff] }
 0x50b   :  { %2777 = vmatpush.bf16.msra.mxu1 %v7353_v58  ;;  %2805 = vmatpush.bf16.msra.mxu3 %v7354_v35  ;;  %v7364_v58 = vld [vmem:[#allocation147_spill] sm:$0xff] }
 0x50c   :  { %2786 = vmatpush.bf16.msra.mxu2 %v7352_v57  ;;  %v7363_v57 = vld [vmem:[#allocation98_spill] sm:$0xff]  ;;  %v7365_v35 = vld [vmem:[#allocation103_spill] sm:$0xff] }
 0x50e   :  { %2759 = vmatpush.bf16.msrb.mxu0 %v7355_v54  ;;  %v7366_v54 = vld [vmem:[#allocation148_spill] sm:$0xff] }
 0x50f   :  { %2778 = vmatpush.bf16.msra.mxu1 %v7357_v49  ;;  %2806 = vmatpush.bf16.msra.mxu3 %v7358_v9  ;;  %v7368_v49 = vld [vmem:[#allocation149_spill] sm:$0xff]  ;;  %v7369_v9 = vld [vmem:[#allocation112_spill] sm:$0xff] }
 0x510   :  { %2787 = vmatpush.bf16.msra.mxu2 %v7356_v45  ;;  %v7367_v45 = vld [vmem:[#allocation106_spill] sm:$0xff] }
 0x512   :  { %2760 = vmatpush.bf16.msrb.mxu0 %v7359_v42  ;;  %v7370_v42 = vld [vmem:[#allocation150_spill] sm:$0xff] }
 0x513   :  { %2779 = vmatpush.bf16.msra.mxu1 %v7361_v36  ;;  %2807 = vmatpush.bf16.msra.mxu3 %v7362_v22  ;;  %v7372_v36 = vld [vmem:[#allocation151_spill] sm:$0xff] }
 0x514   :  { %2788 = vmatpush.bf16.msra.mxu2 %v7360_v46  ;;  %v7371_v46 = vld [vmem:[#allocation115_spill] sm:$0xff] }
 0x516   :  { %2761 = vmatpush.bf16.msrb.mxu0 %v7363_v57 }
 0x518   :  { %2789 = vmatpush.bf16.msra.mxu2 %v7364_v58 }
 0x51a   :  { %2762 = vmatpush.bf16.msrb.mxu0 %v7365_v35 }
 0x51c   :  { %2790 = vmatpush.bf16.msra.mxu2 %v7366_v54 }
 0x51e   :  { %2763 = vmatpush.bf16.msrb.mxu0 %v7367_v45 }
 0x520   :  { %2791 = vmatpush.bf16.msra.mxu2 %v7368_v49 }
 0x522   :  { %2764 = vmatpush.bf16.msrb.mxu0 %v7369_v9 }
 0x524   :  { %2792 = vmatpush.bf16.msra.mxu2 %v7370_v42 }
 0x526   :  { %2765 = vmatpush.bf16.msrb.mxu0 %v7371_v46 }
 0x528   :  { %2793 = vmatpush.bf16.msra.mxu2 %v7372_v36 }
 0x533   :  { %v2447_v22 = vpop.f32.mrf.mxu1 }
 0x539   :  { %v2475_v60 = vpop.f32.mrf.mxu3 }
 0x53b   :  { %v2449_v57 = vpop.f32.mrf.mxu1 }
 0x541   :  { %v2477_v35 = vpop.f32.mrf.mxu3 }
 0x543   :  { %v2503_v58 = vpop.f32.mrf.mxu1 }
 0x546   :  { %v2433_v13 = vpop.f32.mrf.mxu0 }
 0x547   :  { %v2434_v54 = vadd.f32 %v2433_v13, %v7373_v53 }
 0x549   :  { %v2448_v10 = vadd.f32 %v2447_v22, %v2434_v54  ;;  %v2531_v36 = vpop.f32.mrf.mxu3 }
 0x54b   :  { %v2505_v9 = vpop.f32.mrf.mxu1  ;;  %v2536_v46 = vmul.f32 0.5, %v2448_v10 }
 0x54c   :  { %v2461_v45 = vpop.f32.mrf.mxu2 }
 0x54d   :  { %v2462_v49 = vadd.f32 %v2461_v45, %v7374_v33 }
 0x54e   :  { %v2435_v48 = vpop.f32.mrf.mxu0 }
 0x54f   :  { %v2476_v34 = vadd.f32 %v2475_v60, %v2462_v49  ;;  %v2436_v42 = vadd.f32 %v2435_v48, %v7373_v53 }
 0x551   :  { %v2544_v11 = vmul.f32 0.5, %v2476_v34  ;;  %v2450_v43 = vadd.f32 %v2449_v57, %v2436_v42  ;;  %v7375_v34 = vld [vmem:[#allocation78_spill] sm:$0xff]  ;;  %v2533_v10 = vpop.f32.mrf.mxu3 }
 0x553   :  { %4558 = vtanh.f32 %v2544_v11  ;;  %v2537_v39 = vmul.f32 0.5, %v2450_v43  ;;  %v2611_v32 = vpop.f32.mrf.mxu1  ;;  %v425_v11 = vadd.f32 %v7375_v34, %v7138_v47  ;;  %v7376_v34 = vld [vmem:[#allocation54_spill] sm:$0xff] }
 0x554   :  { %4560 = vtanh.f32 %v2536_v46  ;;  %v2463_v44 = vpop.f32.mrf.mxu2 }
 0x555   :  { %v2464_v3 = vadd.f32 %v2463_v44, %v7374_v33  ;;  %4562 = vtanh.f32 %v2537_v39 }
 0x556   :  { %v2489_v13 = vpop.f32.mrf.mxu0 }
 0x557   :  { %v2478_v22 = vadd.f32 %v2477_v35, %v2464_v3  ;;  %v2490_v54 = vadd.f32 %v2489_v13, %v7217_v63  ;;  %v2645_v3 = vadd.f32 %v2611_v32, %v425_v11  ;;  %v7377_v32 = vld [vmem:[#allocation84_spill] sm:$0xff] }
 0x558   :  { %v427_v11 = vadd.f32 %v7377_v32, %v7138_v47 }
 0x559   :  { %v4559_v45 = vpop.eup %4558  ;;  %v2545_v23 = vmul.f32 0.5, %v2478_v22  ;;  %v2504_v60 = vadd.f32 %v2503_v58, %v2490_v54  ;;  %v2660_v33 = vmul.f32 0.5, %v2645_v3 }
 0x55a   :  { %v4561_v49 = vpop.eup %4560  ;;  %v2548_v48 = vmul.f32 0.5, %v4559_v45 }
 0x55b   :  { %4564 = vtanh.f32 %v2545_v23  ;;  %v2540_v44 = vmul.f32 0.5, %v4561_v49  ;;  %v4563_v58 = vpop.eup %4562  ;;  %v2613_v49 = vpop.f32.mrf.mxu1 }
 0x55c   :  { %4566 = vtanh.f32 %v2504_v60  ;;  %v2517_v42 = vpop.f32.mrf.mxu2  ;;  %v2550_v57 = vadd.f32 0.5, %v2548_v48  ;;  %v2541_v48 = vmul.f32 0.5, %v4563_v58 }
 0x55d   :  { %v2518_v43 = vadd.f32 %v2517_v42, %v7140_v55  ;;  %v2542_v39 = vadd.f32 0.5, %v2540_v44 }
 0x55e   :  { %v2491_v46 = vpop.f32.mrf.mxu0  ;;  %v2562_v53 = vmul.f32 %v2550_v57, %v7376_v34 }
 0x55f   :  { %v2532_v35 = vadd.f32 %v2531_v36, %v2518_v43  ;;  %v2492_v13 = vadd.f32 %v2491_v46, %v7217_v63  ;;  %v2649_v43 = vadd.f32 %v2613_v49, %v427_v11  ;;  %v7381_v49 = vld [vmem:[#allocation137_spill] sm:$0xff]  ;;  %v7382_v11 = vld [vmem:[#allocation72_spill] sm:$0xff] }
 0x561   :  { %v4565_v22 = vpop.eup %4564  ;;  %v2554_v54 = vmul.f32 0.5, %v2532_v35  ;;  %v2506_v23 = vadd.f32 %v2505_v9, %v2492_v13  ;;  %v2639_v9 = vpop.f32.mrf.mxu3  ;;  %v7379_v35 = vld [vmem:[#allocation46_spill] sm:$0xff]  ;;  %v2661_v58 = vmul.f32 0.5, %v2649_v43 }
 0x562   :  { %v4567_v45 = vpop.eup %4566  ;;  %v2549_v60 = vmul.f32 0.5, %v4565_v22 }
 0x563   :  { %v2564_v18 = vmul.f32 %v4567_v45, %v2542_v39  ;;  %4568 = vtanh.f32 %v2554_v54  ;;  %v2543_v39 = vadd.f32 0.5, %v2541_v48  ;;  %v7384_v48 = vld [vmem:[#allocation34_spill] sm:$0xff] }
 0x564   :  { %4570 = vtanh.f32 %v2506_v23  ;;  %v2519_v36 = vpop.f32.mrf.mxu2  ;;  %v2551_v46 = vadd.f32 0.5, %v2549_v60  ;;  %v523_v60 = vadd.f32 %v7382_v11, %v7381_v49 }
 0x565   :  { %v6350_v42 = vadd.f32 %v2564_v18, %v2562_v53  ;;  %v2520_v44 = vadd.f32 %v2519_v36, %v7140_v55  ;;  %4572 = vtanh.f32 %v2660_v33  ;;  %v7380_v53 = vld [vmem:[#allocation42_spill] sm:$0xff] }
 0x566   :  { %v2597_v3 = vpop.f32.mrf.mxu0  ;;  %v2563_v34 = vmul.f32 %v2551_v46, %v7380_v53  ;;  %v2647_v43 = vadd.f32 %v2639_v9, %v523_v60 }
 0x567   :  { %7378 = vst [vmem:[#allocation49_spill] sm:$0xff] %v6350_v42  ;;  %v2534_v57 = vadd.f32 %v2533_v10, %v2520_v44  ;;  %v2644_v13 = vadd.f32 %v2597_v3, %v7379_v35  ;;  %4574 = vtanh.f32 %v6350_v42  ;;  %v7383_v10 = vld [vmem:[#allocation80_spill] sm:$0xff] }
 0x568   :  { %v474_v36 = vadd.f32 %v7383_v10, %v5572_v61  ;;  %v7385_v44 = vld [vmem:[#allocation48_spill] sm:$0xff] }
 0x569   :  { %v4569_v22 = vpop.eup %4568  ;;  %v2555_v54 = vmul.f32 0.5, %v2534_v57  ;;  %v2652_v23 = vmul.f32 0.5, %v2644_v13  ;;  %v378_v3 = vadd.f32 %v7385_v44, %v7384_v48  ;;  %v2641_v53 = vpop.f32.mrf.mxu3 }
 0x56a   :  { %v4571_v45 = vpop.eup %4570  ;;  %v2558_v18 = vmul.f32 0.5, %v4569_v22 }
 0x56b   :  { %v2565_v32 = vmul.f32 %v4571_v45, %v2543_v39  ;;  %4576 = vtanh.f32 %v2555_v54  ;;  %v4573_v33 = vpop.eup %4572 }
 0x56c   :  { %4578 = vtanh.f32 %v2652_v23  ;;  %v2560_v13 = vadd.f32 0.5, %v2558_v18  ;;  %v2664_v54 = vmul.f32 0.5, %v4573_v33  ;;  %v7387_v23 = vld [vmem:[#allocation77_spill] sm:$0xff]  ;;  %v7388_v33 = vld [vmem:[#allocation90_spill] sm:$0xff] }
 0x56d   :  { %v6362_v57 = vadd.f32 %v2565_v32, %v2563_v34  ;;  %4580 = vtanh.f32 %v2661_v58  ;;  %v4575_v39 = vpop.eup %4574  ;;  %v525_v10 = vadd.f32 %v7387_v23, %v7381_v49  ;;  %v2670_v32 = vmul.f32 0.5, %v2647_v43 }
 0x56e   :  { %v2599_v22 = vpop.f32.mrf.mxu0  ;;  %v2570_v48 = vmul.f32 %v4575_v39, %v2560_v13  ;;  %v2666_v58 = vadd.f32 0.5, %v2664_v54 }
 0x56f   :  { %7386 = vst [vmem:[#allocation52_spill] sm:$0xff] %v6362_v57  ;;  %4582 = vtanh.f32 %v6362_v57  ;;  %v2648_v45 = vadd.f32 %v2599_v22, %v378_v3  ;;  %v2651_v18 = vadd.f32 %v2641_v53, %v525_v10 }
 0x570   :  { %v2625_v35 = vpop.f32.mrf.mxu2  ;;  %v2572_v23 = vpack.c.bf16 %v2570_v48, %v2570_v48  ;;  %v2678_v43 = vmul.f32 %v2666_v58, %v6235_v25 }
 0x571   :  { %v2646_v46 = vadd.f32 %v2625_v35, %v474_v36  ;;  %v4577_v11 = vpop.eup %4576  ;;  %v2653_v44 = vmul.f32 0.5, %v2648_v45  ;;  %v476_v35 = vadd.f32 %v7388_v33, %v5572_v61  ;;  %v2671_v39 = vmul.f32 0.5, %v2651_v18 }
 0x572   :  { %v4579_v34 = vpop.eup %4578  ;;  %v2559_v9 = vmul.f32 0.5, %v4577_v11 }
 0x573   :  { %4584 = vtanh.f32 %v2646_v46  ;;  %v2656_v60 = vmul.f32 0.5, %v4579_v34  ;;  %v4581_v36 = vpop.eup %4580  ;;  %v2698_v34 = vunpack.c.l.b16 %v2572_v23 }
 0x574   :  { %4586 = vtanh.f32 %v2653_v44  ;;  %v2561_v3 = vadd.f32 0.5, %v2559_v9  ;;  %v2665_v13 = vmul.f32 0.5, %v4581_v36 }
 0x575   :  { %v4583_v22 = vpop.eup %4582  ;;  %v2658_v46 = vadd.f32 0.5, %v2656_v60  ;;  %4588 = vtanh.f32 %v2670_v32 }
 0x576   :  { %v2571_v45 = vmul.f32 %v4583_v22, %v2561_v3  ;;  %v2667_v33 = vadd.f32 0.5, %v2665_v13 }
 0x578   :  { %v2627_v57 = vpop.f32.mrf.mxu2  ;;  %v2573_v53 = vpack.c.bf16 %v2571_v45, %v2571_v45  ;;  %v4343_v11 = vpack.c.bf16 %v2571_v45, %v2570_v48 }
 0x579   :  { %v4585_v42 = vpop.eup %4584  ;;  %v2650_v49 = vadd.f32 %v2627_v57, %v476_v35 }
 0x57a   :  { %v2680_v54 = vmul.f32 %v4585_v42, %v2658_v46  ;;  %v4587_v10 = vpop.eup %4586  ;;  %4344 = vst [vmem:[#allocation3 + $0x8] sm:$0xff] %v4343_v11   ;;  %v2699_v9 = vunpack.c.l.b16 %v2573_v53  ;;  %v2679_v42 = vmul.f32 %v2667_v33, %v6241_v14  ;;  %v7389_v11 = vld [vmem:[#allocation28_spill] sm:$0xff]  ;;  %v7394_v33 = vld [vmem:[#allocation30_spill] sm:$0xff] }
 0x57b   :  { %4590 = vtanh.f32 %v2650_v49  ;;  %v2657_v60 = vmul.f32 0.5, %v4587_v10  ;;  %v4589_v32 = vpop.eup %4588  ;;  %v7390_v10 = vld [vmem:[#allocation29_spill] sm:$0xff] }
 0x57c   :  { %v6370_v44 = vadd.f32 %v2680_v54, %v2678_v43  ;;  %4592 = vtanh.f32 %v2671_v39  ;;  %v2700_v57 = vpack.c.b16 %v2699_v9, %v2698_v34  ;;  %v2674_v48 = vmul.f32 0.5, %v4589_v32  ;;  %v7391_v34 = vld [vmem:[#allocation71_spill] sm:$0xff]  ;;  %v7395_v32 = vld [vmem:[#allocation74_spill] sm:$0xff] }
 0x57d   :  { %v2659_v3 = vadd.f32 0.5, %v2657_v60  ;;  %v7392_v9 = vld [vmem:[#allocation127_spill] sm:$0xff] }
 0x57e   :  { %4594 = vtanh.f32 %v6370_v44  ;;  %2724 = vmatmul.bf16.vlgmr.msrb.gmra.mxu1 %v2700_v57  ;;  %2752 = vmatmul.bf16.vlgmr.msrb.gmra.mxu3 %v2700_v57  ;;  %v2676_v35 = vadd.f32 0.5, %v2674_v48  ;;  %v7393_v60 = vld [vmem:[#allocation31_spill] sm:$0xff]  ;;  %v7401_v48 = vld [vmem:[#allocation76_spill] sm:$0xff] }
 0x57f   :  { %2880 = vmatpush.bf16.msrb.mxu1 %v5097_v50  ;;  %2908 = vmatpush.bf16.msrb.mxu3 %v5224_v16 }
 0x581   :  { %v4591_v25 = vpop.eup %4590 }
 0x582   :  { %v2681_v49 = vmul.f32 %v4591_v25, %v2659_v3  ;;  %v4593_v58 = vpop.eup %4592  ;;  %v7396_v3 = vld [vmem:[#allocation131_spill] sm:$0xff]  ;;  %v7398_v25 = vld [vmem:[#allocation32_spill] sm:$0xff] }
 0x583   :  { %2881 = vmatpush.bf16.msrb.mxu1 %v5127_v2  ;;  %2909 = vmatpush.bf16.msrb.mxu3 %v5237_v29  ;;  %v2675_v22 = vmul.f32 0.5, %v4593_v58  ;;  %v7402_v58 = vld [vmem:[#allocation134_spill] sm:$0xff] }
 0x584   :  { %v6376_v18 = vadd.f32 %v2681_v49, %v2679_v42  ;;  %v4595_v36 = vpop.eup %4594  ;;  %v7399_v42 = vld [vmem:[#allocation81_spill] sm:$0xff]  ;;  %v7400_v49 = vld [vmem:[#allocation83_spill] sm:$0xff] }
 0x585   :  { %v2686_v46 = vmul.f32 %v4595_v36, %v2676_v35  ;;  %v2677_v14 = vadd.f32 0.5, %v2675_v22  ;;  %v7403_v36 = vld [vmem:[#allocation87_spill] sm:$0xff]  ;;  %v7404_v35 = vld [vmem:[#allocation88_spill] sm:$0xff] }
 0x586   :  { %4596 = vtanh.f32 %v6376_v18  ;;  %v7405_v22 = vld [vmem:[#allocation79_spill] sm:$0xff] }
 0x587   :  { %2882 = vmatpush.bf16.msrb.mxu1 %v5142_v12  ;;  %2910 = vmatpush.bf16.msrb.mxu3 %v5245_v38  ;;  %v2688_v45 = vpack.c.bf16 %v2686_v46, %v2686_v46  ;;  %v7406_v46 = vld [vmem:[#allocation138_spill] sm:$0xff] }
 0x589   :  { %v2692_v39 = vunpack.c.l.b16 %v2688_v45  ;;  %v7409_v45 = vld [vmem:[#allocation82_spill] sm:$0xff] }
 0x58b   :  { %2883 = vmatpush.bf16.msrb.mxu1 %v5157_v21  ;;  %2911 = vmatpush.bf16.msrb.mxu3 %v5254_v56 }
 0x58c   :  { %v4597_v23 = vpop.eup %4596 }
 0x58d   :  { %v2687_v43 = vmul.f32 %v4597_v23, %v2677_v14  ;;  %v7407_v14 = vld [vmem:[#allocation91_spill] sm:$0xff]  ;;  %v7408_v23 = vld [vmem:[#allocation92_spill] sm:$0xff] }
 0x58e   :  { %2780 = vmatmul.bf16.vlgmr.msra.gmra.mxu1 %v2700_v57  ;;  %2808 = vmatmul.bf16.vlgmr.msra.gmra.mxu3 %v2700_v57  ;;  %v7397_v57 = vld [vmem:[#allocation33_spill] sm:$0xff] }
 0x58f   :  { %v2689_v13 = vpack.c.bf16 %v2687_v43, %v2687_v43  ;;  %2884 = vmatpush.bf16.msrb.mxu1 %v5172_v31  ;;  %2912 = vmatpush.bf16.msrb.mxu3 %v5265_v4  ;;  %v7410_v43 = vld [vmem:[#allocation141_spill] sm:$0xff] }
 0x591   :  { %v2693_v54 = vunpack.c.l.b16 %v2689_v13  ;;  %v7411_v13 = vld [vmem:[#allocation116_spill] sm:$0xff] }
 0x593   :  { %v2694_v53 = vpack.c.b16 %v2693_v54, %v2692_v39  ;;  %2885 = vmatpush.bf16.msrb.mxu1 %v5188_v40  ;;  %2913 = vmatpush.bf16.msrb.mxu3 %v5273_v20  ;;  %v7412_v39 = vld [vmem:[#allocation118_spill] sm:$0xff]  ;;  %v7413_v54 = vld [vmem:[#allocation95_spill] sm:$0xff] }
 0x595   :  { %2710 = vmatmul.bf16.vlgmr.msra.gmra.mxu0 %v2694_v53  ;;  %2738 = vmatmul.bf16.vlgmr.msrb.gmra.mxu2 %v2694_v53 }
 0x596   :  { %2866 = vmatpush.bf16.msra.mxu0 %v7073_v52  ;;  %2894 = vmatpush.bf16.msrb.mxu2 %v5125_v62 }
 0x597   :  { %2886 = vmatpush.bf16.msrb.mxu1 %v5213_v6  ;;  %2914 = vmatpush.bf16.msrb.mxu3 %v5281_v41 }
 0x59a   :  { %2867 = vmatpush.bf16.msra.mxu0 %v7074_v0  ;;  %2895 = vmatpush.bf16.msrb.mxu2 %v5140_v8 }
 0x59b   :  { %2887 = vmatpush.bf16.msrb.mxu1 %v5252_v51  ;;  %2915 = vmatpush.bf16.msrb.mxu3 %v5294_v7 }
 0x59e   :  { %2868 = vmatpush.bf16.msra.mxu0 %v7075_v30  ;;  %2896 = vmatpush.bf16.msrb.mxu2 %v5155_v17 }
 0x59f   :  { %2994 = vmatpush.bf16.msra.mxu1 %v5380_v59  ;;  %3022 = vmatpush.bf16.msra.mxu3 %v5533_v5 }
 0x5a0   :  { %2888 = vmatmul.bf16.vlgmr.msrb.gmra.mxu1 %v2694_v53  ;;  %2916 = vmatmul.bf16.vlgmr.msrb.gmra.mxu3 %v2694_v53 }
 0x5a2   :  { %2869 = vmatpush.bf16.msra.mxu0 %v7076_v37  ;;  %2897 = vmatpush.bf16.msrb.mxu2 %v5170_v28 }
 0x5a3   :  { %2995 = vmatpush.bf16.msra.mxu1 %v5385_v19  ;;  %3023 = vmatpush.bf16.msra.mxu3 %v5551_v26 }
 0x5a5   :  { %2766 = vmatmul.bf16.vlgmr.msrb.gmra.mxu0 %v2694_v53  ;;  %2794 = vmatmul.bf16.vlgmr.msra.gmra.mxu2 %v2694_v53 }
 0x5a6   :  { %2870 = vmatpush.bf16.msra.mxu0 %v7077_v15  ;;  %2898 = vmatpush.bf16.msrb.mxu2 %v7025_v27 }
 0x5a7   :  { %2996 = vmatpush.bf16.msra.mxu1 %v5394_v24  ;;  %3024 = vmatpush.bf16.msra.mxu3 %v7229_v1 }
 0x5aa   :  { %2871 = vmatpush.bf16.msra.mxu0 %v7389_v11  ;;  %2899 = vmatpush.bf16.msrb.mxu2 %v7390_v10 }
 0x5ab   :  { %2997 = vmatpush.bf16.msra.mxu1 %v7391_v34  ;;  %3025 = vmatpush.bf16.msra.mxu3 %v7392_v9 }
 0x5ae   :  { %2872 = vmatpush.bf16.msra.mxu0 %v7393_v60  ;;  %2900 = vmatpush.bf16.msrb.mxu2 %v7394_v33 }
 0x5af   :  { %2998 = vmatpush.bf16.msra.mxu1 %v7395_v32  ;;  %3026 = vmatpush.bf16.msra.mxu3 %v7396_v3 }
 0x5b2   :  { %2873 = vmatpush.bf16.msra.mxu0 %v7397_v57  ;;  %2901 = vmatpush.bf16.msrb.mxu2 %v7398_v25 }
 0x5b3   :  { %2999 = vmatpush.bf16.msra.mxu1 %v7401_v48  ;;  %3027 = vmatpush.bf16.msra.mxu3 %v7402_v58  ;;  %v7453_v48 = vld [vmem:[#allocation27_spill] sm:$0xff] }
 0x5b5   :  { %2874 = vmatmul.bf16.vlgmr.msra.gmra.mxu0 %v2694_v53  ;;  %2902 = vmatmul.bf16.vlgmr.msrb.gmra.mxu2 %v2694_v53  ;;  %v7414_v53 = vld [vmem:[#allocation96_spill] sm:$0xff] }
 0x5b6   :  { %2980 = vmatpush.bf16.msrb.mxu0 %v7399_v42  ;;  %3008 = vmatpush.bf16.msra.mxu2 %v7400_v49  ;;  %v7454_v42 = vld [vmem:[#allocation152_spill] sm:$0xff] }
 0x5b7   :  { %3000 = vmatpush.bf16.msra.mxu1 %v7405_v22  ;;  %3028 = vmatpush.bf16.msra.mxu3 %v7406_v46  ;;  %v7416_v22 = vld [vmem:[#allocation122_spill] sm:$0xff]  ;;  %v7417_v46 = vld [vmem:[#allocation100_spill] sm:$0xff] }
 0x5ba   :  { %2981 = vmatpush.bf16.msrb.mxu0 %v7403_v36  ;;  %3009 = vmatpush.bf16.msra.mxu2 %v7404_v35  ;;  %v7415_v35 = vld [vmem:[#allocation121_spill] sm:$0xff] }
 0x5bb   :  { %3001 = vmatpush.bf16.msra.mxu1 %v7409_v45  ;;  %3029 = vmatpush.bf16.msra.mxu3 %v7410_v43  ;;  %v7420_v45 = vld [vmem:[#allocation125_spill] sm:$0xff]  ;;  %v7421_v43 = vld [vmem:[#allocation104_spill] sm:$0xff] }
 0x5be   :  { %2982 = vmatpush.bf16.msrb.mxu0 %v7407_v14  ;;  %3010 = vmatpush.bf16.msra.mxu2 %v7408_v23  ;;  %v7418_v14 = vld [vmem:[#allocation101_spill] sm:$0xff]  ;;  %v7419_v23 = vld [vmem:[#allocation124_spill] sm:$0xff] }
 0x5bf   :  { %3050 = vmatpush.bf16.msrb.mxu1 %v7411_v13  ;;  %3078 = vmatpush.bf16.msrb.mxu3 %v7412_v39  ;;  %v7422_v13 = vld [vmem:[#allocation105_spill] sm:$0xff]  ;;  %v7423_v39 = vld [vmem:[#allocation128_spill] sm:$0xff] }
 0x5c2   :  { %2983 = vmatpush.bf16.msrb.mxu0 %v7413_v54  ;;  %3011 = vmatpush.bf16.msra.mxu2 %v7414_v53  ;;  %v7424_v54 = vld [vmem:[#allocation130_spill] sm:$0xff]  ;;  %v7425_v53 = vld [vmem:[#allocation109_spill] sm:$0xff] }
 0x5c3   :  { %3051 = vmatpush.bf16.msrb.mxu1 %v7415_v35  ;;  %3079 = vmatpush.bf16.msrb.mxu3 %v7416_v22  ;;  %v7426_v35 = vld [vmem:[#allocation110_spill] sm:$0xff]  ;;  %v7427_v22 = vld [vmem:[#allocation132_spill] sm:$0xff] }
 0x5c6   :  { %2984 = vmatpush.bf16.msrb.mxu0 %v7417_v46  ;;  %3012 = vmatpush.bf16.msra.mxu2 %v7418_v14  ;;  %v7428_v46 = vld [vmem:[#allocation133_spill] sm:$0xff] }
 0x5c7   :  { %3052 = vmatpush.bf16.msrb.mxu1 %v7419_v23  ;;  %3080 = vmatpush.bf16.msrb.mxu3 %v7420_v45  ;;  %v7429_v14 = vld [vmem:[#allocation113_spill] sm:$0xff]  ;;  %v7430_v23 = vld [vmem:[#allocation114_spill] sm:$0xff] }
 0x5c8   :  { %v7431_v45 = vld [vmem:[#allocation85_spill] sm:$0xff] }
 0x5ca   :  { %2985 = vmatpush.bf16.msrb.mxu0 %v7421_v43  ;;  %3013 = vmatpush.bf16.msra.mxu2 %v7422_v13  ;;  %v7432_v43 = vld [vmem:[#allocation144_spill] sm:$0xff]  ;;  %v7433_v13 = vld [vmem:[#allocation135_spill] sm:$0xff] }
 0x5cb   :  { %3053 = vmatpush.bf16.msrb.mxu1 %v7423_v39  ;;  %3081 = vmatpush.bf16.msrb.mxu3 %v7424_v54  ;;  %v7434_v39 = vld [vmem:[#allocation136_spill] sm:$0xff]  ;;  %v7435_v54 = vld [vmem:[#allocation89_spill] sm:$0xff] }
 0x5ce   :  { %2986 = vmatpush.bf16.msrb.mxu0 %v7425_v53  ;;  %3014 = vmatpush.bf16.msra.mxu2 %v7426_v35  ;;  %v7436_v53 = vld [vmem:[#allocation145_spill] sm:$0xff]  ;;  %v7437_v35 = vld [vmem:[#allocation139_spill] sm:$0xff] }
 0x5cf   :  { %3054 = vmatpush.bf16.msrb.mxu1 %v7427_v22  ;;  %3082 = vmatpush.bf16.msrb.mxu3 %v7428_v46  ;;  %v7438_v22 = vld [vmem:[#allocation140_spill] sm:$0xff]  ;;  %v7439_v46 = vld [vmem:[#allocation94_spill] sm:$0xff] }
 0x5d2   :  { %2987 = vmatpush.bf16.msrb.mxu0 %v7429_v14  ;;  %3015 = vmatpush.bf16.msra.mxu2 %v7430_v23  ;;  %v7440_v14 = vld [vmem:[#allocation146_spill] sm:$0xff] }
 0x5d3   :  { %3055 = vmatpush.bf16.msrb.mxu1 %v7433_v13  ;;  %3083 = vmatpush.bf16.msrb.mxu3 %v7434_v39  ;;  %v7441_v23 = vld [vmem:[#allocation142_spill] sm:$0xff]  ;;  %v7444_v13 = vld [vmem:[#allocation147_spill] sm:$0xff] }
 0x5d4   :  { %v7445_v39 = vld [vmem:[#allocation103_spill] sm:$0xff] }
 0x5d6   :  { %3036 = vmatpush.bf16.msra.mxu0 %v7431_v45  ;;  %3064 = vmatpush.bf16.msrb.mxu2 %v7432_v43  ;;  %v7442_v45 = vld [vmem:[#allocation143_spill] sm:$0xff]  ;;  %v7443_v43 = vld [vmem:[#allocation98_spill] sm:$0xff] }
 0x5d7   :  { %3056 = vmatpush.bf16.msrb.mxu1 %v7437_v35  ;;  %3084 = vmatpush.bf16.msrb.mxu3 %v7438_v22  ;;  %v7448_v35 = vld [vmem:[#allocation149_spill] sm:$0xff]  ;;  %v7449_v22 = vld [vmem:[#allocation112_spill] sm:$0xff] }
 0x5da   :  { %3037 = vmatpush.bf16.msra.mxu0 %v7435_v54  ;;  %3065 = vmatpush.bf16.msrb.mxu2 %v7436_v53  ;;  %v7446_v54 = vld [vmem:[#allocation148_spill] sm:$0xff]  ;;  %v7447_v53 = vld [vmem:[#allocation106_spill] sm:$0xff] }
 0x5db   :  { %3057 = vmatpush.bf16.msrb.mxu1 %v7441_v23  ;;  %3085 = vmatpush.bf16.msrb.mxu3 %v7442_v45  ;;  %v7452_v23 = vld [vmem:[#allocation151_spill] sm:$0xff] }
 0x5de   :  { %3038 = vmatpush.bf16.msra.mxu0 %v7439_v46  ;;  %3066 = vmatpush.bf16.msrb.mxu2 %v7440_v14  ;;  %v7450_v46 = vld [vmem:[#allocation150_spill] sm:$0xff]  ;;  %v7451_v14 = vld [vmem:[#allocation115_spill] sm:$0xff] }
 0x5e2   :  { %3039 = vmatpush.bf16.msra.mxu0 %v7443_v43  ;;  %3067 = vmatpush.bf16.msrb.mxu2 %v7444_v13 }
 0x5e6   :  { %3040 = vmatpush.bf16.msra.mxu0 %v7445_v39  ;;  %3068 = vmatpush.bf16.msrb.mxu2 %v7446_v54 }
 0x5ea   :  { %3041 = vmatpush.bf16.msra.mxu0 %v7447_v53  ;;  %3069 = vmatpush.bf16.msrb.mxu2 %v7448_v35 }
 0x5ee   :  { %3042 = vmatpush.bf16.msra.mxu0 %v7449_v22  ;;  %3070 = vmatpush.bf16.msrb.mxu2 %v7450_v46 }
 0x5f2   :  { %3043 = vmatpush.bf16.msra.mxu0 %v7451_v14  ;;  %3071 = vmatpush.bf16.msrb.mxu2 %v7452_v23 }
 0x5fb   :  { %v2725_v45 = vpop.f32.mrf.mxu1 }
 0x601   :  { %v2753_v36 = vpop.f32.mrf.mxu3 }
 0x603   :  { %v2727_v43 = vpop.f32.mrf.mxu1 }
 0x609   :  { %v2755_v39 = vpop.f32.mrf.mxu3 }
 0x60b   :  { %v2781_v13 = vpop.f32.mrf.mxu1 }
 0x611   :  { %v2809_v23 = vpop.f32.mrf.mxu3 }
 0x612   :  { %v2711_v58 = vpop.f32.mrf.mxu0 }
 0x613   :  { %v2712_v54 = vadd.f32 %v2711_v58, %v7453_v48  ;;  %v2783_v22 = vpop.f32.mrf.mxu1 }
 0x615   :  { %v2726_v49 = vadd.f32 %v2725_v45, %v2712_v54 }
 0x617   :  { %v2814_v14 = vmul.f32 0.5, %v2726_v49 }
 0x618   :  { %v2739_v53 = vpop.f32.mrf.mxu2 }
 0x619   :  { %v2740_v35 = vadd.f32 %v2739_v53, %v7454_v42  ;;  %v2811_v49 = vpop.f32.mrf.mxu3 }
 0x61a   :  { %v2713_v25 = vpop.f32.mrf.mxu0 }
 0x61b   :  { %v2754_v57 = vadd.f32 %v2753_v36, %v2740_v35  ;;  %v2714_v46 = vadd.f32 %v2713_v25, %v7453_v48 }
 0x61d   :  { %v2822_v3 = vmul.f32 0.5, %v2754_v57  ;;  %v2728_v32 = vadd.f32 %v2727_v43, %v2714_v46  ;;  %v2889_v34 = vpop.f32.mrf.mxu1  ;;  %v7455_v57 = vld [vmem:[#allocation93_spill] sm:$0xff] }
 0x61f   :  { %4598 = vtanh.f32 %v2822_v3  ;;  %v2815_v9 = vmul.f32 0.5, %v2728_v32  ;;  %v430_v3 = vadd.f32 %v7455_v57, %v7138_v47  ;;  %v7456_v57 = vld [vmem:[#allocation49_spill] sm:$0xff] }
 0x620   :  { %4600 = vtanh.f32 %v2814_v14  ;;  %v2741_v33 = vpop.f32.mrf.mxu2 }
 0x621   :  { %v2742_v60 = vadd.f32 %v2741_v33, %v7454_v42  ;;  %4602 = vtanh.f32 %v2815_v9 }
 0x622   :  { %v2767_v58 = vpop.f32.mrf.mxu0 }
 0x623   :  { %v2756_v45 = vadd.f32 %v2755_v39, %v2742_v60  ;;  %v2768_v54 = vadd.f32 %v2767_v58, %v7217_v63  ;;  %v2923_v60 = vadd.f32 %v2889_v34, %v430_v3  ;;  %v7457_v34 = vld [vmem:[#allocation102_spill] sm:$0xff] }
 0x624   :  { %v432_v3 = vadd.f32 %v7457_v34, %v7138_v47 }
 0x625   :  { %v4599_v53 = vpop.eup %4598  ;;  %v2823_v10 = vmul.f32 0.5, %v2756_v45  ;;  %v2782_v36 = vadd.f32 %v2781_v13, %v2768_v54  ;;  %v2938_v42 = vmul.f32 0.5, %v2923_v60 }
 0x626   :  { %v4601_v35 = vpop.eup %4600  ;;  %v2826_v25 = vmul.f32 0.5, %v4599_v53 }
 0x627   :  { %4604 = vtanh.f32 %v2823_v10  ;;  %v2818_v33 = vmul.f32 0.5, %v4601_v35  ;;  %v4603_v13 = vpop.eup %4602  ;;  %v2891_v35 = vpop.f32.mrf.mxu1 }
 0x628   :  { %4606 = vtanh.f32 %v2782_v36  ;;  %v2795_v46 = vpop.f32.mrf.mxu2  ;;  %v2828_v43 = vadd.f32 0.5, %v2826_v25  ;;  %v2819_v25 = vmul.f32 0.5, %v4603_v13 }
 0x629   :  { %v2796_v32 = vadd.f32 %v2795_v46, %v7140_v55  ;;  %v2820_v9 = vadd.f32 0.5, %v2818_v33 }
 0x62a   :  { %v2769_v14 = vpop.f32.mrf.mxu0  ;;  %v2840_v48 = vmul.f32 %v2828_v43, %v7456_v57 }
 0x62b   :  { %v2810_v39 = vadd.f32 %v2809_v23, %v2796_v32  ;;  %v2770_v58 = vadd.f32 %v2769_v14, %v7217_v63  ;;  %v2927_v32 = vadd.f32 %v2891_v35, %v432_v3  ;;  %v7461_v35 = vld [vmem:[#allocation137_spill] sm:$0xff]  ;;  %v7462_v3 = vld [vmem:[#allocation86_spill] sm:$0xff] }
 0x62d   :  { %v4605_v45 = vpop.eup %4604  ;;  %v2832_v54 = vmul.f32 0.5, %v2810_v39  ;;  %v2784_v10 = vadd.f32 %v2783_v22, %v2770_v58  ;;  %v2917_v22 = vpop.f32.mrf.mxu3  ;;  %v7459_v39 = vld [vmem:[#allocation36_spill] sm:$0xff]  ;;  %v2939_v13 = vmul.f32 0.5, %v2927_v32 }
 0x62e   :  { %v4607_v53 = vpop.eup %4606  ;;  %v2827_v36 = vmul.f32 0.5, %v4605_v45 }
 0x62f   :  { %v2842_v11 = vmul.f32 %v4607_v53, %v2820_v9  ;;  %4608 = vtanh.f32 %v2832_v54  ;;  %v2821_v9 = vadd.f32 0.5, %v2819_v25  ;;  %v7464_v25 = vld [vmem:[#allocation34_spill] sm:$0xff] }
 0x630   :  { %4610 = vtanh.f32 %v2784_v10  ;;  %v2797_v23 = vpop.f32.mrf.mxu2  ;;  %v2829_v14 = vadd.f32 0.5, %v2827_v36  ;;  %v528_v36 = vadd.f32 %v7462_v3, %v7461_v35 }
 0x631   :  { %v6485_v46 = vadd.f32 %v2842_v11, %v2840_v48  ;;  %v2798_v33 = vadd.f32 %v2797_v23, %v7140_v55  ;;  %4612 = vtanh.f32 %v2938_v42  ;;  %v7460_v48 = vld [vmem:[#allocation52_spill] sm:$0xff] }
 0x632   :  { %v2875_v60 = vpop.f32.mrf.mxu0  ;;  %v2841_v57 = vmul.f32 %v2829_v14, %v7460_v48  ;;  %v2925_v32 = vadd.f32 %v2917_v22, %v528_v36 }
 0x633   :  { %7458 = vst [vmem:[#allocation50_spill] sm:$0xff] %v6485_v46  ;;  %v2812_v43 = vadd.f32 %v2811_v49, %v2798_v33  ;;  %v2922_v58 = vadd.f32 %v2875_v60, %v7459_v39  ;;  %4614 = vtanh.f32 %v6485_v46  ;;  %v7463_v49 = vld [vmem:[#allocation99_spill] sm:$0xff]  ;;  %v7465_v33 = vld [vmem:[#allocation38_spill] sm:$0xff] }
 0x634   :  { %v479_v23 = vadd.f32 %v7463_v49, %v5572_v61  ;;  %v383_v60 = vadd.f32 %v7465_v33, %v7464_v25 }
 0x635   :  { %v4609_v45 = vpop.eup %4608  ;;  %v2833_v54 = vmul.f32 0.5, %v2812_v43  ;;  %v2930_v10 = vmul.f32 0.5, %v2922_v58  ;;  %v2919_v48 = vpop.f32.mrf.mxu3 }
 0x636   :  { %v4611_v53 = vpop.eup %4610  ;;  %v2836_v11 = vmul.f32 0.5, %v4609_v45 }
 0x637   :  { %v2843_v34 = vmul.f32 %v4611_v53, %v2821_v9  ;;  %4616 = vtanh.f32 %v2833_v54  ;;  %v4613_v42 = vpop.eup %4612 }
 0x638   :  { %4618 = vtanh.f32 %v2930_v10  ;;  %v2903_v39 = vpop.f32.mrf.mxu2  ;;  %v2838_v58 = vadd.f32 0.5, %v2836_v11  ;;  %v2942_v54 = vmul.f32 0.5, %v4613_v42  ;;  %v7467_v10 = vld [vmem:[#allocation97_spill] sm:$0xff]  ;;  %v7468_v42 = vld [vmem:[#allocation108_spill] sm:$0xff] }
 0x639   :  { %v6497_v43 = vadd.f32 %v2843_v34, %v2841_v57  ;;  %4620 = vtanh.f32 %v2939_v13  ;;  %v2924_v14 = vadd.f32 %v2903_v39, %v479_v23  ;;  %v4615_v9 = vpop.eup %4614  ;;  %v530_v49 = vadd.f32 %v7467_v10, %v7461_v35 }
 0x63a   :  { %v2877_v45 = vpop.f32.mrf.mxu0  ;;  %v2948_v34 = vmul.f32 0.5, %v2925_v32  ;;  %v2848_v25 = vmul.f32 %v4615_v9, %v2838_v58  ;;  %v2944_v13 = vadd.f32 0.5, %v2942_v54  ;;  %v481_v39 = vadd.f32 %v7468_v42, %v5572_v61 }
 0x63b   :  { %7466 = vst [vmem:[#allocation55_spill] sm:$0xff] %v6497_v43  ;;  %4622 = vtanh.f32 %v6497_v43  ;;  %v2926_v53 = vadd.f32 %v2877_v45, %v383_v60  ;;  %v2929_v11 = vadd.f32 %v2919_v48, %v530_v49 }
 0x63c   :  { %4624 = vtanh.f32 %v2924_v14  ;;  %v2850_v10 = vpack.c.bf16 %v2848_v25, %v2848_v25  ;;  %v2956_v32 = vmul.f32 %v2944_v13, %v6370_v44 }
 0x63d   :  { %v4617_v3 = vpop.eup %4616  ;;  %v2931_v33 = vmul.f32 0.5, %v2926_v53  ;;  %v2949_v9 = vmul.f32 0.5, %v2929_v11 }
 0x63e   :  { %v4619_v57 = vpop.eup %4618  ;;  %v2837_v22 = vmul.f32 0.5, %v4617_v3 }
 0x63f   :  { %v2934_v36 = vmul.f32 0.5, %v4619_v57  ;;  %4626 = vtanh.f32 %v2931_v33  ;;  %v4621_v23 = vpop.eup %4620  ;;  %v2976_v57 = vunpack.c.l.b16 %v2850_v10 }
 0x640   :  { %v2839_v60 = vadd.f32 0.5, %v2837_v22  ;;  %v2905_v43 = vpop.f32.mrf.mxu2  ;;  %4628 = vtanh.f32 %v2948_v34  ;;  %v2943_v58 = vmul.f32 0.5, %v4621_v23 }
 0x641   :  { %v4623_v45 = vpop.eup %4622  ;;  %v2936_v14 = vadd.f32 0.5, %v2934_v36  ;;  %v2928_v35 = vadd.f32 %v2905_v43, %v481_v39 }
 0x642   :  { %v4625_v46 = vpop.eup %4624  ;;  %v2849_v53 = vmul.f32 %v4623_v45, %v2839_v60  ;;  %v2945_v42 = vadd.f32 0.5, %v2943_v58  ;;  %v7497_v58 = vld [vmem:[#allocation100_spill] sm:$0xff] }
 0x643   :  { %v2958_v54 = vmul.f32 %v4625_v46, %v2936_v14  ;;  %4630 = vtanh.f32 %v2928_v35 }
 0x644   :  { %v2851_v48 = vpack.c.bf16 %v2849_v53, %v2849_v53  ;;  %v4348_v3 = vpack.c.bf16 %v2849_v53, %v2848_v25  ;;  %4632 = vtanh.f32 %v2949_v9  ;;  %v2957_v46 = vmul.f32 %v2945_v42, %v6376_v18  ;;  %v7498_v9 = vld [vmem:[#allocation101_spill] sm:$0xff]  ;;  %v7506_v42 = vld [vmem:[#allocation110_spill] sm:$0xff] }
 0x645   :  { %v4627_v49 = vpop.eup %4626  ;;  %v6505_v33 = vadd.f32 %v2958_v54, %v2956_v32  ;;  %v7499_v54 = vld [vmem:[#allocation124_spill] sm:$0xff] }
 0x646   :  { %4349 = vst [vmem:[#allocation3 + $0x20] sm:$0xff] %v4348_v3   ;;  %v2977_v22 = vunpack.c.l.b16 %v2851_v48  ;;  %v2935_v36 = vmul.f32 0.5, %v4627_v49  ;;  %v4629_v34 = vpop.eup %4628  ;;  %v7500_v48 = vld [vmem:[#allocation125_spill] sm:$0xff]  ;;  %v7501_v3 = vld [vmem:[#allocation104_spill] sm:$0xff] }
 0x647   :  { %4634 = vtanh.f32 %v6505_v33  ;;  %v2952_v25 = vmul.f32 0.5, %v4629_v34  ;;  %v7502_v49 = vld [vmem:[#allocation105_spill] sm:$0xff]  ;;  %v7507_v34 = vld [vmem:[#allocation132_spill] sm:$0xff] }
 0x648   :  { %v2937_v60 = vadd.f32 0.5, %v2935_v36  ;;  %v2978_v43 = vpack.c.b16 %v2977_v22, %v2976_v57  ;;  %v7503_v57 = vld [vmem:[#allocation128_spill] sm:$0xff]  ;;  %v7504_v22 = vld [vmem:[#allocation130_spill] sm:$0xff]  ;;  %v7505_v36 = vld [vmem:[#allocation109_spill] sm:$0xff] }
 0x649   :  { %v4631_v44 = vpop.eup %4630  ;;  %v2954_v39 = vadd.f32 0.5, %v2952_v25  ;;  %v7513_v25 = vld [vmem:[#allocation135_spill] sm:$0xff] }
 0x64a   :  { %3002 = vmatmul.bf16.vlgmr.msra.gmra.mxu1 %v2978_v43  ;;  %3030 = vmatmul.bf16.vlgmr.msra.gmra.mxu3 %v2978_v43  ;;  %v2959_v35 = vmul.f32 %v4631_v44, %v2937_v60  ;;  %v4633_v13 = vpop.eup %4632  ;;  %v7508_v60 = vld [vmem:[#allocation133_spill] sm:$0xff] }
 0x64b   :  { %3158 = vmatpush.bf16.msra.mxu1 %v5097_v50  ;;  %3186 = vmatpush.bf16.msra.mxu3 %v5224_v16  ;;  %v2953_v45 = vmul.f32 0.5, %v4633_v13  ;;  %v7510_v44 = vld [vmem:[#allocation85_spill] sm:$0xff]  ;;  %v7514_v13 = vld [vmem:[#allocation136_spill] sm:$0xff] }
 0x64c   :  { %v6511_v11 = vadd.f32 %v2959_v35, %v2957_v46  ;;  %v7511_v46 = vld [vmem:[#allocation114_spill] sm:$0xff]  ;;  %v7512_v35 = vld [vmem:[#allocation144_spill] sm:$0xff] }
 0x64d   :  { %v4635_v23 = vpop.eup %4634  ;;  %v2955_v50 = vadd.f32 0.5, %v2953_v45  ;;  %v7517_v45 = vld [vmem:[#allocation139_spill] sm:$0xff] }
 0x64e   :  { %4636 = vtanh.f32 %v6511_v11  ;;  %v2964_v14 = vmul.f32 %v4635_v23, %v2954_v39  ;;  %v7515_v23 = vld [vmem:[#allocation89_spill] sm:$0xff] }
 0x64f   :  { %3159 = vmatpush.bf16.msra.mxu1 %v5127_v2  ;;  %3187 = vmatpush.bf16.msra.mxu3 %v5237_v29  ;;  %v7478_v29 = vld [vmem:[#allocation32_spill] sm:$0xff]  ;;  %v7516_v39 = vld [vmem:[#allocation145_spill] sm:$0xff] }
 0x650   :  { %v2966_v18 = vpack.c.bf16 %v2964_v14, %v2964_v14  ;;  %v7518_v14 = vld [vmem:[#allocation140_spill] sm:$0xff] }
 0x652   :  { %v2970_v32 = vunpack.c.l.b16 %v2966_v18  ;;  %v7521_v18 = vld [vmem:[#allocation142_spill] sm:$0xff] }
 0x653   :  { %3160 = vmatpush.bf16.msra.mxu1 %v5142_v12  ;;  %3188 = vmatpush.bf16.msra.mxu3 %v5245_v38  ;;  %v7479_v38 = vld [vmem:[#allocation81_spill] sm:$0xff] }
 0x654   :  { %v4637_v16 = vpop.eup %4636 }
 0x655   :  { %v2965_v10 = vmul.f32 %v4637_v16, %v2955_v50  ;;  %v7519_v50 = vld [vmem:[#allocation94_spill] sm:$0xff] }
 0x656   :  { %v7520_v16 = vld [vmem:[#allocation146_spill] sm:$0xff] }
 0x657   :  { %3161 = vmatpush.bf16.msra.mxu1 %v5157_v21  ;;  %3189 = vmatpush.bf16.msra.mxu3 %v5254_v56  ;;  %v2967_v53 = vpack.c.bf16 %v2965_v10, %v2965_v10  ;;  %v7472_v21 = vld [vmem:[#allocation127_spill] sm:$0xff]  ;;  %v7481_v56 = vld [vmem:[#allocation76_spill] sm:$0xff] }
 0x658   :  { %v7522_v10 = vld [vmem:[#allocation143_spill] sm:$0xff] }
 0x659   :  { %v2971_v2 = vunpack.c.l.b16 %v2967_v53  ;;  %v7523_v53 = vld [vmem:[#allocation98_spill] sm:$0xff] }
 0x65a   :  { %3058 = vmatmul.bf16.vlgmr.msrb.gmra.mxu1 %v2978_v43  ;;  %3086 = vmatmul.bf16.vlgmr.msrb.gmra.mxu3 %v2978_v43  ;;  %v7509_v43 = vld [vmem:[#allocation113_spill] sm:$0xff] }
 0x65b   :  { %3162 = vmatpush.bf16.msra.mxu1 %v5172_v31  ;;  %3190 = vmatpush.bf16.msra.mxu3 %v5265_v4  ;;  %v2972_v12 = vpack.c.b16 %v2971_v2, %v2970_v32  ;;  %v7474_v31 = vld [vmem:[#allocation30_spill] sm:$0xff]  ;;  %v7524_v32 = vld [vmem:[#allocation147_spill] sm:$0xff] }
 0x65c   :  { %v7482_v4 = vld [vmem:[#allocation134_spill] sm:$0xff]  ;;  %v7525_v2 = vld [vmem:[#allocation103_spill] sm:$0xff] }
 0x65d   :  { %2988 = vmatmul.bf16.vlgmr.msrb.gmra.mxu0 %v2972_v12  ;;  %3016 = vmatmul.bf16.vlgmr.msra.gmra.mxu2 %v2972_v12 }
 0x65e   :  { %3144 = vmatpush.bf16.msrb.mxu0 %v7073_v52  ;;  %3172 = vmatpush.bf16.msra.mxu2 %v5125_v62  ;;  %v7469_v62 = vld [vmem:[#allocation28_spill] sm:$0xff] }
 0x65f   :  { %3163 = vmatpush.bf16.msra.mxu1 %v5188_v40  ;;  %3191 = vmatpush.bf16.msra.mxu3 %v5273_v20  ;;  %v7475_v40 = vld [vmem:[#allocation74_spill] sm:$0xff]  ;;  %v7483_v20 = vld [vmem:[#allocation87_spill] sm:$0xff]  ;;  %v7491_v52 = vld [vmem:[#allocation116_spill] sm:$0xff] }
 0x662   :  { %3145 = vmatpush.bf16.msrb.mxu0 %v7074_v0  ;;  %3173 = vmatpush.bf16.msra.mxu2 %v5140_v8  ;;  %v7470_v8 = vld [vmem:[#allocation29_spill] sm:$0xff]  ;;  %v7492_v0 = vld [vmem:[#allocation118_spill] sm:$0xff] }
 0x663   :  { %3164 = vmatpush.bf16.msra.mxu1 %v5213_v6  ;;  %3192 = vmatpush.bf16.msra.mxu3 %v5281_v41  ;;  %v7477_v6 = vld [vmem:[#allocation33_spill] sm:$0xff]  ;;  %v7484_v41 = vld [vmem:[#allocation88_spill] sm:$0xff] }
 0x666   :  { %3146 = vmatpush.bf16.msrb.mxu0 %v7075_v30  ;;  %3174 = vmatpush.bf16.msra.mxu2 %v5155_v17  ;;  %v7471_v17 = vld [vmem:[#allocation71_spill] sm:$0xff] }
 0x667   :  { %3165 = vmatpush.bf16.msra.mxu1 %v5252_v51  ;;  %3193 = vmatpush.bf16.msra.mxu3 %v5294_v7  ;;  %v7480_v51 = vld [vmem:[#allocation83_spill] sm:$0xff] }
 0x668   :  { %v7485_v7 = vld [vmem:[#allocation79_spill] sm:$0xff] }
 0x669   :  { %v7493_v30 = vld [vmem:[#allocation95_spill] sm:$0xff] }
 0x66a   :  { %3147 = vmatpush.bf16.msrb.mxu0 %v7076_v37  ;;  %3166 = vmatmul.bf16.vlgmr.msra.gmra.mxu1 %v2972_v12  ;;  %v7494_v37 = vld [vmem:[#allocation96_spill] sm:$0xff] }
 0x66b   :  { %3272 = vmatpush.bf16.msrb.mxu1 %v5380_v59  ;;  %3300 = vmatpush.bf16.msrb.mxu3 %v5533_v5  ;;  %v7476_v59 = vld [vmem:[#allocation131_spill] sm:$0xff]  ;;  %v7488_v5 = vld [vmem:[#allocation92_spill] sm:$0xff] }
 0x66c   :  { %3175 = vmatpush.bf16.msra.mxu2 %v5170_v28  ;;  %3194 = vmatmul.bf16.vlgmr.msra.gmra.mxu3 %v2972_v12  ;;  %v7473_v28 = vld [vmem:[#allocation31_spill] sm:$0xff] }
 0x66d   :  { %3044 = vmatmul.bf16.vlgmr.msra.gmra.mxu0 %v2972_v12  ;;  %3072 = vmatmul.bf16.vlgmr.msrb.gmra.mxu2 %v2972_v12 }
 0x66e   :  { %3148 = vmatpush.bf16.msrb.mxu0 %v7077_v15  ;;  %v7495_v15 = vld [vmem:[#allocation121_spill] sm:$0xff] }
 0x66f   :  { %3273 = vmatpush.bf16.msrb.mxu1 %v5385_v19  ;;  %3301 = vmatpush.bf16.msrb.mxu3 %v5551_v26  ;;  %v7486_v19 = vld [vmem:[#allocation138_spill] sm:$0xff] }
 0x670   :  { %3176 = vmatpush.bf16.msra.mxu2 %v7025_v27  ;;  %v7489_v26 = vld [vmem:[#allocation82_spill] sm:$0xff]  ;;  %v7490_v27 = vld [vmem:[#allocation141_spill] sm:$0xff] }
 0x672   :  { %3149 = vmatpush.bf16.msrb.mxu0 %v7469_v62  ;;  %v7527_v62 = vld [vmem:[#allocation106_spill] sm:$0xff] }
 0x673   :  { %3274 = vmatpush.bf16.msrb.mxu1 %v5394_v24  ;;  %3302 = vmatpush.bf16.msrb.mxu3 %v7229_v1  ;;  %v7487_v24 = vld [vmem:[#allocation91_spill] sm:$0xff]  ;;  %v7496_v1 = vld [vmem:[#allocation122_spill] sm:$0xff] }
 0x674   :  { %3177 = vmatpush.bf16.msra.mxu2 %v7470_v8  ;;  %v7528_v8 = vld [vmem:[#allocation149_spill] sm:$0xff] }
 0x676   :  { %3150 = vmatpush.bf16.msrb.mxu0 %v7473_v28  ;;  %v7531_v28 = vld [vmem:[#allocation115_spill] sm:$0xff] }
 0x677   :  { %3275 = vmatpush.bf16.msrb.mxu1 %v7471_v17  ;;  %3303 = vmatpush.bf16.msrb.mxu3 %v7472_v21  ;;  %v7529_v17 = vld [vmem:[#allocation112_spill] sm:$0xff]  ;;  %v7530_v21 = vld [vmem:[#allocation150_spill] sm:$0xff] }
 0x678   :  { %3178 = vmatpush.bf16.msra.mxu2 %v7474_v31  ;;  %v7532_v31 = vld [vmem:[#allocation151_spill] sm:$0xff] }
 0x67a   :  { %3151 = vmatpush.bf16.msrb.mxu0 %v7477_v6 }
 0x67b   :  { %3276 = vmatpush.bf16.msrb.mxu1 %v7475_v40  ;;  %3304 = vmatpush.bf16.msrb.mxu3 %v7476_v59 }
 0x67c   :  { %3179 = vmatpush.bf16.msra.mxu2 %v7478_v29 }
 0x67d   :  { %3152 = vmatmul.bf16.vlgmr.msrb.gmra.mxu0 %v2972_v12 }
 0x67e   :  { %3258 = vmatpush.bf16.msra.mxu0 %v7479_v38 }
 0x67f   :  { %3277 = vmatpush.bf16.msrb.mxu1 %v7481_v56  ;;  %3305 = vmatpush.bf16.msrb.mxu3 %v7482_v4  ;;  %v7533_v56 = vld [vmem:[#allocation27_spill] sm:$0xff] }
 0x680   :  { %3286 = vmatpush.bf16.msrb.mxu2 %v7480_v51 }
 0x681   :  { %3180 = vmatmul.bf16.vlgmr.msra.gmra.mxu2 %v2972_v12  ;;  %v7526_v12 = vld [vmem:[#allocation148_spill] sm:$0xff] }
 0x682   :  { %3259 = vmatpush.bf16.msra.mxu0 %v7483_v20 }
 0x683   :  { %3278 = vmatpush.bf16.msrb.mxu1 %v7485_v7  ;;  %3306 = vmatpush.bf16.msrb.mxu3 %v7486_v19  ;;  %v7534_v7 = vld [vmem:[#allocation152_spill] sm:$0xff] }
 0x684   :  { %3287 = vmatpush.bf16.msrb.mxu2 %v7484_v41 }
 0x686   :  { %3260 = vmatpush.bf16.msra.mxu0 %v7487_v24 }
 0x687   :  { %3279 = vmatpush.bf16.msrb.mxu1 %v7489_v26  ;;  %3307 = vmatpush.bf16.msrb.mxu3 %v7490_v27 }
 0x688   :  { %3288 = vmatpush.bf16.msrb.mxu2 %v7488_v5 }
 0x68a   :  { %3261 = vmatpush.bf16.msra.mxu0 %v7493_v30 }
 0x68b   :  { %3328 = vmatpush.bf16.msra.mxu1 %v7491_v52  ;;  %3356 = vmatpush.bf16.msra.mxu3 %v7492_v0 }
 0x68c   :  { %3289 = vmatpush.bf16.msrb.mxu2 %v7494_v37 }
 0x68e   :  { %3262 = vmatpush.bf16.msra.mxu0 %v7497_v58 }
 0x68f   :  { %3329 = vmatpush.bf16.msra.mxu1 %v7495_v15  ;;  %3357 = vmatpush.bf16.msra.mxu3 %v7496_v1 }
 0x690   :  { %3290 = vmatpush.bf16.msrb.mxu2 %v7498_v9 }
 0x692   :  { %3263 = vmatpush.bf16.msra.mxu0 %v7501_v3 }
 0x693   :  { %3330 = vmatpush.bf16.msra.mxu1 %v7499_v54  ;;  %3358 = vmatpush.bf16.msra.mxu3 %v7500_v48 }
 0x694   :  { %3291 = vmatpush.bf16.msrb.mxu2 %v7502_v49 }
 0x696   :  { %3264 = vmatpush.bf16.msra.mxu0 %v7505_v36 }
 0x697   :  { %3331 = vmatpush.bf16.msra.mxu1 %v7503_v57  ;;  %3359 = vmatpush.bf16.msra.mxu3 %v7504_v22 }
 0x698   :  { %3292 = vmatpush.bf16.msrb.mxu2 %v7506_v42 }
 0x69a   :  { %3265 = vmatpush.bf16.msra.mxu0 %v7509_v43 }
 0x69b   :  { %3332 = vmatpush.bf16.msra.mxu1 %v7507_v34  ;;  %3360 = vmatpush.bf16.msra.mxu3 %v7508_v60  ;;  %v7535_v60 = vld [vmem:[#allocation111_spill] sm:$0xff] }
 0x69c   :  { %3293 = vmatpush.bf16.msrb.mxu2 %v7511_v46  ;;  %v435_v43 = vadd.f32 %v7535_v60, %v7138_v47 }
 0x69e   :  { %3314 = vmatpush.bf16.msrb.mxu0 %v7510_v44 }
 0x69f   :  { %3333 = vmatpush.bf16.msra.mxu1 %v7513_v25  ;;  %3361 = vmatpush.bf16.msra.mxu3 %v7514_v13 }
 0x6a0   :  { %3342 = vmatpush.bf16.msra.mxu2 %v7512_v35 }
 0x6a2   :  { %3315 = vmatpush.bf16.msrb.mxu0 %v7515_v23 }
 0x6a3   :  { %3334 = vmatpush.bf16.msra.mxu1 %v7517_v45  ;;  %3362 = vmatpush.bf16.msra.mxu3 %v7518_v14 }
 0x6a4   :  { %3343 = vmatpush.bf16.msra.mxu2 %v7516_v39 }
 0x6a6   :  { %3316 = vmatpush.bf16.msrb.mxu0 %v7519_v50 }
 0x6a7   :  { %3335 = vmatpush.bf16.msra.mxu1 %v7521_v18  ;;  %3363 = vmatpush.bf16.msra.mxu3 %v7522_v10 }
 0x6a8   :  { %3344 = vmatpush.bf16.msra.mxu2 %v7520_v16 }
 0x6aa   :  { %3317 = vmatpush.bf16.msrb.mxu0 %v7523_v53 }
 0x6ac   :  { %3345 = vmatpush.bf16.msra.mxu2 %v7524_v32 }
 0x6ae   :  { %3318 = vmatpush.bf16.msrb.mxu0 %v7525_v2  ;;  %v7536_v2 = vld [vmem:[#allocation50_spill] sm:$0xff] }
 0x6b0   :  { %3346 = vmatpush.bf16.msra.mxu2 %v7526_v12 }
 0x6b2   :  { %3319 = vmatpush.bf16.msrb.mxu0 %v7527_v62 }
 0x6b4   :  { %3347 = vmatpush.bf16.msra.mxu2 %v7528_v8 }
 0x6b6   :  { %3320 = vmatpush.bf16.msrb.mxu0 %v7529_v17 }
 0x6b8   :  { %3348 = vmatpush.bf16.msra.mxu2 %v7530_v21  ;;  %v7537_v21 = vld [vmem:[#allocation120_spill] sm:$0xff] }
 0x6ba   :  { %3321 = vmatpush.bf16.msrb.mxu0 %v7531_v28  ;;  %v437_v28 = vadd.f32 %v7537_v21, %v7138_v47 }
 0x6bc   :  { %3349 = vmatpush.bf16.msra.mxu2 %v7532_v31 }
 0x6c7   :  { %v3003_v40 = vpop.f32.mrf.mxu1 }
 0x6cd   :  { %v3031_v6 = vpop.f32.mrf.mxu3 }
 0x6cf   :  { %v3005_v59 = vpop.f32.mrf.mxu1 }
 0x6d5   :  { %v3033_v51 = vpop.f32.mrf.mxu3 }
 0x6d7   :  { %v3059_v29 = vpop.f32.mrf.mxu1 }
 0x6da   :  { %v2989_v38 = vpop.f32.mrf.mxu0 }
 0x6db   :  { %v2990_v4 = vadd.f32 %v2989_v38, %v7533_v56 }
 0x6dd   :  { %v3004_v20 = vadd.f32 %v3003_v40, %v2990_v4  ;;  %v3087_v0 = vpop.f32.mrf.mxu3 }
 0x6df   :  { %v3061_v5 = vpop.f32.mrf.mxu1  ;;  %v3092_v52 = vmul.f32 0.5, %v3004_v20 }
 0x6e0   :  { %v3017_v41 = vpop.f32.mrf.mxu2 }
 0x6e1   :  { %v3018_v19 = vadd.f32 %v3017_v41, %v7534_v7  ;;  %v7538_v41 = vld [vmem:[#allocation41_spill] sm:$0xff] }
 0x6e2   :  { %v2991_v24 = vpop.f32.mrf.mxu0 }
 0x6e3   :  { %v3032_v26 = vadd.f32 %v3031_v6, %v3018_v19  ;;  %v2992_v27 = vadd.f32 %v2991_v24, %v7533_v56  ;;  %v7539_v24 = vld [vmem:[#allocation137_spill] sm:$0xff] }
 0x6e5   :  { %v3100_v30 = vmul.f32 0.5, %v3032_v26  ;;  %v3006_v37 = vadd.f32 %v3005_v59, %v2992_v27  ;;  %v3089_v34 = vpop.f32.mrf.mxu3 }
 0x6e7   :  { %4638 = vtanh.f32 %v3100_v30  ;;  %v3093_v58 = vmul.f32 0.5, %v3006_v37  ;;  %v3167_v49 = vpop.f32.mrf.mxu1 }
 0x6e8   :  { %4640 = vtanh.f32 %v3092_v52  ;;  %v3019_v15 = vpop.f32.mrf.mxu2  ;;  %v3201_v25 = vadd.f32 %v3167_v49, %v435_v43 }
 0x6e9   :  { %v3020_v1 = vadd.f32 %v3019_v15, %v7534_v7  ;;  %4642 = vtanh.f32 %v3093_v58  ;;  %v7541_v58 = vld [vmem:[#allocation55_spill] sm:$0xff] }
 0x6ea   :  { %v3045_v9 = vpop.f32.mrf.mxu0  ;;  %v3216_v32 = vmul.f32 0.5, %v3201_v25 }
 0x6eb   :  { %v3034_v54 = vadd.f32 %v3033_v51, %v3020_v1  ;;  %v3046_v48 = vadd.f32 %v3045_v9, %v7217_v63 }
 0x6ed   :  { %v4639_v3 = vpop.eup %4638  ;;  %v3101_v57 = vmul.f32 0.5, %v3034_v54  ;;  %v3060_v22 = vadd.f32 %v3059_v29, %v3046_v48 }
 0x6ee   :  { %v4641_v36 = vpop.eup %4640  ;;  %v3104_v42 = vmul.f32 0.5, %v4639_v3  ;;  %v7542_v3 = vld [vmem:[#allocation117_spill] sm:$0xff] }
 0x6ef   :  { %4644 = vtanh.f32 %v3101_v57  ;;  %v3096_v46 = vmul.f32 0.5, %v4641_v36  ;;  %v4643_v14 = vpop.eup %4642  ;;  %v3169_v17 = vpop.f32.mrf.mxu1  ;;  %v484_v49 = vadd.f32 %v7542_v3, %v5572_v61  ;;  %v7543_v57 = vld [vmem:[#allocation34_spill] sm:$0xff] }
 0x6f0   :  { %4646 = vtanh.f32 %v3060_v22  ;;  %v3073_v44 = vpop.f32.mrf.mxu2  ;;  %v3106_v23 = vadd.f32 0.5, %v3104_v42  ;;  %v3097_v40 = vmul.f32 0.5, %v4643_v14  ;;  %v3195_v6 = vpop.f32.mrf.mxu3  ;;  %v3205_v38 = vadd.f32 %v3169_v17, %v437_v28  ;;  %v7544_v22 = vld [vmem:[#allocation44_spill] sm:$0xff] }
 0x6f1   :  { %v3074_v35 = vadd.f32 %v3073_v44, %v7140_v55  ;;  %v3098_v16 = vadd.f32 0.5, %v3096_v46  ;;  %v388_v36 = vadd.f32 %v7544_v22, %v7543_v57 }
 0x6f2   :  { %v3047_v13 = vpop.f32.mrf.mxu0  ;;  %v3118_v12 = vmul.f32 %v3106_v23, %v7536_v2  ;;  %v3099_v47 = vadd.f32 0.5, %v3097_v40  ;;  %v3217_v15 = vmul.f32 0.5, %v3205_v38 }
 0x6f3   :  { %v3088_v39 = vadd.f32 %v3087_v0, %v3074_v35  ;;  %v3048_v45 = vadd.f32 %v3047_v13, %v7217_v63 }
 0x6f5   :  { %v4645_v50 = vpop.eup %4644  ;;  %v3110_v18 = vmul.f32 0.5, %v3088_v39  ;;  %v3062_v10 = vadd.f32 %v3061_v5, %v3048_v45  ;;  %v7540_v5 = vld [vmem:[#allocation107_spill] sm:$0xff] }
 0x6f6   :  { %v4647_v53 = vpop.eup %4646  ;;  %v3105_v62 = vmul.f32 0.5, %v4645_v50  ;;  %v533_v26 = vadd.f32 %v7540_v5, %v7539_v24  ;;  %v7545_v39 = vld [vmem:[#allocation119_spill] sm:$0xff] }
 0x6f7   :  { %v3120_v8 = vmul.f32 %v4647_v53, %v3098_v16  ;;  %4648 = vtanh.f32 %v3110_v18  ;;  %v535_v45 = vadd.f32 %v7545_v39, %v7539_v24  ;;  %v4302_v39 = vld [vmem:[%s6702_s9 + $0x18] sm:$0xff] }
 0x6f8   :  { %4650 = vtanh.f32 %v3062_v10  ;;  %v3075_v31 = vpop.f32.mrf.mxu2  ;;  %v3107_v4 = vadd.f32 0.5, %v3105_v62  ;;  %v3203_v37 = vadd.f32 %v3195_v6, %v533_v26  ;;  %v3197_v13 = vpop.f32.mrf.mxu3  ;;  %v7546_v62 = vld [vmem:[#allocation126_spill] sm:$0xff] }
 0x6f9   :  { %v6620_v59 = vadd.f32 %v3120_v8, %v3118_v12  ;;  %v3076_v29 = vadd.f32 %v3075_v31, %v7140_v55  ;;  %4652 = vtanh.f32 %v3216_v32  ;;  %v3207_v10 = vadd.f32 %v3197_v13, %v535_v45  ;;  %v4304_v13 = vld [vmem:[%s6702_s9 + $0x28] sm:$0xff]  ;;  %v4301_v45 = vld [vmem:[%s6702_s9 + $0x10] sm:$0xff] }
 0x6fa   :  { %v3153_v51 = vpop.f32.mrf.mxu0  ;;  %v3119_v9 = vmul.f32 %v3107_v4, %v7541_v58  ;;  %v3226_v60 = vmul.f32 0.5, %v3203_v37  ;;  %v486_v8 = vadd.f32 %v7546_v62, %v5572_v61 }
 0x6fb   :  { %v3090_v20 = vadd.f32 %v3089_v34, %v3076_v29  ;;  %v3200_v19 = vadd.f32 %v3153_v51, %v7538_v41  ;;  %4654 = vtanh.f32 %v6620_v59  ;;  %v3227_v29 = vmul.f32 0.5, %v3207_v10  ;;  %v4314_v10 = vld [vmem:[#allocation3 + $0x18] sm:$0xff] }
 0x6fd   :  { %v4649_v27 = vpop.eup %4648  ;;  %v3111_v52 = vmul.f32 0.5, %v3090_v20  ;;  %v3208_v0 = vmul.f32 0.5, %v3200_v19 }
 0x6fe   :  { %v4651_v30 = vpop.eup %4650  ;;  %v3114_v1 = vmul.f32 0.5, %v4649_v27 }
 0x6ff   :  { %v3121_v54 = vmul.f32 %v4651_v30, %v3099_v47  ;;  %4656 = vtanh.f32 %v3111_v52  ;;  %v4653_v48 = vpop.eup %4652 }
 0x700   :  { %4658 = vtanh.f32 %v3208_v0  ;;  %v3116_v43 = vadd.f32 0.5, %v3114_v1  ;;  %v3220_v25 = vmul.f32 0.5, %v4653_v48 }
 0x701   :  { %v6632_v42 = vadd.f32 %v3121_v54, %v3119_v9  ;;  %4660 = vtanh.f32 %v3217_v15  ;;  %v4655_v35 = vpop.eup %4654 }
 0x702   :  { %v3155_v46 = vpop.f32.mrf.mxu0  ;;  %v3126_v18 = vmul.f32 %v4655_v35, %v3116_v43  ;;  %v3222_v32 = vadd.f32 0.5, %v3220_v25  ;;  %v4305_v25 = vld [vmem:[%s6702_s9 + $0x30] sm:$0xff] }
 0x703   :  { %4662 = vtanh.f32 %v6632_v42  ;;  %v3204_v23 = vadd.f32 %v3155_v46, %v388_v36  ;;  %v4306_v46 = vld [vmem:[%s6702_s9 + $0x38] sm:$0xff] }
 0x704   :  { %v3181_v34 = vpop.f32.mrf.mxu2  ;;  %v3128_v6 = vpack.c.bf16 %v3126_v18, %v3126_v18  ;;  %v3234_v4 = vmul.f32 %v3222_v32, %v6505_v33  ;;  %v4316_v32 = vld [vmem:[#allocation3 + $0x8] sm:$0xff] }
 0x705   :  { %v3202_v44 = vadd.f32 %v3181_v34, %v484_v49  ;;  %v4657_v14 = vpop.eup %4656  ;;  %v3209_v50 = vmul.f32 0.5, %v3204_v23  ;;  %v4303_v23 = vld [vmem:[%s6702_s9 + $0x20] sm:$0xff] }
 0x706   :  { %v4659_v16 = vpop.eup %4658  ;;  %v3115_v53 = vmul.f32 0.5, %v4657_v14  ;;  %v3254_v61 = vunpack.c.l.b16 %v3128_v6  ;;  %v4300_v14 = vld [vmem:[%s6702_s9 + $0x8] sm:$0xff] }
 0x707   :  { %4664 = vtanh.f32 %v3202_v44  ;;  %v3212_v2 = vmul.f32 0.5, %v4659_v16  ;;  %v4661_v12 = vpop.eup %4660  ;;  %v4312_v16 = vld [vmem:[#allocation3 + $0x30] sm:$0xff] }
 0x708   :  { %4666 = vtanh.f32 %v3226_v60  ;;  %v3117_v17 = vadd.f32 0.5, %v3115_v53  ;;  %v3221_v20 = vmul.f32 0.5, %v4661_v12  ;;  %v4315_v53 = vld [vmem:[#allocation3 + $0x10] sm:$0xff] }
 0x709   :  { %4668 = vtanh.f32 %v3209_v50  ;;  %v4663_v21 = vpop.eup %4662  ;;  %v3214_v28 = vadd.f32 0.5, %v3212_v2  ;;  %v4299_v50 = vld [vmem:[%s6702_s9] sm:$0xff]  ;;  %s4910_s9 = smov [#allocation14]  }
 0x70a   :  { %v3127_v38 = vmul.f32 %v4663_v21, %v3117_v17  ;;  %v3223_v0 = vadd.f32 0.5, %v3221_v20  ;;  %v4317_v2 = vld [vmem:[#allocation3 + $0x20] sm:$0xff]  ;;  %s3647_s2 = sshll.u32 %s4910_s9, 4  ;;  %s3648_s2 = int_to_ptr.vmem [resolvable:$true] %s3647_s2 }
 0x70c   :  { %v3183_v31 = vpop.f32.mrf.mxu2  ;;  %v3129_v24 = vpack.c.bf16 %v3127_v38, %v3127_v38  ;;  %v4353_v5 = vpack.c.bf16 %v3127_v38, %v3126_v18  ;;  %v3235_v1 = vmul.f32 %v3223_v0, %v6511_v11  ;;  %v4313_v18 = vld [vmem:[#allocation3] sm:$0xff] }
 0x70d   :  { %v4665_v40 = vpop.eup %4664  ;;  %v3206_v51 = vadd.f32 %v3183_v31, %v486_v8 }
 0x70e   :  { %v3236_v41 = vmul.f32 %v4665_v40, %v3214_v28  ;;  %v4667_v19 = vpop.eup %4666  ;;  %4354 = vst [vmem:[#allocation3 + $0x28] sm:$0xff] %v4353_v5   ;;  %v3255_v47 = vunpack.c.l.b16 %v3129_v24 }
 0x70f   :  { %4670 = vtanh.f32 %v3206_v51  ;;  %v4669_v26 = vpop.eup %4668  ;;  %v3230_v30 = vmul.f32 0.5, %v4667_v19 }
 0x710   :  { %v3238_v27 = vadd.f32 %v3236_v41, %v3234_v4  ;;  %4672 = vtanh.f32 %v3227_v29  ;;  %v3213_v52 = vmul.f32 0.5, %v4669_v26  ;;  %v3256_v15 = vpack.c.b16 %v3255_v47, %v3254_v61 }
 0x711   :  { %v3232_v54 = vadd.f32 0.5, %v3230_v30 }
 0x712   :  { %4674 = vtanh.f32 %v3238_v27  ;;  %3416 = vst [vmem:[#allocation16] sm:$0xff] %v3238_v27  ;;  %v3215_v37 = vadd.f32 0.5, %v3213_v52  ;;  %3280 = vmatmul.bf16.vlgmr.msrb.gmra.mxu1 %v3256_v15  ;;  %3308 = vmatmul.bf16.vlgmr.msrb.gmra.mxu3 %v3256_v15 }
 0x715   :  { %v4671_v33 = vpop.eup %4670  ;;  %v4318_v8 = vld [vmem:[#allocation3 + $0x28] sm:$0xff] }
 0x716   :  { %v3237_v58 = vmul.f32 %v4671_v33, %v3215_v37  ;;  %v4673_v9 = vpop.eup %4672 }
 0x717   :  { %v3231_v57 = vmul.f32 0.5, %v4673_v9 }
 0x718   :  { %v4675_v48 = vpop.eup %4674  ;;  %v3239_v3 = vadd.f32 %v3237_v58, %v3235_v1 }
 0x719   :  { %v3242_v49 = vmul.f32 %v4675_v48, %v3232_v54  ;;  %v3233_v22 = vadd.f32 0.5, %v3231_v57 }
 0x71a   :  { %4676 = vtanh.f32 %v3239_v3  ;;  %3417 = vst [vmem:[#allocation16 + $0x8] sm:$0xff] %v3239_v3 }
 0x71b   :  { %3411 = vst [vmem:[#allocation14] sm:$0xff] %v3242_v49  ;;  %v3244_v60 = vpack.c.bf16 %v3242_v49, %v3242_v49 }
 0x71d   :  { %v3248_v44 = vunpack.c.l.b16 %v3244_v60 }
 0x720   :  { %v4677_v36 = vpop.eup %4676 }
 0x721   :  { %v3243_v34 = vmul.f32 %v4677_v36, %v3233_v22 }
 0x722   :  { %3336 = vmatmul.bf16.vlgmr.msra.gmra.mxu1 %v3256_v15  ;;  %3364 = vmatmul.bf16.vlgmr.msra.gmra.mxu3 %v3256_v15 }
 0x723   :  { %v3245_v43 = vpack.c.bf16 %v3243_v34, %v3243_v34  ;;  %3412 = vst [vmem:[#allocation14 + $0x8] sm:$0xff] %v3243_v34 }
 0x725   :  { %v3249_v11 = vunpack.c.l.b16 %v3245_v43 }
 0x727   :  { %v3250_v35 = vpack.c.b16 %v3249_v11, %v3248_v44 }
 0x729   :  { %3266 = vmatmul.bf16.vlgmr.msra.gmra.mxu0 %v3250_v35  ;;  %3294 = vmatmul.bf16.vlgmr.msrb.gmra.mxu2 %v3250_v35 }
 0x72a   :  { %3549 = vmatpush.bf16.msra.mxu0 %v4306_v46 }
 0x72e   :  { %3550 = vmatpush.bf16.msra.mxu0 %v4305_v25 }
 0x732   :  { %3551 = vmatpush.bf16.msra.mxu0 %v4304_v13 }
 0x736   :  { %3552 = vmatpush.bf16.msra.mxu0 %v4303_v23 }
 0x739   :  { %3322 = vmatmul.bf16.vlgmr.msrb.gmra.mxu0 %v3250_v35  ;;  %3350 = vmatmul.bf16.vlgmr.msra.gmra.mxu2 %v3250_v35 }
 0x73a   :  { %3553 = vmatpush.bf16.msra.mxu0 %v4302_v39 }
 0x73e   :  { %3554 = vmatpush.bf16.msra.mxu0 %v4301_v45 }
 0x742   :  { %3555 = vmatpush.bf16.msra.mxu0 %v4300_v14 }
 0x746   :  { %3556 = vmatpush.bf16.msra.mxu0 %v4299_v50 }
 0x749   :  { %3557 = vmatmul.bf16.vlgmr.msra.gmra.mxu0 %v4312_v16 }
 0x759   :  { %3562 = vmatmul.bf16.gmra.mxu0 %v4313_v18 }
 0x769   :  { %3567 = vmatmul.bf16.gmra.mxu0 %v4314_v10 }
 0x779   :  { %3572 = vmatmul.bf16.gmra.mxu0 %v4315_v53 }
 0x789   :  { %3577 = vmatmul.bf16.gmra.mxu0 %v4316_v32 }
 0x78f   :  { %v3281_v12 = vpop.f32.mrf.mxu1 }
 0x795   :  { %v3309_v17 = vpop.f32.mrf.mxu3 }
 0x797   :  { %v3283_v28 = vpop.f32.mrf.mxu1 }
 0x799   :  { %3582 = vmatmul.bf16.gmra.mxu0 %v4317_v2 }
 0x79d   :  { %v3311_v41 = vpop.f32.mrf.mxu3 }
 0x79f   :  { %v3337_v26 = vpop.f32.mrf.mxu1 }
 0x7a5   :  { %v3365_v33 = vpop.f32.mrf.mxu3 }
 0x7a6   :  { %v3267_v62 = vpop.f32.mrf.mxu0 }
 0x7a7   :  { %v3268_v21 = vadd.f32 %v3267_v62, %v7533_v56  ;;  %v3339_v57 = vpop.f32.mrf.mxu1 }
 0x7a9   :  { %3587 = vmatmul.bf16.gmra.mxu0 %v4318_v8  ;;  %v3282_v31 = vadd.f32 %v3281_v12, %v3268_v21  ;;  %v3422_v21 = vld [vmem:[#allocation13 + $0x8] sm:$0xff] }
 0x7ab   :  { %v3370_v4 = vmul.f32 0.5, %v3282_v31 }
 0x7ac   :  { %v3295_v40 = vpop.f32.mrf.mxu2 }
 0x7ad   :  { %v3296_v6 = vadd.f32 %v3295_v40, %v7534_v7  ;;  %v3367_v39 = vpop.f32.mrf.mxu3 }
 0x7ae   :  { %v3269_v29 = vpop.f32.mrf.mxu0 }
 0x7af   :  { %v3310_v38 = vadd.f32 %v3309_v17, %v3296_v6  ;;  %v3270_v51 = vadd.f32 %v3269_v29, %v7533_v56 }
 0x7b1   :  { %v3378_v20 = vmul.f32 0.5, %v3310_v38  ;;  %v3284_v19 = vadd.f32 %v3283_v28, %v3270_v51 }
 0x7b3   :  { %4678 = vtanh.f32 %v3378_v20  ;;  %v3371_v27 = vmul.f32 0.5, %v3284_v19  ;;  %v3424_v19 = vld [vmem:[#allocation13 + $0x18] sm:$0xff] }
 0x7b4   :  { %4680 = vtanh.f32 %v3370_v4  ;;  %v3297_v24 = vpop.f32.mrf.mxu2  ;;  %v3423_v4 = vld [vmem:[#allocation13 + $0x10] sm:$0xff] }
 0x7b5   :  { %v3298_v5 = vadd.f32 %v3297_v24, %v7534_v7  ;;  %4682 = vtanh.f32 %v3371_v27  ;;  %v3425_v27 = vld [vmem:[#allocation13 + $0x20] sm:$0xff] }
 0x7b6   :  { %v3323_v61 = vpop.f32.mrf.mxu0 }
 0x7b7   :  { %v3312_v47 = vadd.f32 %v3311_v41, %v3298_v5  ;;  %v3324_v52 = vadd.f32 %v3323_v61, %v7217_v63 }
 0x7b9   :  { %v4679_v0 = vpop.eup %4678  ;;  %v3379_v30 = vmul.f32 0.5, %v3312_v47  ;;  %v3338_v37 = vadd.f32 %v3337_v26, %v3324_v52  ;;  %v3426_v52 = vld [vmem:[#allocation13 + $0x28] sm:$0xff] }
 0x7ba   :  { %v4681_v15 = vpop.eup %4680  ;;  %v3382_v56 = vmul.f32 0.5, %v4679_v0 }
 0x7bb   :  { %4684 = vtanh.f32 %v3379_v30  ;;  %v3374_v58 = vmul.f32 0.5, %v4681_v15  ;;  %v4683_v49 = vpop.eup %4682 }
 0x7bc   :  { %4686 = vtanh.f32 %v3338_v37  ;;  %v3351_v1 = vpop.f32.mrf.mxu2  ;;  %v3384_v54 = vadd.f32 0.5, %v3382_v56  ;;  %v3375_v25 = vmul.f32 0.5, %v4683_v49  ;;  %v3427_v37 = vld [vmem:[#allocation13 + $0x30] sm:$0xff] }
 0x7bd   :  { %v3352_v9 = vadd.f32 %v3351_v1, %v7140_v55  ;;  %v3376_v36 = vadd.f32 0.5, %v3374_v58 }
 0x7be   :  { %v3325_v7 = vpop.f32.mrf.mxu0  ;;  %v3396_v44 = vmul.f32 %v3384_v54, %v6620_v59  ;;  %v3377_v10 = vadd.f32 0.5, %v3375_v25 }
 0x7bf   :  { %v3366_v48 = vadd.f32 %v3365_v33, %v3352_v9  ;;  %v3326_v3 = vadd.f32 %v3325_v7, %v7217_v63  ;;  %v3421_v63 = vld [vmem:[#allocation13] sm:$0xff]  ;;  %v3428_v33 = vld [vmem:[#allocation13 + $0x38] sm:$0xff] }
 0x7c0   :  { %v3429_v9 = vld [vmem:[#allocation13 + $0x40] sm:$0xff] }
 0x7c1   :  { %v4685_v22 = vpop.eup %4684  ;;  %v3388_v34 = vmul.f32 0.5, %v3366_v48  ;;  %v3340_v60 = vadd.f32 %v3339_v57, %v3326_v3  ;;  %v3430_v48 = vld [vmem:[#allocation13 + $0x48] sm:$0xff]  ;;  %v3431_v57 = vld [vmem:[#allocation13 + $0x50] sm:$0xff] }
 0x7c2   :  { %v4687_v43 = vpop.eup %4686  ;;  %v3383_v11 = vmul.f32 0.5, %v4685_v22 }
 0x7c3   :  { %v3398_v46 = vmul.f32 %v4687_v43, %v3376_v36  ;;  %4688 = vtanh.f32 %v3388_v34  ;;  %v3432_v34 = vld [vmem:[#allocation13 + $0x58] sm:$0xff] }
 0x7c4   :  { %4690 = vtanh.f32 %v3340_v60  ;;  %v3353_v35 = vpop.f32.mrf.mxu2  ;;  %v3385_v14 = vadd.f32 0.5, %v3383_v11 }
 0x7c5   :  { %v3400_v13 = vadd.f32 %v3398_v46, %v3396_v44  ;;  %v3354_v23 = vadd.f32 %v3353_v35, %v7140_v55  ;;  %v3433_v44 = vld [vmem:[#allocation13 + $0x60] sm:$0xff]  ;;  %v3434_v35 = vld [vmem:[#allocation13 + $0x68] sm:$0xff] }
 0x7c6   :  { %v3558_v45 = vpop.f32.mrf.mxu0  ;;  %v3397_v2 = vmul.f32 %v3385_v14, %v6632_v42 }
 0x7c7   :  { %4692 = vtanh.f32 %v3400_v13  ;;  %3419 = vst [vmem:[#allocation16 + $0x10] sm:$0xff] %v3400_v13  ;;  %v3368_v50 = vadd.f32 %v3367_v39, %v3354_v23  ;;  %v3598_v16 = vadd.f32 %v3558_v45, %v3421_v63  ;;  %v3435_v23 = vld [vmem:[#allocation13 + $0x70] sm:$0xff]  ;;  %v3436_v45 = vld [vmem:[#allocation13 + $0x78] sm:$0xff] }
 0x7c9   :  { %v4689_v18 = vpop.eup %4688  ;;  %v3389_v59 = vmul.f32 0.5, %v3368_v50  ;;  %3614 = vst [vmem:[#allocation13] sm:$0xff] %v3598_v16 }
 0x7ca   :  { %v4691_v53 = vpop.eup %4690  ;;  %v3392_v32 = vmul.f32 0.5, %v4689_v18 }
 0x7cb   :  { %v3399_v12 = vmul.f32 %v4691_v53, %v3377_v10  ;;  %4694 = vtanh.f32 %v3389_v59 }
 0x7cc   :  { %v3394_v62 = vadd.f32 0.5, %v3392_v32 }
 0x7cd   :  { %v4693_v55 = vpop.eup %4692  ;;  %v3401_v8 = vadd.f32 %v3399_v12, %v3397_v2 }
 0x7ce   :  { %v3404_v17 = vmul.f32 %v4693_v55, %v3394_v62  ;;  %v3560_v28 = vpop.f32.mrf.mxu0 }
 0x7cf   :  { %4696 = vtanh.f32 %v3401_v8  ;;  %3420 = vst [vmem:[#allocation16 + $0x18] sm:$0xff] %v3401_v8  ;;  %v3599_v31 = vadd.f32 %v3560_v28, %v3422_v21 }
 0x7d0   :  { %3414 = vst [vmem:[#allocation14 + $0x10] sm:$0xff] %v3404_v17 }
 0x7d1   :  { %v4695_v40 = vpop.eup %4694  ;;  %3615 = vst [vmem:[#allocation13 + $0x8] sm:$0xff] %v3599_v31 }
 0x7d2   :  { %v3393_v6 = vmul.f32 0.5, %v4695_v40 }
 0x7d4   :  { %v3395_v29 = vadd.f32 0.5, %v3393_v6 }
 0x7d5   :  { %v4697_v38 = vpop.eup %4696 }
 0x7d6   :  { %v3405_v51 = vmul.f32 %v4697_v38, %v3395_v29  ;;  %v3563_v42 = vpop.f32.mrf.mxu0 }
 0x7d7   :  { %v3600_v20 = vadd.f32 %v3563_v42, %v3423_v4 }
 0x7d8   :  { %v4358_v41 = vpack.c.bf16 %v3405_v51, %v3404_v17  ;;  %3415 = vst [vmem:[#allocation14 + $0x18] sm:$0xff] %v3405_v51 }
 0x7d9   :  { %3616 = vst [vmem:[#allocation13 + $0x10] sm:$0xff] %v3600_v20  ;;  %3655 = dma.vmem_to_hbm [thread:$0]  %s3648_s2, 512, %s3650_s8, [#allocation15], %s4905_s26, %s4905_s26, %s4906_s28  }
 0x7da   :  { %4359 = vst [vmem:[#allocation3 + $0x38] sm:$0xff] %v4358_v41   ;;  %3668 = dma.vmem_to_hbm [thread:$0]  %s3661_s16, 512, %s3663_s5, [#allocation15], %s4905_s26, %s4905_s26, %s4906_s28  }
 0x7de   :  { %v3565_v24 = vpop.f32.mrf.mxu0 }
 0x7df   :  { %v3601_v5 = vadd.f32 %v3565_v24, %v3424_v19 }
 0x7e1   :  { %3617 = vst [vmem:[#allocation13 + $0x18] sm:$0xff] %v3601_v5  ;;  %v4319_v26 = vld [vmem:[#allocation3 + $0x38] sm:$0xff] }
 0x7e2   :  { %3592 = vmatmul.bf16.gmra.mxu0 %v4319_v26 }
 0x7e6   :  { %v3568_v61 = vpop.f32.mrf.mxu0 }
 0x7e7   :  { %v3602_v47 = vadd.f32 %v3568_v61, %v3425_v27 }
 0x7e9   :  { %3618 = vst [vmem:[#allocation13 + $0x20] sm:$0xff] %v3602_v47 }
 0x7ee   :  { %v3570_v0 = vpop.f32.mrf.mxu0 }
 0x7ef   :  { %v3603_v30 = vadd.f32 %v3570_v0, %v3426_v52 }
 0x7f1   :  { %3619 = vst [vmem:[#allocation13 + $0x28] sm:$0xff] %v3603_v30 }
 0x7f6   :  { %v3573_v15 = vpop.f32.mrf.mxu0 }
 0x7f7   :  { %v3604_v56 = vadd.f32 %v3573_v15, %v3427_v37 }
 0x7f9   :  { %3620 = vst [vmem:[#allocation13 + $0x30] sm:$0xff] %v3604_v56 }
 0x7fe   :  { %v3575_v1 = vpop.f32.mrf.mxu0 }
 0x7ff   :  { %v3605_v58 = vadd.f32 %v3575_v1, %v3428_v33 }
 0x801   :  { %3621 = vst [vmem:[#allocation13 + $0x38] sm:$0xff] %v3605_v58 }
 0x806   :  { %v3578_v7 = vpop.f32.mrf.mxu0 }
 0x807   :  { %v3606_v54 = vadd.f32 %v3578_v7, %v3429_v9 }
 0x809   :  { %3622 = vst [vmem:[#allocation13 + $0x40] sm:$0xff] %v3606_v54 }
 0x80e   :  { %v3580_v3 = vpop.f32.mrf.mxu0 }
 0x80f   :  { %v3607_v49 = vadd.f32 %v3580_v3, %v3430_v48 }
 0x811   :  { %3623 = vst [vmem:[#allocation13 + $0x48] sm:$0xff] %v3607_v49 }
 0x816   :  { %v3583_v22 = vpop.f32.mrf.mxu0 }
 0x817   :  { %v3608_v36 = vadd.f32 %v3583_v22, %v3431_v57 }
 0x819   :  { %3624 = vst [vmem:[#allocation13 + $0x50] sm:$0xff] %v3608_v36 }
 0x81e   :  { %v3585_v60 = vpop.f32.mrf.mxu0 }
 0x81f   :  { %v3609_v43 = vadd.f32 %v3585_v60, %v3432_v34 }
 0x821   :  { %3625 = vst [vmem:[#allocation13 + $0x58] sm:$0xff] %v3609_v43 }
 0x826   :  { %v3588_v11 = vpop.f32.mrf.mxu0 }
 0x827   :  { %v3610_v46 = vadd.f32 %v3588_v11, %v3433_v44 }
 0x829   :  { %3626 = vst [vmem:[#allocation13 + $0x60] sm:$0xff] %v3610_v46 }
 0x82e   :  { %v3590_v25 = vpop.f32.mrf.mxu0 }
 0x82f   :  { %v3611_v13 = vadd.f32 %v3590_v25, %v3434_v35 }
 0x831   :  { %3627 = vst [vmem:[#allocation13 + $0x68] sm:$0xff] %v3611_v13 }
 0x85f   :  { %v3593_v39 = vpop.f32.mrf.mxu0 }
 0x860   :  { %v3612_v63 = vadd.f32 %v3593_v39, %v3435_v23 }
 0x862   :  { %3628 = vst [vmem:[#allocation13 + $0x70] sm:$0xff] %v3612_v63 }
 0x867   :  { %v3595_v14 = vpop.f32.mrf.mxu0 }
 0x868   :  { %v3613_v50 = vadd.f32 %v3595_v14, %v3436_v45 }
 0x86a   :  { %3629 = vst [vmem:[#allocation13 + $0x78] sm:$0xff] %v3613_v50 }
 0x86b   :  { %3642 = dma.vmem_to_hbm [thread:$0]  %s3635_s13, 2048, %s3637_s7, [#allocation6], %s4905_s26, %s4905_s26, %s4906_s28  }
 0x86c   :  { %4896 = dma.done.wait [#allocation6], 2048  }
 0x86d   :  { %4897 = vsyncadd [#allocation6], 4294965248 }
 0x86e   :  { %4898 = dma.done.wait [#allocation15], 1024  }
 0x86f   :  { %4899 = vsyncadd [#allocation15], 4294966272 }
 0x870   :  { %3681 = vsyncpa [#allocation5], 1 }
 0x871   :  { %3682 = vsyncpa [#allocation8], 1 }
 0x872   :  { %3683 = vsyncpa [#allocation11], 1 }
 0x873   :  { %3684 = vsyncpa [#allocation6], 1 }
 0x874   :  { %3685 = vsyncpa [#allocation15], 1 }

</bundles_post_ra>
